<compile_context>
chip_gen: v6e
topology: v6e:2x2x1
jax: 0.10.0
libtpu: 0.0.40
codegen_flags: <defaults>
</compile_context>

<pallas_src>
import numpy as np

import jax
import jax.numpy as jnp
from jax.experimental import pallas as pl
from jax.experimental.pallas import tpu as pltpu


def _make_freqs(encoding_dim, log_space):
    """Matches the PyTorch module's frequency construction."""
    if log_space:
        f = 2.0 ** np.linspace(0.0, encoding_dim - 1, encoding_dim)
    else:
        f = np.linspace(2.0 ** 0.0, 2.0 ** (encoding_dim - 1), encoding_dim)
    return f.astype(np.float32)


def _build_tables(freqs, dim_in, include_input, pack):
    """Block-diagonal expand matrix + per-column phase / identity-mask rows.

    Output column order matches PyTorch: [id?, sin f0, cos f0, sin f1, cos f1, ...]
    per sample. cos columns get a +pi/2 phase so a single sin() covers both.
    """
    num_freqs = int(freqs.shape[0])
    n_funcs = (1 if include_input else 0) + 2 * num_freqs
    d_out = dim_in * n_funcs

    e = np.zeros((dim_in, d_out), np.float32)
    phase = np.zeros((d_out,), np.float32)
    is_id = np.zeros((d_out,), np.int32)
    col = 0
    if include_input:
        e[:, :dim_in] = np.eye(dim_in, dtype=np.float32)
        is_id[:dim_in] = 1
        col = dim_in
    half_pi = np.float32(np.pi / 2.0)
    for f in freqs:
        e[np.arange(dim_in), col + np.arange(dim_in)] = f      # sin(x*f) block
        col += dim_in
        e[np.arange(dim_in), col + np.arange(dim_in)] = f      # cos(x*f) = sin(x*f + pi/2)
        phase[col:col + dim_in] = half_pi
        col += dim_in

    # Pack P independent samples along the lane axis (block-diagonal weights).
    e_packed = np.zeros((pack * dim_in, pack * d_out), np.float32)
    for p in range(pack):
        e_packed[p * dim_in:(p + 1) * dim_in, p * d_out:(p + 1) * d_out] = e
    phase_packed = np.tile(phase, pack)[None, :]                # (1, pack*d_out)
    id_packed = np.tile(is_id, pack)[None, :]                   # (1, pack*d_out)
    return (jnp.asarray(e_packed), jnp.asarray(phase_packed),
            jnp.asarray(id_packed), d_out)


def _posenc_kernel(x_ref, e_ref, phase_ref, id_ref, o_ref):
    # x: (tm, pack*D). One small MXU matmul against the block-diagonal expand
    # matrix yields every output column's argument (identity columns pass v
    # through; HIGHEST precision keeps operands at full f32).
    scaled = jnp.dot(x_ref[...], e_ref[...],
                     preferred_element_type=jnp.float32,
                     precision=jax.lax.Precision.HIGHEST)        # (tm, pack*d_out)
    # Single transcendental per column: cos(x) == sin(x + pi/2).
    trig = jnp.sin(scaled + phase_ref[...])
    out = jnp.where(id_ref[...] != 0, scaled, trig)
    o_ref[...] = out.astype(o_ref.dtype)


def positional_encoder_pallas(v, *, encoding_dim, log_space=False,
                              include_input=True, pack=8, tm=1024):
    """Pallas TPU PositionalEncoder forward.

    v: float array [..., input_dim]; returns [..., input_dim*(include_input + 2L)].
    pack: samples packed along lanes (8 keeps the expand matmul tiny while making
          the output store lane-dense).
    tm:   packed rows per grid step (pack*tm samples/step); auto-shrunk for small
          inputs, always a multiple of 8.
    """
    lead_shape = v.shape[:-1]
    dim_in = v.shape[-1]
    v2 = v.reshape(-1, dim_in).astype(jnp.float32)
    n = v2.shape[0]

    freqs = _make_freqs(encoding_dim, log_space)
    e_packed, phase_packed, id_packed, d_out = _build_tables(
        freqs, dim_in, include_input, pack)

    # Row tiling in packed space: pad N up to pack*tm_eff (tm_eff multiple of 8).
    rows_needed = -(-n // pack)
    tm_eff = min(tm, max(8, ((rows_needed + 7) // 8) * 8))
    rows_pad = ((rows_needed + tm_eff - 1) // tm_eff) * tm_eff
    n_pad = rows_pad * pack

    if n_pad == n:
        v_pad = v2
    else:
        v_pad = jnp.zeros((n_pad, dim_in), jnp.float32).at[:n].set(v2)
    x_packed = v_pad.reshape(rows_pad, pack * dim_in)           # free reshape

    out_packed = pl.pallas_call(
        _posenc_kernel,
        out_shape=jax.ShapeDtypeStruct((rows_pad, pack * d_out), jnp.float32),
        grid_spec=pltpu.PrefetchScalarGridSpec(
            num_scalar_prefetch=0,
            grid=(rows_pad // tm_eff,),
            in_specs=[
                pl.BlockSpec((tm_eff, pack * dim_in), lambda i: (i, 0)),
                pl.BlockSpec((pack * dim_in, pack * d_out), lambda i: (0, 0)),
                pl.BlockSpec((1, pack * d_out), lambda i: (0, 0)),
                pl.BlockSpec((1, pack * d_out), lambda i: (0, 0)),
            ],
            out_specs=pl.BlockSpec((tm_eff, pack * d_out), lambda i: (i, 0)),
        ),
        compiler_params=pltpu.CompilerParams(
            dimension_semantics=("parallel",)),
    )(x_packed, e_packed, phase_packed, id_packed)

    out = out_packed.reshape(n_pad, d_out)[:n]                  # free reshape back
    return out.reshape(*lead_shape, d_out).astype(v.dtype)


def positional_encoder_ref(v, *, encoding_dim, log_space=False, include_input=True):
    """Pure-JAX reference mirroring the PyTorch forward (func order preserved)."""
    freqs = _make_freqs(encoding_dim, log_space)
    parts = [v] if include_input else []
    for f in freqs:
        parts.append(jnp.sin(v * f))
        parts.append(jnp.cos(v * f))
    return jnp.concatenate(parts, axis=-1)


if __name__ == "__main__":
    INPUT_DIM = 3        # xyz coordinates
    ENCODING_DIM = 6     # -> output_dim = 3 * (1 + 2*6) = 39
    LOG_SPACE = True     # standard NeRF log-spaced frequencies

    key = jax.random.PRNGKey(0)
    v = jax.random.uniform(key, (2, 500, INPUT_DIM), jnp.float32, -1.0, 1.0)

    out = positional_encoder_pallas(v, encoding_dim=ENCODING_DIM,
                                    log_space=LOG_SPACE, include_input=True)
    out = jax.block_until_ready(out)

    ref = positional_encoder_ref(v, encoding_dim=ENCODING_DIM,
                                 log_space=LOG_SPACE, include_input=True)
    assert out.shape == (2, 500, INPUT_DIM * (1 + 2 * ENCODING_DIM))
    assert jnp.allclose(out, ref, atol=1e-4, rtol=1e-4), "mismatch vs reference"

    print("KERNEL_OK")
</pallas_src>

<mosaic_0001>
module attributes {stable_mosaic.version = 11 : i64} {
  func.func @_posenc_kernel(%arg0: i32, %arg1: memref<128x24xf32, #tpu.memory_space<vmem>>, %arg2: memref<24x312xf32, #tpu.memory_space<vmem>>, %arg3: memref<1x312xf32, #tpu.memory_space<vmem>>, %arg4: memref<1x312xi32, #tpu.memory_space<vmem>>, %arg5: memref<128x312xf32, #tpu.memory_space<vmem>>) attributes {dimension_semantics = [#tpu.dimension_semantics<parallel>], iteration_bounds = array<i64: 1>, scalar_prefetch = 0 : i64, scratch_operands = 0 : i64, tpu.core_type = #tpu.core_type<tc>, window_params = [{transform_indices = @transform_0, window_bounds = array<i64: 128, 24>}, {pipeline_mode = #tpu.pipeline_mode<synchronous>, transform_indices = @transform_1, window_bounds = array<i64: 24, 312>}, {pipeline_mode = #tpu.pipeline_mode<synchronous>, transform_indices = @transform_2, window_bounds = array<i64: 1, 312>}, {pipeline_mode = #tpu.pipeline_mode<synchronous>, transform_indices = @transform_3, window_bounds = array<i64: 1, 312>}, {transform_indices = @transform_4, window_bounds = array<i64: 128, 312>}]} {
    %c0 = arith.constant 0 : index
    %c0_0 = arith.constant 0 : index
    %0 = vector.load %arg1[%c0, %c0_0] : memref<128x24xf32, #tpu.memory_space<vmem>>, vector<128x24xf32>
    %c0_1 = arith.constant 0 : index
    %c0_2 = arith.constant 0 : index
    %1 = vector.load %arg2[%c0_1, %c0_2] : memref<24x312xf32, #tpu.memory_space<vmem>>, vector<24x312xf32>
    %cst = arith.constant dense<0.000000e+00> : vector<128x312xf32>
    %2 = tpu.matmul %0, %1, %cst {dimension_numbers = #tpu.dot_dimension_numbers<[1], [0], [0], [1], [0, 0, 1, 1], [], []>, precision = #tpu.contract_precision<fp32>} : vector<128x24xf32>, vector<24x312xf32>, vector<128x312xf32> -> vector<128x312xf32>
    %c0_3 = arith.constant 0 : index
    %c0_4 = arith.constant 0 : index
    %3 = vector.load %arg3[%c0_3, %c0_4] : memref<1x312xf32, #tpu.memory_space<vmem>>, vector<1x312xf32>
    %4 = vector.broadcast %3 : vector<1x312xf32> to vector<128x312xf32>
    %5 = arith.addf %2, %4 : vector<128x312xf32>
    %6 = math.sin %5 : vector<128x312xf32>
    %c0_5 = arith.constant 0 : index
    %c0_6 = arith.constant 0 : index
    %7 = vector.load %arg4[%c0_5, %c0_6] : memref<1x312xi32, #tpu.memory_space<vmem>>, vector<1x312xi32>
    %c0_i32 = arith.constant 0 : i32
    %8 = vector.broadcast %c0_i32 : i32 to vector<1x312xi32>
    %9 = arith.cmpi ne, %7, %8 : vector<1x312xi32>
    %10 = vector.shape_cast %9 : vector<1x312xi1> to vector<1x312xi1>
    %11 = vector.broadcast %10 : vector<1x312xi1> to vector<128x312xi1>
    %12 = arith.select %11, %2, %6 : vector<128x312xi1>, vector<128x312xf32>
    %c0_7 = arith.constant 0 : index
    %c0_8 = arith.constant 0 : index
    %13 = vector.load %arg5[%c0_7, %c0_8] : memref<128x312xf32, #tpu.memory_space<vmem>>, vector<128x312xf32>
    tpu.vector_store %arg5[%c0_7, %c0_8], %12 {strides = array<i32>} : memref<128x312xf32, #tpu.memory_space<vmem>>, vector<128x312xf32>,
    return
  }
  func.func @transform_0(%arg0: i32) -> (i32, i32) {
    %c0_i32 = arith.constant 0 : i32
    %c0_i32_0 = arith.constant 0 : i32
    return %arg0, %c0_i32 : i32, i32
  }
  func.func @transform_1(%arg0: i32) -> (i32, i32) {
    %c0_i32 = arith.constant 0 : i32
    %c0_i32_0 = arith.constant 0 : i32
    %c0_i32_1 = arith.constant 0 : i32
    return %c0_i32, %c0_i32_0 : i32, i32
  }
  func.func @transform_2(%arg0: i32) -> (i32, i32) {
    %c0_i32 = arith.constant 0 : i32
    %c0_i32_0 = arith.constant 0 : i32
    %c0_i32_1 = arith.constant 0 : i32
    return %c0_i32, %c0_i32_0 : i32, i32
  }
  func.func @transform_3(%arg0: i32) -> (i32, i32) {
    %c0_i32 = arith.constant 0 : i32
    %c0_i32_0 = arith.constant 0 : i32
    %c0_i32_1 = arith.constant 0 : i32
    return %c0_i32, %c0_i32_0 : i32, i32
  }
  func.func @transform_4(%arg0: i32) -> (i32, i32) {
    %c0_i32 = arith.constant 0 : i32
    %c0_i32_0 = arith.constant 0 : i32
    return %arg0, %c0_i32 : i32, i32
  }
}

</mosaic_0001>

<bundles_post_ra>
// kernel: tpu_custom_call.1
= control target key start
LH: loop header
LB: loop body
LE: loop exit
PB: predicated region body
PF: predicated region fallthrough
CT: control target
= control target key end

     0   :  { %v8515_v3 = vmov 0.0   ;;  %vm42_vm0 = vcmask 195584   ;;  %s14167_s1 = inlined_call_operand.vmem [shape: f32[24,312], index: 1, kind: input, shape index: {}]   ;;  %s14168_s0 = inlined_call_operand.vmem [shape: f32[128,24], index: 0, kind: input, shape index: {}]   ;;  %s14169_s2 = inlined_call_operand.vmem [shape: f32[1,312], index: 2, kind: input, shape index: {}]   ;;  %s14170_s3 = inlined_call_operand.vmem [shape: s32[1,312], index: 3, kind: input, shape index: {}]   ;;  %s14171_s4 = inlined_call_operand.vmem [shape: f32[128,312], index: 4, kind: output, shape index: {}]  }
   0x1   :  { %v40_v0 = vld [vmem:[%s14167_s1 + $0x38] sm:$0xff]  ;;  %v39_v1 = vld [vmem:[%s14167_s1 + $0x30] sm:$0xff]  ;;  %v37_v2 = vld [vmem:[%s14167_s1 + $0x20] sm:$0xff]  ;;  %161 = vmatprep.mubr.f32.mxu0 %v8515_v3  ;;  %432 = vmatprep.mubr.f32.mxu1 %v8515_v3 }
   0x2   :  { %v8559_v4 = vand.u32 4294901760, %v40_v0  ;;  %v8561_v5 = vand.u32 4294901760, %v39_v1  ;;  %v8563_v6 = vand.u32 4294901760, %v37_v2  ;;  %v36_v7 = vld [vmem:[%s14167_s1 + $0x18] sm:$0xff]  ;;  %v34_v8 = vld [vmem:[%s14167_s1 + $0x8] sm:$0xff]  ;;  %v33_v9 = vld [vmem:[%s14167_s1] sm:$0xff] }
   0x3   :  { %v8574_v10 = vand.u32 4294901760, %v36_v7  ;;  %v8576_v11 = vand.u32 4294901760, %v34_v8  ;;  %v8578_v12 = vand.u32 4294901760, %v33_v9  ;;  %v17_v13 = vld [vmem:[%s14168_s0] sm:$0xff]  ;;  %v18_v14 = vld [vmem:[%s14168_s0 + $0x8] sm:$0xff]  ;;  %v19_v39 = vld [vmem:[%s14168_s0 + $0x10] sm:$0xff] }
   0x4   :  { %118 = vmatprep.subr.mxu0 %v8559_v4  ;;  %v8588_v15 = vsub.f32 %v40_v0, %v8559_v4  ;;  %v44_v16 = vsel %vm42_vm0, %v17_v13, 0  ;;  %v8592_v17 = vsub.f32 %v39_v1, %v8561_v5  ;;  %v8595_v18 = vsub.f32 %v37_v2, %v8563_v6  ;;  %v20_v40 = vld [vmem:[%s14168_s0 + $0x18] sm:$0xff]  ;;  %v21_v41 = vld [vmem:[%s14168_s0 + $0x20] sm:$0xff]  ;;  %v22_v50 = vld [vmem:[%s14168_s0 + $0x28] sm:$0xff] }
   0x5   :  { %120 = vmatpush1.msra.mxu0 %v8561_v5  ;;  %v8598_v19 = vand.u32 4294901760, %v44_v16  ;;  %v8601_v20 = vsub.f32 %v36_v7, %v8574_v10  ;;  %v8604_v21 = vsub.f32 %v34_v8, %v8576_v11  ;;  %v47_v22 = vsel %vm42_vm0, %v18_v14, 0  ;;  %v23_v55 = vld [vmem:[%s14168_s0 + $0x30] sm:$0xff]  ;;  %v24_v13 = vld [vmem:[%s14168_s0 + $0x38] sm:$0xff] }
   0x6   :  { %122 = vmatprep.subr.mxu0 %v8563_v6  ;;  %v366_v23 = vand.u32 4294901760, %v8588_v15  ;;  %v14176_v24 = vand.u32 4294901760, %v8592_v17  ;;  %v14175_v25 = vand.u32 4294901760, %v8595_v18  ;;  %v8611_v26 = vand.u32 4294901760, %v47_v22 }
   0x7   :  { %14243 = vst [vmem:[#allocation2_spill] sm:$0xff] %v8598_v19  ;;  %124 = vmatpush1.msra.mxu0 %v8574_v10  ;;  %v8615_v27 = vsub.f32 %v44_v16, %v8598_v19  ;;  %v14174_v28 = vand.u32 4294901760, %v8601_v20  ;;  %v14173_v29 = vand.u32 4294901760, %v8604_v21  ;;  %v8620_v30 = vsub.f32 %v33_v9, %v8578_v12 }
   0x8   :  { %126 = vmatprep.subr.mxu0 %v8576_v11  ;;  %v367_v31 = vsub.f32 %v8588_v15, %v366_v23  ;;  %v373_v32 = vsub.f32 %v8592_v17, %v14176_v24  ;;  %v379_v33 = vsub.f32 %v8595_v18, %v14175_v25  ;;  %v8633_v34 = vsub.f32 %v47_v22, %v8611_v26 }
   0x9   :  { %128 = vmatpush1.msra.mxu0 %v8578_v12  ;;  %v8637_v35 = vand.u32 4294901760, %v8615_v27  ;;  %v385_v36 = vsub.f32 %v8601_v20, %v14174_v28  ;;  %v391_v37 = vsub.f32 %v8604_v21, %v14173_v29  ;;  %v14172_v38 = vand.u32 4294901760, %v8620_v30 }
   0xa   :  { %v368_v42 = vand.u32 4294901760, %v367_v31  ;;  %v374_v43 = vand.u32 4294901760, %v373_v32  ;;  %v380_v44 = vand.u32 4294901760, %v379_v33  ;;  %573 = vmatprep.subr.mxu0 %v8588_v15  ;;  %v8657_v45 = vand.u32 4294901760, %v8633_v34  ;;  %v25_v33 = vld [vmem:[%s14168_s0 + $0x40] sm:$0xff] }
   0xb   :  { %v165_v46 = vsub.f32 %v8615_v27, %v8637_v35  ;;  %v386_v47 = vand.u32 4294901760, %v385_v36  ;;  %v392_v48 = vand.u32 4294901760, %v391_v37  ;;  %v397_v49 = vsub.f32 %v8620_v30, %v14172_v38 }
   0xc   :  { %369 = vmatprep.subr.mxu1 %v368_v42  ;;  %v176_v51 = vsub.f32 %v8633_v34, %v8657_v45  ;;  %v50_v52 = vsel %vm42_vm0, %v19_v39, 0  ;;  %v53_v53 = vsel %vm42_vm0, %v20_v40, 0  ;;  %v56_v54 = vsel %vm42_vm0, %v21_v41, 0 }
   0xd   :  { %v8675_v56 = vand.u32 4294901760, %v165_v46  ;;  %375 = vmatpush1.msra.mxu1 %v374_v43  ;;  %v398_v57 = vand.u32 4294901760, %v397_v49  ;;  %v8677_v58 = vand.u32 4294901760, %v50_v52  ;;  %v8679_v59 = vand.u32 4294901760, %v53_v53  ;;  %v26_v46 = vld [vmem:[%s14168_s0 + $0x48] sm:$0xff] }
   0xe   :  { %381 = vmatprep.subr.mxu1 %v380_v44  ;;  %v8681_v60 = vand.u32 4294901760, %v176_v51  ;;  %v8683_v61 = vand.u32 4294901760, %v56_v54  ;;  %v59_v62 = vsel %vm42_vm0, %v22_v50, 0  ;;  %v62_v2 = vsel %vm42_vm0, %v23_v55, 0 }
   0xf   :  { %14244 = vst [vmem:[#allocation3_spill] sm:$0xff] %v8675_v56  ;;  %167 = vmatmul.mubr.f32.vlgmr.msra.gmra.mxu0 %v8675_v56  ;;  %387 = vmatpush1.msra.mxu1 %v386_v47  ;;  %v8688_v63 = vsub.f32 %v50_v52, %v8677_v58  ;;  %v8691_v0 = vsub.f32 %v53_v53, %v8679_v59  ;;  %v8693_v1 = vand.u32 4294901760, %v59_v62  ;;  %v8712_v14 = vand.u32 4294901760, %v62_v2  ;;  %v27_v53 = vld [vmem:[%s14168_s0 + $0x50] sm:$0xff] }
  0x10   :  { %14245 = vst [vmem:[#allocation4_spill] sm:$0xff] %v8681_v60  ;;  %14246 = vst [vmem:[#allocation5_spill] sm:$0xff] %v8683_v61  ;;  %172 = vmatprep.mubr.f32.mxu0 %v8515_v3  ;;  %393 = vmatprep.subr.mxu1 %v392_v48  ;;  %v8698_v7 = vsub.f32 %v56_v54, %v8683_v61  ;;  %v65_v36 = vsel %vm42_vm0, %v24_v13, 0  ;;  %v68_v40 = vsel %vm42_vm0, %v25_v33, 0  ;;  %v71_v52 = vsel %vm42_vm0, %v26_v46, 0 }
  0x11   :  { %14247 = vst [vmem:[#allocation6_spill] sm:$0xff] %v8693_v1  ;;  %399 = vmatpush1.msra.mxu1 %v398_v57  ;;  %576 = vmatpush1.msra.mxu0 %v8592_v17  ;;  %v8702_v8 = vand.u32 4294901760, %v8688_v63  ;;  %v8705_v9 = vand.u32 4294901760, %v8691_v0  ;;  %14248 = vst [vmem:[#allocation7_spill] sm:$0xff] %v8712_v14  ;;  %v8724_v32 = vsub.f32 %v59_v62, %v8693_v1  ;;  %v8751_v44 = vand.u32 4294901760, %v65_v36 }
  0x12   :  { %434 = vmatmul.mubr.f32.vlgmr.msra.gmra.mxu1 %v8598_v19  ;;  %777 = vmatprep.subr.mxu1 %v8559_v4  ;;  %v8721_v31 = vand.u32 4294901760, %v8698_v7  ;;  %v8738_v39 = vsub.f32 %v62_v2, %v8712_v14  ;;  %v8761_v47 = vand.u32 4294901760, %v68_v40  ;;  %v8798_v15 = vand.u32 4294901760, %v71_v52 }
  0x13   :  { %178 = vmatmul.mubr.f32.gmra.mxu0 %v8681_v60  ;;  %779 = vmatpush1.msra.mxu1 %v8561_v5  ;;  %v187_v16 = vsub.f32 %v8688_v63, %v8702_v8  ;;  %v198_v22 = vsub.f32 %v8691_v0, %v8705_v9  ;;  %v8749_v43 = vand.u32 4294901760, %v8724_v32  ;;  %14251 = vst [vmem:[#allocation10_spill] sm:$0xff] %v8751_v44 }
  0x14   :  { %183 = vmatprep.mubr.f32.mxu0 %v8515_v3  ;;  %439 = vmatprep.mubr.f32.mxu1 %v8515_v3  ;;  %v209_v42 = vsub.f32 %v8698_v7, %v8721_v31  ;;  %14252 = vst [vmem:[#allocation11_spill] sm:$0xff] %v8761_v47  ;;  %v8771_v50 = vand.u32 4294901760, %v8738_v39  ;;  %v8774_v51 = vsub.f32 %v65_v36, %v8751_v44  ;;  %14255 = vst [vmem:[#allocation14_spill] sm:$0xff] %v8798_v15 }
  0x15   :  { %v8732_v37 = vand.u32 4294901760, %v187_v16  ;;  %579 = vmatprep.subr.mxu0 %v8595_v18  ;;  %781 = vmatprep.subr.mxu1 %v8563_v6  ;;  %v8743_v41 = vand.u32 4294901760, %v198_v22  ;;  %v220_v49 = vsub.f32 %v8724_v32, %v8749_v43  ;;  %v8786_v54 = vsub.f32 %v68_v40, %v8761_v47  ;;  %v29_v40 = vld [vmem:[%s14168_s0 + $0x60] sm:$0xff] }
  0x16   :  { %441 = vmatmul.mubr.f32.gmra.mxu1 %v8611_v26  ;;  %582 = vmatpush1.msra.mxu0 %v8601_v20  ;;  %v8765_v48 = vand.u32 4294901760, %v209_v42  ;;  %v231_v57 = vsub.f32 %v8738_v39, %v8771_v50  ;;  %v8796_v62 = vand.u32 4294901760, %v8774_v51  ;;  %v8816_v22 = vsub.f32 %v71_v52, %v8798_v15 }
  0x17   :  { %14249 = vst [vmem:[#allocation8_spill] sm:$0xff] %v8732_v37  ;;  %189 = vmatmul.mubr.f32.gmra.mxu0 %v8732_v37  ;;  %14250 = vst [vmem:[#allocation9_spill] sm:$0xff] %v8743_v41  ;;  %446 = vmatprep.mubr.f32.mxu1 %v8515_v3  ;;  %v8790_v55 = vand.u32 4294901760, %v220_v49  ;;  %v8807_v2 = vand.u32 4294901760, %v8786_v54 }
  0x18   :  { %194 = vmatprep.mubr.f32.mxu0 %v8515_v3  ;;  %783 = vmatpush1.msra.mxu1 %v8574_v10  ;;  %14253 = vst [vmem:[#allocation12_spill] sm:$0xff] %v8765_v48  ;;  %v8810_v13 = vand.u32 4294901760, %v231_v57  ;;  %v242_v16 = vsub.f32 %v8774_v51, %v8796_v62  ;;  %v8833_v49 = vand.u32 4294901760, %v8816_v22  ;;  %v30_v57 = vld [vmem:[%s14168_s0 + $0x68] sm:$0xff] }
  0x19   :  { %585 = vmatprep.subr.mxu0 %v8604_v21  ;;  %785 = vmatprep.subr.mxu1 %v8576_v11  ;;  %14254 = vst [vmem:[#allocation13_spill] sm:$0xff] %v8790_v55  ;;  %v253_v42 = vsub.f32 %v8786_v54, %v8807_v2  ;;  %v83_v38 = vsel %vm42_vm0, %v30_v57, 0 }
  0x1a   :  { %448 = vmatmul.mubr.f32.gmra.mxu1 %v8677_v58  ;;  %588 = vmatpush1.msra.mxu0 %v8620_v30  ;;  %14256 = vst [vmem:[#allocation15_spill] sm:$0xff] %v8810_v13  ;;  %v8829_v46 = vand.u32 4294901760, %v242_v16  ;;  %v8866_v57 = vand.u32 4294901760, %v83_v38 }
  0x1b   :  { %200 = vmatmul.mubr.f32.gmra.mxu0 %v8743_v41  ;;  %453 = vmatprep.mubr.f32.mxu1 %v8515_v3  ;;  %v8846_v16 = vand.u32 4294901760, %v253_v42  ;;  %v31_v42 = vld [vmem:[%s14168_s0 + $0x70] sm:$0xff] }
  0x1c   :  { %205 = vmatprep.mubr.f32.mxu0 %v8515_v3  ;;  %787 = vmatpush1.msra.mxu1 %v8578_v12  ;;  %14258 = vst [vmem:[#allocation17_spill] sm:$0xff] %v8829_v46  ;;  %v86_v25 = vsel %vm42_vm0, %v31_v42, 0  ;;  %v32_v42 = vld [vmem:[%s14168_s0 + $0x78] sm:$0xff] }
  0x1d   :  { %994 = vmatprep.subr.mxu0 %v366_v23  ;;  %1187 = vmatprep.subr.mxu1 %v8559_v4  ;;  %v74_v23 = vsel %vm42_vm0, %v27_v53, 0  ;;  %v28_v4 = vld [vmem:[%s14168_s0 + $0x58] sm:$0xff]  ;;  %14260 = vst [vmem:[#allocation19_spill] sm:$0xff] %v8846_v16  ;;  %v89_v41 = vsel %vm42_vm0, %v32_v42, 0 }
  0x1e   :  { %455 = vmatmul.mubr.f32.gmra.mxu1 %v8679_v59  ;;  %v8818_v33 = vand.u32 4294901760, %v74_v23  ;;  %v77_v36 = vsel %vm42_vm0, %v28_v4, 0  ;;  %v80_v4 = vsel %vm42_vm0, %v29_v40, 0  ;;  %v8915_v60 = vand.u32 4294901760, %v89_v41 }
  0x1f   :  { %211 = vmatmul.mubr.f32.gmra.mxu0 %v8765_v48  ;;  %460 = vmatprep.mubr.f32.mxu1 %v8515_v3  ;;  %v8838_v53 = vand.u32 4294901760, %v77_v36  ;;  %v8859_v40 = vand.u32 4294901760, %v80_v4  ;;  %v8898_v48 = vsub.f32 %v83_v38, %v8866_v57 }
  0x20   :  { %216 = vmatprep.mubr.f32.mxu0 %v8515_v3  ;;  %14257 = vst [vmem:[#allocation16_spill] sm:$0xff] %v8818_v33  ;;  %v8836_v52 = vsub.f32 %v74_v23, %v8818_v33  ;;  %v264_v23 = vsub.f32 %v8816_v22, %v8833_v49 }
  0x21   :  { %14259 = vst [vmem:[#allocation18_spill] sm:$0xff] %v8838_v53  ;;  %v8857_v28 = vsub.f32 %v77_v36, %v8838_v53  ;;  %14261 = vst [vmem:[#allocation20_spill] sm:$0xff] %v8859_v40  ;;  %v8913_v38 = vand.u32 4294901760, %v8898_v48 }
  0x22   :  { %462 = vmatmul.mubr.f32.gmra.mxu1 %v8683_v61  ;;  %v8854_v29 = vand.u32 4294901760, %v8836_v52  ;;  %v8870_v24 = vand.u32 4294901760, %v264_v23  ;;  %v8886_v23 = vand.u32 4294901760, %v86_v25 }
  0x23   :  { %222 = vmatmul.mubr.f32.gmra.mxu0 %v8790_v55  ;;  %467 = vmatprep.mubr.f32.mxu1 %v8515_v3  ;;  %v308_v42 = vsub.f32 %v8898_v48, %v8913_v38 }
  0x24   :  { %227 = vmatprep.mubr.f32.mxu0 %v8515_v3  ;;  %14262 = vst [vmem:[#allocation21_spill] sm:$0xff] %v8870_v24  ;;  %v275_v36 = vsub.f32 %v8836_v52, %v8854_v29 }
  0x26   :  { %469 = vmatmul.mubr.f32.gmra.mxu1 %v8693_v1 }
  0x27   :  { %233 = vmatmul.mubr.f32.gmra.mxu0 %v8810_v13  ;;  %474 = vmatprep.mubr.f32.mxu1 %v8515_v3  ;;  %v8879_v13 = vsub.f32 %v80_v4, %v8859_v40 }
  0x28   :  { %238 = vmatprep.mubr.f32.mxu0 %v8515_v3 }
  0x29   :  { %v8895_v55 = vand.u32 4294901760, %v8879_v13 }
  0x2a   :  { %476 = vmatmul.mubr.f32.gmra.mxu1 %v8712_v14 }
  0x2b   :  { %244 = vmatmul.mubr.f32.gmra.mxu0 %v8829_v46  ;;  %481 = vmatprep.mubr.f32.mxu1 %v8515_v3  ;;  %v8876_v46 = vand.u32 4294901760, %v8857_v28  ;;  %v297_v37 = vsub.f32 %v8879_v13, %v8895_v55 }
  0x2c   :  { %249 = vmatprep.mubr.f32.mxu0 %v8515_v3 }
  0x2d   :  { %v286_v4 = vsub.f32 %v8857_v28, %v8876_v46 }
  0x2e   :  { %483 = vmatmul.mubr.f32.gmra.mxu1 %v8751_v44 }
  0x2f   :  { %255 = vmatmul.mubr.f32.gmra.mxu0 %v8846_v16  ;;  %488 = vmatprep.mubr.f32.mxu1 %v8515_v3  ;;  %v8889_v16 = vand.u32 4294901760, %v275_v36  ;;  %v8904_v36 = vsub.f32 %v86_v25, %v8886_v23  ;;  %v8920_v25 = vand.u32 4294901760, %v297_v37 }
  0x30   :  { %260 = vmatprep.mubr.f32.mxu0 %v8515_v3 }
  0x31   :  { %14263 = vst [vmem:[#allocation22_spill] sm:$0xff] %v8889_v16  ;;  %14265 = vst [vmem:[#allocation24_spill] sm:$0xff] %v8920_v25 }
  0x32   :  { %490 = vmatmul.mubr.f32.gmra.mxu1 %v8761_v47 }
  0x33   :  { %266 = vmatmul.mubr.f32.gmra.mxu0 %v8870_v24  ;;  %495 = vmatprep.mubr.f32.mxu1 %v8515_v3  ;;  %v8907_v24 = vand.u32 4294901760, %v286_v4  ;;  %v8926_v4 = vand.u32 4294901760, %v8904_v36 }
  0x34   :  { %271 = vmatprep.mubr.f32.mxu0 %v8515_v3 }
  0x35   :  { %14264 = vst [vmem:[#allocation23_spill] sm:$0xff] %v8907_v24  ;;  %v319_v37 = vsub.f32 %v8904_v36, %v8926_v4 }
  0x36   :  { %497 = vmatmul.mubr.f32.gmra.mxu1 %v8798_v15 }
  0x37   :  { %277 = vmatmul.mubr.f32.gmra.mxu0 %v8889_v16  ;;  %502 = vmatprep.mubr.f32.mxu1 %v8515_v3  ;;  %v8929_v16 = vsub.f32 %v89_v41, %v8915_v60  ;;  %v8945_v41 = vand.u32 4294901760, %v319_v37 }
  0x38   :  { %282 = vmatprep.mubr.f32.mxu0 %v8515_v3 }
  0x39   :  { %v8940_v56 = vand.u32 4294901760, %v8929_v16  ;;  %14268 = vst [vmem:[#allocation27_spill] sm:$0xff] %v8945_v41 }
  0x3a   :  { %504 = vmatmul.mubr.f32.gmra.mxu1 %v8818_v33 }
  0x3b   :  { %288 = vmatmul.mubr.f32.gmra.mxu0 %v8907_v24  ;;  %509 = vmatprep.mubr.f32.mxu1 %v8515_v3  ;;  %v8934_v24 = vand.u32 4294901760, %v308_v42  ;;  %14267 = vst [vmem:[#allocation26_spill] sm:$0xff] %v8940_v56  ;;  %v330_v42 = vsub.f32 %v8929_v16, %v8940_v56 }
  0x3c   :  { %293 = vmatprep.mubr.f32.mxu0 %v8515_v3 }
  0x3d   :  { %14266 = vst [vmem:[#allocation25_spill] sm:$0xff] %v8934_v24 }
  0x3e   :  { %511 = vmatmul.mubr.f32.gmra.mxu1 %v8838_v53 }
  0x3f   :  { %299 = vmatmul.mubr.f32.gmra.mxu0 %v8920_v25  ;;  %516 = vmatprep.mubr.f32.mxu1 %v8515_v3  ;;  %v41_v25 = vld [vmem:[%s14167_s1 + $0x40] sm:$0xff] }
  0x40   :  { %304 = vmatprep.mubr.f32.mxu0 %v8515_v3  ;;  %v8960_v37 = vand.u32 4294901760, %v41_v25 }
  0x42   :  { %518 = vmatmul.mubr.f32.gmra.mxu1 %v8859_v40  ;;  %v8956_v40 = vand.u32 4294901760, %v330_v42  ;;  %v14270_v42 = vand.u32 4294901760, %v8592_v17  ;;  %v14273_v17 = vand.u32 4294901760, %v8604_v21 }
  0x43   :  { %310 = vmatmul.mubr.f32.gmra.mxu0 %v8934_v24  ;;  %523 = vmatprep.mubr.f32.mxu1 %v8515_v3  ;;  %v8967_v24 = vsub.f32 %v41_v25, %v8960_v37  ;;  %v14272_v25 = vand.u32 4294901760, %v8601_v20  ;;  %v14274_v20 = vand.u32 4294901760, %v8620_v30 }
  0x44   :  { %315 = vmatprep.mubr.f32.mxu0 %v8515_v3  ;;  %14269 = vst [vmem:[#allocation28_spill] sm:$0xff] %v8956_v40 }
  0x46   :  { %525 = vmatmul.mubr.f32.gmra.mxu1 %v8866_v57 }
  0x47   :  { %321 = vmatmul.mubr.f32.gmra.mxu0 %v8945_v41  ;;  %530 = vmatprep.mubr.f32.mxu1 %v8515_v3  ;;  %v8978_v41 = vand.u32 4294901760, %v8967_v24 }
  0x48   :  { %326 = vmatprep.mubr.f32.mxu0 %v8515_v3 }
  0x4a   :  { %532 = vmatmul.mubr.f32.gmra.mxu1 %v8886_v23 }
  0x4b   :  { %332 = vmatmul.mubr.f32.gmra.mxu0 %v8956_v40  ;;  %537 = vmatprep.mubr.f32.mxu1 %v8515_v3  ;;  %v14271_v40 = vand.u32 4294901760, %v8595_v18  ;;  %v1601_v18 = vsub.f32 %v8967_v24, %v8978_v41 }
  0x4c   :  { %621 = vmatprep.mubr.f32.mxu0 %v8515_v3 }
  0x4e   :  { %539 = vmatmul.mubr.f32.gmra.mxu1 %v8915_v60 }
  0x4f   :  { %624 = vmatmul.mubr.f32.vlgmr.msra.gmra.mxu0 %v8615_v27  ;;  %820 = vmatprep.mubr.f32.mxu1 %v8515_v3 }
  0x50   :  { %629 = vmatprep.mubr.f32.mxu0 %v8515_v3  ;;  %998 = vmatpush1.msra.mxu0 %v14270_v42 }
  0x51   :  { %1002 = vmatprep.subr.mxu0 %v14271_v40 }
  0x52   :  { %824 = vmatmul.mubr.f32.vlgmr.msra.gmra.mxu1 %v8637_v35  ;;  %1006 = vmatpush1.msra.mxu0 %v14272_v25 }
  0x53   :  { %632 = vmatmul.mubr.f32.gmra.mxu0 %v8633_v34  ;;  %1189 = vmatpush1.msra.mxu1 %v8561_v5  ;;  %v9001_v5 = vand.u32 4294901760, %v1601_v18 }
  0x54   :  { %637 = vmatprep.mubr.f32.mxu0 %v8515_v3  ;;  %829 = vmatprep.mubr.f32.mxu1 %v8515_v3 }
  0x55   :  { %1191 = vmatprep.subr.mxu1 %v8563_v6  ;;  %1010 = vmatprep.subr.mxu0 %v14273_v17  ;;  %v38_v6 = vld [vmem:[%s14167_s1 + $0x28] sm:$0xff] }
  0x56   :  { %833 = vmatmul.mubr.f32.gmra.mxu1 %v8657_v45  ;;  %1014 = vmatpush1.msra.mxu0 %v14274_v20 }
  0x57   :  { %640 = vmatmul.mubr.f32.gmra.mxu0 %v8688_v63  ;;  %838 = vmatprep.mubr.f32.mxu1 %v8515_v3 }
  0x58   :  { %645 = vmatprep.mubr.f32.mxu0 %v8515_v3  ;;  %1193 = vmatpush1.msra.mxu1 %v8574_v10  ;;  %v9048_v10 = vand.u32 4294901760, %v38_v6 }
  0x59   :  { %1195 = vmatprep.subr.mxu1 %v8576_v11  ;;  %7942 = vmatprep.subr.mxu0 %v8960_v37  ;;  %v35_v11 = vld [vmem:[%s14167_s1 + $0x10] sm:$0xff] }
  0x5a   :  { %842 = vmatmul.mubr.f32.gmra.mxu1 %v8702_v8  ;;  %v9060_v21 = vand.u32 4294901760, %v35_v11 }
  0x5b   :  { %648 = vmatmul.mubr.f32.gmra.mxu0 %v8691_v0  ;;  %847 = vmatprep.mubr.f32.mxu1 %v8515_v3 }
  0x5c   :  { %653 = vmatprep.mubr.f32.mxu0 %v8515_v3  ;;  %1197 = vmatpush1.msra.mxu1 %v8578_v12  ;;  %v9058_v12 = vsub.f32 %v38_v6, %v9048_v10  ;;  %v9070_v40 = vsub.f32 %v35_v11, %v9060_v21  ;;  %v14276_v6 = vld [vmem:[#allocation3_spill] sm:$0xff] }
  0x5d   :  { %7972 = vmatprep.subr.mxu1 %v9001_v5 }
  0x5e   :  { %851 = vmatmul.mubr.f32.gmra.mxu1 %v8705_v9  ;;  %v9067_v30 = vand.u32 4294901760, %v9058_v12  ;;  %v9079_v25 = vand.u32 4294901760, %v9070_v40 }
  0x5f   :  { %656 = vmatmul.mubr.f32.gmra.mxu0 %v8698_v7  ;;  %856 = vmatprep.mubr.f32.mxu1 %v8515_v3 }
  0x60   :  { %661 = vmatprep.mubr.f32.mxu0 %v8515_v3  ;;  %v1608_v42 = vsub.f32 %v9058_v12, %v9067_v30  ;;  %v1615_v18 = vsub.f32 %v9070_v40, %v9079_v25 }
  0x62   :  { %860 = vmatmul.mubr.f32.gmra.mxu1 %v8721_v31  ;;  %v1609_v17 = vand.u32 4294901760, %v1608_v42  ;;  %v1616_v20 = vand.u32 4294901760, %v1615_v18  ;;  %v14277_v42 = vld [vmem:[#allocation4_spill] sm:$0xff] }
  0x63   :  { %664 = vmatmul.mubr.f32.gmra.mxu0 %v8724_v32  ;;  %865 = vmatprep.mubr.f32.mxu1 %v8515_v3 }
  0x64   :  { %669 = vmatprep.mubr.f32.mxu0 %v8515_v3 }
  0x66   :  { %869 = vmatmul.mubr.f32.gmra.mxu1 %v8749_v43 }
  0x67   :  { %672 = vmatmul.mubr.f32.gmra.mxu0 %v8738_v39  ;;  %874 = vmatprep.mubr.f32.mxu1 %v8515_v3 }
  0x68   :  { %677 = vmatprep.mubr.f32.mxu0 %v8515_v3 }
  0x6a   :  { %878 = vmatmul.mubr.f32.gmra.mxu1 %v8771_v50 }
  0x6b   :  { %680 = vmatmul.mubr.f32.gmra.mxu0 %v8774_v51  ;;  %883 = vmatprep.mubr.f32.mxu1 %v8515_v3 }
  0x6c   :  { %685 = vmatprep.mubr.f32.mxu0 %v8515_v3 }
  0x6e   :  { %887 = vmatmul.mubr.f32.gmra.mxu1 %v8796_v62 }
  0x6f   :  { %688 = vmatmul.mubr.f32.gmra.mxu0 %v8786_v54  ;;  %892 = vmatprep.mubr.f32.mxu1 %v8515_v3 }
  0x70   :  { %693 = vmatprep.mubr.f32.mxu0 %v8515_v3 }
  0x72   :  { %896 = vmatmul.mubr.f32.gmra.mxu1 %v8807_v2 }
  0x73   :  { %696 = vmatmul.mubr.f32.gmra.mxu0 %v8816_v22  ;;  %901 = vmatprep.mubr.f32.mxu1 %v8515_v3 }
  0x74   :  { %701 = vmatprep.mubr.f32.mxu0 %v8515_v3 }
  0x76   :  { %905 = vmatmul.mubr.f32.gmra.mxu1 %v8833_v49 }
  0x77   :  { %704 = vmatmul.mubr.f32.gmra.mxu0 %v8836_v52  ;;  %910 = vmatprep.mubr.f32.mxu1 %v8515_v3 }
  0x78   :  { %709 = vmatprep.mubr.f32.mxu0 %v8515_v3 }
  0x7a   :  { %914 = vmatmul.mubr.f32.gmra.mxu1 %v8854_v29 }
  0x7b   :  { %712 = vmatmul.mubr.f32.gmra.mxu0 %v8857_v28  ;;  %919 = vmatprep.mubr.f32.mxu1 %v8515_v3 }
  0x7c   :  { %717 = vmatprep.mubr.f32.mxu0 %v8515_v3 }
  0x7e   :  { %923 = vmatmul.mubr.f32.gmra.mxu1 %v8876_v46 }
  0x7f   :  { %720 = vmatmul.mubr.f32.gmra.mxu0 %v8879_v13  ;;  %928 = vmatprep.mubr.f32.mxu1 %v8515_v3 }
  0x80   :  { %725 = vmatprep.mubr.f32.mxu0 %v8515_v3 }
  0x82   :  { %932 = vmatmul.mubr.f32.gmra.mxu1 %v8895_v55 }
  0x83   :  { %728 = vmatmul.mubr.f32.gmra.mxu0 %v8898_v48  ;;  %937 = vmatprep.mubr.f32.mxu1 %v8515_v3 }
  0x84   :  { %733 = vmatprep.mubr.f32.mxu0 %v8515_v3 }
  0x86   :  { %941 = vmatmul.mubr.f32.gmra.mxu1 %v8913_v38 }
  0x87   :  { %736 = vmatmul.mubr.f32.gmra.mxu0 %v8904_v36  ;;  %946 = vmatprep.mubr.f32.mxu1 %v8515_v3 }
  0x88   :  { %741 = vmatprep.mubr.f32.mxu0 %v8515_v3 }
  0x8a   :  { %950 = vmatmul.mubr.f32.gmra.mxu1 %v8926_v4 }
  0x8b   :  { %744 = vmatmul.mubr.f32.gmra.mxu0 %v8929_v16  ;;  %955 = vmatprep.mubr.f32.mxu1 %v8515_v3 }
  0x8c   :  { %1047 = vmatprep.mubr.f32.mxu0 %v8515_v3 }
  0x8e   :  { %959 = vmatmul.mubr.f32.gmra.mxu1 %v8940_v56 }
  0x8f   :  { %1049 = vmatmul.mubr.f32.vlgmr.msra.gmra.mxu0 %v8598_v19  ;;  %1230 = vmatprep.mubr.f32.mxu1 %v8515_v3 }
  0x90   :  { %1054 = vmatprep.mubr.f32.mxu0 %v8515_v3  ;;  %7943 = vmatpush3.msra.mxu0 %v8960_v37 }
  0x91   :  { %7944 = vmatprep.subr.mxu0 %v9048_v10 }
  0x92   :  { %1232 = vmatmul.mubr.f32.vlgmr.msra.gmra.mxu1 %v8598_v19  ;;  %7945 = vmatpush3.msra.mxu0 %v9048_v10 }
  0x93   :  { %1056 = vmatmul.mubr.f32.gmra.mxu0 %v8611_v26  ;;  %7973 = vmatpush3.msra.mxu1 %v9001_v5  ;;  %v14275_v5 = vld [vmem:[#allocation20_spill] sm:$0xff] }
  0x94   :  { %1061 = vmatprep.mubr.f32.mxu0 %v8515_v3  ;;  %1237 = vmatprep.mubr.f32.mxu1 %v8515_v3 }
  0x95   :  { %7974 = vmatprep.subr.mxu1 %v1609_v17  ;;  %7946 = vmatprep.subr.mxu0 %v9060_v21 }
  0x96   :  { %1239 = vmatmul.mubr.f32.gmra.mxu1 %v8611_v26  ;;  %7947 = vmatpush3.msra.mxu0 %v9060_v21 }
  0x97   :  { %1063 = vmatmul.mubr.f32.gmra.mxu0 %v8677_v58  ;;  %1244 = vmatprep.mubr.f32.mxu1 %v8515_v3 }
  0x98   :  { %1068 = vmatprep.mubr.f32.mxu0 %v8515_v3  ;;  %7975 = vmatpush3.msra.mxu1 %v1609_v17  ;;  %v14278_v17 = vld [vmem:[#allocation8_spill] sm:$0xff] }
  0x99   :  { %7976 = vmatprep.subr.mxu1 %v1616_v20  ;;  %8002 = vmatprep.subr.mxu0 %v8967_v24 }
  0x9a   :  { %1246 = vmatmul.mubr.f32.gmra.mxu1 %v8677_v58 }
  0x9b   :  { %1070 = vmatmul.mubr.f32.gmra.mxu0 %v8679_v59  ;;  %1251 = vmatprep.mubr.f32.mxu1 %v8515_v3 }
  0x9c   :  { %1075 = vmatprep.mubr.f32.mxu0 %v8515_v3  ;;  %7977 = vmatpush3.msra.mxu1 %v1616_v20 }
  0x9d   :  { %8032 = vmatprep.subr.mxu1 %v8960_v37 }
  0x9e   :  { %1253 = vmatmul.mubr.f32.gmra.mxu1 %v8679_v59 }
  0x9f   :  { %1077 = vmatmul.mubr.f32.gmra.mxu0 %v8683_v61  ;;  %1258 = vmatprep.mubr.f32.mxu1 %v8515_v3 }
  0xa0   :  { %1082 = vmatprep.mubr.f32.mxu0 %v8515_v3 }
  0xa2   :  { %1260 = vmatmul.mubr.f32.gmra.mxu1 %v8683_v61 }
  0xa3   :  { %1084 = vmatmul.mubr.f32.gmra.mxu0 %v8693_v1  ;;  %1265 = vmatprep.mubr.f32.mxu1 %v8515_v3 }
  0xa4   :  { %1089 = vmatprep.mubr.f32.mxu0 %v8515_v3 }
  0xa6   :  { %1267 = vmatmul.mubr.f32.gmra.mxu1 %v8693_v1 }
  0xa7   :  { %1091 = vmatmul.mubr.f32.gmra.mxu0 %v8712_v14  ;;  %1272 = vmatprep.mubr.f32.mxu1 %v8515_v3 }
  0xa8   :  { %1096 = vmatprep.mubr.f32.mxu0 %v8515_v3 }
  0xaa   :  { %1274 = vmatmul.mubr.f32.gmra.mxu1 %v8712_v14 }
  0xab   :  { %1098 = vmatmul.mubr.f32.gmra.mxu0 %v8751_v44  ;;  %1279 = vmatprep.mubr.f32.mxu1 %v8515_v3 }
  0xac   :  { %1103 = vmatprep.mubr.f32.mxu0 %v8515_v3 }
  0xae   :  { %1281 = vmatmul.mubr.f32.gmra.mxu1 %v8751_v44 }
  0xaf   :  { %1105 = vmatmul.mubr.f32.gmra.mxu0 %v8761_v47  ;;  %1286 = vmatprep.mubr.f32.mxu1 %v8515_v3 }
  0xb0   :  { %1110 = vmatprep.mubr.f32.mxu0 %v8515_v3 }
  0xb2   :  { %1288 = vmatmul.mubr.f32.gmra.mxu1 %v8761_v47 }
  0xb3   :  { %1112 = vmatmul.mubr.f32.gmra.mxu0 %v8798_v15  ;;  %1293 = vmatprep.mubr.f32.mxu1 %v8515_v3 }
  0xb4   :  { %1117 = vmatprep.mubr.f32.mxu0 %v8515_v3 }
  0xb6   :  { %1295 = vmatmul.mubr.f32.gmra.mxu1 %v8798_v15 }
  0xb7   :  { %1119 = vmatmul.mubr.f32.gmra.mxu0 %v8818_v33  ;;  %1300 = vmatprep.mubr.f32.mxu1 %v8515_v3 }
  0xb8   :  { %1124 = vmatprep.mubr.f32.mxu0 %v8515_v3 }
  0xba   :  { %1302 = vmatmul.mubr.f32.gmra.mxu1 %v8818_v33 }
  0xbb   :  { %1126 = vmatmul.mubr.f32.gmra.mxu0 %v8838_v53  ;;  %1307 = vmatprep.mubr.f32.mxu1 %v8515_v3 }
  0xbc   :  { %1131 = vmatprep.mubr.f32.mxu0 %v8515_v3 }
  0xbe   :  { %1309 = vmatmul.mubr.f32.gmra.mxu1 %v8838_v53 }
  0xbf   :  { %1133 = vmatmul.mubr.f32.gmra.mxu0 %v14275_v5  ;;  %1314 = vmatprep.mubr.f32.mxu1 %v8515_v3 }
  0xc0   :  { %1138 = vmatprep.mubr.f32.mxu0 %v8515_v3 }
  0xc2   :  { %1316 = vmatmul.mubr.f32.gmra.mxu1 %v14275_v5 }
  0xc3   :  { %1140 = vmatmul.mubr.f32.gmra.mxu0 %v8866_v57  ;;  %1321 = vmatprep.mubr.f32.mxu1 %v8515_v3 }
  0xc4   :  { %1145 = vmatprep.mubr.f32.mxu0 %v8515_v3 }
  0xc6   :  { %1323 = vmatmul.mubr.f32.gmra.mxu1 %v8866_v57 }
  0xc7   :  { %1147 = vmatmul.mubr.f32.gmra.mxu0 %v8886_v23  ;;  %1328 = vmatprep.mubr.f32.mxu1 %v8515_v3 }
  0xc8   :  { %1152 = vmatprep.mubr.f32.mxu0 %v8515_v3 }
  0xca   :  { %1330 = vmatmul.mubr.f32.gmra.mxu1 %v8886_v23 }
  0xcb   :  { %1154 = vmatmul.mubr.f32.gmra.mxu0 %v8915_v60  ;;  %1335 = vmatprep.mubr.f32.mxu1 %v8515_v3 }
  0xcc   :  { %7948 = vmatprep.mubr.f32.mxu0 %v14276_v6  ;;  %v14279_v6 = vld [vmem:[#allocation9_spill] sm:$0xff] }
  0xce   :  { %1337 = vmatmul.mubr.f32.gmra.mxu1 %v8915_v60 }
  0xcf   :  { %v168_v11 = vpop.f32.mrf.mxu0  ;;  %7949 = vmatmul.mubr.f32.vlgmr.msra.gmra.mxu0 %v14277_v42  ;;  %7978 = vmatprep.mubr.f32.mxu1 %v8598_v19  ;;  %v14281_v19 = vld [vmem:[#allocation12_spill] sm:$0xff] }
  0xd0   :  { %7951 = vmatprep.mubr.f32.mxu0 %v14278_v17  ;;  %8003 = vmatpush3.msra.mxu0 %v8967_v24 }
  0xd1   :  { %v170_v18 = vpop.f32.mrf.mxu0  ;;  %8004 = vmatprep.subr.mxu0 %v9058_v12 }
  0xd2   :  { %v435_v20 = vpop.f32.mrf.mxu1  ;;  %7979 = vmatmul.mubr.f32.vlgmr.msra.gmra.mxu1 %v8611_v26  ;;  %8005 = vmatpush3.msra.mxu0 %v9058_v12 }
  0xd3   :  { %v179_v3 = vpop.f32.mrf.mxu0  ;;  %7952 = vmatmul.mubr.f32.gmra.mxu0 %v14279_v6  ;;  %v9164_v56 = vadd.f32 %v435_v20, %v168_v11  ;;  %8033 = vmatpush3.msra.mxu1 %v8960_v37  ;;  %v14282_v20 = vld [vmem:[#allocation13_spill] sm:$0xff] }
  0xd4   :  { %v437_v42 = vpop.f32.mrf.mxu1  ;;  %7954 = vmatprep.mubr.f32.mxu0 %v14281_v19  ;;  %7981 = vmatprep.mubr.f32.mxu1 %v8677_v58 }
  0xd5   :  { %14280 = vst [vmem:[#allocation20_spill] sm:$0xff] %v9164_v56  ;;  %v181_v24 = vpop.f32.mrf.mxu0  ;;  %v9169_v17 = vadd.f32 %v437_v42, %v170_v18  ;;  %8034 = vmatprep.subr.mxu1 %v9048_v10  ;;  %8006 = vmatprep.subr.mxu0 %v9070_v40  ;;  %v14284_v56 = vld [vmem:[#allocation15_spill] sm:$0xff] }
  0xd6   :  { %v442_v12 = vpop.f32.mrf.mxu1  ;;  %7982 = vmatmul.mubr.f32.gmra.mxu1 %v8679_v59  ;;  %8007 = vmatpush3.msra.mxu0 %v9070_v40 }
  0xd7   :  { %v190_v11 = vpop.f32.mrf.mxu0  ;;  %7955 = vmatmul.mubr.f32.gmra.mxu0 %v14282_v20  ;;  %v9176_v6 = vadd.f32 %v442_v12, %v179_v3  ;;  %7984 = vmatprep.mubr.f32.mxu1 %v8683_v61  ;;  %v14286_v3 = vld [vmem:[#allocation17_spill] sm:$0xff]  ;;  %v14287_v61 = vld [vmem:[#allocation19_spill] sm:$0xff] }
  0xd8   :  { %v444_v19 = vpop.f32.mrf.mxu1  ;;  %7957 = vmatprep.mubr.f32.mxu0 %v14284_v56  ;;  %8035 = vmatpush3.msra.mxu1 %v9048_v10 }
  0xd9   :  { %14283 = vst [vmem:[#allocation3_spill] sm:$0xff] %v9176_v6  ;;  %v192_v18 = vpop.f32.mrf.mxu0  ;;  %v9181_v42 = vadd.f32 %v444_v19, %v181_v24  ;;  %8036 = vmatprep.subr.mxu1 %v9060_v21  ;;  %8062 = vmatprep.subr.mxu0 %v8978_v41  ;;  %v14289_v6 = vld [vmem:[#allocation21_spill] sm:$0xff] }
  0xda   :  { %v449_v40 = vpop.f32.mrf.mxu1  ;;  %7985 = vmatmul.mubr.f32.gmra.mxu1 %v8693_v1 }
  0xdb   :  { %14285 = vst [vmem:[#allocation4_spill] sm:$0xff] %v9181_v42  ;;  %v201_v20 = vpop.f32.mrf.mxu0  ;;  %7958 = vmatmul.mubr.f32.gmra.mxu0 %v14286_v3  ;;  %v9187_v12 = vadd.f32 %v449_v40, %v190_v11  ;;  %7987 = vmatprep.mubr.f32.mxu1 %v8712_v14  ;;  %v14290_v3 = vld [vmem:[#allocation22_spill] sm:$0xff] }
  0xdc   :  { %v451_v56 = vpop.f32.mrf.mxu1  ;;  %7960 = vmatprep.mubr.f32.mxu0 %v14287_v61  ;;  %8037 = vmatpush3.msra.mxu1 %v9060_v21 }
  0xdd   :  { %v203_v24 = vpop.f32.mrf.mxu0  ;;  %v9192_v19 = vadd.f32 %v451_v56, %v192_v18  ;;  %8092 = vmatprep.subr.mxu1 %v8960_v37 }
  0xde   :  { %v456_v42 = vpop.f32.mrf.mxu1  ;;  %7988 = vmatmul.mubr.f32.gmra.mxu1 %v8751_v44 }
  0xdf   :  { %14288 = vst [vmem:[#allocation8_spill] sm:$0xff] %v9192_v19  ;;  %v212_v1 = vpop.f32.mrf.mxu0  ;;  %7961 = vmatmul.mubr.f32.gmra.mxu0 %v14289_v6  ;;  %v9197_v11 = vadd.f32 %v456_v42, %v201_v20  ;;  %7990 = vmatprep.mubr.f32.mxu1 %v8761_v47  ;;  %v14291_v19 = vld [vmem:[#allocation23_spill] sm:$0xff]  ;;  %v14292_v42 = vld [vmem:[#allocation24_spill] sm:$0xff] }
  0xe0   :  { %v458_v40 = vpop.f32.mrf.mxu1  ;;  %7963 = vmatprep.mubr.f32.mxu0 %v14290_v3 }
  0xe1   :  { %v214_v61 = vpop.f32.mrf.mxu0  ;;  %v9201_v14 = vadd.f32 %v458_v40, %v203_v24  ;;  %v14293_v40 = vld [vmem:[#allocation25_spill] sm:$0xff] }
  0xe2   :  { %v463_v18 = vpop.f32.mrf.mxu1  ;;  %7991 = vmatmul.mubr.f32.gmra.mxu1 %v8798_v15 }
  0xe3   :  { %v223_v56 = vpop.f32.mrf.mxu0  ;;  %7964 = vmatmul.mubr.f32.gmra.mxu0 %v14291_v19  ;;  %v9205_v44 = vadd.f32 %v463_v18, %v212_v1  ;;  %7993 = vmatprep.mubr.f32.mxu1 %v8818_v33  ;;  %v14294_v19 = vld [vmem:[#allocation27_spill] sm:$0xff] }
  0xe4   :  { %v465_v6 = vpop.f32.mrf.mxu1  ;;  %7966 = vmatprep.mubr.f32.mxu0 %v14292_v42 }
  0xe5   :  { %v225_v20 = vpop.f32.mrf.mxu0  ;;  %v9209_v47 = vadd.f32 %v465_v6, %v214_v61  ;;  %v14295_v6 = vld [vmem:[#allocation28_spill] sm:$0xff] }
  0xe6   :  { %v470_v3 = vpop.f32.mrf.mxu1  ;;  %7994 = vmatmul.mubr.f32.gmra.mxu1 %v8838_v53 }
  0xe7   :  { %v234_v24 = vpop.f32.mrf.mxu0  ;;  %7967 = vmatmul.mubr.f32.gmra.mxu0 %v14293_v40  ;;  %v9213_v15 = vadd.f32 %v470_v3, %v223_v56  ;;  %7996 = vmatprep.mubr.f32.mxu1 %v14275_v5 }
  0xe8   :  { %v472_v1 = vpop.f32.mrf.mxu1  ;;  %7969 = vmatprep.mubr.f32.mxu0 %v14294_v19 }
  0xe9   :  { %v236_v18 = vpop.f32.mrf.mxu0  ;;  %v9217_v33 = vadd.f32 %v472_v1, %v225_v20 }
  0xea   :  { %v477_v42 = vpop.f32.mrf.mxu1  ;;  %7997 = vmatmul.mubr.f32.gmra.mxu1 %v8866_v57 }
  0xeb   :  { %v245_v61 = vpop.f32.mrf.mxu0  ;;  %7970 = vmatmul.mubr.f32.gmra.mxu0 %v14295_v6  ;;  %v9221_v53 = vadd.f32 %v477_v42, %v234_v24  ;;  %7999 = vmatprep.mubr.f32.mxu1 %v8886_v23 }
  0xec   :  { %v479_v56 = vpop.f32.mrf.mxu1  ;;  %8008 = vmatprep.mubr.f32.mxu0 %v8615_v27 }
  0xed   :  { %v247_v3 = vpop.f32.mrf.mxu0  ;;  %v9225_v40 = vadd.f32 %v479_v56, %v236_v18 }
  0xee   :  { %v484_v19 = vpop.f32.mrf.mxu1  ;;  %8000 = vmatmul.mubr.f32.gmra.mxu1 %v8915_v60 }
  0xef   :  { %v256_v20 = vpop.f32.mrf.mxu0  ;;  %8009 = vmatmul.mubr.f32.vlgmr.msra.gmra.mxu0 %v8633_v34  ;;  %v9229_v1 = vadd.f32 %v484_v19, %v245_v61  ;;  %8038 = vmatprep.mubr.f32.mxu1 %v8637_v35 }
  0xf0   :  { %v486_v24 = vpop.f32.mrf.mxu1  ;;  %8011 = vmatprep.mubr.f32.mxu0 %v8688_v63  ;;  %8063 = vmatpush3.msra.mxu0 %v8978_v41 }
  0xf1   :  { %v258_v42 = vpop.f32.mrf.mxu0  ;;  %v9234_v27 = vadd.f32 %v486_v24, %v247_v3  ;;  %8064 = vmatprep.subr.mxu0 %v9067_v30 }
  0xf2   :  { %v491_v18 = vpop.f32.mrf.mxu1  ;;  %8039 = vmatmul.mubr.f32.vlgmr.msra.gmra.mxu1 %v8657_v45  ;;  %8065 = vmatpush3.msra.mxu0 %v9067_v30 }
  0xf3   :  { %v267_v34 = vpop.f32.mrf.mxu0  ;;  %8012 = vmatmul.mubr.f32.gmra.mxu0 %v8691_v0  ;;  %v9240_v61 = vadd.f32 %v491_v18, %v256_v20  ;;  %8093 = vmatpush3.msra.mxu1 %v8960_v37  ;;  %v14296_v18 = vld [vmem:[#allocation2_spill] sm:$0xff] }
  0xf4   :  { %v493_v35 = vpop.f32.mrf.mxu1  ;;  %8014 = vmatprep.mubr.f32.mxu0 %v8698_v7  ;;  %8041 = vmatprep.mubr.f32.mxu1 %v8702_v8 }
  0xf5   :  { %v269_v63 = vpop.f32.mrf.mxu0  ;;  %v9245_v41 = vadd.f32 %v493_v35, %v258_v42  ;;  %8094 = vmatprep.subr.mxu1 %v9048_v10  ;;  %8066 = vmatprep.subr.mxu0 %v9079_v25  ;;  %v14297_v35 = vld [vmem:[#allocation26_spill] sm:$0xff] }
  0xf6   :  { %v498_v45 = vpop.f32.mrf.mxu1  ;;  %8042 = vmatmul.mubr.f32.gmra.mxu1 %v8705_v9  ;;  %8067 = vmatpush3.msra.mxu0 %v9079_v25 }
  0xf7   :  { %v278_v0 = vpop.f32.mrf.mxu0  ;;  %8015 = vmatmul.mubr.f32.gmra.mxu0 %v8724_v32  ;;  %v9252_v37 = vadd.f32 %v498_v45, %v267_v34  ;;  %8044 = vmatprep.mubr.f32.mxu1 %v8721_v31 }
  0xf8   :  { %v500_v7 = vpop.f32.mrf.mxu1  ;;  %8017 = vmatprep.mubr.f32.mxu0 %v8738_v39  ;;  %8095 = vmatpush3.msra.mxu1 %v9048_v10 }
  0xf9   :  { %v280_v8 = vpop.f32.mrf.mxu0  ;;  %v9257_v30 = vadd.f32 %v500_v7, %v269_v63  ;;  %8096 = vmatprep.subr.mxu1 %v9060_v21 }
  0xfa   :  { %v505_v9 = vpop.f32.mrf.mxu1  ;;  %8045 = vmatmul.mubr.f32.gmra.mxu1 %v8749_v43 }
  0xfb   :  { %v289_v25 = vpop.f32.mrf.mxu0  ;;  %8018 = vmatmul.mubr.f32.gmra.mxu0 %v8774_v51  ;;  %v9262_v32 = vadd.f32 %v505_v9, %v278_v0  ;;  %8047 = vmatprep.mubr.f32.mxu1 %v8771_v50  ;;  %v14298_v9 = vld [vmem:[#allocation3_spill] sm:$0xff] }
  0xfc   :  { %v507_v31 = vpop.f32.mrf.mxu1  ;;  %8020 = vmatprep.mubr.f32.mxu0 %v8786_v54  ;;  %8097 = vmatpush3.msra.mxu1 %v9060_v21 }
  0xfd   :  { %v291_v39 = vpop.f32.mrf.mxu0  ;;  %v9267_v10 = vadd.f32 %v507_v31, %v280_v8 }
  0xfe   :  { %v512_v6 = vpop.f32.mrf.mxu1  ;;  %8048 = vmatmul.mubr.f32.gmra.mxu1 %v8796_v62 }
  0xff   :  { %v300_v56 = vpop.f32.mrf.mxu0  ;;  %8021 = vmatmul.mubr.f32.gmra.mxu0 %v8816_v22  ;;  %v9271_v43 = vadd.f32 %v512_v6, %v289_v25  ;;  %8050 = vmatprep.mubr.f32.mxu1 %v8807_v2 }
 0x100   :  { %v514_v51 = vpop.f32.mrf.mxu1  ;;  %8023 = vmatprep.mubr.f32.mxu0 %v8836_v52 }
 0x101   :  { %v302_v50 = vpop.f32.mrf.mxu0  ;;  %v9275_v54 = vadd.f32 %v514_v51, %v291_v39  ;;  %v14299_v39 = vld [vmem:[#allocation5_spill] sm:$0xff]  ;;  %v14300_v51 = vld [vmem:[#allocation4_spill] sm:$0xff] }
 0x102   :  { %v519_v21 = vpop.f32.mrf.mxu1  ;;  %8051 = vmatmul.mubr.f32.gmra.mxu1 %v8833_v49 }
 0x103   :  { %v311_v3 = vpop.f32.mrf.mxu0  ;;  %8024 = vmatmul.mubr.f32.gmra.mxu0 %v8857_v28  ;;  %v9279_v62 = vadd.f32 %v519_v21, %v300_v56  ;;  %8053 = vmatprep.mubr.f32.mxu1 %v8854_v29 }
 0x104   :  { %v521_v22 = vpop.f32.mrf.mxu1  ;;  %8026 = vmatprep.mubr.f32.mxu0 %v8879_v13 }
 0x105   :  { %v313_v2 = vpop.f32.mrf.mxu0  ;;  %v9283_v19 = vadd.f32 %v521_v22, %v302_v50 }
 0x106   :  { %v526_v52 = vpop.f32.mrf.mxu1  ;;  %8054 = vmatmul.mubr.f32.gmra.mxu1 %v8876_v46 }
 0x107   :  { %v322_v20 = vpop.f32.mrf.mxu0  ;;  %8027 = vmatmul.mubr.f32.gmra.mxu0 %v8898_v48  ;;  %v9287_v49 = vadd.f32 %v526_v52, %v311_v3  ;;  %8056 = vmatprep.mubr.f32.mxu1 %v8895_v55 }
 0x108   :  { %v528_v28 = vpop.f32.mrf.mxu1  ;;  %8029 = vmatprep.mubr.f32.mxu0 %v8904_v36 }
 0x109   :  { %v324_v29 = vpop.f32.mrf.mxu0  ;;  %v9291_v24 = vadd.f32 %v528_v28, %v313_v2  ;;  %v14302_v2 = vld [vmem:[#allocation7_spill] sm:$0xff]  ;;  %v14303_v28 = vld [vmem:[#allocation8_spill] sm:$0xff] }
 0x10a   :  { %v533_v13 = vpop.f32.mrf.mxu1  ;;  %8057 = vmatmul.mubr.f32.gmra.mxu1 %v8913_v38 }
 0x10b   :  { %v333_v42 = vpop.f32.mrf.mxu0  ;;  %8030 = vmatmul.mubr.f32.gmra.mxu0 %v8929_v16  ;;  %v9295_v46 = vadd.f32 %v533_v13, %v322_v20  ;;  %8059 = vmatprep.mubr.f32.mxu1 %v8926_v4 }
 0x10c   :  { %v535_v48 = vpop.f32.mrf.mxu1  ;;  %8068 = vmatprep.mubr.f32.mxu0 %v14296_v18 }
 0x10d   :  { %v335_v55 = vpop.f32.mrf.mxu0  ;;  %v9299_v34 = vadd.f32 %v535_v48, %v324_v29 }
 0x10e   :  { %v540_v36 = vpop.f32.mrf.mxu1  ;;  %8060 = vmatmul.mubr.f32.gmra.mxu1 %v14297_v35 }
 0x10f   :  { %v9302_v63 = vpop.f32.mrf.mxu0  ;;  %8069 = vmatmul.mubr.f32.vlgmr.msra.gmra.mxu0 %v8611_v26  ;;  %v9305_v38 = vadd.f32 %v540_v36, %v333_v42  ;;  %8098 = vmatprep.mubr.f32.mxu1 %v14296_v18  ;;  %v14304_v42 = vld [vmem:[#allocation10_spill] sm:$0xff] }
 0x110   :  { %v542_v16 = vpop.f32.mrf.mxu1  ;;  %8071 = vmatprep.mubr.f32.mxu0 %v8677_v58 }
 0x111   :  { %v627_v4 = vpop.f32.mrf.mxu0  ;;  %v9309_v45 = vadd.f32 %v542_v16, %v335_v55  ;;  %v14305_v55 = vld [vmem:[#allocation11_spill] sm:$0xff] }
 0x112   :  { %v628_v0 = vadd.f32 %v627_v4, %v9169_v17  ;;  %v9312_v7 = vpop.f32.mrf.mxu1  ;;  %8099 = vmatmul.mubr.f32.vlgmr.msra.gmra.mxu1 %v8611_v26  ;;  %v14301_v26 = vld [vmem:[#allocation6_spill] sm:$0xff] }
 0x113   :  { %v633_v8 = vpop.f32.mrf.mxu0  ;;  %8072 = vmatmul.mubr.f32.gmra.mxu0 %v8679_v59  ;;  %8101 = vmatprep.mubr.f32.mxu1 %v8677_v58 }
 0x114   :  { %v634_v25 = vadd.f32 %v633_v8, %v14298_v9  ;;  %v827_v31 = vpop.f32.mrf.mxu1  ;;  %8074 = vmatprep.mubr.f32.mxu0 %v14299_v39  ;;  %v14306_v8 = vld [vmem:[#allocation14_spill] sm:$0xff] }
 0x115   :  { %v635_v6 = vpop.f32.mrf.mxu0  ;;  %v9319_v56 = vadd.f32 %v827_v31, %v628_v0  ;;  %v14307_v31 = vld [vmem:[#allocation16_spill] sm:$0xff] }
 0x116   :  { %v636_v50 = vadd.f32 %v635_v6, %v14300_v51  ;;  %v834_v17 = vpop.f32.mrf.mxu1  ;;  %8102 = vmatmul.mubr.f32.gmra.mxu1 %v8679_v59 }
 0x117   :  { %v641_v21 = vpop.f32.mrf.mxu0  ;;  %8075 = vmatmul.mubr.f32.gmra.mxu0 %v14301_v26  ;;  %v9324_v3 = vadd.f32 %v834_v17, %v634_v25  ;;  %8104 = vmatprep.mubr.f32.mxu1 %v14299_v39  ;;  %v14308_v17 = vld [vmem:[#allocation18_spill] sm:$0xff] }
 0x118   :  { %v642_v58 = vadd.f32 %v641_v21, %v9187_v12  ;;  %v836_v22 = vpop.f32.mrf.mxu1  ;;  %8077 = vmatprep.mubr.f32.mxu0 %v14302_v2 }
 0x119   :  { %v643_v52 = vpop.f32.mrf.mxu0  ;;  %v9329_v20 = vadd.f32 %v836_v22, %v636_v50 }
 0x11a   :  { %v644_v29 = vadd.f32 %v643_v52, %v14303_v28  ;;  %v843_v13 = vpop.f32.mrf.mxu1  ;;  %8105 = vmatmul.mubr.f32.gmra.mxu1 %v14301_v26 }
 0x11b   :  { %v649_v59 = vpop.f32.mrf.mxu0  ;;  %8078 = vmatmul.mubr.f32.gmra.mxu0 %v14304_v42  ;;  %v9334_v48 = vadd.f32 %v843_v13, %v642_v58  ;;  %8107 = vmatprep.mubr.f32.mxu1 %v14302_v2 }
 0x11c   :  { %v650_v12 = vadd.f32 %v649_v59, %v9197_v11  ;;  %v845_v18 = vpop.f32.mrf.mxu1  ;;  %8080 = vmatprep.mubr.f32.mxu0 %v14305_v55 }
 0x11d   :  { %v651_v36 = vpop.f32.mrf.mxu0  ;;  %v9339_v35 = vadd.f32 %v845_v18, %v644_v29 }
 0x11e   :  { %v652_v16 = vadd.f32 %v651_v36, %v9201_v14  ;;  %v852_v4 = vpop.f32.mrf.mxu1  ;;  %8108 = vmatmul.mubr.f32.gmra.mxu1 %v14304_v42 }
 0x11f   :  { %v657_v0 = vpop.f32.mrf.mxu0  ;;  %8081 = vmatmul.mubr.f32.gmra.mxu0 %v14306_v8  ;;  %v9344_v9 = vadd.f32 %v852_v4, %v650_v12  ;;  %8110 = vmatprep.mubr.f32.mxu1 %v14305_v55 }
 0x120   :  { %v658_v11 = vadd.f32 %v657_v0, %v9205_v44  ;;  %v854_v25 = vpop.f32.mrf.mxu1  ;;  %8083 = vmatprep.mubr.f32.mxu0 %v14307_v31 }
 0x121   :  { %v659_v39 = vpop.f32.mrf.mxu0  ;;  %v9349_v6 = vadd.f32 %v854_v25, %v652_v16 }
 0x122   :  { %v660_v14 = vadd.f32 %v659_v39, %v9209_v47  ;;  %v861_v51 = vpop.f32.mrf.mxu1  ;;  %8111 = vmatmul.mubr.f32.gmra.mxu1 %v14306_v8 }
 0x123   :  { %v665_v50 = vpop.f32.mrf.mxu0  ;;  %8084 = vmatmul.mubr.f32.gmra.mxu0 %v14308_v17  ;;  %v9354_v21 = vadd.f32 %v861_v51, %v658_v11  ;;  %8113 = vmatprep.mubr.f32.mxu1 %v14307_v31 }
 0x124   :  { %v666_v44 = vadd.f32 %v665_v50, %v9213_v15  ;;  %v863_v26 = vpop.f32.mrf.mxu1  ;;  %8086 = vmatprep.mubr.f32.mxu0 %v14275_v5 }
 0x125   :  { %v667_v58 = vpop.f32.mrf.mxu0  ;;  %v9359_v22 = vadd.f32 %v863_v26, %v660_v14 }
 0x126   :  { %v668_v47 = vadd.f32 %v667_v58, %v9217_v33  ;;  %v870_v2 = vpop.f32.mrf.mxu1  ;;  %8114 = vmatmul.mubr.f32.gmra.mxu1 %v14308_v17 }
 0x127   :  { %v673_v52 = vpop.f32.mrf.mxu0  ;;  %8087 = vmatmul.mubr.f32.gmra.mxu0 %v8866_v57  ;;  %v9364_v28 = vadd.f32 %v870_v2, %v666_v44  ;;  %8116 = vmatprep.mubr.f32.mxu1 %v14275_v5 }
 0x128   :  { %v674_v15 = vadd.f32 %v673_v52, %v9221_v53  ;;  %v872_v29 = vpop.f32.mrf.mxu1  ;;  %8089 = vmatprep.mubr.f32.mxu0 %v8886_v23 }
 0x129   :  { %v675_v13 = vpop.f32.mrf.mxu0  ;;  %v9369_v59 = vadd.f32 %v872_v29, %v668_v47 }
 0x12a   :  { %v676_v33 = vadd.f32 %v675_v13, %v9225_v40  ;;  %v879_v42 = vpop.f32.mrf.mxu1  ;;  %8117 = vmatmul.mubr.f32.gmra.mxu1 %v8866_v57 }
 0x12b   :  { %v681_v12 = vpop.f32.mrf.mxu0  ;;  %8090 = vmatmul.mubr.f32.gmra.mxu0 %v8915_v60  ;;  %v9374_v18 = vadd.f32 %v879_v42, %v674_v15  ;;  %8119 = vmatprep.mubr.f32.mxu1 %v8886_v23 }
 0x12c   :  { %v682_v53 = vadd.f32 %v681_v12, %v9229_v1  ;;  %v881_v5 = vpop.f32.mrf.mxu1 }
 0x12d   :  { %v683_v55 = vpop.f32.mrf.mxu0  ;;  %v9378_v36 = vadd.f32 %v881_v5, %v676_v33 }
 0x12e   :  { %v684_v16 = vadd.f32 %v683_v55, %v9234_v27  ;;  %v888_v4 = vpop.f32.mrf.mxu1  ;;  %8120 = vmatmul.mubr.f32.gmra.mxu1 %v8915_v60 }
 0x12f   :  { %v689_v40 = vpop.f32.mrf.mxu0  ;;  %v9382_v57 = vadd.f32 %v888_v4, %v682_v53 }
 0x130   :  { %v690_v0 = vadd.f32 %v689_v40, %v9240_v61  ;;  %v890_v8 = vpop.f32.mrf.mxu1 }
 0x131   :  { %v691_v11 = vpop.f32.mrf.mxu0  ;;  %v9385_v25 = vadd.f32 %v890_v8, %v684_v16 }
 0x132   :  { %v692_v23 = vadd.f32 %v691_v11, %v9245_v41  ;;  %v897_v1 = vpop.f32.mrf.mxu1 }
 0x133   :  { %14309 = vst [vmem:[#allocation9_spill] sm:$0xff] %v9385_v25  ;;  %v697_v31 = vpop.f32.mrf.mxu0  ;;  %v9388_v39 = vadd.f32 %v897_v1, %v690_v0  ;;  %v2462_v1 = vlaneseq }
 0x134   :  { %v698_v27 = vadd.f32 %v697_v31, %v9252_v37  ;;  %v899_v14 = vpop.f32.mrf.mxu1 }
 0x135   :  { %14310 = vst [vmem:[#allocation12_spill] sm:$0xff] %v9388_v39  ;;  %v699_v51 = vpop.f32.mrf.mxu0  ;;  %v9391_v60 = vadd.f32 %v899_v14, %v692_v23 }
 0x136   :  { %v700_v50 = vadd.f32 %v699_v51, %v9257_v30  ;;  %v906_v17 = vpop.f32.mrf.mxu1 }
 0x137   :  { %14311 = vst [vmem:[#allocation13_spill] sm:$0xff] %v9391_v60  ;;  %v705_v61 = vpop.f32.mrf.mxu0  ;;  %v9394_v44 = vadd.f32 %v906_v17, %v698_v27 }
 0x138   :  { %v706_v26 = vadd.f32 %v705_v61, %v9262_v32  ;;  %v908_v58 = vpop.f32.mrf.mxu1  ;;  %v9423_v61 = vshrl.u32 %v2462_v1, 7 }
 0x139   :  { %14312 = vst [vmem:[#allocation15_spill] sm:$0xff] %v9394_v44  ;;  %v707_v41 = vpop.f32.mrf.mxu0  ;;  %v9397_v47 = vadd.f32 %v908_v58, %v700_v50 }
 0x13a   :  { %v708_v2 = vadd.f32 %v707_v41, %v9267_v10  ;;  %v915_v52 = vpop.f32.mrf.mxu1  ;;  %14322 = vst [vmem:[#allocation2_spill] sm:$0xff] %v9423_v61 }
 0x13b   :  { %14313 = vst [vmem:[#allocation17_spill] sm:$0xff] %v9397_v47  ;;  %v713_v37 = vpop.f32.mrf.mxu0  ;;  %v9400_v15 = vadd.f32 %v915_v52, %v706_v26  ;;  %v14324_v52 = vld [vmem:[#allocation20_spill] sm:$0xff] }
 0x13c   :  { %v714_v29 = vadd.f32 %v713_v37, %v9271_v43  ;;  %v917_v13 = vpop.f32.mrf.mxu1  ;;  %v626_v37 = vadd.f32 %v9302_v63, %v14324_v52  ;;  %v14216_v63 = vsub.s32 1, %v9423_v61 }
 0x13d   :  { %14314 = vst [vmem:[#allocation19_spill] sm:$0xff] %v9400_v15  ;;  %v715_v30 = vpop.f32.mrf.mxu0  ;;  %v9403_v33 = vadd.f32 %v917_v13, %v708_v2  ;;  %v14217_v13 = vsub.s32 0, %v9423_v61 }
 0x13e   :  { %v716_v42 = vadd.f32 %v715_v30, %v9275_v54  ;;  %v924_v12 = vpop.f32.mrf.mxu1 }
 0x13f   :  { %14315 = vst [vmem:[#allocation21_spill] sm:$0xff] %v9403_v33  ;;  %v721_v32 = vpop.f32.mrf.mxu0  ;;  %v9406_v53 = vadd.f32 %v924_v12, %v714_v29  ;;  %v826_v12 = vadd.f32 %v9312_v7, %v626_v37 }
 0x140   :  { %v722_v5 = vadd.f32 %v721_v32, %v9279_v62  ;;  %v926_v55 = vpop.f32.mrf.mxu1 }
 0x141   :  { %14316 = vst [vmem:[#allocation22_spill] sm:$0xff] %v9406_v53  ;;  %v723_v10 = vpop.f32.mrf.mxu0  ;;  %v9409_v16 = vadd.f32 %v926_v55, %v716_v42 }
 0x142   :  { %v724_v4 = vadd.f32 %v723_v10, %v9283_v19  ;;  %v933_v40 = vpop.f32.mrf.mxu1 }
 0x143   :  { %14317 = vst [vmem:[#allocation23_spill] sm:$0xff] %v9409_v16  ;;  %v729_v43 = vpop.f32.mrf.mxu0  ;;  %v9412_v0 = vadd.f32 %v933_v40, %v722_v5 }
 0x144   :  { %v730_v8 = vadd.f32 %v729_v43, %v9287_v49  ;;  %v935_v11 = vpop.f32.mrf.mxu1 }
 0x145   :  { %14318 = vst [vmem:[#allocation24_spill] sm:$0xff] %v9412_v0  ;;  %v731_v54 = vpop.f32.mrf.mxu0  ;;  %v9415_v23 = vadd.f32 %v935_v11, %v724_v4 }
 0x146   :  { %v732_v31 = vadd.f32 %v731_v54, %v9291_v24  ;;  %v942_v62 = vpop.f32.mrf.mxu1 }
 0x147   :  { %14319 = vst [vmem:[#allocation25_spill] sm:$0xff] %v9415_v23  ;;  %v737_v27 = vpop.f32.mrf.mxu0  ;;  %v9418_v14 = vadd.f32 %v942_v62, %v730_v8 }
 0x148   :  { %v738_v51 = vadd.f32 %v737_v27, %v9295_v46  ;;  %v944_v19 = vpop.f32.mrf.mxu1 }
 0x149   :  { %14320 = vst [vmem:[#allocation27_spill] sm:$0xff] %v9418_v14  ;;  %v739_v50 = vpop.f32.mrf.mxu0  ;;  %v9421_v17 = vadd.f32 %v944_v19, %v732_v31 }
 0x14a   :  { %v740_v49 = vadd.f32 %v739_v50, %v9299_v34  ;;  %v951_v26 = vpop.f32.mrf.mxu1  ;;  %v2460_v34 = vld [vmem:[%s14169_s2] sm:$0x7] }
 0x14b   :  { %14321 = vst [vmem:[#allocation28_spill] sm:$0xff] %v9421_v17  ;;  %v745_v58 = vpop.f32.mrf.mxu0  ;;  %v9426_v41 = vadd.f32 %v951_v26, %v738_v51  ;;  %v9453_v54 = vrot.slane %v2460_v34, %v14216_v63 }
 0x14c   :  { %v746_v24 = vadd.f32 %v745_v58, %v9305_v38  ;;  %v953_v2 = vpop.f32.mrf.mxu1 }
 0x14d   :  { %14323 = vst [vmem:[#allocation26_spill] sm:$0xff] %v9426_v41  ;;  %v747_v29 = vpop.f32.mrf.mxu0  ;;  %v9431_v46 = vadd.f32 %v953_v2, %v740_v49 }
 0x14e   :  { %v748_v30 = vadd.f32 %v747_v29, %v9309_v45  ;;  %v960_v42 = vpop.f32.mrf.mxu1  ;;  %v9446_v45 = vrot.slane %v2460_v34, %v14217_v13 }
 0x14f   :  { %14325 = vst [vmem:[#allocation3_spill] sm:$0xff] %v9431_v46  ;;  %v1050_v32 = vpop.f32.mrf.mxu0  ;;  %v9439_v38 = vadd.f32 %v960_v42, %v746_v24 }
 0x150   :  { %v962_v5 = vpop.f32.mrf.mxu1  ;;  %v1051_v55 = vadd.f32 %v1050_v32, %v826_v12 }
 0x151   :  { %14326 = vst [vmem:[#allocation5_spill] sm:$0xff] %v9439_v38  ;;  %v1052_v10 = vpop.f32.mrf.mxu0  ;;  %v9442_v4 = vadd.f32 %v962_v5, %v748_v30 }
 0x152   :  { %v1233_v40 = vpop.f32.mrf.mxu1  ;;  %v1053_v43 = vadd.f32 %v1052_v10, %v9319_v56 }
 0x153   :  { %14327 = vst [vmem:[#allocation4_spill] sm:$0xff] %v9442_v4  ;;  %v1057_v8 = vpop.f32.mrf.mxu0  ;;  %v9449_v11 = vadd.f32 %v1233_v40, %v1051_v55 }
 0x154   :  { %v1235_v7 = vpop.f32.mrf.mxu1  ;;  %v1058_v62 = vadd.f32 %v1057_v8, %v9324_v3 }
 0x155   :  { %v9457_v1 = vadd.f32 %v9446_v45, %v9449_v11  ;;  %v9459_v31 = vadd.f32 %v1235_v7, %v1053_v43  ;;  %v1059_v19 = vpop.f32.mrf.mxu0 }
 0x156   :  { %v1240_v27 = vpop.f32.mrf.mxu1  ;;  %v1060_v37 = vadd.f32 %v1059_v19, %v9329_v20 }
 0x157   :  { %v14215_v51 = vand.u32 2147483647, %v9457_v1  ;;  %v2528_v56 = vand.u32 2139095040, %v9457_v1  ;;  %v9466_v50 = vadd.f32 %v9453_v54, %v9459_v31  ;;  %v9468_v49 = vadd.f32 %v1240_v27, %v1058_v62 }
 0x158   :  { %v1242_v2 = vpop.f32.mrf.mxu1  ;;  %vm2527_vm15 = vcmp.lt.s32.totalorder %v9457_v1, 0 }
 0x159   :  { %v2529_v26 = vshrl.u32 %v2528_v56, 23  ;;  %v2532_v58 = vand.u32 8388607, %v14215_v51  ;;  %v14214_v24 = vand.u32 2147483647, %v9466_v50  ;;  %v2632_v3 = vand.u32 2139095040, %v9466_v50 }
 0x15a   :  { %v9477_v29 = vadd.f32 %v9446_v45, %v9468_v49  ;;  %v9481_v12 = vadd.f32 %v1242_v2, %v1060_v37  ;;  %v14228_v51 = vmov 1326507024  }
 0x15b   :  { %v7636_v52 = vadd.s32 4294967169, %v2529_v26  ;;  %v2633_v30 = vshrl.u32 %v2632_v3, 23  ;;  %v2636_v42 = vand.u32 8388607, %v14214_v24  ;;  %v2533_v32 = vor.u32 8388608, %v2532_v58 }
 0x15c   :  { %v2840_v10 = vand.u32 2139095040, %v9477_v29  ;;  %v9490_v56 = vadd.f32 %v9453_v54, %v9481_v12  ;;  %v14224_v26 = vmov 683565275   ;;  %v14218_v3 = vmov 2475754826  }
 0x15d   :  { %v2535_v34 = vadd.s32 1, %v7636_v52  ;;  %v7640_v5 = vadd.s32 4294967169, %v2633_v30  ;;  %v2637_v55 = vor.u32 8388608, %v2636_v42  ;;  %v9484_v7 = vshll.u32 %v2533_v32, 8 }
 0x15e   :  { %v2841_v27 = vshrl.u32 %v2840_v10, 23  ;;  %v14220_v52 = vmov 2131351028   ;;  %v14222_v30 = vmov 2102212464  }
 0x15f   :  { %vm2536_vm1 = vcmp.gt.s32.totalorder %v2535_v34, 0  ;;  %v2639_v43 = vadd.s32 1, %v7640_v5  ;;  %v9486_v62 = vshll.u32 %v2637_v55, 8 }
 0x160   :  { %v2537_v40 = vsel %vm2536_vm1, %v2535_v34, 0  ;;  %v14226_v34 = vmov 920167782  }
 0x161   :  { %v2538_v20 = vshrl.u32 %v2537_v40, 5  ;;  %v2539_v8 = vand.u32 31, %v2537_v40  ;;  %vm2640_vm2 = vcmp.gt.s32.totalorder %v2639_v43, 0 }
 0x163   :  { %v2540_v19 = vsub.s32 32, %v2539_v8  ;;  %v2542_v58 = vshll.u32 %v14224_v26, %v2539_v8  ;;  %v2545_v2 = vshll.u32 %v14218_v3, %v2539_v8  ;;  %v2548_v37 = vshll.u32 %v14220_v52, %v2539_v8 }
 0x164   :  { %v2551_v42 = vshll.u32 %v14222_v30, %v2539_v8  ;;  %v2554_v32 = vshll.u32 %v14226_v34, %v2539_v8  ;;  %vm2557_vm3 = vcmp.lt.s32.totalorder %v2538_v20, 1  ;;  %vm2558_vm4 = vcmp.lt.s32.totalorder %v2538_v20, 2 }
 0x165   :  { %v2543_v5 = vshrl.u32 %v14218_v3, %v2540_v19  ;;  %v2546_v55 = vshrl.u32 %v14220_v52, %v2540_v19  ;;  %v2549_v10 = vshrl.u32 %v14222_v30, %v2540_v19  ;;  %v2541_v40 = vshrl.u32 %v14224_v26, %v2540_v19 }
 0x166   :  { %v2552_v24 = vshrl.u32 %v14226_v34, %v2540_v19  ;;  %v2555_v63 = vshrl.u32 %v14228_v51, %v2540_v19  ;;  %vm2559_vm5 = vcmp.lt.s32.totalorder %v2538_v20, 3  ;;  %v2641_v8 = vsel %vm2640_vm2, %v2639_v43, 0 }
 0x167   :  { %v2544_v13 = vor.u32 %v2543_v5, %v2542_v58  ;;  %v2547_v4 = vor.u32 %v2546_v55, %v2545_v2  ;;  %v2550_v38 = vor.u32 %v2549_v10, %v2548_v37  ;;  %vm2560_vm6 = vcmp.lt.s32.totalorder %v2538_v20, 4 }
 0x168   :  { %v2553_v46 = vor.u32 %v2552_v24, %v2551_v42  ;;  %v2556_v3 = vor.u32 %v2555_v63, %v2554_v32  ;;  %v2643_v52 = vand.u32 31, %v2641_v8  ;;  %v7648_v24 = vadd.s32 4294967169, %v2841_v27 }
 0x169   :  { %v2561_v30 = vsel %vm2557_vm3, %v2541_v40, %v2544_v13  ;;  %v2562_v41 = vsel %vm2560_vm6, %v2550_v38, 2102212464  ;;  %v2565_v26 = vsel %vm2557_vm3, %v2544_v13, %v2547_v4  ;;  %v2569_v34 = vsel %vm2557_vm3, %v2547_v4, %v2550_v38 }
 0x16a   :  { %v2563_v17 = vsel %vm2559_vm5, %v2547_v4, %v2562_v41  ;;  %v2566_v19 = vsel %vm2560_vm6, %v2553_v46, 920167782  ;;  %v2570_v51 = vsel %vm2560_vm6, %v2556_v3, 1326507024  ;;  %v2644_v58 = vsub.s32 32, %v2643_v52 }
 0x16b   :  { %v2564_v2 = vsel %vm2558_vm4, %v2561_v30, %v2563_v17  ;;  %v2567_v43 = vsel %vm2559_vm5, %v2550_v38, %v2566_v19  ;;  %v2571_v63 = vsel %vm2559_vm5, %v2553_v46, %v2570_v51  ;;  %v2642_v32 = vshrl.u32 %v2641_v8, 5  ;;  %v7517_v17 = vld [vmem:[%s14170_s3] sm:$0x7] }
 0x16c   :  { %v2568_v37 = vsel %vm2558_vm4, %v2565_v26, %v2567_v43  ;;  %v2572_v42 = vsel %vm2558_vm4, %v2569_v34, %v2571_v63  ;;  %v14328_v13 = vmov 683565275   ;;  %v2580_v46 = vmul.u32 %v9484_v7, %v2564_v2 }
 0x16d   :  { %v2646_v5 = vshll.u32 %v14328_v13, %v2643_v52  ;;  %v9515_v55 = vmul.u32.u64.low %v9484_v7, %v2572_v42  ;;  %v9516_v41 = vmul.u32.u64.high %v9484_v7, %v2572_v42, %v9515_v55  ;;  %v14329_v38 = vmov 2475754826  }
 0x16e   :  { %v9519_v4 = vmul.u32.u64.low %v9484_v7, %v2568_v37  ;;  %v9520_v3 = vmul.u32.u64.high %v9484_v7, %v2568_v37, %v9519_v4  ;;  %v2647_v51 = vshrl.u32 %v14329_v38, %v2644_v58  ;;  %v2649_v20 = vshll.u32 %v14329_v38, %v2643_v52 }
 0x16f   :  { %v14330_v27 = vmov 2131351028   ;;  %v14331_v34 = vmov 2102212464   ;;  %v14332_v8 = vmov 920167782   ;;  %v2645_v55 = vshrl.u32 %v14328_v13, %v2644_v58 }
 0x170   :  { %v2650_v26 = vshrl.u32 %v14330_v27, %v2644_v58  ;;  %v2652_v30 = vshll.u32 %v14330_v27, %v2643_v52  ;;  %v2653_v10 = vshrl.u32 %v14331_v34, %v2644_v58  ;;  %v2655_v40 = vshll.u32 %v14331_v34, %v2643_v52 }
 0x171   :  { %v2656_v19 = vshrl.u32 %v14332_v8, %v2644_v58  ;;  %vm7518_vm7 = vcmp.ne.s32.totalorder %v7517_v17, 0  ;;  %v2648_v43 = vor.u32 %v2647_v51, %v2646_v5  ;;  %v2658_v37 = vshll.u32 %v14332_v8, %v2643_v52 }
 0x172   :  { %v2651_v63 = vor.u32 %v2650_v26, %v2649_v20  ;;  %v14333_v7 = vmov 1326507024   ;;  %vm2582_vm8 = vc.u32 %v9516_v41, %v9519_v4  ;;  %v2583_v42 = vadd.s32 1, %v9520_v3 }
 0x173   :  { %v2659_v2 = vshrl.u32 %v14333_v7, %v2644_v58  ;;  %v2654_v14 = vor.u32 %v2653_v10, %v2652_v30  ;;  %v2657_v23 = vor.u32 %v2656_v19, %v2655_v40  ;;  %vm2661_vm9 = vcmp.lt.s32.totalorder %v2642_v32, 1 }
 0x174   :  { %vm2662_vm10 = vcmp.lt.s32.totalorder %v2642_v32, 2  ;;  %v2584_v16 = vsel %vm2582_vm8, %v2583_v42, %v9520_v3  ;;  %vm2663_vm11 = vcmp.lt.s32.totalorder %v2642_v32, 3  ;;  %vm2664_vm12 = vcmp.lt.s32.totalorder %v2642_v32, 4 }
 0x175   :  { %v2660_v0 = vor.u32 %v2659_v2, %v2658_v37  ;;  %v2669_v5 = vsel %vm2661_vm9, %v2648_v43, %v2651_v63  ;;  %v2585_v52 = vadd.s32 %v2584_v16, %v2580_v46  ;;  %v2666_v51 = vsel %vm2664_vm12, %v2654_v14, 2102212464 }
 0x176   :  { %v2670_v20 = vsel %vm2664_vm12, %v2657_v23, 920167782  ;;  %v2673_v26 = vsel %vm2661_vm9, %v2651_v63, %v2654_v14  ;;  %v2665_v53 = vsel %vm2661_vm9, %v2645_v55, %v2648_v43  ;;  %v2847_v47 = vadd.s32 1, %v7648_v24 }
 0x177   :  { %v2671_v33 = vsel %vm2663_vm11, %v2654_v14, %v2670_v20  ;;  %v2674_v15 = vsel %vm2664_vm12, %v2660_v0, 1326507024  ;;  %v2586_v44 = vadd.s32 536870912, %v2585_v52  ;;  %v2667_v58 = vsel %vm2663_vm11, %v2651_v63, %v2666_v51 }
 0x178   :  { %v2672_v30 = vsel %vm2662_vm10, %v2669_v5, %v2671_v33  ;;  %v2675_v10 = vsel %vm2663_vm11, %v2657_v23, %v2674_v15  ;;  %v14230_v16 = vand.u32 2147483647, %v9477_v29  ;;  %vm2848_vm13 = vcmp.gt.s32.totalorder %v2847_v47, 0 }
 0x179   :  { %v2676_v40 = vsel %vm2662_vm10, %v2673_v26, %v2675_v10  ;;  %v9544_v3 = vmul.u32.u64.low %v9486_v62, %v2672_v30  ;;  %v9545_v19 = vmul.u32.u64.high %v9486_v62, %v2672_v30, %v9544_v3  ;;  %v2587_v46 = vshrl.u32 %v2586_v44, 30 }
 0x17a   :  { %v9550_v43 = vmul.u32.u64.low %v9486_v62, %v2676_v40  ;;  %v9551_v14 = vmul.u32.u64.high %v9486_v62, %v2676_v40, %v9550_v43  ;;  %v2668_v0 = vsel %vm2662_vm10, %v2665_v53, %v2667_v58  ;;  %v2849_v24 = vsel %vm2848_vm13, %v2847_v47, 0 }
 0x17b   :  { %v2588_v33 = vshll.u32 %v2587_v46, 30  ;;  %v2851_v15 = vand.u32 31, %v2849_v24  ;;  %v8522_v23 = vmov 0   ;;  %v2687_v37 = vadd.s32 1, %v9545_v19 }
 0x17c   :  { %v9555_v63 = vsel %vm7518_vm7, 1, %v8522_v23  ;;  %v9560_v2 = vand.u32 8388607, %v14230_v16  ;;  %v2944_v44 = vand.u32 2139095040, %v9490_v56  ;;  %v2684_v32 = vmul.u32 %v9486_v62, %v2668_v0 }
 0x17d   :  { %14334 = vst [vmem:[#allocation6_spill] sm:$0xff] %v9555_v63  ;;  %v9563_v42 = vsub.s32 %v2585_v52, %v2588_v33  ;;  %vm2686_vm14 = vc.u32 %v9551_v14, %v9544_v3  ;;  %v2852_v53 = vsub.s32 32, %v2851_v15  ;;  %v14335_v55 = vsub.s32 0, %v9423_v61 }
 0x17e   :  { %v2688_v47 = vsel %vm2686_vm14, %v2687_v37, %v9545_v19  ;;  %v14336_v52 = vsub.s32 1, %v9423_v61  ;;  %v2845_v20 = vor.u32 8388608, %v9560_v2  ;;  %v2945_v26 = vshrl.u32 %v2944_v44, 23 }
 0x17f   :  { %v2591_v17 = vsub.s32 0, %v9563_v42  ;;  %v9573_v5 = vrot.slane %v9555_v63, %v14335_v55  ;;  %v2689_v51 = vadd.s32 %v2688_v47, %v2684_v32  ;;  %v2855_v10 = vshrl.u32 %v14329_v38, %v2852_v53 }
 0x180   :  { %v9579_v62 = vrot.slane %v9555_v63, %v14336_v52  ;;  %v2861_v40 = vshrl.u32 %v14331_v34, %v2852_v53  ;;  %v2581_v19 = vadd.s32 %v9519_v4, %v9516_v41  ;;  %v2850_v43 = vshrl.u32 %v2849_v24, 5 }
 0x181   :  { %v7637_v58 = vmin.u32 %v2591_v17, %v9563_v42  ;;  %v2690_v30 = vadd.s32 536870912, %v2689_v51  ;;  %v2858_v0 = vshrl.u32 %v14330_v27, %v2852_v53  ;;  %v2860_v33 = vshll.u32 %v14330_v27, %v2851_v15 }
 0x182   :  { %v2611_v37 = vsub.s32 4, %v2587_v46  ;;  %v2854_v2 = vshll.u32 %v14328_v13, %v2851_v15  ;;  %v2864_v44 = vshrl.u32 %v14332_v8, %v2852_v53  ;;  %v2857_v47 = vshll.u32 %v14329_v38, %v2851_v15 }
 0x183   :  { %v2593_v23 = vclz %v7637_v58  ;;  %v9591_v32 = vshrl.u32 %v2690_v30, 30  ;;  %v2862_v17 = vor.u32 %v2861_v40, %v2860_v33  ;;  %v7652_v55 = vadd.s32 4294967169, %v2945_v26 }
 0x184   :  { %v14337_v52 = vand.u32 2147483647, %v9457_v1  ;;  %v2856_v24 = vor.u32 %v2855_v10, %v2854_v2  ;;  %v2863_v58 = vshll.u32 %v14331_v34, %v2851_v15  ;;  %v2867_v16 = vshrl.u32 %v14333_v7, %v2852_v53 }
 0x185   :  { %v7638_v4 = vadd.s32 4294967294, %v2593_v23  ;;  %v2692_v63 = vshll.u32 %v9591_v32, 30  ;;  %v2859_v30 = vor.u32 %v2858_v0, %v2857_v47  ;;  %v2866_v61 = vshll.u32 %v14332_v8, %v2851_v15 }
 0x186   :  { %vm9596_vm0 = vcmp.le.f32.partialorder %v14337_v52, 0.7853982  ;;  %vm2872_vm1 = vcmp.lt.s32.totalorder %v2850_v43, 4  ;;  %v2612_v26 = vsel %vm2527_vm15, %v2611_v37, %v2587_v46  ;;  %v2865_v40 = vor.u32 %v2864_v44, %v2863_v58 }
 0x187   :  { %vm7639_vm2 = vcmp.lt.s32.totalorder %v7638_v4, 0  ;;  %v2874_v33 = vsel %vm2872_vm1, %v2862_v17, 2102212464  ;;  %v9607_v23 = vsub.s32 %v2689_v51, %v2692_v63  ;;  %v2853_v10 = vshrl.u32 %v14328_v13, %v2852_v53 }
 0x188   :  { %v2596_v52 = vsel %vm7639_vm2, 0, %v7638_v4  ;;  %v2868_v2 = vor.u32 %v2867_v16, %v2866_v61  ;;  %vm2869_vm3 = vcmp.lt.s32.totalorder %v2850_v43, 1  ;;  %vm2871_vm4 = vcmp.lt.s32.totalorder %v2850_v43, 3 }
 0x189   :  { %v2597_v60 = vsub.s32 32, %v2596_v52  ;;  %v2601_v39 = vsub.s32 4294967266, %v2596_v52  ;;  %v2598_v15 = vshll.u32 %v9563_v42, %v2596_v52  ;;  %v2695_v0 = vsub.s32 0, %v9607_v23 }
 0x18a   :  { %v2873_v47 = vsel %vm2869_vm3, %v2853_v10, %v2856_v24  ;;  %v2875_v46 = vsel %vm2871_vm4, %v2859_v30, %v2874_v33  ;;  %vm2631_vm5 = vcmp.lt.s32.totalorder %v9466_v50, 0  ;;  %v2877_v63 = vsel %vm2869_vm3, %v2856_v24, %v2859_v30 }
 0x18b   :  { %v2599_v37 = vshrl.u32 %v2581_v19, %v2597_v60  ;;  %v2602_v44 = vadd.s32 127, %v2601_v39  ;;  %v2878_v51 = vsel %vm2872_vm1, %v2865_v40, 920167782  ;;  %v7641_v61 = vmin.u32 %v2695_v0, %v9607_v23 }
 0x18c   :  { %v2879_v16 = vsel %vm2871_vm4, %v2862_v17, %v2878_v51  ;;  %v2881_v53 = vsel %vm2869_vm3, %v2859_v30, %v2862_v17  ;;  %v2882_v4 = vsel %vm2872_vm1, %v2868_v2, 1326507024  ;;  %vm2870_vm6 = vcmp.lt.s32.totalorder %v2850_v43, 2 }
 0x18d   :  { %v2600_v42 = vor.u32 %v2599_v37, %v2598_v15  ;;  %v2603_v58 = vshll.u32 %v2602_v44, 23  ;;  %v2883_v52 = vsel %vm2871_vm4, %v2865_v40, %v2882_v4  ;;  %v2614_v39 = vsel %vm9596_vm0, 0, %v2612_v26 }
 0x18e   :  { %v2697_v60 = vclz %v7641_v61  ;;  %v2880_v19 = vsel %vm2870_vm6, %v2877_v63, %v2879_v16  ;;  %v2885_v24 = vshll.u32 %v2845_v20, 8  ;;  %v2715_v10 = vsub.s32 4, %v9591_v32 }
 0x18f   :  { %v2604_v33 = vor.u32 4788187, %v2603_v58  ;;  %v2876_v0 = vsel %vm2870_vm6, %v2873_v47, %v2875_v46  ;;  %v2884_v25 = vsel %vm2870_vm6, %v2881_v53, %v2883_v52  ;;  %v2607_v51 = vcvt.s32.f32 %v2600_v42  ;;  %v1064_v46 = vpop.f32.mrf.mxu0 }
 0x190   :  { %v7642_v17 = vadd.s32 4294967294, %v2697_v60  ;;  %v9622_v30 = vmul.u32.u64.low %v2885_v24, %v2884_v25  ;;  %v9623_v2 = vmul.u32.u64.high %v2885_v24, %v2884_v25, %v9622_v30  ;;  %v2951_v40 = vadd.s32 1, %v7652_v55 }
 0x191   :  { %v2605_v15 = vand.u32 2147483647, %v2604_v33  ;;  %v9625_v37 = vmul.u32.u64.low %v2885_v24, %v2880_v19  ;;  %v9626_v43 = vmul.u32.u64.high %v2885_v24, %v2880_v19, %v9625_v37  ;;  %v14340_v26 = vand.u32 2147483647, %v9466_v50  ;;  %v1066_v60 = vpop.f32.mrf.mxu0  ;;  %v1247_v30 = vpop.f32.mrf.mxu1 }
 0x192   :  { %v2685_v47 = vadd.s32 %v9544_v3, %v9551_v14  ;;  %vm7643_vm8 = vcmp.lt.s32.totalorder %v7642_v17, 0  ;;  %v2941_v25 = vand.u32 2147483647, %v9490_v56  ;;  %v2618_v63 = vadd.s32 3, %v2614_v39 }
 0x193   :  { %vm9631_vm7 = vcmp.le.f32.partialorder %v14340_v26, 0.7853982  ;;  %v2608_v44 = vmul.f32 %v2607_v51, %v2605_v15  ;;  %v2700_v61 = vsel %vm7643_vm8, 0, %v7642_v17  ;;  %vm2952_vm9 = vcmp.gt.s32.totalorder %v2951_v40, 0 }
 0x194   :  { %v2701_v16 = vsub.s32 32, %v2700_v61  ;;  %v2705_v53 = vsub.s32 4294967266, %v2700_v61  ;;  %v2716_v55 = vsel %vm2631_vm5, %v2715_v10, %v9591_v32  ;;  %v2892_v4 = vmul.u32 %v2885_v24, %v2876_v0 }
 0x195   :  { %v2609_v42 = vxor.u32 2147483648, %v2608_v44  ;;  %vm2894_vm10 = vc.u32 %v9623_v2, %v9625_v37  ;;  %v2895_v3 = vadd.s32 1, %v9626_v43  ;;  %v2953_v14 = vsel %vm2952_vm9, %v2951_v40, 0 }
 0x196   :  { %v2702_v58 = vshll.u32 %v9607_v23, %v2700_v61  ;;  %v2703_v52 = vshrl.u32 %v2685_v47, %v2701_v16  ;;  %v2706_v39 = vadd.s32 127, %v2705_v53  ;;  %v2955_v19 = vand.u32 31, %v2953_v14 }
 0x197   :  { %v2610_v33 = vsel %vm2527_vm15, %v2609_v42, %v2608_v44  ;;  %v2718_v32 = vsel %vm9631_vm7, 0, %v2716_v55  ;;  %v2896_v24 = vsel %vm2894_vm10, %v2895_v3, %v9626_v43  ;;  %v2948_v10 = vand.u32 8388607, %v2941_v25 }
 0x198   :  { %v2613_v0 = vsel %vm9596_vm0, %v9457_v1, %v2610_v33  ;;  %v2704_v23 = vor.u32 %v2703_v52, %v2702_v58  ;;  %v2707_v51 = vshll.u32 %v2706_v39, 23  ;;  %v2897_v17 = vadd.s32 %v2896_v24, %v2892_v4 }
 0x199   :  { %8322 = vcosq.f32 %v2613_v0  ;;  %v1065_v15 = vadd.f32 %v1064_v46, %v9334_v48  ;;  %v1067_v40 = vadd.f32 %v1066_v60, %v9339_v35  ;;  %v2956_v26 = vsub.s32 32, %v2955_v19 }
 0x19a   :  { %8324 = vsinq.f32 %v2613_v0  ;;  %v9657_v47 = vand.u32 3, %v2618_v63  ;;  %v2708_v43 = vor.u32 4788187, %v2707_v51  ;;  %v2898_v44 = vadd.s32 536870912, %v2897_v17 }
 0x19b   :  { %v2711_v61 = vcvt.s32.f32 %v2704_v23  ;;  %v2722_v16 = vadd.s32 3, %v2718_v32  ;;  %v2949_v53 = vor.u32 8388608, %v2948_v10  ;;  %v9659_v41 = vadd.f32 %v1247_v30, %v1065_v15  ;;  %v1249_v10 = vpop.f32.mrf.mxu1 }
 0x19c   :  { %v2709_v55 = vand.u32 2147483647, %v2708_v43  ;;  %v9661_v42 = vshrl.u32 %v2898_v44, 30  ;;  %v2959_v4 = vshrl.u32 %v14329_v38, %v2956_v26  ;;  %v2962_v48 = vshrl.u32 %v14330_v27, %v2956_v26 }
 0x19d   :  { %v9665_v46 = vshrl.u32 %v2953_v14, 5  ;;  %v2965_v35 = vshrl.u32 %v14331_v34, %v2956_v26  ;;  %v2967_v63 = vshll.u32 %v14331_v34, %v2955_v19  ;;  %v2968_v3 = vshrl.u32 %v14332_v8, %v2956_v26 }
 0x19e   :  { %v2712_v58 = vmul.f32 %v2711_v61, %v2709_v55  ;;  %v2900_v52 = vshll.u32 %v9661_v42, 30  ;;  %v2958_v39 = vshll.u32 %v14328_v13, %v2955_v19  ;;  %v2961_v60 = vshll.u32 %v14329_v38, %v2955_v19 }
 0x19f   :  { %v2964_v33 = vshll.u32 %v14330_v27, %v2955_v19  ;;  %v2969_v32 = vor.u32 %v2968_v3, %v2967_v63  ;;  %v2970_v24 = vshll.u32 %v14332_v8, %v2955_v19  ;;  %v2971_v14 = vshrl.u32 %v14333_v7, %v2956_v26 }
 0x1a0   :  { %vm2624_vm11 = vcmp.eq.s32.totalorder %v9657_v47, 2  ;;  %v2713_v0 = vxor.u32 2147483648, %v2712_v58  ;;  %v9677_v23 = vsub.s32 %v2897_v17, %v2900_v52  ;;  %v2960_v51 = vor.u32 %v2959_v4, %v2958_v39 }
 0x1a1   :  { %v2963_v30 = vor.u32 %v2962_v48, %v2961_v60  ;;  %vm2621_vm12 = vcmp.eq.s32.totalorder %v9657_v47, 0  ;;  %v9680_v15 = vand.u32 3, %v2722_v16  ;;  %v2966_v43 = vor.u32 %v2965_v35, %v2964_v33 }
 0x1a2   :  { %v2972_v44 = vor.u32 %v2971_v14, %v2970_v24  ;;  %v9682_v61 = vshll.u32 %v2949_v53, 8  ;;  %vm2620_vm13 = vcmp.lt.s32.totalorder %v9657_v47, 2  ;;  %vm7532_vm14 = vcmp.eq.s32.totalorder %v9573_v5, 1 }
 0x1a3   :  { %v2714_v19 = vsel %vm2631_vm5, %v2713_v0, %v2712_v58  ;;  %v2903_v17 = vsub.s32 0, %v9677_v23  ;;  %vm2976_vm15 = vcmp.lt.s32.totalorder %v9665_v46, 4  ;;  %v9690_v55 = vadd.f32 %v1249_v10, %v1067_v40 }
 0x1a4   :  { %vm2617_vm0 = vweird.f32 %v9457_v1  ;;  %v2717_v16 = vsel %vm9631_vm7, %v9466_v50, %v2714_v19  ;;  %vm2973_vm1 = vcmp.lt.s32.totalorder %v9665_v46, 1  ;;  %v2982_v53 = vsel %vm2976_vm15, %v2969_v32, 920167782 }
 0x1a5   :  { %v9701_v4 = vadd.f32 %v9446_v45, %v9659_v41  ;;  %8326 = vcosq.f32 %v2717_v16  ;;  %vm2839_vm2 = vcmp.lt.s32.totalorder %v9477_v29, 0  ;;  %v7649_v40 = vmin.u32 %v2903_v17, %v9677_v23 }
 0x1a6   :  { %vm2975_vm3 = vcmp.lt.s32.totalorder %v9665_v46, 3  ;;  %v2981_v20 = vsel %vm2973_vm1, %v2960_v51, %v2963_v30  ;;  %8328 = vsinq.f32 %v2717_v16  ;;  %v2985_v35 = vsel %vm2973_vm1, %v2963_v30, %v2966_v43  ;;  %v8323_v3 = vpop.eup %8322 }
 0x1a7   :  { %v2983_v48 = vsel %vm2975_vm3, %v2966_v43, %v2982_v53  ;;  %v2986_v63 = vsel %vm2976_vm15, %v2972_v44, 1326507024  ;;  %v2905_v58 = vclz %v7649_v40  ;;  %v2957_v52 = vshrl.u32 %v14328_v13, %v2956_v26  ;;  %v8325_v60 = vpop.eup %8324 }
 0x1a8   :  { %vm2974_vm4 = vcmp.lt.s32.totalorder %v9665_v46, 2  ;;  %v2978_v39 = vsel %vm2976_vm15, %v2966_v43, 2102212464  ;;  %v2625_v33 = vxor.u32 2147483648, %v8323_v3  ;;  %v2923_v24 = vsub.s32 4, %v9661_v42 }
 0x1a9   :  { %v2984_v14 = vsel %vm2974_vm4, %v2981_v20, %v2983_v48  ;;  %v2987_v10 = vsel %vm2975_vm3, %v2969_v32, %v2986_v63  ;;  %v2622_v0 = vxor.u32 2147483648, %v8325_v60  ;;  %v7650_v44 = vadd.s32 4294967294, %v2905_v58 }
 0x1aa   :  { %v2977_v26 = vsel %vm2973_vm1, %v2957_v52, %v2960_v51  ;;  %v2988_v19 = vsel %vm2974_vm4, %v2985_v35, %v2987_v10  ;;  %v2626_v43 = vsel %vm2624_vm11, %v2625_v33, %v8325_v60  ;;  %v2979_v17 = vsel %vm2975_vm3, %v2963_v30, %v2978_v39 }
 0x1ab   :  { %v9732_v16 = vmul.u32.u64.low %v9682_v61, %v2988_v19  ;;  %v9733_v53 = vmul.u32.u64.high %v9682_v61, %v2988_v19, %v9732_v16  ;;  %v2623_v32 = vsel %vm2621_vm12, %v8323_v3, %v2622_v0  ;;  %vm7651_vm5 = vcmp.lt.s32.totalorder %v7650_v44, 0 }
 0x1ac   :  { %v9738_v40 = vmul.u32.u64.low %v9682_v61, %v2984_v14  ;;  %v9739_v51 = vmul.u32.u64.high %v9682_v61, %v2984_v14, %v9738_v40  ;;  %v2627_v20 = vsel %vm2620_vm13, %v2623_v32, %v2626_v43  ;;  %v2893_v48 = vadd.s32 %v9625_v37, %v9623_v2 }
 0x1ad   :  { %v2908_v35 = vsel %vm7651_vm5, 0, %v7650_v44  ;;  %v3152_v30 = vand.u32 2139095040, %v9701_v4  ;;  %v2628_v63 = vsel %vm2617_vm0, nan, %v2627_v20  ;;  %v2980_v3 = vsel %vm2974_vm4, %v2977_v26, %v2979_v17 }
 0x1ae   :  { %v2909_v58 = vsub.s32 32, %v2908_v35  ;;  %v2913_v52 = vsub.s32 4294967266, %v2908_v35  ;;  %v7535_v39 = vsel %vm7532_vm14, %v9449_v11, %v2628_v63  ;;  %vm7533_vm6 = vcmp.eq.s32.totalorder %v9579_v62, 1 }
 0x1af   :  { %v2924_v2 = vsel %vm2839_vm2, %v2923_v24, %v9661_v42  ;;  %vm2998_vm7 = vc.u32 %v9733_v53, %v9738_v40  ;;  %v3153_v37 = vshrl.u32 %v3152_v30, 23  ;;  %7583 = vst [vmem:[%s14171_s4] sm:$0xff] %v7535_v39  ;;  %v2910_v1 = vshll.u32 %v9677_v23, %v2908_v35 }
 0x1b0   :  { %v2911_v47 = vshrl.u32 %v2893_v48, %v2909_v58  ;;  %v2914_v46 = vadd.s32 127, %v2913_v52  ;;  %v2999_v60 = vadd.s32 1, %v9739_v51  ;;  %vm2724_vm8 = vcmp.lt.s32.totalorder %v9680_v15, 2 }
 0x1b1   :  { %v14343_v11 = vand.u32 2147483647, %v9477_v29  ;;  %v2996_v42 = vmul.u32 %v9682_v61, %v2980_v3  ;;  %v7660_v24 = vadd.s32 4294967169, %v3153_v37  ;;  %vm2725_vm10 = vcmp.eq.s32.totalorder %v9680_v15, 0 }
 0x1b2   :  { %v2912_v14 = vor.u32 %v2911_v47, %v2910_v1  ;;  %v2915_v10 = vshll.u32 %v2914_v46, 23  ;;  %v3000_v0 = vsel %vm2998_vm7, %v2999_v60, %v9739_v51  ;;  %v8327_v44 = vpop.eup %8326  ;;  %v3149_v19 = vand.u32 2147483647, %v9701_v4 }
 0x1b3   :  { %vm9766_vm9 = vcmp.le.f32.partialorder %v14343_v11, 0.7853982  ;;  %v3001_v26 = vadd.s32 %v3000_v0, %v2996_v42  ;;  %v3159_v43 = vadd.s32 1, %v7660_v24  ;;  %v8329_v17 = vpop.eup %8328  ;;  %vm2728_vm11 = vcmp.eq.s32.totalorder %v9680_v15, 2 }
 0x1b4   :  { %v2926_v23 = vsel %vm9766_vm9, 0, %v2924_v2  ;;  %v2729_v16 = vxor.u32 2147483648, %v8327_v44  ;;  %v2916_v61 = vor.u32 4788187, %v2915_v10  ;;  %v9779_v32 = vadd.f32 %v9453_v54, %v9690_v55 }
 0x1b5   :  { %v2726_v20 = vxor.u32 2147483648, %v8329_v17  ;;  %v2930_v48 = vadd.s32 3, %v2926_v23  ;;  %v3002_v35 = vadd.s32 536870912, %v3001_v26  ;;  %vm3160_vm12 = vcmp.gt.s32.totalorder %v3159_v43, 0 }
 0x1b6   :  { %v2730_v51 = vsel %vm2728_vm11, %v2729_v16, %v8329_v17  ;;  %v2917_v30 = vand.u32 2147483647, %v2916_v61  ;;  %v2919_v63 = vcvt.s32.f32 %v2912_v14  ;;  %v3161_v58 = vsel %vm3160_vm12, %v3159_v43, 0 }
 0x1b7   :  { %v2727_v52 = vsel %vm2725_vm10, %v8327_v44, %v2726_v20  ;;  %v9783_v3 = vshrl.u32 %v3002_v35, 30  ;;  %v3156_v39 = vand.u32 8388607, %v3149_v19  ;;  %v3163_v2 = vand.u32 31, %v3161_v58 }
 0x1b8   :  { %vm2721_vm13 = vweird.f32 %v9466_v50  ;;  %v2731_v37 = vsel %vm2724_vm8, %v2727_v52, %v2730_v51  ;;  %v2920_v1 = vmul.f32 %v2919_v63, %v2917_v30  ;;  %v3256_v47 = vand.u32 2139095040, %v9779_v32 }
 0x1b9   :  { %v2732_v46 = vsel %vm2721_vm13, nan, %v2731_v37  ;;  %v3004_v60 = vshll.u32 %v9783_v3, 30  ;;  %v3164_v11 = vsub.s32 32, %v3163_v2  ;;  %v9795_v14 = vand.u32 3, %v2930_v48 }
 0x1ba   :  { %v7536_v42 = vsel %vm7533_vm6, %v9459_v31, %v2732_v46  ;;  %v2921_v24 = vxor.u32 2147483648, %v2920_v1  ;;  %v2997_v10 = vadd.s32 %v9738_v40, %v9733_v53  ;;  %v3157_v15 = vor.u32 8388608, %v3156_v39 }
 0x1bb   :  { %7584 = vst [vmem:[%s14171_s4 + $0x8] sm:$0xff] %v7536_v42  ;;  %v9801_v50 = vsub.s32 %v3001_v26, %v3004_v60  ;;  %v3167_v23 = vshrl.u32 %v14329_v38, %v3164_v11  ;;  %v3253_v0 = vand.u32 2147483647, %v9779_v32  ;;  %v3166_v31 = vshll.u32 %v14328_v13, %v3163_v2 }
 0x1bc   :  { %v2922_v44 = vsel %vm2839_vm2, %v2921_v24, %v2920_v1  ;;  %v3170_v43 = vshrl.u32 %v14330_v27, %v3164_v11  ;;  %v3257_v17 = vshrl.u32 %v3256_v47, 23  ;;  %vm2943_vm15 = vcmp.lt.s32.totalorder %v9490_v56, 0 }
 0x1bd   :  { %v2925_v53 = vsel %vm9766_vm9, %v9477_v29, %v2922_v44  ;;  %v3007_v40 = vsub.s32 0, %v9801_v50  ;;  %v3162_v26 = vshrl.u32 %v3161_v58, 5  ;;  %v3169_v16 = vshll.u32 %v14329_v38, %v3163_v2 }
 0x1be   :  { %8330 = vcosq.f32 %v2925_v53  ;;  %v3168_v61 = vor.u32 %v3167_v23, %v3166_v31  ;;  %v3172_v20 = vshll.u32 %v14330_v27, %v3163_v2  ;;  %v3173_v48 = vshrl.u32 %v14331_v34, %v3164_v11 }
 0x1bf   :  { %8332 = vsinq.f32 %v2925_v53  ;;  %v7653_v35 = vmin.u32 %v3007_v40, %v9801_v50  ;;  %v3171_v51 = vor.u32 %v3170_v43, %v3169_v16  ;;  %v3176_v33 = vshrl.u32 %v14332_v8, %v3164_v11 }
 0x1c0   :  { %v3174_v30 = vor.u32 %v3173_v48, %v3172_v20  ;;  %v3175_v63 = vshll.u32 %v14331_v34, %v3163_v2  ;;  %v3178_v52 = vshll.u32 %v14332_v8, %v3163_v2  ;;  %v3179_v58 = vshrl.u32 %v14333_v7, %v3164_v11 }
 0x1c1   :  { %v3009_v39 = vclz %v7653_v35  ;;  %v3027_v37 = vsub.s32 4, %v9783_v3  ;;  %v9823_v1 = vshll.u32 %v3157_v15, 8  ;;  %v7664_v47 = vadd.s32 4294967169, %v3257_v17  ;;  %v1071_v35 = vpop.f32.mrf.mxu0 }
 0x1c2   :  { %v3165_v46 = vshrl.u32 %v14328_v13, %v3164_v11  ;;  %v3177_v60 = vor.u32 %v3176_v33, %v3175_v63  ;;  %v3180_v42 = vor.u32 %v3179_v58, %v3178_v52  ;;  %vm3181_vm0 = vcmp.lt.s32.totalorder %v3162_v26, 1 }
 0x1c3   :  { %vm9828_vm1 = vcmp.le.f32.partialorder %v2941_v25, 0.7853982  ;;  %v7654_v2 = vadd.s32 4294967294, %v3009_v39  ;;  %vm3183_vm2 = vcmp.lt.s32.totalorder %v3162_v26, 3  ;;  %vm3184_vm3 = vcmp.lt.s32.totalorder %v3162_v26, 4 }
 0x1c4   :  { %v3189_v23 = vsel %vm3181_vm0, %v3168_v61, %v3171_v51  ;;  %v3186_v44 = vsel %vm3184_vm3, %v3174_v30, 2102212464  ;;  %v3190_v15 = vsel %vm3184_vm3, %v3177_v60, 920167782  ;;  %v3193_v31 = vsel %vm3181_vm0, %v3171_v51, %v3174_v30 }
 0x1c5   :  { %v3194_v43 = vsel %vm3184_vm3, %v3180_v42, 1326507024  ;;  %vm7655_vm4 = vcmp.lt.s32.totalorder %v7654_v2, 0  ;;  %vm3182_vm5 = vcmp.lt.s32.totalorder %v3162_v26, 2  ;;  %v3191_v11 = vsel %vm3183_vm2, %v3174_v30, %v3190_v15 }
 0x1c6   :  { %v3195_v17 = vsel %vm3183_vm2, %v3177_v60, %v3194_v43  ;;  %v3012_v25 = vsel %vm7655_vm4, 0, %v7654_v2  ;;  %v3028_v53 = vsel %vm2943_vm15, %v3027_v37, %v9783_v3  ;;  %v3192_v40 = vsel %vm3182_vm5, %v3189_v23, %v3191_v11 }
 0x1c7   :  { %v3196_v16 = vsel %vm3182_vm5, %v3193_v31, %v3195_v17  ;;  %v3013_v20 = vsub.s32 32, %v3012_v25  ;;  %v3017_v48 = vsub.s32 4294967266, %v3012_v25  ;;  %v3185_v33 = vsel %vm3181_vm0, %v3165_v46, %v3168_v61 }
 0x1c8   :  { %v3187_v63 = vsel %vm3183_vm2, %v3171_v51, %v3186_v44  ;;  %vm2929_vm7 = vweird.f32 %v9477_v29  ;;  %v9845_v30 = vmul.u32.u64.low %v9823_v1, %v3196_v16  ;;  %v9846_v52 = vmul.u32.u64.high %v9823_v1, %v3196_v16, %v9845_v30 }
 0x1c9   :  { %v9849_v58 = vmul.u32.u64.low %v9823_v1, %v3192_v40  ;;  %v9850_v3 = vmul.u32.u64.high %v9823_v1, %v3192_v40, %v9849_v58  ;;  %v3014_v39 = vshll.u32 %v9801_v50, %v3012_v25  ;;  %v3015_v37 = vshrl.u32 %v2997_v10, %v3013_v20  ;;  %v1254_v40 = vpop.f32.mrf.mxu1 }
 0x1ca   :  { %v3018_v60 = vadd.s32 127, %v3017_v48  ;;  %v3263_v42 = vadd.s32 1, %v7664_v47  ;;  %vm2932_vm8 = vcmp.lt.s32.totalorder %v9795_v14, 2  ;;  %vm2936_vm9 = vcmp.eq.s32.totalorder %v9795_v14, 2 }
 0x1cb   :  { %v1072_v61 = vadd.f32 %v1071_v35, %v9344_v9  ;;  %v3188_v51 = vsel %vm3182_vm5, %v3185_v33, %v3187_v63  ;;  %v8331_v46 = vpop.eup %8330  ;;  %v3016_v2 = vor.u32 %v3015_v37, %v3014_v39  ;;  %v3260_v44 = vand.u32 8388607, %v3253_v0 }
 0x1cc   :  { %v3019_v23 = vshll.u32 %v3018_v60, 23  ;;  %vm3264_vm10 = vcmp.gt.s32.totalorder %v3263_v42, 0  ;;  %v8333_v15 = vpop.eup %8332  ;;  %v2937_v50 = vxor.u32 2147483648, %v8331_v46  ;;  %v3030_v10 = vsel %vm9828_vm1, 0, %v3028_v53 }
 0x1cd   :  { %vm3206_vm11 = vc.u32 %v9846_v52, %v9849_v58  ;;  %v3207_v47 = vadd.s32 1, %v9850_v3  ;;  %v2934_v9 = vxor.u32 2147483648, %v8333_v15  ;;  %v3204_v31 = vmul.u32 %v9823_v1, %v3188_v51 }
 0x1ce   :  { %v3020_v26 = vor.u32 4788187, %v3019_v23  ;;  %v3265_v43 = vsel %vm3264_vm10, %v3263_v42, 0  ;;  %vm2933_vm12 = vcmp.eq.s32.totalorder %v9795_v14, 0  ;;  %v2938_v11 = vsel %vm2936_vm9, %v2937_v50, %v8333_v15 }
 0x1cf   :  { %v3208_v17 = vsel %vm3206_vm11, %v3207_v47, %v9850_v3  ;;  %v3267_v25 = vand.u32 31, %v3265_v43  ;;  %v2935_v53 = vsel %vm2933_vm12, %v8331_v46, %v2934_v9  ;;  %v3023_v20 = vcvt.s32.f32 %v3016_v2 }
 0x1d0   :  { %v3021_v16 = vand.u32 2147483647, %v3020_v26  ;;  %v3209_v48 = vadd.s32 %v3208_v17, %v3204_v31  ;;  %v2939_v35 = vsel %vm2932_vm8, %v2935_v53, %v2938_v11  ;;  %v3034_v33 = vadd.s32 3, %v3030_v10 }
 0x1d1   :  { %v3261_v63 = vor.u32 8388608, %v3260_v44  ;;  %v3268_v1 = vsub.s32 32, %v3267_v25  ;;  %v2940_v30 = vsel %vm2929_vm7, nan, %v2939_v35  ;;  %v9874_v60 = vadd.f32 %v1254_v40, %v1072_v61 }
 0x1d2   :  { %v3024_v39 = vmul.f32 %v3023_v20, %v3021_v16  ;;  %v3210_v37 = vadd.s32 536870912, %v3209_v48  ;;  %v7538_v3 = vsel %vm7532_vm14, %v9468_v49, %v2940_v30  ;;  %v3270_v42 = vshll.u32 %v14328_v13, %v3267_v25 }
 0x1d3   :  { %v3271_v51 = vshrl.u32 %v14329_v38, %v3268_v1  ;;  %v3274_v14 = vshrl.u32 %v14330_v27, %v3268_v1  ;;  %7587 = vst [vmem:[%s14171_s4 + $0x18] sm:$0xff] %v7538_v3  ;;  %v3273_v2 = vshll.u32 %v14329_v38, %v3267_v25  ;;  %v3277_v61 = vshrl.u32 %v14331_v34, %v3268_v1 }
 0x1d4   :  { %v3025_v29 = vxor.u32 2147483648, %v3024_v39  ;;  %v3211_v46 = vshrl.u32 %v3210_v37, 30  ;;  %v3266_v23 = vshrl.u32 %v3265_v43, 5  ;;  %v3276_v44 = vshll.u32 %v14330_v27, %v3267_v25 }
 0x1d5   :  { %v3279_v49 = vshll.u32 %v14331_v34, %v3267_v25  ;;  %v3280_v15 = vshrl.u32 %v14332_v8, %v3268_v1  ;;  %v3272_v47 = vor.u32 %v3271_v51, %v3270_v42  ;;  %v3275_v9 = vor.u32 %v3274_v14, %v3273_v2 }
 0x1d6   :  { %v3026_v50 = vsel %vm2943_vm15, %v3025_v29, %v3024_v39  ;;  %v3212_v10 = vshll.u32 %v3211_v46, 30  ;;  %v3282_v11 = vshll.u32 %v14332_v8, %v3267_v25  ;;  %v3283_v43 = vshrl.u32 %v14333_v7, %v3268_v1  ;;  %v1073_v25 = vpop.f32.mrf.mxu0 }
 0x1d7   :  { %v3029_v26 = vsel %vm9828_vm1, %v9490_v56, %v3026_v50  ;;  %v3281_v31 = vor.u32 %v3280_v15, %v3279_v49  ;;  %v3278_v40 = vor.u32 %v3277_v61, %v3276_v44  ;;  %v9899_v53 = vand.u32 3, %v3034_v33  ;;  %v1256_v50 = vpop.f32.mrf.mxu1 }
 0x1d8   :  { %8334 = vcosq.f32 %v3029_v26  ;;  %v9897_v17 = vsub.s32 %v3209_v48, %v3212_v10  ;;  %v3284_v16 = vor.u32 %v3283_v43, %v3282_v11  ;;  %v3301_v20 = vshll.u32 %v3261_v63, 8 }
 0x1d9   :  { %8336 = vsinq.f32 %v3029_v26  ;;  %vm3285_vm13 = vcmp.lt.s32.totalorder %v3266_v23, 1  ;;  %vm3288_vm15 = vcmp.lt.s32.totalorder %v3266_v23, 4  ;;  %v9904_v24 = vadd.f32 %v9446_v45, %v9874_v60 }
 0x1da   :  { %v3215_v35 = vsub.s32 0, %v9897_v17  ;;  %v3269_v30 = vshrl.u32 %v14328_v13, %v3268_v1  ;;  %vm3287_vm0 = vcmp.lt.s32.totalorder %v3266_v23, 3  ;;  %v3293_v48 = vsel %vm3285_vm13, %v3272_v47, %v3275_v9 }
 0x1db   :  { %v3294_v39 = vsel %vm3288_vm15, %v3281_v31, 920167782  ;;  %vm3286_vm1 = vcmp.lt.s32.totalorder %v3266_v23, 2  ;;  %v3290_v37 = vsel %vm3288_vm15, %v3278_v40, 2102212464  ;;  %v3235_v3 = vsub.s32 4, %v3211_v46 }
 0x1dc   :  { %v7661_v33 = vmin.u32 %v3215_v35, %v9897_v17  ;;  %v3295_v63 = vsel %vm3287_vm0, %v3278_v40, %v3294_v39  ;;  %v3297_v51 = vsel %vm3285_vm13, %v3275_v9, %v3278_v40  ;;  %v3298_v14 = vsel %vm3288_vm15, %v3284_v16, 1326507024 }
 0x1dd   :  { %v3296_v42 = vsel %vm3286_vm1, %v3293_v48, %v3295_v63  ;;  %v1074_v2 = vadd.f32 %v1073_v25, %v9349_v6  ;;  %v3289_v1 = vsel %vm3285_vm13, %v3269_v30, %v3272_v47  ;;  %v3291_v61 = vsel %vm3287_vm0, %v3275_v9, %v3290_v37 }
 0x1de   :  { %v3217_v29 = vclz %v7661_v33  ;;  %v3299_v44 = vsel %vm3287_vm0, %v3281_v31, %v3298_v14  ;;  %v9913_v49 = vmul.u32.u64.low %v3301_v20, %v3296_v42  ;;  %v9914_v15 = vmul.u32.u64.high %v3301_v20, %v3296_v42, %v9913_v49 }
 0x1df   :  { %vm9919_vm2 = vcmp.le.f32.partialorder %v3149_v19, 0.7853982  ;;  %vm3151_vm3 = vcmp.lt.s32.totalorder %v9701_v4, 0  ;;  %v3300_v6 = vsel %vm3286_vm1, %v3297_v51, %v3299_v44  ;;  %vm3036_vm4 = vcmp.lt.s32.totalorder %v9899_v53, 2 }
 0x1e0   :  { %v7662_v26 = vadd.s32 4294967294, %v3217_v29  ;;  %v3236_v47 = vsel %vm3151_vm3, %v3235_v3, %v3211_v46  ;;  %v9928_v9 = vmul.u32.u64.low %v3301_v20, %v3300_v6  ;;  %v9929_v31 = vmul.u32.u64.high %v3301_v20, %v3300_v6, %v9928_v9 }
 0x1e1   :  { %v3464_v11 = vand.u32 2139095040, %v9904_v24  ;;  %vm3033_vm5 = vweird.f32 %v9490_v56  ;;  %vm3037_vm7 = vcmp.eq.s32.totalorder %v9899_v53, 0  ;;  %v3292_v19 = vsel %vm3286_vm1, %v3289_v1, %v3291_v61 }
 0x1e2   :  { %vm7663_vm8 = vcmp.lt.s32.totalorder %v7662_v26, 0  ;;  %v9935_v43 = vadd.f32 %v1256_v50, %v1074_v2  ;;  %v3205_v40 = vadd.s32 %v9849_v58, %v9846_v52  ;;  %v3311_v46 = vadd.s32 1, %v9914_v15 }
 0x1e3   :  { %v3220_v16 = vsel %vm7663_vm8, 0, %v7662_v26  ;;  %v3465_v35 = vshrl.u32 %v3464_v11, 23  ;;  %v3238_v48 = vsel %vm9919_vm2, 0, %v3236_v47  ;;  %v3461_v39 = vand.u32 2147483647, %v9904_v24 }
 0x1e4   :  { %v3221_v25 = vsub.s32 32, %v3220_v16  ;;  %v3225_v30 = vsub.s32 4294967266, %v3220_v16  ;;  %v3222_v23 = vshll.u32 %v9897_v17, %v3220_v16  ;;  %v3308_v37 = vmul.u32 %v3301_v20, %v3292_v19 }
 0x1e5   :  { %v8335_v33 = vpop.eup %8334  ;;  %vm3310_vm9 = vc.u32 %v9929_v31, %v9913_v49  ;;  %v7672_v63 = vadd.s32 4294967169, %v3465_v35  ;;  %vm3040_vm10 = vcmp.eq.s32.totalorder %v9899_v53, 2  ;;  %v3242_v17 = vadd.s32 3, %v3238_v48 }
 0x1e6   :  { %v8337_v52 = vpop.eup %8336  ;;  %v3041_v58 = vxor.u32 2147483648, %v8335_v33  ;;  %v3223_v3 = vshrl.u32 %v3205_v40, %v3221_v25  ;;  %v3226_v42 = vadd.s32 127, %v3225_v30  ;;  %v3312_v51 = vsel %vm3310_vm9, %v3311_v46, %v9914_v15 }
 0x1e7   :  { %v3038_v14 = vxor.u32 2147483648, %v8337_v52  ;;  %v3313_v29 = vadd.s32 %v3312_v51, %v3308_v37  ;;  %v3471_v2 = vadd.s32 1, %v7672_v63  ;;  %v3468_v26 = vand.u32 8388607, %v3461_v39 }
 0x1e8   :  { %v3042_v1 = vsel %vm3040_vm10, %v3041_v58, %v8337_v52  ;;  %v3224_v61 = vor.u32 %v3223_v3, %v3222_v23  ;;  %v3227_v44 = vshll.u32 %v3226_v42, 23  ;;  %v9956_v9 = vadd.f32 %v9453_v54, %v9935_v43 }
 0x1e9   :  { %v3039_v20 = vsel %vm3037_vm7, %v8335_v33, %v3038_v14  ;;  %v3314_v50 = vadd.s32 536870912, %v3313_v29  ;;  %vm3472_vm11 = vcmp.gt.s32.totalorder %v3471_v2, 0  ;;  %v9969_v48 = vand.u32 3, %v3242_v17 }
 0x1ea   :  { %v3043_v15 = vsel %vm3036_vm4, %v3039_v20, %v3042_v1  ;;  %v3228_v6 = vor.u32 4788187, %v3227_v44  ;;  %v3473_v47 = vsel %vm3472_vm11, %v3471_v2, 0  ;;  %v3231_v35 = vcvt.s32.f32 %v3224_v61 }
 0x1eb   :  { %v3044_v11 = vsel %vm3033_vm5, nan, %v3043_v15  ;;  %v9960_v19 = vshrl.u32 %v3314_v50, 30  ;;  %v3475_v40 = vand.u32 31, %v3473_v47  ;;  %v3469_v56 = vor.u32 8388608, %v3468_v26 }
 0x1ec   :  { %v7539_v16 = vsel %vm7533_vm6, %v9481_v12, %v3044_v11  ;;  %v3229_v46 = vand.u32 2147483647, %v3228_v6  ;;  %v3565_v33 = vand.u32 2147483647, %v9956_v9  ;;  %v3309_v23 = vadd.s32 %v9913_v49, %v9929_v31 }
 0x1ed   :  { %7588 = vst [vmem:[%s14171_s4 + $0x20] sm:$0xff] %v7539_v16  ;;  %v3316_v53 = vshll.u32 %v9960_v19, 30  ;;  %v3476_v25 = vsub.s32 32, %v3475_v40  ;;  %v3568_v63 = vand.u32 2139095040, %v9956_v9  ;;  %v3478_v58 = vshll.u32 %v14328_v13, %v3475_v40 }
 0x1ee   :  { %v3232_v30 = vmul.f32 %v3231_v35, %v3229_v46  ;;  %v3481_v14 = vshll.u32 %v14329_v38, %v3475_v40  ;;  %v3484_v2 = vshll.u32 %v14330_v27, %v3475_v40  ;;  %v3487_v61 = vshll.u32 %v14331_v34, %v3475_v40 }
 0x1ef   :  { %v9974_v37 = vsub.s32 %v3313_v29, %v3316_v53  ;;  %v3479_v12 = vshrl.u32 %v14329_v38, %v3476_v25  ;;  %v3482_v3 = vshrl.u32 %v14330_v27, %v3476_v25  ;;  %v3485_v42 = vshrl.u32 %v14331_v34, %v3476_v25 }
 0x1f0   :  { %v3233_v52 = vxor.u32 2147483648, %v3232_v30  ;;  %v3488_v49 = vshrl.u32 %v14332_v8, %v3476_v25  ;;  %v3474_v29 = vshrl.u32 %v3473_v47, 5  ;;  %v3490_v15 = vshll.u32 %v14332_v8, %v3475_v40 }
 0x1f1   :  { %v3319_v51 = vsub.s32 0, %v9974_v37  ;;  %v3480_v1 = vor.u32 %v3479_v12, %v3478_v58  ;;  %v3483_v20 = vor.u32 %v3482_v3, %v3481_v14  ;;  %v3486_v50 = vor.u32 %v3485_v42, %v3484_v2 }
 0x1f2   :  { %v3234_v31 = vsel %vm3151_vm3, %v3233_v52, %v3232_v30  ;;  %v3489_v26 = vor.u32 %v3488_v49, %v3487_v61  ;;  %v3491_v6 = vshrl.u32 %v14333_v7, %v3476_v25  ;;  %v9994_v47 = vshll.u32 %v3469_v56, 8  ;;  %v1078_v30 = vpop.f32.mrf.mxu0 }
 0x1f3   :  { %v3237_v44 = vsel %vm9919_vm2, %v9701_v4, %v3234_v31  ;;  %v7665_v17 = vmin.u32 %v3319_v51, %v9974_v37  ;;  %v3569_v16 = vshrl.u32 %v3568_v63, 23  ;;  %v3339_v46 = vsub.s32 4, %v9960_v19 }
 0x1f4   :  { %8338 = vcosq.f32 %v3237_v44  ;;  %v3477_v10 = vshrl.u32 %v14328_v13, %v3476_v25  ;;  %v3492_v35 = vor.u32 %v3491_v6, %v3490_v15  ;;  %vm3493_vm12 = vcmp.lt.s32.totalorder %v3474_v29, 1 }
 0x1f5   :  { %8340 = vsinq.f32 %v3237_v44  ;;  %v3321_v11 = vclz %v7665_v17  ;;  %vm3495_vm13 = vcmp.lt.s32.totalorder %v3474_v29, 3  ;;  %vm3496_vm15 = vcmp.lt.s32.totalorder %v3474_v29, 4  ;;  %v1080_v44 = vpop.f32.mrf.mxu0 }
 0x1f6   :  { %v3501_v12 = vsel %vm3493_vm12, %v3480_v1, %v3483_v20  ;;  %vm3255_vm0 = vcmp.lt.s32.totalorder %v9779_v32, 0  ;;  %v3498_v40 = vsel %vm3496_vm15, %v3486_v50, 2102212464  ;;  %v3502_v52 = vsel %vm3496_vm15, %v3489_v26, 920167782 }
 0x1f7   :  { %v7666_v53 = vadd.s32 4294967294, %v3321_v11  ;;  %v3505_v56 = vsel %vm3493_vm12, %v3483_v20, %v3486_v50  ;;  %v3506_v58 = vsel %vm3496_vm15, %v3492_v35, 1326507024  ;;  %vm3494_vm2 = vcmp.lt.s32.totalorder %v3474_v29, 2 }
 0x1f8   :  { %v3503_v63 = vsel %vm3495_vm13, %v3486_v50, %v3502_v52  ;;  %v3507_v25 = vsel %vm3495_vm13, %v3489_v26, %v3506_v58  ;;  %v3497_v42 = vsel %vm3493_vm12, %v3477_v10, %v3480_v1  ;;  %vm10008_vm3 = vcmp.le.f32.partialorder %v3253_v0, 0.7853982 }
 0x1f9   :  { %vm7667_vm1 = vcmp.lt.s32.totalorder %v7666_v53, 0  ;;  %v3504_v51 = vsel %vm3494_vm2, %v3501_v12, %v3503_v63  ;;  %v3508_v14 = vsel %vm3494_vm2, %v3505_v56, %v3507_v25  ;;  %v3499_v61 = vsel %vm3495_vm13, %v3483_v20, %v3498_v40 }
 0x1fa   :  { %v3324_v3 = vsel %vm7667_vm1, 0, %v7666_v53  ;;  %v7676_v17 = vadd.s32 4294967169, %v3569_v16  ;;  %v10014_v50 = vmul.u32.u64.low %v9994_v47, %v3508_v14  ;;  %v10015_v26 = vmul.u32.u64.high %v9994_v47, %v3508_v14, %v10014_v50 }
 0x1fb   :  { %v3325_v49 = vsub.s32 32, %v3324_v3  ;;  %v3329_v31 = vsub.s32 4294967266, %v3324_v3  ;;  %v10018_v1 = vmul.u32.u64.low %v9994_v47, %v3504_v51  ;;  %v10019_v15 = vmul.u32.u64.high %v9994_v47, %v3504_v51, %v10018_v1 }
 0x1fc   :  { %v3326_v0 = vshll.u32 %v9974_v37, %v3324_v3  ;;  %v3575_v10 = vadd.s32 1, %v7676_v17  ;;  %vm3241_vm4 = vweird.f32 %v9701_v4  ;;  %vm3244_vm5 = vcmp.lt.s32.totalorder %v9969_v48, 2 }
 0x1fd   :  { %v3327_v6 = vshrl.u32 %v3309_v23, %v3325_v49  ;;  %v3330_v11 = vadd.s32 127, %v3329_v31  ;;  %v10026_v20 = vadd.f32 %v1078_v30, %v9354_v21  ;;  %v3500_v16 = vsel %vm3494_vm2, %v3497_v42, %v3499_v61 }
 0x1fe   :  { %v10030_v35 = vadd.f32 %v1080_v44, %v9359_v22  ;;  %vm3245_vm7 = vcmp.eq.s32.totalorder %v9969_v48, 0  ;;  %vm3576_vm8 = vcmp.gt.s32.totalorder %v3575_v10, 0  ;;  %vm3518_vm9 = vc.u32 %v10015_v26, %v10018_v1 }
 0x1ff   :  { %v3328_v53 = vor.u32 %v3327_v6, %v3326_v0  ;;  %v3331_v12 = vshll.u32 %v3330_v11, 23  ;;  %v3519_v23 = vadd.s32 1, %v10019_v15  ;;  %v3572_v37 = vand.u32 8388607, %v3565_v33 }
 0x200   :  { %v3577_v21 = vsel %vm3576_vm8, %v3575_v10, 0  ;;  %v3340_v22 = vsel %vm3255_vm0, %v3339_v46, %v9960_v19  ;;  %v3516_v40 = vmul.u32 %v9994_v47, %v3500_v16  ;;  %vm3248_vm10 = vcmp.eq.s32.totalorder %v9969_v48, 2 }
 0x201   :  { %v8339_v30 = vpop.eup %8338  ;;  %v3332_v29 = vor.u32 4788187, %v3331_v12  ;;  %v3579_v52 = vand.u32 31, %v3577_v21  ;;  %v3335_v63 = vcvt.s32.f32 %v3328_v53  ;;  %v3520_v25 = vsel %vm3518_vm9, %v3519_v23, %v10019_v15 }
 0x202   :  { %v8341_v56 = vpop.eup %8340  ;;  %v3249_v58 = vxor.u32 2147483648, %v8339_v30  ;;  %v3521_v51 = vadd.s32 %v3520_v25, %v3516_v40  ;;  %v3342_v31 = vsel %vm10008_vm3, 0, %v3340_v22  ;;  %v3573_v61 = vor.u32 8388608, %v3572_v37  ;;  %v1261_v22 = vpop.f32.mrf.mxu1 }
 0x203   :  { %v3246_v3 = vxor.u32 2147483648, %v8341_v56  ;;  %v3333_v42 = vand.u32 2147483647, %v3332_v29  ;;  %v3580_v14 = vsub.s32 32, %v3579_v52  ;;  %v10046_v19 = vshrl.u32 %v3577_v21, 5 }
 0x204   :  { %v3250_v49 = vsel %vm3248_vm10, %v3249_v58, %v8341_v56  ;;  %v3522_v44 = vadd.s32 536870912, %v3521_v51  ;;  %v3582_v17 = vshll.u32 %v14328_v13, %v3579_v52  ;;  %v3585_v53 = vshll.u32 %v14329_v38, %v3579_v52 }
 0x205   :  { %v3247_v47 = vsel %vm3245_vm7, %v8339_v30, %v3246_v3  ;;  %v3336_v46 = vmul.f32 %v3335_v63, %v3333_v42  ;;  %v3583_v15 = vshrl.u32 %v14329_v38, %v3580_v14  ;;  %v3586_v0 = vshrl.u32 %v14330_v27, %v3580_v14 }
 0x206   :  { %v3251_v50 = vsel %vm3244_vm5, %v3247_v47, %v3250_v49  ;;  %v3589_v6 = vshrl.u32 %v14331_v34, %v3580_v14  ;;  %v3523_v16 = vshrl.u32 %v3522_v44, 30  ;;  %v3588_v48 = vshll.u32 %v14330_v27, %v3579_v52 }
 0x207   :  { %v3252_v11 = vsel %vm3241_vm4, nan, %v3251_v50  ;;  %v3337_v10 = vxor.u32 2147483648, %v3336_v46  ;;  %v3584_v23 = vor.u32 %v3583_v15, %v3582_v17  ;;  %v3591_v37 = vshll.u32 %v14331_v34, %v3579_v52 }
 0x208   :  { %v7541_v12 = vsel %vm7532_vm14, %v9659_v41, %v3252_v11  ;;  %v3524_v21 = vshll.u32 %v3523_v16, 30  ;;  %v3587_v30 = vor.u32 %v3586_v0, %v3585_v53  ;;  %v3592_v29 = vshrl.u32 %v14332_v8, %v3580_v14 }
 0x209   :  { %7590 = vst [vmem:[%s14171_s4 + $0x30] sm:$0xff] %v7541_v12  ;;  %v3338_v4 = vsel %vm3255_vm0, %v3337_v10, %v3336_v46  ;;  %v3590_v40 = vor.u32 %v3589_v6, %v3588_v48  ;;  %v3594_v56 = vshll.u32 %v14332_v8, %v3579_v52  ;;  %v3595_v58 = vshrl.u32 %v14333_v7, %v3580_v14 }
 0x20a   :  { %v3341_v41 = vsel %vm10008_vm3, %v9779_v32, %v3338_v4  ;;  %v3346_v63 = vadd.s32 3, %v3342_v31  ;;  %v10075_v25 = vsub.s32 %v3521_v51, %v3524_v21  ;;  %v3593_v3 = vor.u32 %v3592_v29, %v3591_v37  ;;  %v1263_v37 = vpop.f32.mrf.mxu1 }
 0x20b   :  { %8342 = vcosq.f32 %v3341_v41  ;;  %v3596_v42 = vor.u32 %v3595_v58, %v3594_v56  ;;  %v3613_v49 = vshll.u32 %v3573_v61, 8  ;;  %v10078_v47 = vadd.f32 %v1261_v22, %v10026_v20 }
 0x20c   :  { %8344 = vsinq.f32 %v3341_v41  ;;  %v3527_v46 = vsub.s32 0, %v10075_v25  ;;  %v3581_v2 = vshrl.u32 %v14328_v13, %v3580_v14  ;;  %vm3597_vm11 = vcmp.lt.s32.totalorder %v10046_v19, 1 }
 0x20d   :  { %vm3600_vm12 = vcmp.lt.s32.totalorder %v10046_v19, 4  ;;  %vm3599_vm13 = vcmp.lt.s32.totalorder %v10046_v19, 3  ;;  %v3605_v51 = vsel %vm3597_vm11, %v3584_v23, %v3587_v30  ;;  %v3547_v44 = vsub.s32 4, %v3523_v16 }
 0x20e   :  { %v3602_v52 = vsel %vm3600_vm12, %v3590_v40, 2102212464  ;;  %v3606_v31 = vsel %vm3600_vm12, %v3593_v3, 920167782  ;;  %v7673_v61 = vmin.u32 %v3527_v46, %v10075_v25  ;;  %vm3598_vm15 = vcmp.lt.s32.totalorder %v10046_v19, 2 }
 0x20f   :  { %v3607_v20 = vsel %vm3599_vm13, %v3590_v40, %v3606_v31  ;;  %v3609_v17 = vsel %vm3597_vm11, %v3587_v30, %v3590_v40  ;;  %v3610_v50 = vsel %vm3600_vm12, %v3596_v42, 1326507024  ;;  %v10097_v15 = vadd.f32 %v9446_v45, %v10078_v47 }
 0x210   :  { %v3608_v14 = vsel %vm3598_vm15, %v3605_v51, %v3607_v20  ;;  %v3347_v0 = vand.u32 3, %v3346_v63  ;;  %v3529_v6 = vclz %v7673_v61  ;;  %v3601_v11 = vsel %vm3597_vm11, %v3581_v2, %v3584_v23 }
 0x211   :  { %v3603_v10 = vsel %vm3599_vm13, %v3587_v30, %v3602_v52  ;;  %vm3463_vm0 = vcmp.lt.s32.totalorder %v9904_v24, 0  ;;  %v3611_v53 = vsel %vm3599_vm13, %v3593_v3, %v3610_v50  ;;  %vm10112_vm1 = vcmp.le.f32.partialorder %v3461_v39, 0.7853982 }
 0x212   :  { %v10106_v12 = vmul.u32.u64.low %v3613_v49, %v3608_v14  ;;  %v10107_v48 = vmul.u32.u64.high %v3613_v49, %v3608_v14, %v10106_v12  ;;  %v7674_v23 = vadd.s32 4294967294, %v3529_v6  ;;  %v3548_v21 = vsel %vm3463_vm0, %v3547_v44, %v3523_v16 }
 0x213   :  { %v3612_v30 = vsel %vm3598_vm15, %v3609_v17, %v3611_v53  ;;  %v3604_v29 = vsel %vm3598_vm15, %v3601_v11, %v3603_v10  ;;  %v3776_v40 = vand.u32 2139095040, %v10097_v15  ;;  %vm3345_vm2 = vweird.f32 %v9779_v32 }
 0x214   :  { %v10122_v22 = vmul.u32.u64.low %v3613_v49, %v3612_v30  ;;  %v10123_v41 = vmul.u32.u64.high %v3613_v49, %v3612_v30, %v10122_v22  ;;  %vm3348_vm3 = vcmp.lt.s32.totalorder %v3347_v0, 2  ;;  %vm3349_vm4 = vcmp.eq.s32.totalorder %v3347_v0, 0 }
 0x215   :  { %vm7675_vm5 = vcmp.lt.s32.totalorder %v7674_v23, 0  ;;  %v10128_v39 = vadd.f32 %v1263_v37, %v10030_v35  ;;  %v3517_v16 = vadd.s32 %v10018_v1, %v10015_v26  ;;  %v3623_v19 = vadd.s32 1, %v10107_v48 }
 0x216   :  { %v3532_v56 = vsel %vm7675_vm5, 0, %v7674_v23  ;;  %v3777_v58 = vshrl.u32 %v3776_v40, 23  ;;  %v3550_v42 = vsel %vm10112_vm1, 0, %v3548_v21  ;;  %v3620_v46 = vmul.u32 %v3613_v49, %v3604_v29 }
 0x217   :  { %v3533_v63 = vsub.s32 32, %v3532_v56  ;;  %v3537_v3 = vsub.s32 4294967266, %v3532_v56  ;;  %v3534_v52 = vshll.u32 %v10075_v25, %v3532_v56  ;;  %vm3622_vm7 = vc.u32 %v10123_v41, %v10106_v12 }
 0x218   :  { %v8343_v2 = vpop.eup %8342  ;;  %v3773_v35 = vand.u32 2147483647, %v10097_v15  ;;  %v7684_v51 = vadd.s32 4294967169, %v3777_v58  ;;  %v3624_v44 = vsel %vm3622_vm7, %v3623_v19, %v10107_v48  ;;  %vm3352_vm8 = vcmp.eq.s32.totalorder %v3347_v0, 2  ;;  %v1085_v48 = vpop.f32.mrf.mxu0 }
 0x219   :  { %v8345_v26 = vpop.eup %8344  ;;  %v3353_v1 = vxor.u32 2147483648, %v8343_v2  ;;  %v3535_v31 = vshrl.u32 %v3517_v16, %v3533_v63  ;;  %v3538_v61 = vadd.s32 127, %v3537_v3  ;;  %v3625_v14 = vadd.s32 %v3624_v44, %v3620_v46 }
 0x21a   :  { %v3350_v20 = vxor.u32 2147483648, %v8345_v26  ;;  %v3783_v17 = vadd.s32 1, %v7684_v51  ;;  %v10142_v25 = vadd.f32 %v9453_v54, %v10128_v39  ;;  %v3554_v10 = vadd.s32 3, %v3550_v42 }
 0x21b   :  { %v3354_v49 = vsel %vm3352_vm8, %v3353_v1, %v8345_v26  ;;  %v3536_v50 = vor.u32 %v3535_v31, %v3534_v52  ;;  %v3539_v6 = vshll.u32 %v3538_v61, 23  ;;  %v3626_v53 = vadd.s32 536870912, %v3625_v14 }
 0x21c   :  { %v3351_v11 = vsel %vm3349_vm4, %v8343_v2, %v3350_v20  ;;  %vm3784_vm9 = vcmp.gt.s32.totalorder %v3783_v17, 0  ;;  %v3780_v21 = vand.u32 8388607, %v3773_v35  ;;  %v10160_v58 = vadd.f32 %v1085_v48, %v9364_v28 }
 0x21d   :  { %v3355_v37 = vsel %vm3348_vm3, %v3351_v11, %v3354_v49  ;;  %v3540_v23 = vor.u32 4788187, %v3539_v6  ;;  %v3785_v30 = vsel %vm3784_vm9, %v3783_v17, 0  ;;  %v10150_v22 = vshrl.u32 %v3626_v53, 30 }
 0x21e   :  { %v3356_v29 = vsel %vm3345_vm2, nan, %v3355_v37  ;;  %v3787_v40 = vand.u32 31, %v3785_v30  ;;  %v3543_v19 = vcvt.s32.f32 %v3536_v50  ;;  %v10162_v3 = vand.u32 3, %v3554_v10 }
 0x21f   :  { %v7542_v16 = vsel %vm7533_vm6, %v9690_v55, %v3356_v29  ;;  %v3541_v56 = vand.u32 2147483647, %v3540_v23  ;;  %v3628_v0 = vshll.u32 %v10150_v22, 30  ;;  %v3781_v42 = vor.u32 8388608, %v3780_v21 }
 0x220   :  { %7591 = vst [vmem:[%s14171_s4 + $0x38] sm:$0xff] %v7542_v16  ;;  %v3788_v32 = vsub.s32 32, %v3787_v40  ;;  %v3877_v46 = vand.u32 2147483647, %v10142_v25  ;;  %v3621_v55 = vadd.s32 %v10106_v12, %v10123_v41  ;;  %v3880_v51 = vand.u32 2139095040, %v10142_v25 }
 0x221   :  { %v3544_v63 = vmul.f32 %v3543_v19, %v3541_v56  ;;  %v10167_v2 = vsub.s32 %v3625_v14, %v3628_v0  ;;  %v3790_v28 = vshll.u32 %v14328_v13, %v3787_v40  ;;  %v3793_v44 = vshll.u32 %v14329_v38, %v3787_v40 }
 0x222   :  { %v3791_v52 = vshrl.u32 %v14329_v38, %v3788_v32  ;;  %v3794_v1 = vshrl.u32 %v14330_v27, %v3788_v32  ;;  %v3797_v31 = vshrl.u32 %v14331_v34, %v3788_v32  ;;  %v3796_v20 = vshll.u32 %v14330_v27, %v3787_v40 }
 0x223   :  { %v3545_v26 = vxor.u32 2147483648, %v3544_v63  ;;  %v3631_v61 = vsub.s32 0, %v10167_v2  ;;  %v3800_v12 = vshrl.u32 %v14332_v8, %v3788_v32  ;;  %v3786_v14 = vshrl.u32 %v3785_v30, 5 }
 0x224   :  { %v3792_v17 = vor.u32 %v3791_v52, %v3790_v28  ;;  %v3799_v49 = vshll.u32 %v14331_v34, %v3787_v40  ;;  %v3795_v11 = vor.u32 %v3794_v1, %v3793_v44  ;;  %v3798_v10 = vor.u32 %v3797_v31, %v3796_v20 }
 0x225   :  { %v3546_v41 = vsel %vm3463_vm0, %v3545_v26, %v3544_v63  ;;  %v7677_v6 = vmin.u32 %v3631_v61, %v10167_v2  ;;  %v3802_v37 = vshll.u32 %v14332_v8, %v3787_v40  ;;  %v3803_v23 = vshrl.u32 %v14333_v7, %v3788_v32 }
 0x226   :  { %v3549_v50 = vsel %vm10112_vm1, %v9904_v24, %v3546_v41  ;;  %v3801_v53 = vor.u32 %v3800_v12, %v3799_v49  ;;  %v3821_v21 = vshll.u32 %v3781_v42, 8  ;;  %v3881_v30 = vshrl.u32 %v3880_v51, 23  ;;  %v1087_v12 = vpop.f32.mrf.mxu0 }
 0x227   :  { %8346 = vcosq.f32 %v3549_v50  ;;  %v3633_v48 = vclz %v7677_v6  ;;  %v3651_v29 = vsub.s32 4, %v10150_v22  ;;  %v3789_v16 = vshrl.u32 %v14328_v13, %v3788_v32 }
 0x228   :  { %8348 = vsinq.f32 %v3549_v50  ;;  %v3804_v4 = vor.u32 %v3803_v23, %v3802_v37  ;;  %vm3805_vm10 = vcmp.lt.s32.totalorder %v3786_v14, 1  ;;  %vm3807_vm11 = vcmp.lt.s32.totalorder %v3786_v14, 3 }
 0x229   :  { %v7678_v56 = vadd.s32 4294967294, %v3633_v48  ;;  %vm3808_vm12 = vcmp.lt.s32.totalorder %v3786_v14, 4  ;;  %v3813_v19 = vsel %vm3805_vm10, %v3792_v17, %v3795_v11  ;;  %v3817_v52 = vsel %vm3805_vm10, %v3795_v11, %v3798_v10 }
 0x22a   :  { %v3810_v0 = vsel %vm3808_vm12, %v3798_v10, 2102212464  ;;  %v3814_v63 = vsel %vm3808_vm12, %v3801_v53, 920167782  ;;  %v3818_v40 = vsel %vm3808_vm12, %v3804_v4, 1326507024  ;;  %v3809_v28 = vsel %vm3805_vm10, %v3789_v16, %v3792_v17 }
 0x22b   :  { %vm7679_vm13 = vcmp.lt.s32.totalorder %v7678_v56, 0  ;;  %vm3806_vm15 = vcmp.lt.s32.totalorder %v3786_v14, 2  ;;  %v3815_v26 = vsel %vm3807_vm11, %v3798_v10, %v3814_v63  ;;  %v3819_v42 = vsel %vm3807_vm11, %v3801_v53, %v3818_v40 }
 0x22c   :  { %v3636_v51 = vsel %vm7679_vm13, 0, %v7678_v56  ;;  %v3816_v32 = vsel %vm3806_vm15, %v3813_v19, %v3815_v26  ;;  %v3820_v1 = vsel %vm3806_vm15, %v3817_v52, %v3819_v42  ;;  %vm10195_vm0 = vcmp.le.f32.partialorder %v3565_v33, 0.7853982 }
 0x22d   :  { %v3637_v61 = vsub.s32 32, %v3636_v51  ;;  %v3641_v44 = vsub.s32 4294967266, %v3636_v51  ;;  %v3811_v20 = vsel %vm3807_vm11, %v3795_v11, %v3810_v0  ;;  %v7688_v41 = vadd.s32 4294967169, %v3881_v30 }
 0x22e   :  { %v10200_v49 = vmul.u32.u64.low %v3821_v21, %v3820_v1  ;;  %v10201_v50 = vmul.u32.u64.high %v3821_v21, %v3820_v1, %v10200_v49  ;;  %v10203_v17 = vmul.u32.u64.low %v3821_v21, %v3816_v32  ;;  %v10204_v6 = vmul.u32.u64.high %v3821_v21, %v3816_v32, %v10203_v17 }
 0x22f   :  { %v3638_v10 = vshll.u32 %v10167_v2, %v3636_v51  ;;  %v3639_v53 = vshrl.u32 %v3621_v55, %v3637_v61  ;;  %v3642_v33 = vadd.s32 127, %v3641_v44  ;;  %v3887_v37 = vadd.s32 1, %v7688_v41 }
 0x230   :  { %vm3553_vm1 = vweird.f32 %v9904_v24  ;;  %vm3556_vm2 = vcmp.lt.s32.totalorder %v10162_v3, 2  ;;  %vm3567_vm3 = vcmp.lt.s32.totalorder %v9956_v9, 0  ;;  %v3812_v11 = vsel %vm3806_vm15, %v3809_v28, %v3811_v20 }
 0x231   :  { %v10213_v23 = vadd.f32 %v1087_v12, %v9369_v59  ;;  %vm3557_vm4 = vcmp.eq.s32.totalorder %v10162_v3, 0  ;;  %v3640_v48 = vor.u32 %v3639_v53, %v3638_v10  ;;  %v3643_v30 = vshll.u32 %v3642_v33, 23 }
 0x232   :  { %vm3888_vm5 = vcmp.gt.s32.totalorder %v3887_v37, 0  ;;  %vm3830_vm7 = vc.u32 %v10201_v50, %v10203_v17  ;;  %v3831_v55 = vadd.s32 1, %v10204_v6  ;;  %v3884_v2 = vand.u32 8388607, %v3877_v46 }
 0x233   :  { %v3889_v16 = vsel %vm3888_vm5, %v3887_v37, 0  ;;  %v3644_v14 = vor.u32 4788187, %v3643_v30  ;;  %v3652_v59 = vsel %vm3567_vm3, %v3651_v29, %v10150_v22  ;;  %v3828_v56 = vmul.u32 %v3821_v21, %v3812_v11 }
 0x234   :  { %v8347_v4 = vpop.eup %8346  ;;  %v3891_v19 = vand.u32 31, %v3889_v16  ;;  %vm3560_vm8 = vcmp.eq.s32.totalorder %v10162_v3, 2  ;;  %v3647_v52 = vcvt.s32.f32 %v3640_v48  ;;  %v3832_v40 = vsel %vm3830_vm7, %v3831_v55, %v10204_v6 }
 0x235   :  { %v8349_v0 = vpop.eup %8348  ;;  %v3561_v63 = vxor.u32 2147483648, %v8347_v4  ;;  %v3645_v42 = vand.u32 2147483647, %v3644_v14  ;;  %v3833_v51 = vadd.s32 %v3832_v40, %v3828_v56  ;;  %v3654_v1 = vsel %vm10195_vm0, 0, %v3652_v59 }
 0x236   :  { %v3558_v26 = vxor.u32 2147483648, %v8349_v0  ;;  %v3892_v28 = vsub.s32 32, %v3891_v19  ;;  %v3885_v61 = vor.u32 8388608, %v3884_v2  ;;  %v10228_v44 = vshrl.u32 %v3889_v16, 5 }
 0x237   :  { %v3562_v32 = vsel %vm3560_vm8, %v3561_v63, %v8349_v0  ;;  %v3648_v21 = vmul.f32 %v3647_v52, %v3645_v42  ;;  %v3834_v29 = vadd.s32 536870912, %v3833_v51  ;;  %v3894_v20 = vshll.u32 %v14328_v13, %v3891_v19 }
 0x238   :  { %v3559_v22 = vsel %vm3557_vm4, %v8347_v4, %v3558_v26  ;;  %v3895_v41 = vshrl.u32 %v14329_v38, %v3892_v28  ;;  %v3898_v49 = vshrl.u32 %v14330_v27, %v3892_v28  ;;  %v3901_v6 = vshrl.u32 %v14331_v34, %v3892_v28  ;;  %v1268_v4 = vpop.f32.mrf.mxu1 }
 0x239   :  { %v3563_v12 = vsel %vm3556_vm2, %v3559_v22, %v3562_v32  ;;  %v3649_v53 = vxor.u32 2147483648, %v3648_v21  ;;  %v3835_v33 = vshrl.u32 %v3834_v29, 30  ;;  %v3897_v37 = vshll.u32 %v14329_v38, %v3891_v19 }
 0x23a   :  { %v3564_v10 = vsel %vm3553_vm1, nan, %v3563_v12  ;;  %v3896_v48 = vor.u32 %v3895_v41, %v3894_v20  ;;  %v3900_v3 = vshll.u32 %v14330_v27, %v3891_v19  ;;  %v3903_v30 = vshll.u32 %v14331_v34, %v3891_v19 }
 0x23b   :  { %v7544_v11 = vsel %vm7532_vm14, %v9874_v60, %v3564_v10  ;;  %v3650_v24 = vsel %vm3567_vm3, %v3649_v53, %v3648_v21  ;;  %v3836_v55 = vshll.u32 %v3835_v33, 30  ;;  %v3899_v2 = vor.u32 %v3898_v49, %v3897_v37 }
 0x23c   :  { %7593 = vst [vmem:[%s14171_s4 + $0x48] sm:$0xff] %v7544_v11  ;;  %v3904_v16 = vshrl.u32 %v14332_v8, %v3892_v28  ;;  %v3653_v60 = vsel %vm10195_vm0, %v9956_v9, %v3650_v24  ;;  %v3902_v14 = vor.u32 %v3901_v6, %v3900_v3  ;;  %v3906_v59 = vshll.u32 %v14332_v8, %v3891_v19  ;;  %v1270_v11 = vpop.f32.mrf.mxu1 }
 0x23d   :  { %v3907_v56 = vshrl.u32 %v14333_v7, %v3892_v28  ;;  %8350 = vcosq.f32 %v3653_v60  ;;  %v3658_v0 = vadd.s32 3, %v3654_v1  ;;  %v10257_v63 = vsub.s32 %v3833_v51, %v3836_v55 }
 0x23e   :  { %v3905_v52 = vor.u32 %v3904_v16, %v3903_v30  ;;  %8352 = vsinq.f32 %v3653_v60  ;;  %v3925_v26 = vshll.u32 %v3885_v61, 8  ;;  %v10260_v42 = vadd.f32 %v1268_v4, %v10160_v58 }
 0x23f   :  { %v3908_v40 = vor.u32 %v3907_v56, %v3906_v59  ;;  %v3839_v32 = vsub.s32 0, %v10257_v63  ;;  %v3893_v31 = vshrl.u32 %v14328_v13, %v3892_v28  ;;  %vm3909_vm9 = vcmp.lt.s32.totalorder %v10228_v44, 1 }
 0x240   :  { %vm3912_vm10 = vcmp.lt.s32.totalorder %v10228_v44, 4  ;;  %vm3911_vm11 = vcmp.lt.s32.totalorder %v10228_v44, 3  ;;  %v3917_v51 = vsel %vm3909_vm9, %v3896_v48, %v3899_v2  ;;  %v3859_v22 = vsub.s32 4, %v3835_v33 }
 0x241   :  { %v3914_v19 = vsel %vm3912_vm10, %v3902_v14, 2102212464  ;;  %v3918_v1 = vsel %vm3912_vm10, %v3905_v52, 920167782  ;;  %v7685_v61 = vmin.u32 %v3839_v32, %v10257_v63  ;;  %vm3910_vm12 = vcmp.lt.s32.totalorder %v10228_v44, 2 }
 0x242   :  { %v3919_v58 = vsel %vm3911_vm11, %v3902_v14, %v3918_v1  ;;  %v3921_v21 = vsel %vm3909_vm9, %v3899_v2, %v3902_v14  ;;  %v3922_v29 = vsel %vm3912_vm10, %v3908_v40, 1326507024  ;;  %v10279_v20 = vadd.f32 %v9446_v45, %v10260_v42 }
 0x243   :  { %v3920_v28 = vsel %vm3910_vm12, %v3917_v51, %v3919_v58  ;;  %v3659_v12 = vand.u32 3, %v3658_v0  ;;  %v3841_v41 = vclz %v7685_v61  ;;  %v3913_v49 = vsel %vm3909_vm9, %v3893_v31, %v3896_v48 }
 0x244   :  { %v3915_v6 = vsel %vm3911_vm11, %v3899_v2, %v3914_v19  ;;  %vm3775_vm13 = vcmp.lt.s32.totalorder %v10097_v15, 0  ;;  %v3923_v10 = vsel %vm3911_vm11, %v3905_v52, %v3922_v29  ;;  %vm10294_vm15 = vcmp.le.f32.partialorder %v3773_v35, 0.7853982 }
 0x245   :  { %v10288_v53 = vmul.u32.u64.low %v3925_v26, %v3920_v28  ;;  %v10289_v37 = vmul.u32.u64.high %v3925_v26, %v3920_v28, %v10288_v53  ;;  %v7686_v48 = vadd.s32 4294967294, %v3841_v41  ;;  %v3860_v30 = vsel %vm3775_vm13, %v3859_v22, %v3835_v33 }
 0x246   :  { %v3924_v24 = vsel %vm3910_vm12, %v3921_v21, %v3923_v10  ;;  %v3916_v55 = vsel %vm3910_vm12, %v3913_v49, %v3915_v6  ;;  %v4088_v4 = vand.u32 2139095040, %v10279_v20  ;;  %vm3657_vm0 = vweird.f32 %v9956_v9 }
 0x247   :  { %v10304_v2 = vmul.u32.u64.low %v3925_v26, %v3924_v24  ;;  %v10305_v16 = vmul.u32.u64.high %v3925_v26, %v3924_v24, %v10304_v2  ;;  %vm3660_vm1 = vcmp.lt.s32.totalorder %v3659_v12, 2  ;;  %vm3661_vm2 = vcmp.eq.s32.totalorder %v3659_v12, 0 }
 0x248   :  { %vm7687_vm3 = vcmp.lt.s32.totalorder %v7686_v48, 0  ;;  %v10310_v35 = vadd.f32 %v1270_v11, %v10213_v23  ;;  %v3829_v33 = vadd.s32 %v10203_v17, %v10201_v50  ;;  %v3935_v44 = vadd.s32 1, %v10289_v37 }
 0x249   :  { %v3844_v60 = vsel %vm7687_vm3, 0, %v7686_v48  ;;  %v4089_v14 = vshrl.u32 %v4088_v4, 23  ;;  %v3862_v0 = vsel %vm10294_vm15, 0, %v3860_v30  ;;  %v3932_v52 = vmul.u32 %v3925_v26, %v3916_v55 }
 0x24a   :  { %v3845_v59 = vsub.s32 32, %v3844_v60  ;;  %v3849_v56 = vsub.s32 4294967266, %v3844_v60  ;;  %v8351_v40 = vpop.eup %8350  ;;  %v3846_v32 = vshll.u32 %v10257_v63, %v3844_v60  ;;  %vm3934_vm4 = vc.u32 %v10305_v16, %v10288_v53 }
 0x24b   :  { %v4085_v23 = vand.u32 2147483647, %v10279_v20  ;;  %v7696_v31 = vadd.s32 4294967169, %v4089_v14  ;;  %v8353_v50 = vpop.eup %8352  ;;  %v3665_v17 = vxor.u32 2147483648, %v8351_v40  ;;  %v3936_v1 = vsel %vm3934_vm4, %v3935_v44, %v10289_v37 }
 0x24c   :  { %v3847_v19 = vshrl.u32 %v3829_v33, %v3845_v59  ;;  %v3850_v51 = vadd.s32 127, %v3849_v56  ;;  %v3662_v61 = vxor.u32 2147483648, %v8353_v50  ;;  %vm3664_vm5 = vcmp.eq.s32.totalorder %v3659_v12, 2 }
 0x24d   :  { %v3937_v22 = vadd.s32 %v3936_v1, %v3932_v52  ;;  %v4095_v58 = vadd.s32 1, %v7696_v31  ;;  %v3666_v26 = vsel %vm3664_vm5, %v3665_v17, %v8353_v50  ;;  %v10324_v63 = vadd.f32 %v9453_v54, %v10310_v35 }
 0x24e   :  { %v3848_v28 = vor.u32 %v3847_v19, %v3846_v32  ;;  %v3851_v21 = vshll.u32 %v3850_v51, 23  ;;  %v3663_v29 = vsel %vm3661_vm2, %v8351_v40, %v3662_v61  ;;  %v3866_v41 = vadd.s32 3, %v3862_v0 }
 0x24f   :  { %v3938_v49 = vadd.s32 536870912, %v3937_v22  ;;  %vm4096_vm7 = vcmp.gt.s32.totalorder %v4095_v58, 0  ;;  %v3667_v6 = vsel %vm3660_vm1, %v3663_v29, %v3666_v26  ;;  %v4092_v37 = vand.u32 8388607, %v4085_v23 }
 0x250   :  { %v3852_v10 = vor.u32 4788187, %v3851_v21  ;;  %v4097_v11 = vsel %vm4096_vm7, %v4095_v58, 0  ;;  %v3668_v48 = vsel %vm3657_vm0, nan, %v3667_v6  ;;  %v3855_v4 = vcvt.s32.f32 %v3848_v28 }
 0x251   :  { %v10332_v30 = vshrl.u32 %v3938_v49, 30  ;;  %v4099_v24 = vand.u32 31, %v4097_v11  ;;  %v7545_v55 = vsel %vm7533_vm6, %v9935_v43, %v3668_v48  ;;  %v10341_v44 = vand.u32 3, %v3866_v41 }
 0x252   :  { %v3853_v2 = vand.u32 2147483647, %v3852_v10  ;;  %7594 = vst [vmem:[%s14171_s4 + $0x50] sm:$0xff] %v7545_v55  ;;  %v4093_v9 = vor.u32 8388608, %v4092_v37  ;;  %v4189_v14 = vand.u32 2147483647, %v10324_v63  ;;  %v3933_v59 = vadd.s32 %v10288_v53, %v10305_v16  ;;  %v1092_v55 = vpop.f32.mrf.mxu0 }
 0x253   :  { %v3940_v12 = vshll.u32 %v10332_v30, 30  ;;  %v4100_v33 = vsub.s32 32, %v4099_v24  ;;  %v4192_v0 = vand.u32 2139095040, %v10324_v63  ;;  %v4102_v40 = vshll.u32 %v14328_v13, %v4099_v24 }
 0x254   :  { %v3856_v60 = vmul.f32 %v3855_v4, %v3853_v2  ;;  %v4105_v17 = vshll.u32 %v14329_v38, %v4099_v24  ;;  %v4108_v19 = vshll.u32 %v14330_v27, %v4099_v24  ;;  %v4098_v51 = vshrl.u32 %v4097_v11, 5 }
 0x255   :  { %v10346_v56 = vsub.s32 %v3937_v22, %v3940_v12  ;;  %v4103_v43 = vshrl.u32 %v14329_v38, %v4100_v33  ;;  %v4106_v32 = vshrl.u32 %v14330_v27, %v4100_v33  ;;  %v4109_v31 = vshrl.u32 %v14331_v34, %v4100_v33 }
 0x256   :  { %v3857_v52 = vxor.u32 2147483648, %v3856_v60  ;;  %v4112_v53 = vshrl.u32 %v14332_v8, %v4100_v33  ;;  %v4111_v61 = vshll.u32 %v14331_v34, %v4099_v24  ;;  %v4114_v29 = vshll.u32 %v14332_v8, %v4099_v24 }
 0x257   :  { %v3943_v50 = vsub.s32 0, %v10346_v56  ;;  %v4104_v1 = vor.u32 %v4103_v43, %v4102_v40  ;;  %v4107_v26 = vor.u32 %v4106_v32, %v4105_v17  ;;  %v4110_v28 = vor.u32 %v4109_v31, %v4108_v19  ;;  %v1094_v19 = vpop.f32.mrf.mxu0 }
 0x258   :  { %v3858_v16 = vsel %vm3775_vm13, %v3857_v52, %v3856_v60  ;;  %v4113_v21 = vor.u32 %v4112_v53, %v4111_v61  ;;  %v4115_v41 = vshrl.u32 %v14333_v7, %v4100_v33  ;;  %v10366_v6 = vshll.u32 %v4093_v9, 8 }
 0x259   :  { %v3861_v22 = vsel %vm10294_vm15, %v10097_v15, %v3858_v16  ;;  %v7689_v58 = vmin.u32 %v3943_v50, %v10346_v56  ;;  %v4193_v10 = vshrl.u32 %v4192_v0, 23  ;;  %v3963_v37 = vsub.s32 4, %v10332_v30 }
 0x25a   :  { %8354 = vcosq.f32 %v3861_v22  ;;  %v4101_v3 = vshrl.u32 %v14328_v13, %v4100_v33  ;;  %v4116_v11 = vor.u32 %v4115_v41, %v4114_v29  ;;  %vm4117_vm8 = vcmp.lt.s32.totalorder %v4098_v51, 1 }
 0x25b   :  { %8356 = vsinq.f32 %v3861_v22  ;;  %v3945_v49 = vclz %v7689_v58  ;;  %vm4119_vm9 = vcmp.lt.s32.totalorder %v4098_v51, 3  ;;  %vm4120_vm10 = vcmp.lt.s32.totalorder %v4098_v51, 4 }
 0x25c   :  { %v4125_v2 = vsel %vm4117_vm8, %v4104_v1, %v4107_v26  ;;  %vm3879_vm11 = vcmp.lt.s32.totalorder %v10142_v25, 0  ;;  %v4122_v24 = vsel %vm4120_vm10, %v4110_v28, 2102212464  ;;  %v4126_v4 = vsel %vm4120_vm10, %v4113_v21, 920167782 }
 0x25d   :  { %v7690_v48 = vadd.s32 4294967294, %v3945_v49  ;;  %v4129_v12 = vsel %vm4117_vm8, %v4107_v26, %v4110_v28  ;;  %v4130_v60 = vsel %vm4120_vm10, %v4116_v11, 1326507024  ;;  %vm4118_vm13 = vcmp.lt.s32.totalorder %v4098_v51, 2 }
 0x25e   :  { %v4127_v9 = vsel %vm4119_vm9, %v4110_v28, %v4126_v4  ;;  %v4131_v33 = vsel %vm4119_vm9, %v4113_v21, %v4130_v60  ;;  %v4121_v0 = vsel %vm4117_vm8, %v4101_v3, %v4104_v1  ;;  %vm10380_vm15 = vcmp.le.f32.partialorder %v3877_v46, 0.7853982 }
 0x25f   :  { %vm7691_vm12 = vcmp.lt.s32.totalorder %v7690_v48, 0  ;;  %v4128_v52 = vsel %vm4118_vm13, %v4125_v2, %v4127_v9  ;;  %v4132_v40 = vsel %vm4118_vm13, %v4129_v12, %v4131_v33  ;;  %v4123_v17 = vsel %vm4119_vm9, %v4107_v26, %v4122_v24 }
 0x260   :  { %v3948_v43 = vsel %vm7691_vm12, 0, %v7690_v48  ;;  %v7700_v53 = vadd.s32 4294967169, %v4193_v10  ;;  %v10386_v16 = vmul.u32.u64.low %v10366_v6, %v4132_v40  ;;  %v10387_v61 = vmul.u32.u64.high %v10366_v6, %v4132_v40, %v10386_v16 }
 0x261   :  { %v3949_v31 = vsub.s32 32, %v3948_v43  ;;  %v3953_v50 = vsub.s32 4294967266, %v3948_v43  ;;  %v10390_v1 = vmul.u32.u64.low %v10366_v6, %v4128_v52  ;;  %v10391_v22 = vmul.u32.u64.high %v10366_v6, %v4128_v52, %v10390_v1 }
 0x262   :  { %v3950_v46 = vshll.u32 %v10346_v56, %v3948_v43  ;;  %v4199_v21 = vadd.s32 1, %v7700_v53  ;;  %vm3865_vm0 = vweird.f32 %v10097_v15  ;;  %vm3868_vm1 = vcmp.lt.s32.totalorder %v10341_v44, 2 }
 0x263   :  { %v3951_v58 = vshrl.u32 %v3933_v59, %v3949_v31  ;;  %v3954_v28 = vadd.s32 127, %v3953_v50  ;;  %v10398_v26 = vadd.f32 %v1092_v55, %v9374_v18  ;;  %v4124_v29 = vsel %vm4118_vm13, %v4121_v0, %v4123_v17 }
 0x264   :  { %v10402_v41 = vadd.f32 %v1094_v19, %v9378_v36  ;;  %vm3869_vm2 = vcmp.eq.s32.totalorder %v10341_v44, 0  ;;  %vm4200_vm3 = vcmp.gt.s32.totalorder %v4199_v21, 0  ;;  %vm4142_vm4 = vc.u32 %v10387_v61, %v10390_v1 }
 0x265   :  { %v3952_v49 = vor.u32 %v3951_v58, %v3950_v46  ;;  %v3955_v10 = vshll.u32 %v3954_v28, 23  ;;  %v4143_v59 = vadd.s32 1, %v10391_v22  ;;  %v4196_v56 = vand.u32 8388607, %v4189_v14 }
 0x266   :  { %v4201_v18 = vsel %vm4200_vm3, %v4199_v21, 0  ;;  %v3964_v36 = vsel %vm3879_vm11, %v3963_v37, %v10332_v30  ;;  %v4140_v11 = vmul.u32 %v10366_v6, %v4124_v29  ;;  %vm3872_vm5 = vcmp.eq.s32.totalorder %v10341_v44, 2 }
 0x267   :  { %v8355_v3 = vpop.eup %8354  ;;  %v3956_v51 = vor.u32 4788187, %v3955_v10  ;;  %v4203_v48 = vand.u32 31, %v4201_v18  ;;  %v3959_v24 = vcvt.s32.f32 %v3952_v49  ;;  %v4144_v4 = vsel %vm4142_vm4, %v4143_v59, %v10391_v22 }
 0x268   :  { %v8357_v55 = vpop.eup %8356  ;;  %v3873_v2 = vxor.u32 2147483648, %v8355_v3  ;;  %v4145_v9 = vadd.s32 %v4144_v4, %v4140_v11  ;;  %v3966_v0 = vsel %vm10380_vm15, 0, %v3964_v36  ;;  %v4197_v52 = vor.u32 8388608, %v4196_v56  ;;  %v1275_v56 = vpop.f32.mrf.mxu1 }
 0x269   :  { %v3870_v12 = vxor.u32 2147483648, %v8357_v55  ;;  %v3957_v60 = vand.u32 2147483647, %v3956_v51  ;;  %v4204_v33 = vsub.s32 32, %v4203_v48  ;;  %v10418_v30 = vshrl.u32 %v4201_v18, 5 }
 0x26a   :  { %v3874_v43 = vsel %vm3872_vm5, %v3873_v2, %v8357_v55  ;;  %v4146_v40 = vadd.s32 536870912, %v4145_v9  ;;  %v4206_v31 = vshll.u32 %v14328_v13, %v4203_v48  ;;  %v4209_v58 = vshll.u32 %v14329_v38, %v4203_v48 }
 0x26b   :  { %v3871_v6 = vsel %vm3869_vm2, %v8355_v3, %v3870_v12  ;;  %v3960_v37 = vmul.f32 %v3959_v24, %v3957_v60  ;;  %v4207_v17 = vshrl.u32 %v14329_v38, %v4204_v33  ;;  %v4210_v19 = vshrl.u32 %v14330_v27, %v4204_v33 }
 0x26c   :  { %v3875_v50 = vsel %vm3868_vm1, %v3871_v6, %v3874_v43  ;;  %v4213_v53 = vshrl.u32 %v14331_v34, %v4204_v33  ;;  %v4147_v46 = vshrl.u32 %v4146_v40, 30  ;;  %v4212_v44 = vshll.u32 %v14330_v27, %v4203_v48 }
 0x26d   :  { %v3876_v16 = vsel %vm3865_vm0, nan, %v3875_v50  ;;  %v3961_v22 = vxor.u32 2147483648, %v3960_v37  ;;  %v4208_v21 = vor.u32 %v4207_v17, %v4206_v31  ;;  %v4215_v29 = vshll.u32 %v14331_v34, %v4203_v48 }
 0x26e   :  { %v7547_v28 = vsel %vm7532_vm14, %v10078_v47, %v3876_v16  ;;  %v4148_v49 = vshll.u32 %v4147_v46, 30  ;;  %v4211_v10 = vor.u32 %v4210_v19, %v4209_v58  ;;  %v4216_v59 = vshrl.u32 %v14332_v8, %v4204_v33 }
 0x26f   :  { %7596 = vst [vmem:[%s14171_s4 + $0x60] sm:$0xff] %v7547_v28  ;;  %v3962_v15 = vsel %vm3879_vm11, %v3961_v22, %v3960_v37  ;;  %v4214_v18 = vor.u32 %v4213_v53, %v4212_v44  ;;  %v4218_v3 = vshll.u32 %v14332_v8, %v4203_v48  ;;  %v4219_v51 = vshrl.u32 %v14333_v7, %v4204_v33  ;;  %v1277_v22 = vpop.f32.mrf.mxu1 }
 0x270   :  { %v3965_v47 = vsel %vm10380_vm15, %v10142_v25, %v3962_v15  ;;  %v3970_v36 = vadd.s32 3, %v3966_v0  ;;  %v10447_v11 = vsub.s32 %v4145_v9, %v4148_v49  ;;  %v4217_v55 = vor.u32 %v4216_v59, %v4215_v29 }
 0x271   :  { %8358 = vcosq.f32 %v3965_v47  ;;  %v4220_v2 = vor.u32 %v4219_v51, %v4218_v3  ;;  %v4237_v24 = vshll.u32 %v4197_v52, 8  ;;  %v10450_v4 = vadd.f32 %v1275_v56, %v10398_v26 }
 0x272   :  { %8360 = vsinq.f32 %v3965_v47  ;;  %v4151_v12 = vsub.s32 0, %v10447_v11  ;;  %v4205_v32 = vshrl.u32 %v14328_v13, %v4204_v33  ;;  %vm4221_vm7 = vcmp.lt.s32.totalorder %v10418_v30, 1 }
 0x273   :  { %vm4224_vm8 = vcmp.lt.s32.totalorder %v10418_v30, 4  ;;  %vm4223_vm9 = vcmp.lt.s32.totalorder %v10418_v30, 3  ;;  %v4229_v60 = vsel %vm4221_vm7, %v4208_v21, %v4211_v10  ;;  %v4171_v0 = vsub.s32 4, %v4147_v46 }
 0x274   :  { %v4226_v48 = vsel %vm4224_vm8, %v4214_v18, 2102212464  ;;  %v4230_v9 = vsel %vm4224_vm8, %v4217_v55, 920167782  ;;  %v7697_v43 = vmin.u32 %v4151_v12, %v10447_v11  ;;  %vm4222_vm10 = vcmp.lt.s32.totalorder %v10418_v30, 2 }
 0x275   :  { %v4231_v26 = vsel %vm4223_vm9, %v4214_v18, %v4230_v9  ;;  %v4233_v52 = vsel %vm4221_vm7, %v4211_v10, %v4214_v18  ;;  %v4234_v6 = vsel %vm4224_vm8, %v4220_v2, 1326507024  ;;  %v10469_v37 = vadd.f32 %v9446_v45, %v10450_v4 }
 0x276   :  { %v4232_v33 = vsel %vm4222_vm10, %v4229_v60, %v4231_v26  ;;  %v3971_v40 = vand.u32 3, %v3970_v36  ;;  %v4153_v31 = vclz %v7697_v43  ;;  %v4225_v50 = vsel %vm4221_vm7, %v4205_v32, %v4208_v21 }
 0x277   :  { %v4227_v17 = vsel %vm4223_vm9, %v4211_v10, %v4226_v48  ;;  %vm4087_vm11 = vcmp.lt.s32.totalorder %v10279_v20, 0  ;;  %v4235_v19 = vsel %vm4223_vm9, %v4217_v55, %v4234_v6  ;;  %vm10484_vm12 = vcmp.le.f32.partialorder %v4085_v23, 0.7853982 }
 0x278   :  { %v10478_v53 = vmul.u32.u64.low %v4237_v24, %v4232_v33  ;;  %v10479_v16 = vmul.u32.u64.high %v4237_v24, %v4232_v33, %v10478_v53  ;;  %v7698_v28 = vadd.s32 4294967294, %v4153_v31  ;;  %v4172_v21 = vsel %vm4087_vm11, %v4171_v0, %v4147_v46 }
 0x279   :  { %v4236_v44 = vsel %vm4222_vm10, %v4233_v52, %v4235_v19  ;;  %v4228_v29 = vsel %vm4222_vm10, %v4225_v50, %v4227_v17  ;;  %v4400_v10 = vand.u32 2139095040, %v10469_v37  ;;  %vm3969_vm13 = vweird.f32 %v10142_v25 }
 0x27a   :  { %v10494_v15 = vmul.u32.u64.low %v4237_v24, %v4236_v44  ;;  %v10495_v49 = vmul.u32.u64.high %v4237_v24, %v4236_v44, %v10494_v15  ;;  %vm3972_vm15 = vcmp.lt.s32.totalorder %v3971_v40, 2  ;;  %vm3973_vm0 = vcmp.eq.s32.totalorder %v3971_v40, 0 }
 0x27b   :  { %vm7699_vm1 = vcmp.lt.s32.totalorder %v7698_v28, 0  ;;  %v10500_v23 = vadd.f32 %v1277_v22, %v10402_v41  ;;  %v4141_v46 = vadd.s32 %v10390_v1, %v10387_v61  ;;  %v4247_v30 = vadd.s32 1, %v10479_v16 }
 0x27c   :  { %v4156_v59 = vsel %vm7699_vm1, 0, %v7698_v28  ;;  %v4401_v56 = vshrl.u32 %v4400_v10, 23  ;;  %v4174_v3 = vsel %vm10484_vm12, 0, %v4172_v21  ;;  %v4244_v51 = vmul.u32 %v4237_v24, %v4228_v29 }
 0x27d   :  { %v4157_v47 = vsub.s32 32, %v4156_v59  ;;  %v4161_v18 = vsub.s32 4294967266, %v4156_v59  ;;  %v4158_v55 = vshll.u32 %v10447_v11, %v4156_v59  ;;  %vm4246_vm2 = vc.u32 %v10495_v49, %v10478_v53 }
 0x27e   :  { %v8359_v36 = vpop.eup %8358  ;;  %v4397_v41 = vand.u32 2147483647, %v10469_v37  ;;  %v7708_v2 = vadd.s32 4294967169, %v4401_v56  ;;  %v4248_v48 = vsel %vm4246_vm2, %v4247_v30, %v10479_v16  ;;  %vm3976_vm3 = vcmp.eq.s32.totalorder %v3971_v40, 2 }
 0x27f   :  { %v8361_v61 = vpop.eup %8360  ;;  %v3977_v1 = vxor.u32 2147483648, %v8359_v36  ;;  %v4159_v12 = vshrl.u32 %v4141_v46, %v4157_v47  ;;  %v4162_v32 = vadd.s32 127, %v4161_v18  ;;  %v4249_v9 = vadd.s32 %v4248_v48, %v4244_v51 }
 0x280   :  { %v3974_v60 = vxor.u32 2147483648, %v8361_v61  ;;  %v4407_v43 = vadd.s32 1, %v7708_v2  ;;  %v10514_v11 = vadd.f32 %v9453_v54, %v10500_v23  ;;  %v4178_v52 = vadd.s32 3, %v4174_v3 }
 0x281   :  { %v3978_v24 = vsel %vm3976_vm3, %v3977_v1, %v8361_v61  ;;  %v4160_v0 = vor.u32 %v4159_v12, %v4158_v55  ;;  %v4163_v26 = vshll.u32 %v4162_v32, 23  ;;  %v4250_v6 = vadd.s32 536870912, %v4249_v9 }
 0x282   :  { %v3975_v33 = vsel %vm3973_vm0, %v8359_v36, %v3974_v60  ;;  %vm4408_vm4 = vcmp.gt.s32.totalorder %v4407_v43, 0  ;;  %v4404_v17 = vand.u32 8388607, %v4397_v41  ;;  %v10531_v46 = vand.u32 3, %v4178_v52 }
 0x283   :  { %v3979_v31 = vsel %vm3972_vm15, %v3975_v33, %v3978_v24  ;;  %v4164_v50 = vor.u32 4788187, %v4163_v26  ;;  %v4409_v19 = vsel %vm4408_vm4, %v4407_v43, 0  ;;  %v10522_v22 = vshrl.u32 %v4250_v6, 30 }
 0x284   :  { %v3980_v16 = vsel %vm3969_vm13, nan, %v3979_v31  ;;  %v4411_v28 = vand.u32 31, %v4409_v19  ;;  %v4167_v29 = vcvt.s32.f32 %v4160_v0  ;;  %v4405_v25 = vor.u32 8388608, %v4404_v17 }
 0x285   :  { %v7548_v21 = vsel %vm7533_vm6, %v10128_v39, %v3980_v16  ;;  %v4165_v44 = vand.u32 2147483647, %v4164_v50  ;;  %v4252_v40 = vshll.u32 %v10522_v22, 30  ;;  %v4501_v59 = vand.u32 2147483647, %v10514_v11 }
 0x286   :  { %7597 = vst [vmem:[%s14171_s4 + $0x68] sm:$0xff] %v7548_v21  ;;  %v4412_v15 = vsub.s32 32, %v4411_v28  ;;  %v4245_v30 = vadd.s32 %v10478_v53, %v10495_v49  ;;  %v4504_v47 = vand.u32 2139095040, %v10514_v11  ;;  %v4414_v3 = vshll.u32 %v14328_v13, %v4411_v28 }
 0x287   :  { %v4168_v10 = vmul.f32 %v4167_v29, %v4165_v44  ;;  %v10536_v56 = vsub.s32 %v4249_v9, %v4252_v40  ;;  %v4417_v2 = vshll.u32 %v14329_v38, %v4411_v28  ;;  %v4420_v61 = vshll.u32 %v14330_v27, %v4411_v28 }
 0x288   :  { %v4415_v39 = vshrl.u32 %v14329_v38, %v4412_v15  ;;  %v4418_v51 = vshrl.u32 %v14330_v27, %v4412_v15  ;;  %v4421_v36 = vshrl.u32 %v14331_v34, %v4412_v15  ;;  %v4424_v53 = vshrl.u32 %v14332_v8, %v4412_v15 }
 0x289   :  { %v4169_v18 = vxor.u32 2147483648, %v4168_v10  ;;  %v4255_v55 = vsub.s32 0, %v10536_v56  ;;  %v4410_v1 = vshrl.u32 %v4409_v19, 5  ;;  %v4423_v32 = vshll.u32 %v14331_v34, %v4411_v28  ;;  %v1099_v19 = vpop.f32.mrf.mxu0 }
 0x28a   :  { %v4416_v12 = vor.u32 %v4415_v39, %v4414_v3  ;;  %v4419_v9 = vor.u32 %v4418_v51, %v4417_v2  ;;  %v4422_v43 = vor.u32 %v4421_v36, %v4420_v61  ;;  %v4426_v0 = vshll.u32 %v14332_v8, %v4411_v28 }
 0x28b   :  { %v4170_v49 = vsel %vm4087_vm11, %v4169_v18, %v4168_v10  ;;  %v7701_v60 = vmin.u32 %v4255_v55, %v10536_v56  ;;  %v4425_v24 = vor.u32 %v4424_v53, %v4423_v32  ;;  %v4427_v26 = vshrl.u32 %v14333_v7, %v4412_v15  ;;  %v1101_v55 = vpop.f32.mrf.mxu0 }
 0x28c   :  { %v4173_v48 = vsel %vm10484_vm12, %v10279_v20, %v4170_v49  ;;  %v10556_v52 = vshll.u32 %v4405_v25, 8  ;;  %v4505_v6 = vshrl.u32 %v4504_v47, 23  ;;  %v4275_v31 = vsub.s32 4, %v10522_v22 }
 0x28d   :  { %8362 = vcosq.f32 %v4173_v48  ;;  %v4257_v33 = vclz %v7701_v60  ;;  %v4413_v58 = vshrl.u32 %v14328_v13, %v4412_v15  ;;  %v4428_v50 = vor.u32 %v4427_v26, %v4426_v0 }
 0x28e   :  { %8364 = vsinq.f32 %v4173_v48  ;;  %vm4429_vm5 = vcmp.lt.s32.totalorder %v4410_v1, 1  ;;  %vm4431_vm7 = vcmp.lt.s32.totalorder %v4410_v1, 3  ;;  %vm4432_vm8 = vcmp.lt.s32.totalorder %v4410_v1, 4 }
 0x28f   :  { %v7702_v17 = vadd.s32 4294967294, %v4257_v33  ;;  %v4437_v16 = vsel %vm4429_vm5, %v4416_v12, %v4419_v9  ;;  %vm4191_vm9 = vcmp.lt.s32.totalorder %v10324_v63, 0  ;;  %v4434_v28 = vsel %vm4432_vm8, %v4422_v43, 2102212464 }
 0x290   :  { %v4438_v21 = vsel %vm4432_vm8, %v4425_v24, 920167782  ;;  %v4441_v44 = vsel %vm4429_vm5, %v4419_v9, %v4422_v43  ;;  %v4442_v29 = vsel %vm4432_vm8, %v4428_v50, 1326507024  ;;  %vm4430_vm11 = vcmp.lt.s32.totalorder %v4410_v1, 2 }
 0x291   :  { %vm7703_vm10 = vcmp.lt.s32.totalorder %v7702_v17, 0  ;;  %v4439_v40 = vsel %vm4431_vm7, %v4422_v43, %v4438_v21  ;;  %v4443_v15 = vsel %vm4431_vm7, %v4425_v24, %v4442_v29  ;;  %v4433_v25 = vsel %vm4429_vm5, %v4413_v58, %v4416_v12  ;;  %v14364_v24 = vld [vmem:[#allocation9_spill] sm:$0xff] }
 0x292   :  { %v4260_v10 = vsel %vm7703_vm10, 0, %v7702_v17  ;;  %v4440_v39 = vsel %vm4430_vm11, %v4437_v16, %v4439_v40  ;;  %v4444_v47 = vsel %vm4430_vm11, %v4441_v44, %v4443_v15  ;;  %vm10570_vm12 = vcmp.le.f32.partialorder %v4189_v14, 0.7853982 }
 0x293   :  { %v4261_v3 = vsub.s32 32, %v4260_v10  ;;  %v4265_v51 = vsub.s32 4294967266, %v4260_v10  ;;  %v4435_v36 = vsel %vm4431_vm7, %v4419_v9, %v4434_v28  ;;  %v7712_v2 = vadd.s32 4294967169, %v4505_v6 }
 0x294   :  { %v10576_v61 = vmul.u32.u64.low %v10556_v52, %v4444_v47  ;;  %v10577_v53 = vmul.u32.u64.high %v10556_v52, %v4444_v47, %v10576_v61  ;;  %v10580_v49 = vmul.u32.u64.low %v10556_v52, %v4440_v39  ;;  %v10581_v12 = vmul.u32.u64.high %v10556_v52, %v4440_v39, %v10580_v49 }
 0x295   :  { %v4262_v14 = vshll.u32 %v10536_v56, %v4260_v10  ;;  %v4263_v32 = vshrl.u32 %v4245_v30, %v4261_v3  ;;  %v4266_v48 = vadd.s32 127, %v4265_v51  ;;  %v4511_v60 = vadd.s32 1, %v7712_v2 }
 0x296   :  { %vm4177_vm13 = vweird.f32 %v10279_v20  ;;  %vm4180_vm15 = vcmp.lt.s32.totalorder %v10531_v46, 2  ;;  %v10588_v9 = vadd.f32 %v1099_v19, %v9382_v57  ;;  %v4436_v43 = vsel %vm4430_vm11, %v4433_v25, %v4435_v36 }
 0x297   :  { %v10592_v0 = vadd.f32 %v1101_v55, %v14364_v24  ;;  %vm4181_vm0 = vcmp.eq.s32.totalorder %v10531_v46, 0  ;;  %v4264_v26 = vor.u32 %v4263_v32, %v4262_v14  ;;  %v4267_v33 = vshll.u32 %v4266_v48, 23 }
 0x298   :  { %vm4512_vm1 = vcmp.gt.s32.totalorder %v4511_v60, 0  ;;  %vm4454_vm2 = vc.u32 %v10577_v53, %v10580_v49  ;;  %v4455_v30 = vadd.s32 1, %v10581_v12  ;;  %v4508_v56 = vand.u32 8388607, %v4501_v59 }
 0x299   :  { %v4513_v57 = vsel %vm4512_vm1, %v4511_v60, 0  ;;  %v4268_v1 = vor.u32 4788187, %v4267_v33  ;;  %v4276_v58 = vsel %vm4191_vm9, %v4275_v31, %v10522_v22  ;;  %v4452_v50 = vmul.u32 %v10556_v52, %v4436_v43 }
 0x29a   :  { %v8363_v6 = vpop.eup %8362  ;;  %v4515_v17 = vand.u32 31, %v4513_v57  ;;  %vm4184_vm3 = vcmp.eq.s32.totalorder %v10531_v46, 2  ;;  %v4271_v28 = vcvt.s32.f32 %v4264_v26  ;;  %v4456_v21 = vsel %vm4454_vm2, %v4455_v30, %v10581_v12  ;;  %v1282_v30 = vpop.f32.mrf.mxu1 }
 0x29b   :  { %v8365_v19 = vpop.eup %8364  ;;  %v4185_v16 = vxor.u32 2147483648, %v8363_v6  ;;  %v4269_v29 = vand.u32 2147483647, %v4268_v1  ;;  %v4457_v40 = vadd.s32 %v4456_v21, %v4452_v50  ;;  %v4278_v25 = vsel %vm10570_vm12, 0, %v4276_v58 }
 0x29c   :  { %v4182_v44 = vxor.u32 2147483648, %v8365_v19  ;;  %v4516_v15 = vsub.s32 32, %v4515_v17  ;;  %v4509_v39 = vor.u32 8388608, %v4508_v56  ;;  %v10608_v22 = vshrl.u32 %v4513_v57, 5 }
 0x29d   :  { %v4186_v10 = vsel %vm4184_vm3, %v4185_v16, %v8365_v19  ;;  %v4272_v31 = vmul.f32 %v4271_v28, %v4269_v29  ;;  %v4458_v47 = vadd.s32 536870912, %v4457_v40  ;;  %v4518_v3 = vshll.u32 %v14328_v13, %v4515_v17 }
 0x29e   :  { %v4183_v52 = vsel %vm4181_vm0, %v8363_v6, %v4182_v44  ;;  %v4519_v36 = vshrl.u32 %v14329_v38, %v4516_v15  ;;  %v4522_v55 = vshrl.u32 %v14330_v27, %v4516_v15  ;;  %v4525_v2 = vshrl.u32 %v14331_v34, %v4516_v15 }
 0x29f   :  { %v4187_v51 = vsel %vm4180_vm15, %v4183_v52, %v4186_v10  ;;  %v4273_v12 = vxor.u32 2147483648, %v4272_v31  ;;  %v4459_v14 = vshrl.u32 %v4458_v47, 30  ;;  %v4521_v32 = vshll.u32 %v14329_v38, %v4515_v17 }
 0x2a0   :  { %v4188_v61 = vsel %vm4177_vm13, nan, %v4187_v51  ;;  %v4520_v60 = vor.u32 %v4519_v36, %v4518_v3  ;;  %v4524_v46 = vshll.u32 %v14330_v27, %v4515_v17  ;;  %v4527_v43 = vshll.u32 %v14331_v34, %v4515_v17 }
 0x2a1   :  { %v7550_v48 = vsel %vm7532_vm14, %v10260_v42, %v4188_v61  ;;  %v4274_v20 = vsel %vm4191_vm9, %v4273_v12, %v4272_v31  ;;  %v4460_v24 = vshll.u32 %v4459_v14, 30  ;;  %v4523_v26 = vor.u32 %v4522_v55, %v4521_v32  ;;  %v1284_v61 = vpop.f32.mrf.mxu1 }
 0x2a2   :  { %7599 = vst [vmem:[%s14171_s4 + $0x78] sm:$0xff] %v7550_v48  ;;  %v4528_v33 = vshrl.u32 %v14332_v8, %v4516_v15  ;;  %v4277_v42 = vsel %vm10570_vm12, %v10324_v63, %v4274_v20  ;;  %v4526_v56 = vor.u32 %v4525_v2, %v4524_v46  ;;  %v4530_v57 = vshll.u32 %v14332_v8, %v4515_v17 }
 0x2a3   :  { %v4531_v6 = vshrl.u32 %v14333_v7, %v4516_v15  ;;  %8366 = vcosq.f32 %v4277_v42  ;;  %v4282_v1 = vadd.s32 3, %v4278_v25  ;;  %v10637_v58 = vsub.s32 %v4457_v40, %v4460_v24 }
 0x2a4   :  { %v4529_v50 = vor.u32 %v4528_v33, %v4527_v43  ;;  %8368 = vsinq.f32 %v4277_v42  ;;  %v4549_v16 = vshll.u32 %v4509_v39, 8  ;;  %v10640_v28 = vadd.f32 %v1282_v30, %v10588_v9 }
 0x2a5   :  { %v4532_v19 = vor.u32 %v4531_v6, %v4530_v57  ;;  %v4463_v21 = vsub.s32 0, %v10637_v58  ;;  %v4517_v18 = vshrl.u32 %v14328_v13, %v4516_v15  ;;  %vm4533_vm4 = vcmp.lt.s32.totalorder %v10608_v22, 1 }
 0x2a6   :  { %vm4536_vm5 = vcmp.lt.s32.totalorder %v10608_v22, 4  ;;  %vm4535_vm7 = vcmp.lt.s32.totalorder %v10608_v22, 3  ;;  %v4541_v44 = vsel %vm4533_vm4, %v4520_v60, %v4523_v26  ;;  %v4483_v10 = vsub.s32 4, %v4459_v14 }
 0x2a7   :  { %v4538_v17 = vsel %vm4536_vm5, %v4526_v56, 2102212464  ;;  %v4542_v29 = vsel %vm4536_vm5, %v4529_v50, 920167782  ;;  %v7709_v40 = vmin.u32 %v4463_v21, %v10637_v58  ;;  %vm4534_vm8 = vcmp.lt.s32.totalorder %v10608_v22, 2 }
 0x2a8   :  { %v4543_v9 = vsel %vm4535_vm7, %v4526_v56, %v4542_v29  ;;  %v4545_v25 = vsel %vm4533_vm4, %v4523_v26, %v4526_v56  ;;  %v4546_v39 = vsel %vm4536_vm5, %v4532_v19, 1326507024  ;;  %v10659_v52 = vadd.f32 %v9446_v45, %v10640_v28 }
 0x2a9   :  { %v4544_v15 = vsel %vm4534_vm8, %v4541_v44, %v4543_v9  ;;  %v4283_v31 = vand.u32 3, %v4282_v1  ;;  %v4465_v47 = vclz %v7709_v40  ;;  %v4537_v3 = vsel %vm4533_vm4, %v4517_v18, %v4520_v60 }
 0x2aa   :  { %v4539_v51 = vsel %vm4535_vm7, %v4523_v26, %v4538_v17  ;;  %vm4399_vm9 = vcmp.lt.s32.totalorder %v10469_v37, 0  ;;  %v4547_v36 = vsel %vm4535_vm7, %v4529_v50, %v4546_v39  ;;  %vm10674_vm10 = vcmp.le.f32.partialorder %v4397_v41, 0.7853982 }
 0x2ab   :  { %v10668_v55 = vmul.u32.u64.low %v4549_v16, %v4544_v15  ;;  %v10669_v2 = vmul.u32.u64.high %v4549_v16, %v4544_v15, %v10668_v55  ;;  %v7710_v32 = vadd.s32 4294967294, %v4465_v47  ;;  %v4484_v48 = vsel %vm4399_vm9, %v4483_v10, %v4459_v14 }
 0x2ac   :  { %v4548_v60 = vsel %vm4534_vm8, %v4545_v25, %v4547_v36  ;;  %v4540_v46 = vsel %vm4534_vm8, %v4537_v3, %v4539_v51  ;;  %v4712_v24 = vand.u32 2139095040, %v10659_v52  ;;  %vm4281_vm11 = vweird.f32 %v10324_v63 }
 0x2ad   :  { %v10684_v43 = vmul.u32.u64.low %v4549_v16, %v4548_v60  ;;  %v10685_v20 = vmul.u32.u64.high %v4549_v16, %v4548_v60, %v10684_v43  ;;  %vm4284_vm12 = vcmp.lt.s32.totalorder %v4283_v31, 2  ;;  %vm4285_vm13 = vcmp.eq.s32.totalorder %v4283_v31, 0 }
 0x2ae   :  { %vm7711_vm15 = vcmp.lt.s32.totalorder %v7710_v32, 0  ;;  %v10690_v41 = vadd.f32 %v1284_v61, %v10592_v0  ;;  %v4453_v14 = vadd.s32 %v10580_v49, %v10577_v53  ;;  %v4559_v22 = vadd.s32 1, %v10669_v2 }
 0x2af   :  { %v4468_v26 = vsel %vm7711_vm15, 0, %v7710_v32  ;;  %v4713_v33 = vshrl.u32 %v4712_v24, 23  ;;  %v4486_v56 = vsel %vm10674_vm10, 0, %v4484_v48  ;;  %v4556_v57 = vmul.u32 %v4549_v16, %v4540_v46 }
 0x2b0   :  { %v4469_v30 = vsub.s32 32, %v4468_v26  ;;  %v4473_v42 = vsub.s32 4294967266, %v4468_v26  ;;  %v8367_v6 = vpop.eup %8366  ;;  %v4470_v1 = vshll.u32 %v10637_v58, %v4468_v26  ;;  %vm4558_vm0 = vc.u32 %v10685_v20, %v10668_v55 }
 0x2b1   :  { %v4709_v0 = vand.u32 2147483647, %v10659_v52  ;;  %v7720_v50 = vadd.s32 4294967169, %v4713_v33  ;;  %v8369_v53 = vpop.eup %8368  ;;  %v4289_v49 = vxor.u32 2147483648, %v8367_v6  ;;  %v4560_v18 = vsel %vm4558_vm0, %v4559_v22, %v10669_v2 }
 0x2b2   :  { %v4471_v19 = vshrl.u32 %v4453_v14, %v4469_v30  ;;  %v4474_v21 = vadd.s32 127, %v4473_v42  ;;  %v4286_v17 = vxor.u32 2147483648, %v8369_v53  ;;  %vm4288_vm1 = vcmp.eq.s32.totalorder %v4283_v31, 2 }
 0x2b3   :  { %v4561_v44 = vadd.s32 %v4560_v18, %v4556_v57  ;;  %v4719_v29 = vadd.s32 1, %v7720_v50  ;;  %v4290_v16 = vsel %vm4288_vm1, %v4289_v49, %v8369_v53  ;;  %v10704_v58 = vadd.f32 %v9453_v54, %v10690_v41 }
 0x2b4   :  { %v4472_v40 = vor.u32 %v4471_v19, %v4470_v1  ;;  %v4475_v10 = vshll.u32 %v4474_v21, 23  ;;  %v4287_v9 = vsel %vm4285_vm13, %v8367_v6, %v4286_v17  ;;  %v4490_v15 = vadd.s32 3, %v4486_v56 }
 0x2b5   :  { %v4562_v25 = vadd.s32 536870912, %v4561_v44  ;;  %vm4720_vm2 = vcmp.gt.s32.totalorder %v4719_v29, 0  ;;  %v4291_v39 = vsel %vm4284_vm12, %v4287_v9, %v4290_v16  ;;  %v4716_v3 = vand.u32 8388607, %v4709_v0 }
 0x2b6   :  { %v4476_v47 = vor.u32 4788187, %v4475_v10  ;;  %v4721_v51 = vsel %vm4720_vm2, %v4719_v29, 0  ;;  %v4292_v36 = vsel %vm4281_vm11, nan, %v4291_v39  ;;  %v4479_v60 = vcvt.s32.f32 %v4472_v40 }
 0x2b7   :  { %v10712_v2 = vshrl.u32 %v4562_v25, 30  ;;  %v4723_v61 = vand.u32 31, %v4721_v51  ;;  %v7551_v32 = vsel %vm7533_vm6, %v10310_v35, %v4292_v36  ;;  %v10721_v24 = vand.u32 3, %v4490_v15 }
 0x2b8   :  { %v4477_v48 = vand.u32 2147483647, %v4476_v47  ;;  %7600 = vst [vmem:[%s14171_s4 + $0x80] sm:$0xff] %v7551_v32  ;;  %v4717_v63 = vor.u32 8388608, %v4716_v3  ;;  %v4813_v14 = vand.u32 2147483647, %v10704_v58  ;;  %v4557_v26 = vadd.s32 %v10668_v55, %v10685_v20  ;;  %v1106_v3 = vpop.f32.mrf.mxu0 }
 0x2b9   :  { %v4564_v31 = vshll.u32 %v10712_v2, 30  ;;  %v4724_v46 = vsub.s32 32, %v4723_v61  ;;  %v4816_v33 = vand.u32 2139095040, %v10704_v58  ;;  %v4726_v42 = vshll.u32 %v14328_v13, %v4723_v61 }
 0x2ba   :  { %v4480_v43 = vmul.f32 %v4479_v60, %v4477_v48  ;;  %v4729_v1 = vshll.u32 %v14329_v38, %v4723_v61  ;;  %v4732_v50 = vshll.u32 %v14330_v27, %v4723_v61  ;;  %v4722_v53 = vshrl.u32 %v4721_v51, 5 }
 0x2bb   :  { %v10726_v22 = vsub.s32 %v4561_v44, %v4564_v31  ;;  %v4727_v35 = vshrl.u32 %v14329_v38, %v4724_v46  ;;  %v4730_v56 = vshrl.u32 %v14330_v27, %v4724_v46  ;;  %v4733_v57 = vshrl.u32 %v14331_v34, %v4724_v46 }
 0x2bc   :  { %v4481_v30 = vxor.u32 2147483648, %v4480_v43  ;;  %v4736_v55 = vshrl.u32 %v14332_v8, %v4724_v46  ;;  %v4735_v19 = vshll.u32 %v14331_v34, %v4723_v61  ;;  %v4738_v16 = vshll.u32 %v14332_v8, %v4723_v61 }
 0x2bd   :  { %v4567_v6 = vsub.s32 0, %v10726_v22  ;;  %v4728_v49 = vor.u32 %v4727_v35, %v4726_v42  ;;  %v4731_v17 = vor.u32 %v4730_v56, %v4729_v1  ;;  %v4734_v44 = vor.u32 %v4733_v57, %v4732_v50  ;;  %v1108_v57 = vpop.f32.mrf.mxu0 }
 0x2be   :  { %v4482_v20 = vsel %vm4399_vm9, %v4481_v30, %v4480_v43  ;;  %v4737_v29 = vor.u32 %v4736_v55, %v4735_v19  ;;  %v4739_v40 = vshrl.u32 %v14333_v7, %v4724_v46  ;;  %v10746_v9 = vshll.u32 %v4717_v63, 8 }
 0x2bf   :  { %v4485_v21 = vsel %vm10674_vm10, %v10469_v37, %v4482_v20  ;;  %v7713_v18 = vmin.u32 %v4567_v6, %v10726_v22  ;;  %v4817_v15 = vshrl.u32 %v4816_v33, 23  ;;  %v4587_v25 = vsub.s32 4, %v10712_v2 }
 0x2c0   :  { %8370 = vcosq.f32 %v4485_v21  ;;  %v4725_v12 = vshrl.u32 %v14328_v13, %v4724_v46  ;;  %v4740_v39 = vor.u32 %v4739_v40, %v4738_v16  ;;  %vm4741_vm3 = vcmp.lt.s32.totalorder %v4722_v53, 1 }
 0x2c1   :  { %8372 = vsinq.f32 %v4485_v21  ;;  %v4569_v10 = vclz %v7713_v18  ;;  %vm4743_vm4 = vcmp.lt.s32.totalorder %v4722_v53, 3  ;;  %vm4744_vm5 = vcmp.lt.s32.totalorder %v4722_v53, 4  ;;  %v14369_v18 = vld [vmem:[#allocation12_spill] sm:$0xff] }
 0x2c2   :  { %v4749_v51 = vsel %vm4741_vm3, %v4728_v49, %v4731_v17  ;;  %vm4503_vm7 = vcmp.lt.s32.totalorder %v10514_v11, 0  ;;  %v4746_v36 = vsel %vm4744_vm5, %v4734_v44, 2102212464  ;;  %v4750_v61 = vsel %vm4744_vm5, %v4737_v29, 920167782 }
 0x2c3   :  { %v7714_v47 = vadd.s32 4294967294, %v4569_v10  ;;  %v4753_v32 = vsel %vm4741_vm3, %v4731_v17, %v4734_v44  ;;  %v4754_v48 = vsel %vm4744_vm5, %v4740_v39, 1326507024  ;;  %vm4742_vm9 = vcmp.lt.s32.totalorder %v4722_v53, 2 }
 0x2c4   :  { %v4751_v60 = vsel %vm4743_vm4, %v4734_v44, %v4750_v61  ;;  %v4755_v31 = vsel %vm4743_vm4, %v4737_v29, %v4754_v48  ;;  %v4745_v43 = vsel %vm4741_vm3, %v4725_v12, %v4728_v49  ;;  %vm10760_vm10 = vcmp.le.f32.partialorder %v4501_v59, 0.7853982  ;;  %v14370_v29 = vld [vmem:[#allocation13_spill] sm:$0xff] }
 0x2c5   :  { %vm7715_vm8 = vcmp.lt.s32.totalorder %v7714_v47, 0  ;;  %v4752_v63 = vsel %vm4742_vm9, %v4749_v51, %v4751_v60  ;;  %v4756_v35 = vsel %vm4742_vm9, %v4753_v32, %v4755_v31  ;;  %v4747_v56 = vsel %vm4743_vm4, %v4731_v17, %v4746_v36 }
 0x2c6   :  { %v4572_v46 = vsel %vm7715_vm8, 0, %v7714_v47  ;;  %v7724_v6 = vadd.s32 4294967169, %v4817_v15  ;;  %v10766_v1 = vmul.u32.u64.low %v10746_v9, %v4756_v35  ;;  %v10767_v50 = vmul.u32.u64.high %v10746_v9, %v4756_v35, %v10766_v1 }
 0x2c7   :  { %v4573_v30 = vsub.s32 32, %v4572_v46  ;;  %v4577_v42 = vsub.s32 4294967266, %v4572_v46  ;;  %v10770_v55 = vmul.u32.u64.low %v10746_v9, %v4752_v63  ;;  %v10771_v20 = vmul.u32.u64.high %v10746_v9, %v4752_v63, %v10770_v55 }
 0x2c8   :  { %v4574_v59 = vshll.u32 %v10726_v22, %v4572_v46  ;;  %v4823_v21 = vadd.s32 1, %v7724_v6  ;;  %vm4489_vm11 = vweird.f32 %v10469_v37  ;;  %vm4492_vm12 = vcmp.lt.s32.totalorder %v10721_v24, 2 }
 0x2c9   :  { %v4575_v49 = vshrl.u32 %v4557_v26, %v4573_v30  ;;  %v4578_v19 = vadd.s32 127, %v4577_v42  ;;  %v10778_v17 = vadd.f32 %v1106_v3, %v14369_v18  ;;  %v4748_v44 = vsel %vm4742_vm9, %v4745_v43, %v4747_v56 }
 0x2ca   :  { %v10782_v16 = vadd.f32 %v1108_v57, %v14370_v29  ;;  %vm4493_vm13 = vcmp.eq.s32.totalorder %v10721_v24, 0  ;;  %vm4824_vm15 = vcmp.gt.s32.totalorder %v4823_v21, 0  ;;  %vm4766_vm0 = vc.u32 %v10767_v50, %v10770_v55 }
 0x2cb   :  { %v4576_v40 = vor.u32 %v4575_v49, %v4574_v59  ;;  %v4579_v10 = vshll.u32 %v4578_v19, 23  ;;  %v4767_v26 = vadd.s32 1, %v10771_v20  ;;  %v4820_v22 = vand.u32 8388607, %v4813_v14 }
 0x2cc   :  { %v4825_v15 = vsel %vm4824_vm15, %v4823_v21, 0  ;;  %v4588_v39 = vsel %vm4503_vm7, %v4587_v25, %v10712_v2  ;;  %v4764_v47 = vmul.u32 %v10746_v9, %v4748_v44  ;;  %vm4496_vm1 = vcmp.eq.s32.totalorder %v10721_v24, 2 }
 0x2cd   :  { %v8371_v12 = vpop.eup %8370  ;;  %v4580_v53 = vor.u32 4788187, %v4579_v10  ;;  %v4827_v3 = vand.u32 31, %v4825_v15  ;;  %v4583_v61 = vcvt.s32.f32 %v4576_v40  ;;  %v4768_v32 = vsel %vm4766_vm0, %v4767_v26, %v10771_v20  ;;  %v1289_v26 = vpop.f32.mrf.mxu1 }
 0x2ce   :  { %v8373_v51 = vpop.eup %8372  ;;  %v4497_v36 = vxor.u32 2147483648, %v8371_v12  ;;  %v4769_v31 = vadd.s32 %v4768_v32, %v4764_v47  ;;  %v4590_v63 = vsel %vm10760_vm10, 0, %v4588_v39  ;;  %v4821_v35 = vor.u32 8388608, %v4820_v22 }
 0x2cf   :  { %v4494_v48 = vxor.u32 2147483648, %v8373_v51  ;;  %v4581_v60 = vand.u32 2147483647, %v4580_v53  ;;  %v4828_v46 = vsub.s32 32, %v4827_v3  ;;  %v10798_v2 = vshrl.u32 %v4825_v15, 5 }
 0x2d0   :  { %v4498_v43 = vsel %vm4496_vm1, %v4497_v36, %v8373_v51  ;;  %v4770_v30 = vadd.s32 536870912, %v4769_v31  ;;  %v4830_v42 = vshll.u32 %v14328_v13, %v4827_v3  ;;  %v4833_v19 = vshll.u32 %v14329_v38, %v4827_v3 }
 0x2d1   :  { %v4495_v9 = vsel %vm4493_vm13, %v8371_v12, %v4494_v48  ;;  %v4584_v25 = vmul.f32 %v4583_v61, %v4581_v60  ;;  %v4831_v57 = vshrl.u32 %v14329_v38, %v4828_v46  ;;  %v4834_v6 = vshrl.u32 %v14330_v27, %v4828_v46 }
 0x2d2   :  { %v4499_v56 = vsel %vm4492_vm12, %v4495_v9, %v4498_v43  ;;  %v4837_v1 = vshrl.u32 %v14331_v34, %v4828_v46  ;;  %v4771_v49 = vshrl.u32 %v4770_v30, 30  ;;  %v4836_v24 = vshll.u32 %v14330_v27, %v4827_v3 }
 0x2d3   :  { %v4500_v20 = vsel %vm4489_vm11, nan, %v4499_v56  ;;  %v4585_v59 = vxor.u32 2147483648, %v4584_v25  ;;  %v4832_v18 = vor.u32 %v4831_v57, %v4830_v42  ;;  %v4839_v44 = vshll.u32 %v14331_v34, %v4827_v3 }
 0x2d4   :  { %v7553_v21 = vsel %vm7532_vm14, %v10450_v4, %v4500_v20  ;;  %v4772_v29 = vshll.u32 %v4771_v49, 30  ;;  %v4835_v40 = vor.u32 %v4834_v6, %v4833_v19  ;;  %v4840_v10 = vshrl.u32 %v14332_v8, %v4828_v46  ;;  %v1291_v20 = vpop.f32.mrf.mxu1 }
 0x2d5   :  { %7602 = vst [vmem:[%s14171_s4 + $0x90] sm:$0xff] %v7553_v21  ;;  %v4586_v37 = vsel %vm4503_vm7, %v4585_v59, %v4584_v25  ;;  %v4838_v22 = vor.u32 %v4837_v1, %v4836_v24  ;;  %v4842_v15 = vshll.u32 %v14332_v8, %v4827_v3  ;;  %v4843_v12 = vshrl.u32 %v14333_v7, %v4828_v46 }
 0x2d6   :  { %v4589_v4 = vsel %vm10760_vm10, %v10514_v11, %v4586_v37  ;;  %v4594_v53 = vadd.s32 3, %v4590_v63  ;;  %v10827_v39 = vsub.s32 %v4769_v31, %v4772_v29  ;;  %v4841_v47 = vor.u32 %v4840_v10, %v4839_v44 }
 0x2d7   :  { %8374 = vcosq.f32 %v4589_v4  ;;  %v4844_v51 = vor.u32 %v4843_v12, %v4842_v15  ;;  %v4861_v36 = vshll.u32 %v4821_v35, 8  ;;  %v10830_v61 = vadd.f32 %v1289_v26, %v10778_v17 }
 0x2d8   :  { %8376 = vsinq.f32 %v4589_v4  ;;  %v4775_v32 = vsub.s32 0, %v10827_v39  ;;  %v4829_v33 = vshrl.u32 %v14328_v13, %v4828_v46  ;;  %vm4845_vm2 = vcmp.lt.s32.totalorder %v10798_v2, 1 }
 0x2d9   :  { %vm4848_vm3 = vcmp.lt.s32.totalorder %v10798_v2, 4  ;;  %vm4847_vm4 = vcmp.lt.s32.totalorder %v10798_v2, 3  ;;  %v4853_v48 = vsel %vm4845_vm2, %v4832_v18, %v4835_v40  ;;  %v4795_v43 = vsub.s32 4, %v4771_v49 }
 0x2da   :  { %v4850_v3 = vsel %vm4848_vm3, %v4838_v22, 2102212464  ;;  %v4854_v60 = vsel %vm4848_vm3, %v4841_v47, 920167782  ;;  %v7721_v31 = vmin.u32 %v4775_v32, %v10827_v39  ;;  %vm4846_vm5 = vcmp.lt.s32.totalorder %v10798_v2, 2 }
 0x2db   :  { %v4855_v17 = vsel %vm4847_vm4, %v4838_v22, %v4854_v60  ;;  %v4857_v63 = vsel %vm4845_vm2, %v4835_v40, %v4838_v22  ;;  %v4858_v35 = vsel %vm4848_vm3, %v4844_v51, 1326507024  ;;  %v10849_v9 = vadd.f32 %v9446_v45, %v10830_v61 }
 0x2dc   :  { %v4856_v46 = vsel %vm4846_vm5, %v4853_v48, %v4855_v17  ;;  %v4595_v25 = vand.u32 3, %v4594_v53  ;;  %v4777_v30 = vclz %v7721_v31  ;;  %v4849_v42 = vsel %vm4845_vm2, %v4829_v33, %v4832_v18 }
 0x2dd   :  { %v4851_v56 = vsel %vm4847_vm4, %v4835_v40, %v4850_v3  ;;  %vm4711_vm7 = vcmp.lt.s32.totalorder %v10659_v52, 0  ;;  %v4859_v57 = vsel %vm4847_vm4, %v4841_v47, %v4858_v35  ;;  %vm10864_vm8 = vcmp.le.f32.partialorder %v4709_v0, 0.7853982 }
 0x2de   :  { %v10858_v6 = vmul.u32.u64.low %v4861_v36, %v4856_v46  ;;  %v10859_v1 = vmul.u32.u64.high %v4861_v36, %v4856_v46, %v10858_v6  ;;  %v7722_v19 = vadd.s32 4294967294, %v4777_v30  ;;  %v4796_v21 = vsel %vm4711_vm7, %v4795_v43, %v4771_v49 }
 0x2df   :  { %v4860_v18 = vsel %vm4846_vm5, %v4857_v63, %v4859_v57  ;;  %v4852_v24 = vsel %vm4846_vm5, %v4849_v42, %v4851_v56  ;;  %v5024_v29 = vand.u32 2139095040, %v10849_v9  ;;  %vm4593_vm9 = vweird.f32 %v10514_v11 }
 0x2e0   :  { %v10874_v44 = vmul.u32.u64.low %v4861_v36, %v4860_v18  ;;  %v10875_v37 = vmul.u32.u64.high %v4861_v36, %v4860_v18, %v10874_v44  ;;  %vm4596_vm10 = vcmp.lt.s32.totalorder %v4595_v25, 2  ;;  %vm4597_vm11 = vcmp.eq.s32.totalorder %v4595_v25, 0 }
 0x2e1   :  { %vm7723_vm12 = vcmp.lt.s32.totalorder %v7722_v19, 0  ;;  %v10880_v0 = vadd.f32 %v1291_v20, %v10782_v16  ;;  %v4765_v49 = vadd.s32 %v10770_v55, %v10767_v50  ;;  %v4871_v2 = vadd.s32 1, %v10859_v1 }
 0x2e2   :  { %v4780_v40 = vsel %vm7723_vm12, 0, %v7722_v19  ;;  %v5025_v10 = vshrl.u32 %v5024_v29, 23  ;;  %v4798_v22 = vsel %vm10864_vm8, 0, %v4796_v21  ;;  %v4868_v15 = vmul.u32 %v4861_v36, %v4852_v24 }
 0x2e3   :  { %v4781_v26 = vsub.s32 32, %v4780_v40  ;;  %v4785_v4 = vsub.s32 4294967266, %v4780_v40  ;;  %v4782_v53 = vshll.u32 %v10827_v39, %v4780_v40  ;;  %vm4870_vm13 = vc.u32 %v10875_v37, %v10858_v6 }
 0x2e4   :  { %v8375_v12 = vpop.eup %8374  ;;  %v5021_v16 = vand.u32 2147483647, %v10849_v9  ;;  %v7732_v47 = vadd.s32 4294967169, %v5025_v10  ;;  %v4872_v33 = vsel %vm4870_vm13, %v4871_v2, %v10859_v1  ;;  %vm4600_vm15 = vcmp.eq.s32.totalorder %v4595_v25, 2 }
 0x2e5   :  { %v8377_v50 = vpop.eup %8376  ;;  %v4601_v55 = vxor.u32 2147483648, %v8375_v12  ;;  %v4783_v51 = vshrl.u32 %v4765_v49, %v4781_v26  ;;  %v4786_v32 = vadd.s32 127, %v4785_v4  ;;  %v4873_v48 = vadd.s32 %v4872_v33, %v4868_v15 }
 0x2e6   :  { %v4598_v3 = vxor.u32 2147483648, %v8377_v50  ;;  %v5031_v60 = vadd.s32 1, %v7732_v47  ;;  %v10894_v39 = vadd.f32 %v9453_v54, %v10880_v0  ;;  %v4802_v46 = vadd.s32 3, %v4798_v22 }
 0x2e7   :  { %v4602_v36 = vsel %vm4600_vm15, %v4601_v55, %v8377_v50  ;;  %v4784_v31 = vor.u32 %v4783_v51, %v4782_v53  ;;  %v4787_v43 = vshll.u32 %v4786_v32, 23  ;;  %v4874_v63 = vadd.s32 536870912, %v4873_v48 }
 0x2e8   :  { %v4599_v17 = vsel %vm4597_vm11, %v8375_v12, %v4598_v3  ;;  %vm5032_vm0 = vcmp.gt.s32.totalorder %v5031_v60, 0  ;;  %v5028_v42 = vand.u32 8388607, %v5021_v16  ;;  %v10911_v29 = vand.u32 3, %v4802_v46 }
 0x2e9   :  { %v4603_v35 = vsel %vm4596_vm10, %v4599_v17, %v4602_v36  ;;  %v4788_v30 = vor.u32 4788187, %v4787_v43  ;;  %v5033_v56 = vsel %vm5032_vm0, %v5031_v60, 0  ;;  %v10902_v1 = vshrl.u32 %v4874_v63, 30 }
 0x2ea   :  { %v4604_v57 = vsel %vm4593_vm9, nan, %v4603_v35  ;;  %v5035_v20 = vand.u32 31, %v5033_v56  ;;  %v4791_v18 = vcvt.s32.f32 %v4784_v31  ;;  %v5029_v11 = vor.u32 8388608, %v5028_v42  ;;  %v1113_v42 = vpop.f32.mrf.mxu0 }
 0x2eb   :  { %v7554_v19 = vsel %vm7533_vm6, %v10500_v23, %v4604_v57  ;;  %v4789_v21 = vand.u32 2147483647, %v4788_v30  ;;  %v4876_v25 = vshll.u32 %v10902_v1, 30  ;;  %v5125_v49 = vand.u32 2147483647, %v10894_v39 }
 0x2ec   :  { %7603 = vst [vmem:[%s14171_s4 + $0x98] sm:$0xff] %v7554_v19  ;;  %v5036_v24 = vsub.s32 32, %v5035_v20  ;;  %v4869_v40 = vadd.s32 %v10858_v6, %v10875_v37  ;;  %v5128_v10 = vand.u32 2139095040, %v10894_v39  ;;  %v5038_v4 = vshll.u32 %v14328_v13, %v5035_v20 }
 0x2ed   :  { %v4792_v44 = vmul.f32 %v4791_v18, %v4789_v21  ;;  %v10916_v2 = vsub.s32 %v4873_v48, %v4876_v25  ;;  %v5041_v53 = vshll.u32 %v14329_v38, %v5035_v20  ;;  %v5044_v47 = vshll.u32 %v14330_v27, %v5035_v20 }
 0x2ee   :  { %v5039_v23 = vshrl.u32 %v14329_v38, %v5036_v24  ;;  %v5042_v22 = vshrl.u32 %v14330_v27, %v5036_v24  ;;  %v5045_v15 = vshrl.u32 %v14331_v34, %v5036_v24  ;;  %v5048_v6 = vshrl.u32 %v14332_v8, %v5036_v24 }
 0x2ef   :  { %v4793_v26 = vxor.u32 2147483648, %v4792_v44  ;;  %v4879_v12 = vsub.s32 0, %v10916_v2  ;;  %v5034_v50 = vshrl.u32 %v5033_v56, 5  ;;  %v5047_v51 = vshll.u32 %v14331_v34, %v5035_v20 }
 0x2f0   :  { %v5040_v55 = vor.u32 %v5039_v23, %v5038_v4  ;;  %v5043_v3 = vor.u32 %v5042_v22, %v5041_v53  ;;  %v5046_v48 = vor.u32 %v5045_v15, %v5044_v47  ;;  %v5050_v36 = vshll.u32 %v14332_v8, %v5035_v20  ;;  %v1115_v15 = vpop.f32.mrf.mxu0 }
 0x2f1   :  { %v4794_v37 = vsel %vm4711_vm7, %v4793_v26, %v4792_v44  ;;  %v7725_v33 = vmin.u32 %v4879_v12, %v10916_v2  ;;  %v5049_v60 = vor.u32 %v5048_v6, %v5047_v51  ;;  %v5051_v31 = vshrl.u32 %v14333_v7, %v5036_v24 }
 0x2f2   :  { %v4797_v32 = vsel %vm10864_vm8, %v10659_v52, %v4794_v37  ;;  %v10936_v17 = vshll.u32 %v5029_v11, 8  ;;  %v5129_v46 = vshrl.u32 %v5128_v10, 23  ;;  %v4899_v63 = vsub.s32 4, %v10902_v1 }
 0x2f3   :  { %8378 = vcosq.f32 %v4797_v32  ;;  %v4881_v43 = vclz %v7725_v33  ;;  %v5037_v59 = vshrl.u32 %v14328_v13, %v5036_v24  ;;  %v5052_v35 = vor.u32 %v5051_v31, %v5050_v36  ;;  %v14375_v33 = vld [vmem:[#allocation15_spill] sm:$0xff] }
 0x2f4   :  { %8380 = vsinq.f32 %v4797_v32  ;;  %vm5053_vm1 = vcmp.lt.s32.totalorder %v5034_v50, 1  ;;  %vm5055_vm2 = vcmp.lt.s32.totalorder %v5034_v50, 3  ;;  %vm5056_vm3 = vcmp.lt.s32.totalorder %v5034_v50, 4 }
 0x2f5   :  { %v7726_v30 = vadd.s32 4294967294, %v4881_v43  ;;  %v5061_v56 = vsel %vm5053_vm1, %v5040_v55, %v5043_v3  ;;  %vm4815_vm4 = vcmp.lt.s32.totalorder %v10704_v58, 0  ;;  %v5058_v57 = vsel %vm5056_vm3, %v5046_v48, 2102212464 }
 0x2f6   :  { %v5062_v20 = vsel %vm5056_vm3, %v5049_v60, 920167782  ;;  %v5065_v19 = vsel %vm5053_vm1, %v5043_v3, %v5046_v48  ;;  %v5066_v21 = vsel %vm5056_vm3, %v5052_v35, 1326507024  ;;  %vm5054_vm7 = vcmp.lt.s32.totalorder %v5034_v50, 2 }
 0x2f7   :  { %vm7727_vm5 = vcmp.lt.s32.totalorder %v7726_v30, 0  ;;  %v5063_v18 = vsel %vm5055_vm2, %v5046_v48, %v5062_v20  ;;  %v5067_v25 = vsel %vm5055_vm2, %v5049_v60, %v5066_v21  ;;  %v5057_v44 = vsel %vm5053_vm1, %v5037_v59, %v5040_v55  ;;  %v14376_v60 = vld [vmem:[#allocation17_spill] sm:$0xff] }
 0x2f8   :  { %v4884_v24 = vsel %vm7727_vm5, 0, %v7726_v30  ;;  %v5064_v11 = vsel %vm5054_vm7, %v5061_v56, %v5063_v18  ;;  %v5068_v23 = vsel %vm5054_vm7, %v5065_v19, %v5067_v25  ;;  %vm10950_vm8 = vcmp.le.f32.partialorder %v4813_v14, 0.7853982 }
 0x2f9   :  { %v4885_v26 = vsub.s32 32, %v4884_v24  ;;  %v4889_v4 = vsub.s32 4294967266, %v4884_v24  ;;  %v5059_v22 = vsel %vm5055_vm2, %v5043_v3, %v5058_v57  ;;  %v7736_v12 = vadd.s32 4294967169, %v5129_v46 }
 0x2fa   :  { %v10956_v53 = vmul.u32.u64.low %v10936_v17, %v5068_v23  ;;  %v10957_v47 = vmul.u32.u64.high %v10936_v17, %v5068_v23, %v10956_v53  ;;  %v10960_v6 = vmul.u32.u64.low %v10936_v17, %v5064_v11  ;;  %v10961_v37 = vmul.u32.u64.high %v10936_v17, %v5064_v11, %v10960_v6 }
 0x2fb   :  { %v4886_v14 = vshll.u32 %v10916_v2, %v4884_v24  ;;  %v4887_v55 = vshrl.u32 %v4869_v40, %v4885_v26  ;;  %v4890_v51 = vadd.s32 127, %v4889_v4  ;;  %v5135_v32 = vadd.s32 1, %v7736_v12 }
 0x2fc   :  { %vm4801_vm9 = vweird.f32 %v10659_v52  ;;  %vm4804_vm10 = vcmp.lt.s32.totalorder %v10911_v29, 2  ;;  %v10968_v3 = vadd.f32 %v1113_v42, %v14375_v33  ;;  %v5060_v48 = vsel %vm5054_vm7, %v5057_v44, %v5059_v22 }
 0x2fd   :  { %v10972_v36 = vadd.f32 %v1115_v15, %v14376_v60  ;;  %vm4805_vm11 = vcmp.eq.s32.totalorder %v10911_v29, 0  ;;  %v4888_v31 = vor.u32 %v4887_v55, %v4886_v14  ;;  %v4891_v43 = vshll.u32 %v4890_v51, 23 }
 0x2fe   :  { %vm5136_vm12 = vcmp.gt.s32.totalorder %v5135_v32, 0  ;;  %vm5078_vm13 = vc.u32 %v10957_v47, %v10960_v6  ;;  %v5079_v40 = vadd.s32 1, %v10961_v37  ;;  %v5132_v2 = vand.u32 8388607, %v5125_v49 }
 0x2ff   :  { %v5137_v46 = vsel %vm5136_vm12, %v5135_v32, 0  ;;  %v4892_v50 = vor.u32 4788187, %v4891_v43  ;;  %v4900_v35 = vsel %vm4815_vm4, %v4899_v63, %v10902_v1  ;;  %v5076_v30 = vmul.u32 %v10936_v17, %v5060_v48 }
 0x300   :  { %v8379_v59 = vpop.eup %8378  ;;  %v5139_v42 = vand.u32 31, %v5137_v46  ;;  %vm4808_vm15 = vcmp.eq.s32.totalorder %v10911_v29, 2  ;;  %v4895_v20 = vcvt.s32.f32 %v4888_v31  ;;  %v5080_v19 = vsel %vm5078_vm13, %v5079_v40, %v10961_v37  ;;  %v1296_v40 = vpop.f32.mrf.mxu1 }
 0x301   :  { %v8381_v56 = vpop.eup %8380  ;;  %v4809_v57 = vxor.u32 2147483648, %v8379_v59  ;;  %v4893_v18 = vand.u32 2147483647, %v4892_v50  ;;  %v5081_v25 = vadd.s32 %v5080_v19, %v5076_v30  ;;  %v4902_v11 = vsel %vm10950_vm8, 0, %v4900_v35 }
 0x302   :  { %v4806_v21 = vxor.u32 2147483648, %v8381_v56  ;;  %v5140_v24 = vsub.s32 32, %v5139_v42  ;;  %v5133_v23 = vor.u32 8388608, %v5132_v2  ;;  %v10988_v1 = vshrl.u32 %v5137_v46, 5 }
 0x303   :  { %v4810_v44 = vsel %vm4808_vm15, %v4809_v57, %v8381_v56  ;;  %v4896_v63 = vmul.f32 %v4895_v20, %v4893_v18  ;;  %v5082_v26 = vadd.s32 536870912, %v5081_v25  ;;  %v5142_v4 = vshll.u32 %v14328_v13, %v5139_v42 }
 0x304   :  { %v4807_v17 = vsel %vm4805_vm11, %v8379_v59, %v4806_v21  ;;  %v5143_v15 = vshrl.u32 %v14329_v38, %v5140_v24  ;;  %v5146_v12 = vshrl.u32 %v14330_v27, %v5140_v24  ;;  %v5149_v53 = vshrl.u32 %v14331_v34, %v5140_v24 }
 0x305   :  { %v4811_v22 = vsel %vm4804_vm10, %v4807_v17, %v4810_v44  ;;  %v4897_v14 = vxor.u32 2147483648, %v4896_v63  ;;  %v5083_v55 = vshrl.u32 %v5082_v26, 30  ;;  %v5145_v51 = vshll.u32 %v14329_v38, %v5139_v42 }
 0x306   :  { %v4812_v37 = vsel %vm4801_vm9, nan, %v4811_v22  ;;  %v5144_v33 = vor.u32 %v5143_v15, %v5142_v4  ;;  %v5148_v29 = vshll.u32 %v14330_v27, %v5139_v42  ;;  %v5151_v48 = vshll.u32 %v14331_v34, %v5139_v42 }
 0x307   :  { %v7556_v32 = vsel %vm7532_vm14, %v10640_v28, %v4812_v37  ;;  %v4898_v52 = vsel %vm4815_vm4, %v4897_v14, %v4896_v63  ;;  %v5084_v60 = vshll.u32 %v5083_v55, 30  ;;  %v5147_v31 = vor.u32 %v5146_v12, %v5145_v51  ;;  %v1298_v37 = vpop.f32.mrf.mxu1 }
 0x308   :  { %7605 = vst [vmem:[%s14171_s4 + $0xa8] sm:$0xff] %v7556_v32  ;;  %v5152_v43 = vshrl.u32 %v14332_v8, %v5140_v24  ;;  %v4901_v28 = vsel %vm10950_vm8, %v10704_v58, %v4898_v52  ;;  %v5150_v2 = vor.u32 %v5149_v53, %v5148_v29  ;;  %v5154_v46 = vshll.u32 %v14332_v8, %v5139_v42 }
 0x309   :  { %v5155_v59 = vshrl.u32 %v14333_v7, %v5140_v24  ;;  %8382 = vcosq.f32 %v4901_v28  ;;  %v4906_v50 = vadd.s32 3, %v4902_v11  ;;  %v11017_v35 = vsub.s32 %v5081_v25, %v5084_v60 }
 0x30a   :  { %v5153_v30 = vor.u32 %v5152_v43, %v5151_v48  ;;  %8384 = vsinq.f32 %v4901_v28  ;;  %v5173_v57 = vshll.u32 %v5133_v23, 8  ;;  %v11020_v20 = vadd.f32 %v1296_v40, %v10968_v3 }
 0x30b   :  { %v5156_v56 = vor.u32 %v5155_v59, %v5154_v46  ;;  %v5087_v19 = vsub.s32 0, %v11017_v35  ;;  %v5141_v10 = vshrl.u32 %v14328_v13, %v5140_v24  ;;  %vm5157_vm0 = vcmp.lt.s32.totalorder %v10988_v1, 1 }
 0x30c   :  { %vm5160_vm1 = vcmp.lt.s32.totalorder %v10988_v1, 4  ;;  %vm5159_vm2 = vcmp.lt.s32.totalorder %v10988_v1, 3  ;;  %v5165_v21 = vsel %vm5157_vm0, %v5144_v33, %v5147_v31  ;;  %v5107_v44 = vsub.s32 4, %v5083_v55 }
 0x30d   :  { %v5162_v42 = vsel %vm5160_vm1, %v5150_v2, 2102212464  ;;  %v5166_v18 = vsel %vm5160_vm1, %v5153_v30, 920167782  ;;  %v7733_v25 = vmin.u32 %v5087_v19, %v11017_v35  ;;  %vm5158_vm3 = vcmp.lt.s32.totalorder %v10988_v1, 2 }
 0x30e   :  { %v5167_v3 = vsel %vm5159_vm2, %v5150_v2, %v5166_v18  ;;  %v5169_v11 = vsel %vm5157_vm0, %v5147_v31, %v5150_v2  ;;  %v5170_v23 = vsel %vm5160_vm1, %v5156_v56, 1326507024  ;;  %v11039_v17 = vadd.f32 %v9446_v45, %v11020_v20 }
 0x30f   :  { %v5168_v24 = vsel %vm5158_vm3, %v5165_v21, %v5167_v3  ;;  %v4907_v63 = vand.u32 3, %v4906_v50  ;;  %v5089_v26 = vclz %v7733_v25  ;;  %v5161_v4 = vsel %vm5157_vm0, %v5141_v10, %v5144_v33 }
 0x310   :  { %v5163_v22 = vsel %vm5159_vm2, %v5147_v31, %v5162_v42  ;;  %vm5023_vm4 = vcmp.lt.s32.totalorder %v10849_v9, 0  ;;  %v5171_v15 = vsel %vm5159_vm2, %v5153_v30, %v5170_v23  ;;  %vm11054_vm5 = vcmp.le.f32.partialorder %v5021_v16, 0.7853982 }
 0x311   :  { %v11048_v12 = vmul.u32.u64.low %v5173_v57, %v5168_v24  ;;  %v11049_v53 = vmul.u32.u64.high %v5173_v57, %v5168_v24, %v11048_v12  ;;  %v7734_v51 = vadd.s32 4294967294, %v5089_v26  ;;  %v5108_v32 = vsel %vm5023_vm4, %v5107_v44, %v5083_v55 }
 0x312   :  { %v5172_v33 = vsel %vm5158_vm3, %v5169_v11, %v5171_v15  ;;  %v5164_v29 = vsel %vm5158_vm3, %v5161_v4, %v5163_v22  ;;  %v5336_v60 = vand.u32 2139095040, %v11039_v17  ;;  %vm4905_vm7 = vweird.f32 %v10704_v58 }
 0x313   :  { %v11064_v48 = vmul.u32.u64.low %v5173_v57, %v5172_v33  ;;  %v11065_v52 = vmul.u32.u64.high %v5173_v57, %v5172_v33, %v11064_v48  ;;  %vm4908_vm8 = vcmp.lt.s32.totalorder %v4907_v63, 2  ;;  %vm4909_vm9 = vcmp.eq.s32.totalorder %v4907_v63, 0 }
 0x314   :  { %vm7735_vm10 = vcmp.lt.s32.totalorder %v7734_v51, 0  ;;  %v11070_v16 = vadd.f32 %v1298_v37, %v10972_v36  ;;  %v5077_v55 = vadd.s32 %v10960_v6, %v10957_v47  ;;  %v5183_v1 = vadd.s32 1, %v11049_v53 }
 0x315   :  { %v5092_v31 = vsel %vm7735_vm10, 0, %v7734_v51  ;;  %v5337_v43 = vshrl.u32 %v5336_v60, 23  ;;  %v5110_v2 = vsel %vm11054_vm5, 0, %v5108_v32  ;;  %v5180_v46 = vmul.u32 %v5173_v57, %v5164_v29 }
 0x316   :  { %v5093_v40 = vsub.s32 32, %v5092_v31  ;;  %v5097_v28 = vsub.s32 4294967266, %v5092_v31  ;;  %v8383_v59 = vpop.eup %8382  ;;  %v5094_v50 = vshll.u32 %v11017_v35, %v5092_v31  ;;  %vm5182_vm11 = vc.u32 %v11065_v52, %v11048_v12 }
 0x317   :  { %v5333_v36 = vand.u32 2147483647, %v11039_v17  ;;  %v7744_v30 = vadd.s32 4294967169, %v5337_v43  ;;  %v8385_v47 = vpop.eup %8384  ;;  %v4913_v6 = vxor.u32 2147483648, %v8383_v59  ;;  %v5184_v10 = vsel %vm5182_vm11, %v5183_v1, %v11049_v53 }
 0x318   :  { %v5095_v56 = vshrl.u32 %v5077_v55, %v5093_v40  ;;  %v5098_v19 = vadd.s32 127, %v5097_v28  ;;  %v4910_v42 = vxor.u32 2147483648, %v8385_v47  ;;  %vm4912_vm12 = vcmp.eq.s32.totalorder %v4907_v63, 2 }
 0x319   :  { %v5185_v21 = vadd.s32 %v5184_v10, %v5180_v46  ;;  %v5343_v18 = vadd.s32 1, %v7744_v30  ;;  %v4914_v57 = vsel %vm4912_vm12, %v4913_v6, %v8385_v47  ;;  %v11084_v35 = vadd.f32 %v9453_v54, %v11070_v16 }
 0x31a   :  { %v5096_v25 = vor.u32 %v5095_v56, %v5094_v50  ;;  %v5099_v44 = vshll.u32 %v5098_v19, 23  ;;  %v4911_v3 = vsel %vm4909_vm9, %v8383_v59, %v4910_v42  ;;  %v5114_v24 = vadd.s32 3, %v5110_v2 }
 0x31b   :  { %v5186_v11 = vadd.s32 536870912, %v5185_v21  ;;  %vm5344_vm13 = vcmp.gt.s32.totalorder %v5343_v18, 0  ;;  %v4915_v23 = vsel %vm4908_vm8, %v4911_v3, %v4914_v57  ;;  %v5340_v4 = vand.u32 8388607, %v5333_v36 }
 0x31c   :  { %v5100_v26 = vor.u32 4788187, %v5099_v44  ;;  %v5345_v22 = vsel %vm5344_vm13, %v5343_v18, 0  ;;  %v4916_v15 = vsel %vm4905_vm7, nan, %v4915_v23  ;;  %v5103_v33 = vcvt.s32.f32 %v5096_v25 }
 0x31d   :  { %v11092_v53 = vshrl.u32 %v5186_v11, 30  ;;  %v5347_v37 = vand.u32 31, %v5345_v22  ;;  %v7557_v51 = vsel %vm7533_vm6, %v10690_v41, %v4916_v15  ;;  %v11101_v60 = vand.u32 3, %v5114_v24 }
 0x31e   :  { %v5101_v32 = vand.u32 2147483647, %v5100_v26  ;;  %7606 = vst [vmem:[%s14171_s4 + $0xb0] sm:$0xff] %v7557_v51  ;;  %v5341_v58 = vor.u32 8388608, %v5340_v4  ;;  %v5437_v55 = vand.u32 2147483647, %v11084_v35  ;;  %v5181_v31 = vadd.s32 %v11048_v12, %v11065_v52  ;;  %v1120_v4 = vpop.f32.mrf.mxu0 }
 0x31f   :  { %v5188_v63 = vshll.u32 %v11092_v53, 30  ;;  %v5348_v29 = vsub.s32 32, %v5347_v37  ;;  %v5440_v43 = vand.u32 2139095040, %v11084_v35  ;;  %v5350_v28 = vshll.u32 %v14328_v13, %v5347_v37 }
 0x320   :  { %v5104_v48 = vmul.f32 %v5103_v33, %v5101_v32  ;;  %v5353_v50 = vshll.u32 %v14329_v38, %v5347_v37  ;;  %v5356_v30 = vshll.u32 %v14330_v27, %v5347_v37  ;;  %v5346_v47 = vshrl.u32 %v5345_v22, 5 }
 0x321   :  { %v11106_v1 = vsub.s32 %v5185_v21, %v5188_v63  ;;  %v5351_v41 = vshrl.u32 %v14329_v38, %v5348_v29  ;;  %v5354_v2 = vshrl.u32 %v14330_v27, %v5348_v29  ;;  %v5357_v46 = vshrl.u32 %v14331_v34, %v5348_v29 }
 0x322   :  { %v5105_v40 = vxor.u32 2147483648, %v5104_v48  ;;  %v5360_v12 = vshrl.u32 %v14332_v8, %v5348_v29  ;;  %v5359_v56 = vshll.u32 %v14331_v34, %v5347_v37  ;;  %v5362_v57 = vshll.u32 %v14332_v8, %v5347_v37 }
 0x323   :  { %v5191_v59 = vsub.s32 0, %v11106_v1  ;;  %v5352_v6 = vor.u32 %v5351_v41, %v5350_v28  ;;  %v5355_v42 = vor.u32 %v5354_v2, %v5353_v50  ;;  %v5358_v21 = vor.u32 %v5357_v46, %v5356_v30  ;;  %v1122_v46 = vpop.f32.mrf.mxu0 }
 0x324   :  { %v5106_v52 = vsel %vm5023_vm4, %v5105_v40, %v5104_v48  ;;  %v5361_v18 = vor.u32 %v5360_v12, %v5359_v56  ;;  %v5363_v25 = vshrl.u32 %v14333_v7, %v5348_v29  ;;  %v11126_v3 = vshll.u32 %v5341_v58, 8 }
 0x325   :  { %v5109_v19 = vsel %vm11054_vm5, %v10849_v9, %v5106_v52  ;;  %v7737_v10 = vmin.u32 %v5191_v59, %v11106_v1  ;;  %v5441_v24 = vshrl.u32 %v5440_v43, 23  ;;  %v5211_v11 = vsub.s32 4, %v11092_v53 }
 0x326   :  { %8386 = vcosq.f32 %v5109_v19  ;;  %v5349_v14 = vshrl.u32 %v14328_v13, %v5348_v29  ;;  %v5364_v23 = vor.u32 %v5363_v25, %v5362_v57  ;;  %vm5365_vm15 = vcmp.lt.s32.totalorder %v5346_v47, 1 }
 0x327   :  { %8388 = vsinq.f32 %v5109_v19  ;;  %v5193_v44 = vclz %v7737_v10  ;;  %vm5367_vm0 = vcmp.lt.s32.totalorder %v5346_v47, 3  ;;  %vm5368_vm1 = vcmp.lt.s32.totalorder %v5346_v47, 4  ;;  %v14381_v10 = vld [vmem:[#allocation19_spill] sm:$0xff] }
 0x328   :  { %v5373_v22 = vsel %vm5365_vm15, %v5352_v6, %v5355_v42  ;;  %vm5127_vm2 = vcmp.lt.s32.totalorder %v10894_v39, 0  ;;  %v5370_v15 = vsel %vm5368_vm1, %v5358_v21, 2102212464  ;;  %v5374_v37 = vsel %vm5368_vm1, %v5361_v18, 920167782 }
 0x329   :  { %v7738_v26 = vadd.s32 4294967294, %v5193_v44  ;;  %v5377_v51 = vsel %vm5365_vm15, %v5355_v42, %v5358_v21  ;;  %v5378_v32 = vsel %vm5368_vm1, %v5364_v23, 1326507024  ;;  %vm5366_vm4 = vcmp.lt.s32.totalorder %v5346_v47, 2 }
 0x32a   :  { %v5375_v33 = vsel %vm5367_vm0, %v5358_v21, %v5374_v37  ;;  %v5379_v63 = vsel %vm5367_vm0, %v5361_v18, %v5378_v32  ;;  %v5369_v48 = vsel %vm5365_vm15, %v5349_v14, %v5352_v6  ;;  %vm11140_vm5 = vcmp.le.f32.partialorder %v5125_v49, 0.7853982  ;;  %v14382_v18 = vld [vmem:[#allocation21_spill] sm:$0xff] }
 0x32b   :  { %vm7739_vm3 = vcmp.lt.s32.totalorder %v7738_v26, 0  ;;  %v5376_v58 = vsel %vm5366_vm4, %v5373_v22, %v5375_v33  ;;  %v5380_v41 = vsel %vm5366_vm4, %v5377_v51, %v5379_v63  ;;  %v5371_v2 = vsel %vm5367_vm0, %v5355_v42, %v5370_v15 }
 0x32c   :  { %v5196_v29 = vsel %vm7739_vm3, 0, %v7738_v26  ;;  %v7748_v59 = vadd.s32 4294967169, %v5441_v24  ;;  %v11146_v50 = vmul.u32.u64.low %v11126_v3, %v5380_v41  ;;  %v11147_v30 = vmul.u32.u64.high %v11126_v3, %v5380_v41, %v11146_v50 }
 0x32d   :  { %v5197_v40 = vsub.s32 32, %v5196_v29  ;;  %v5201_v28 = vsub.s32 4294967266, %v5196_v29  ;;  %v11150_v12 = vmul.u32.u64.low %v11126_v3, %v5376_v58  ;;  %v11151_v52 = vmul.u32.u64.high %v11126_v3, %v5376_v58, %v11150_v12 }
 0x32e   :  { %v5198_v49 = vshll.u32 %v11106_v1, %v5196_v29  ;;  %v5447_v19 = vadd.s32 1, %v7748_v59  ;;  %vm5113_vm7 = vweird.f32 %v10849_v9  ;;  %vm5116_vm8 = vcmp.lt.s32.totalorder %v11101_v60, 2 }
 0x32f   :  { %v5199_v6 = vshrl.u32 %v5181_v31, %v5197_v40  ;;  %v5202_v56 = vadd.s32 127, %v5201_v28  ;;  %v11158_v42 = vadd.f32 %v1120_v4, %v14381_v10  ;;  %v5372_v21 = vsel %vm5366_vm4, %v5369_v48, %v5371_v2 }
 0x330   :  { %v11162_v57 = vadd.f32 %v1122_v46, %v14382_v18  ;;  %vm5117_vm9 = vcmp.eq.s32.totalorder %v11101_v60, 0  ;;  %vm5448_vm10 = vcmp.gt.s32.totalorder %v5447_v19, 0  ;;  %vm5390_vm11 = vc.u32 %v11147_v30, %v11150_v12 }
 0x331   :  { %v5200_v25 = vor.u32 %v5199_v6, %v5198_v49  ;;  %v5203_v44 = vshll.u32 %v5202_v56, 23  ;;  %v5391_v31 = vadd.s32 1, %v11151_v52  ;;  %v5444_v1 = vand.u32 8388607, %v5437_v55 }
 0x332   :  { %v5449_v24 = vsel %vm5448_vm10, %v5447_v19, 0  ;;  %v5212_v23 = vsel %vm5127_vm2, %v5211_v11, %v11092_v53  ;;  %v5388_v26 = vmul.u32 %v11126_v3, %v5372_v21  ;;  %vm5120_vm12 = vcmp.eq.s32.totalorder %v11101_v60, 2 }
 0x333   :  { %v8387_v14 = vpop.eup %8386  ;;  %v5204_v47 = vor.u32 4788187, %v5203_v44  ;;  %v5451_v4 = vand.u32 31, %v5449_v24  ;;  %v5207_v37 = vcvt.s32.f32 %v5200_v25  ;;  %v5392_v51 = vsel %vm5390_vm11, %v5391_v31, %v11151_v52  ;;  %v1303_v31 = vpop.f32.mrf.mxu1 }
 0x334   :  { %v8389_v22 = vpop.eup %8388  ;;  %v5121_v15 = vxor.u32 2147483648, %v8387_v14  ;;  %v5393_v63 = vadd.s32 %v5392_v51, %v5388_v26  ;;  %v5214_v58 = vsel %vm11140_vm5, 0, %v5212_v23  ;;  %v5445_v41 = vor.u32 8388608, %v5444_v1 }
 0x335   :  { %v5118_v32 = vxor.u32 2147483648, %v8389_v22  ;;  %v5205_v33 = vand.u32 2147483647, %v5204_v47  ;;  %v5452_v29 = vsub.s32 32, %v5451_v4  ;;  %v11178_v53 = vshrl.u32 %v5449_v24, 5 }
 0x336   :  { %v5122_v48 = vsel %vm5120_vm12, %v5121_v15, %v8389_v22  ;;  %v5394_v40 = vadd.s32 536870912, %v5393_v63  ;;  %v5454_v28 = vshll.u32 %v14328_v13, %v5451_v4  ;;  %v5457_v56 = vshll.u32 %v14329_v38, %v5451_v4 }
 0x337   :  { %v5119_v3 = vsel %vm5117_vm9, %v8387_v14, %v5118_v32  ;;  %v5208_v11 = vmul.f32 %v5207_v37, %v5205_v33  ;;  %v5455_v46 = vshrl.u32 %v14329_v38, %v5452_v29  ;;  %v5458_v59 = vshrl.u32 %v14330_v27, %v5452_v29 }
 0x338   :  { %v5123_v2 = vsel %vm5116_vm8, %v5119_v3, %v5122_v48  ;;  %v5461_v50 = vshrl.u32 %v14331_v34, %v5452_v29  ;;  %v5395_v6 = vshrl.u32 %v5394_v40, 30  ;;  %v5460_v60 = vshll.u32 %v14330_v27, %v5451_v4 }
 0x339   :  { %v5124_v52 = vsel %vm5113_vm7, nan, %v5123_v2  ;;  %v5209_v49 = vxor.u32 2147483648, %v5208_v11  ;;  %v5456_v10 = vor.u32 %v5455_v46, %v5454_v28  ;;  %v5463_v21 = vshll.u32 %v14331_v34, %v5451_v4 }
 0x33a   :  { %v7559_v19 = vsel %vm7532_vm14, %v10830_v61, %v5124_v52  ;;  %v5396_v18 = vshll.u32 %v5395_v6, 30  ;;  %v5459_v25 = vor.u32 %v5458_v59, %v5457_v56  ;;  %v5464_v44 = vshrl.u32 %v14332_v8, %v5452_v29  ;;  %v1305_v52 = vpop.f32.mrf.mxu1 }
 0x33b   :  { %7608 = vst [vmem:[%s14171_s4 + $0xc0] sm:$0xff] %v7559_v19  ;;  %v5210_v9 = vsel %vm5127_vm2, %v5209_v49, %v5208_v11  ;;  %v5462_v1 = vor.u32 %v5461_v50, %v5460_v60  ;;  %v5466_v24 = vshll.u32 %v14332_v8, %v5451_v4  ;;  %v5467_v14 = vshrl.u32 %v14333_v7, %v5452_v29 }
 0x33c   :  { %v5213_v61 = vsel %vm11140_vm5, %v10894_v39, %v5210_v9  ;;  %v5218_v47 = vadd.s32 3, %v5214_v58  ;;  %v11207_v23 = vsub.s32 %v5393_v63, %v5396_v18  ;;  %v5465_v26 = vor.u32 %v5464_v44, %v5463_v21 }
 0x33d   :  { %8390 = vcosq.f32 %v5213_v61  ;;  %v5468_v22 = vor.u32 %v5467_v14, %v5466_v24  ;;  %v5485_v15 = vshll.u32 %v5445_v41, 8  ;;  %v11210_v37 = vadd.f32 %v1303_v31, %v11158_v42 }
 0x33e   :  { %8392 = vsinq.f32 %v5213_v61  ;;  %v5399_v51 = vsub.s32 0, %v11207_v23  ;;  %v5453_v43 = vshrl.u32 %v14328_v13, %v5452_v29  ;;  %vm5469_vm13 = vcmp.lt.s32.totalorder %v11178_v53, 1 }
 0x33f   :  { %vm5472_vm15 = vcmp.lt.s32.totalorder %v11178_v53, 4  ;;  %vm5471_vm0 = vcmp.lt.s32.totalorder %v11178_v53, 3  ;;  %v5477_v32 = vsel %vm5469_vm13, %v5456_v10, %v5459_v25  ;;  %v5419_v48 = vsub.s32 4, %v5395_v6 }
 0x340   :  { %v5474_v4 = vsel %vm5472_vm15, %v5462_v1, 2102212464  ;;  %v5478_v33 = vsel %vm5472_vm15, %v5465_v26, 920167782  ;;  %v7745_v63 = vmin.u32 %v5399_v51, %v11207_v23  ;;  %vm5470_vm1 = vcmp.lt.s32.totalorder %v11178_v53, 2 }
 0x341   :  { %v5479_v42 = vsel %vm5471_vm0, %v5462_v1, %v5478_v33  ;;  %v5481_v58 = vsel %vm5469_vm13, %v5459_v25, %v5462_v1  ;;  %v5482_v41 = vsel %vm5472_vm15, %v5468_v22, 1326507024  ;;  %v11229_v3 = vadd.f32 %v9446_v45, %v11210_v37 }
 0x342   :  { %v5480_v29 = vsel %vm5470_vm1, %v5477_v32, %v5479_v42  ;;  %v5219_v11 = vand.u32 3, %v5218_v47  ;;  %v5401_v40 = vclz %v7745_v63  ;;  %v5473_v28 = vsel %vm5469_vm13, %v5453_v43, %v5456_v10 }
 0x343   :  { %v5475_v2 = vsel %vm5471_vm0, %v5459_v25, %v5474_v4  ;;  %vm5335_vm2 = vcmp.lt.s32.totalorder %v11039_v17, 0  ;;  %v5483_v46 = vsel %vm5471_vm0, %v5465_v26, %v5482_v41  ;;  %vm11244_vm3 = vcmp.le.f32.partialorder %v5333_v36, 0.7853982 }
 0x344   :  { %v11238_v59 = vmul.u32.u64.low %v5485_v15, %v5480_v29  ;;  %v11239_v50 = vmul.u32.u64.high %v5485_v15, %v5480_v29, %v11238_v59  ;;  %v7746_v56 = vadd.s32 4294967294, %v5401_v40  ;;  %v5420_v19 = vsel %vm5335_vm2, %v5419_v48, %v5395_v6 }
 0x345   :  { %v5484_v10 = vsel %vm5470_vm1, %v5481_v58, %v5483_v46  ;;  %v5476_v60 = vsel %vm5470_vm1, %v5473_v28, %v5475_v2  ;;  %v5648_v18 = vand.u32 2139095040, %v11229_v3  ;;  %vm5217_vm4 = vweird.f32 %v10894_v39 }
 0x346   :  { %v11254_v21 = vmul.u32.u64.low %v5485_v15, %v5484_v10  ;;  %v11255_v9 = vmul.u32.u64.high %v5485_v15, %v5484_v10, %v11254_v21  ;;  %vm5220_vm5 = vcmp.lt.s32.totalorder %v5219_v11, 2  ;;  %vm5221_vm7 = vcmp.eq.s32.totalorder %v5219_v11, 0 }
 0x347   :  { %vm7747_vm8 = vcmp.lt.s32.totalorder %v7746_v56, 0  ;;  %v11260_v36 = vadd.f32 %v1305_v52, %v11162_v57  ;;  %v5389_v6 = vadd.s32 %v11150_v12, %v11147_v30  ;;  %v5495_v53 = vadd.s32 1, %v11239_v50 }
 0x348   :  { %v5404_v25 = vsel %vm7747_vm8, 0, %v7746_v56  ;;  %v5649_v44 = vshrl.u32 %v5648_v18, 23  ;;  %v5422_v1 = vsel %vm11244_vm3, 0, %v5420_v19  ;;  %v5492_v24 = vmul.u32 %v5485_v15, %v5476_v60 }
 0x349   :  { %v5405_v31 = vsub.s32 32, %v5404_v25  ;;  %v5409_v61 = vsub.s32 4294967266, %v5404_v25  ;;  %v5406_v47 = vshll.u32 %v11207_v23, %v5404_v25  ;;  %vm5494_vm9 = vc.u32 %v11255_v9, %v11238_v59 }
 0x34a   :  { %v8391_v14 = vpop.eup %8390  ;;  %v5645_v57 = vand.u32 2147483647, %v11229_v3  ;;  %v7756_v26 = vadd.s32 4294967169, %v5649_v44  ;;  %v5496_v43 = vsel %vm5494_vm9, %v5495_v53, %v11239_v50  ;;  %vm5224_vm10 = vcmp.eq.s32.totalorder %v5219_v11, 2 }
 0x34b   :  { %v8393_v30 = vpop.eup %8392  ;;  %v5225_v12 = vxor.u32 2147483648, %v8391_v14  ;;  %v5407_v22 = vshrl.u32 %v5389_v6, %v5405_v31  ;;  %v5410_v51 = vadd.s32 127, %v5409_v61  ;;  %v5497_v32 = vadd.s32 %v5496_v43, %v5492_v24 }
 0x34c   :  { %v5222_v4 = vxor.u32 2147483648, %v8393_v30  ;;  %v5655_v33 = vadd.s32 1, %v7756_v26  ;;  %v11274_v23 = vadd.f32 %v9453_v54, %v11260_v36  ;;  %v5426_v29 = vadd.s32 3, %v5422_v1 }
 0x34d   :  { %v5226_v15 = vsel %vm5224_vm10, %v5225_v12, %v8393_v30  ;;  %v5408_v63 = vor.u32 %v5407_v22, %v5406_v47  ;;  %v5411_v48 = vshll.u32 %v5410_v51, 23  ;;  %v5498_v58 = vadd.s32 536870912, %v5497_v32 }
 0x34e   :  { %v5223_v42 = vsel %vm5221_vm7, %v8391_v14, %v5222_v4  ;;  %vm5656_vm11 = vcmp.gt.s32.totalorder %v5655_v33, 0  ;;  %v5652_v28 = vand.u32 8388607, %v5645_v57  ;;  %v11291_v18 = vand.u32 3, %v5426_v29 }
 0x34f   :  { %v5227_v41 = vsel %vm5220_vm5, %v5223_v42, %v5226_v15  ;;  %v5412_v40 = vor.u32 4788187, %v5411_v48  ;;  %v5657_v2 = vsel %vm5656_vm11, %v5655_v33, 0  ;;  %v11282_v50 = vshrl.u32 %v5498_v58, 30 }
 0x350   :  { %v5228_v46 = vsel %vm5217_vm4, nan, %v5227_v41  ;;  %v5659_v52 = vand.u32 31, %v5657_v2  ;;  %v5415_v10 = vcvt.s32.f32 %v5408_v63  ;;  %v5653_v39 = vor.u32 8388608, %v5652_v28  ;;  %v1127_v28 = vpop.f32.mrf.mxu0 }
 0x351   :  { %v7560_v56 = vsel %vm7533_vm6, %v10880_v0, %v5228_v46  ;;  %v5413_v19 = vand.u32 2147483647, %v5412_v40  ;;  %v5500_v11 = vshll.u32 %v11282_v50, 30  ;;  %v5749_v6 = vand.u32 2147483647, %v11274_v23 }
 0x352   :  { %7609 = vst [vmem:[%s14171_s4 + $0xc8] sm:$0xff] %v7560_v56  ;;  %v5660_v60 = vsub.s32 32, %v5659_v52  ;;  %v5493_v25 = vadd.s32 %v11238_v59, %v11255_v9  ;;  %v5752_v44 = vand.u32 2139095040, %v11274_v23  ;;  %v5662_v61 = vshll.u32 %v14328_v13, %v5659_v52 }
 0x353   :  { %v5416_v21 = vmul.f32 %v5415_v10, %v5413_v19  ;;  %v11296_v53 = vsub.s32 %v5497_v32, %v5500_v11  ;;  %v5665_v47 = vshll.u32 %v14329_v38, %v5659_v52  ;;  %v5668_v26 = vshll.u32 %v14330_v27, %v5659_v52 }
 0x354   :  { %v5663_v0 = vshrl.u32 %v14329_v38, %v5660_v60  ;;  %v5666_v1 = vshrl.u32 %v14330_v27, %v5660_v60  ;;  %v5669_v24 = vshrl.u32 %v14331_v34, %v5660_v60  ;;  %v5672_v59 = vshrl.u32 %v14332_v8, %v5660_v60 }
 0x355   :  { %v5417_v31 = vxor.u32 2147483648, %v5416_v21  ;;  %v5503_v14 = vsub.s32 0, %v11296_v53  ;;  %v5658_v30 = vshrl.u32 %v5657_v2, 5  ;;  %v5671_v22 = vshll.u32 %v14331_v34, %v5659_v52 }
 0x356   :  { %v5664_v12 = vor.u32 %v5663_v0, %v5662_v61  ;;  %v5667_v4 = vor.u32 %v5666_v1, %v5665_v47  ;;  %v5670_v32 = vor.u32 %v5669_v24, %v5668_v26  ;;  %v5674_v15 = vshll.u32 %v14332_v8, %v5659_v52  ;;  %v1129_v24 = vpop.f32.mrf.mxu0 }
 0x357   :  { %v5418_v9 = vsel %vm5335_vm2, %v5417_v31, %v5416_v21  ;;  %v7749_v43 = vmin.u32 %v5503_v14, %v11296_v53  ;;  %v5673_v33 = vor.u32 %v5672_v59, %v5671_v22  ;;  %v5675_v63 = vshrl.u32 %v14333_v7, %v5660_v60 }
 0x358   :  { %v5421_v51 = vsel %vm11244_vm3, %v11039_v17, %v5418_v9  ;;  %v11316_v42 = vshll.u32 %v5653_v39, 8  ;;  %v5753_v29 = vshrl.u32 %v5752_v44, 23  ;;  %v5523_v58 = vsub.s32 4, %v11282_v50 }
 0x359   :  { %8394 = vcosq.f32 %v5421_v51  ;;  %v5505_v48 = vclz %v7749_v43  ;;  %v5661_v49 = vshrl.u32 %v14328_v13, %v5660_v60  ;;  %v5676_v41 = vor.u32 %v5675_v63, %v5674_v15  ;;  %v14387_v43 = vld [vmem:[#allocation22_spill] sm:$0xff] }
 0x35a   :  { %8396 = vsinq.f32 %v5421_v51  ;;  %vm5677_vm12 = vcmp.lt.s32.totalorder %v5658_v30, 1  ;;  %vm5679_vm13 = vcmp.lt.s32.totalorder %v5658_v30, 3  ;;  %vm5680_vm15 = vcmp.lt.s32.totalorder %v5658_v30, 4 }
 0x35b   :  { %v7750_v40 = vadd.s32 4294967294, %v5505_v48  ;;  %v5685_v2 = vsel %vm5677_vm12, %v5664_v12, %v5667_v4  ;;  %vm5439_vm0 = vcmp.lt.s32.totalorder %v11084_v35, 0  ;;  %v5682_v46 = vsel %vm5680_vm15, %v5670_v32, 2102212464 }
 0x35c   :  { %v5686_v52 = vsel %vm5680_vm15, %v5673_v33, 920167782  ;;  %v5689_v56 = vsel %vm5677_vm12, %v5667_v4, %v5670_v32  ;;  %v5690_v19 = vsel %vm5680_vm15, %v5676_v41, 1326507024  ;;  %vm5678_vm2 = vcmp.lt.s32.totalorder %v5658_v30, 2 }
 0x35d   :  { %vm7751_vm1 = vcmp.lt.s32.totalorder %v7750_v40, 0  ;;  %v5687_v10 = vsel %vm5679_vm13, %v5670_v32, %v5686_v52  ;;  %v5691_v11 = vsel %vm5679_vm13, %v5673_v33, %v5690_v19  ;;  %v5681_v21 = vsel %vm5677_vm12, %v5661_v49, %v5664_v12  ;;  %v14388_v33 = vld [vmem:[#allocation23_spill] sm:$0xff] }
 0x35e   :  { %v5508_v60 = vsel %vm7751_vm1, 0, %v7750_v40  ;;  %v5688_v39 = vsel %vm5678_vm2, %v5685_v2, %v5687_v10  ;;  %v5692_v0 = vsel %vm5678_vm2, %v5689_v56, %v5691_v11  ;;  %vm11330_vm3 = vcmp.le.f32.partialorder %v5437_v55, 0.7853982 }
 0x35f   :  { %v5509_v31 = vsub.s32 32, %v5508_v60  ;;  %v5513_v61 = vsub.s32 4294967266, %v5508_v60  ;;  %v5683_v1 = vsel %vm5679_vm13, %v5667_v4, %v5682_v46  ;;  %v7760_v14 = vadd.s32 4294967169, %v5753_v29 }
 0x360   :  { %v11336_v47 = vmul.u32.u64.low %v11316_v42, %v5692_v0  ;;  %v11337_v26 = vmul.u32.u64.high %v11316_v42, %v5692_v0, %v11336_v47  ;;  %v11340_v59 = vmul.u32.u64.low %v11316_v42, %v5688_v39  ;;  %v11341_v9 = vmul.u32.u64.high %v11316_v42, %v5688_v39, %v11340_v59 }
 0x361   :  { %v5510_v55 = vshll.u32 %v11296_v53, %v5508_v60  ;;  %v5511_v12 = vshrl.u32 %v5493_v25, %v5509_v31  ;;  %v5514_v22 = vadd.s32 127, %v5513_v61  ;;  %v5759_v51 = vadd.s32 1, %v7760_v14 }
 0x362   :  { %vm5425_vm4 = vweird.f32 %v11039_v17  ;;  %vm5428_vm5 = vcmp.lt.s32.totalorder %v11291_v18, 2  ;;  %v11348_v4 = vadd.f32 %v1127_v28, %v14387_v43  ;;  %v5684_v32 = vsel %vm5678_vm2, %v5681_v21, %v5683_v1 }
 0x363   :  { %v11352_v15 = vadd.f32 %v1129_v24, %v14388_v33  ;;  %vm5429_vm7 = vcmp.eq.s32.totalorder %v11291_v18, 0  ;;  %v5512_v63 = vor.u32 %v5511_v12, %v5510_v55  ;;  %v5515_v48 = vshll.u32 %v5514_v22, 23 }
 0x364   :  { %vm5760_vm8 = vcmp.gt.s32.totalorder %v5759_v51, 0  ;;  %vm5702_vm9 = vc.u32 %v11337_v26, %v11340_v59  ;;  %v5703_v25 = vadd.s32 1, %v11341_v9  ;;  %v5756_v53 = vand.u32 8388607, %v5749_v6 }
 0x365   :  { %v5761_v29 = vsel %vm5760_vm8, %v5759_v51, 0  ;;  %v5516_v30 = vor.u32 4788187, %v5515_v48  ;;  %v5524_v41 = vsel %vm5439_vm0, %v5523_v58, %v11282_v50  ;;  %v5700_v40 = vmul.u32 %v11316_v42, %v5684_v32 }
 0x366   :  { %v8395_v49 = vpop.eup %8394  ;;  %v5763_v28 = vand.u32 31, %v5761_v29  ;;  %vm5432_vm10 = vcmp.eq.s32.totalorder %v11291_v18, 2  ;;  %v5519_v52 = vcvt.s32.f32 %v5512_v63  ;;  %v5704_v56 = vsel %vm5702_vm9, %v5703_v25, %v11341_v9  ;;  %v1310_v25 = vpop.f32.mrf.mxu1 }
 0x367   :  { %v8397_v2 = vpop.eup %8396  ;;  %v5433_v46 = vxor.u32 2147483648, %v8395_v49  ;;  %v5517_v10 = vand.u32 2147483647, %v5516_v30  ;;  %v5705_v11 = vadd.s32 %v5704_v56, %v5700_v40  ;;  %v5526_v39 = vsel %vm11330_vm3, 0, %v5524_v41 }
 0x368   :  { %v5430_v19 = vxor.u32 2147483648, %v8397_v2  ;;  %v5764_v60 = vsub.s32 32, %v5763_v28  ;;  %v5757_v0 = vor.u32 8388608, %v5756_v53  ;;  %v11368_v50 = vshrl.u32 %v5761_v29, 5 }
 0x369   :  { %v5434_v21 = vsel %vm5432_vm10, %v5433_v46, %v8397_v2  ;;  %v5520_v58 = vmul.f32 %v5519_v52, %v5517_v10  ;;  %v5706_v31 = vadd.s32 536870912, %v5705_v11  ;;  %v5766_v61 = vshll.u32 %v14328_v13, %v5763_v28 }
 0x36a   :  { %v5431_v42 = vsel %vm5429_vm7, %v8395_v49, %v5430_v19  ;;  %v5767_v24 = vshrl.u32 %v14329_v38, %v5764_v60  ;;  %v5770_v14 = vshrl.u32 %v14330_v27, %v5764_v60  ;;  %v5773_v47 = vshrl.u32 %v14331_v34, %v5764_v60 }
 0x36b   :  { %v5435_v1 = vsel %vm5428_vm5, %v5431_v42, %v5434_v21  ;;  %v5521_v55 = vxor.u32 2147483648, %v5520_v58  ;;  %v5707_v12 = vshrl.u32 %v5706_v31, 30  ;;  %v5769_v22 = vshll.u32 %v14329_v38, %v5763_v28 }
 0x36c   :  { %v5436_v9 = vsel %vm5425_vm4, nan, %v5435_v1  ;;  %v5768_v43 = vor.u32 %v5767_v24, %v5766_v61  ;;  %v5772_v18 = vshll.u32 %v14330_v27, %v5763_v28  ;;  %v5775_v32 = vshll.u32 %v14331_v34, %v5763_v28 }
 0x36d   :  { %v7562_v51 = vsel %vm7532_vm14, %v11020_v20, %v5436_v9  ;;  %v5522_v17 = vsel %vm5439_vm0, %v5521_v55, %v5520_v58  ;;  %v5708_v33 = vshll.u32 %v5707_v12, 30  ;;  %v5771_v63 = vor.u32 %v5770_v14, %v5769_v22  ;;  %v1312_v9 = vpop.f32.mrf.mxu1 }
 0x36e   :  { %7611 = vst [vmem:[%s14171_s4 + $0xd8] sm:$0xff] %v7562_v51  ;;  %v5776_v48 = vshrl.u32 %v14332_v8, %v5764_v60  ;;  %v5525_v20 = vsel %vm11330_vm3, %v11084_v35, %v5522_v17  ;;  %v5774_v53 = vor.u32 %v5773_v47, %v5772_v18  ;;  %v5778_v29 = vshll.u32 %v14332_v8, %v5763_v28 }
 0x36f   :  { %v5779_v49 = vshrl.u32 %v14333_v7, %v5764_v60  ;;  %8398 = vcosq.f32 %v5525_v20  ;;  %v5530_v30 = vadd.s32 3, %v5526_v39  ;;  %v11397_v41 = vsub.s32 %v5705_v11, %v5708_v33 }
 0x370   :  { %v5777_v40 = vor.u32 %v5776_v48, %v5775_v32  ;;  %8400 = vsinq.f32 %v5525_v20  ;;  %v5797_v46 = vshll.u32 %v5757_v0, 8  ;;  %v11400_v52 = vadd.f32 %v1310_v25, %v11348_v4 }
 0x371   :  { %v5780_v2 = vor.u32 %v5779_v49, %v5778_v29  ;;  %v5711_v56 = vsub.s32 0, %v11397_v41  ;;  %v5765_v44 = vshrl.u32 %v14328_v13, %v5764_v60  ;;  %vm5781_vm11 = vcmp.lt.s32.totalorder %v11368_v50, 1 }
 0x372   :  { %vm5784_vm12 = vcmp.lt.s32.totalorder %v11368_v50, 4  ;;  %vm5783_vm13 = vcmp.lt.s32.totalorder %v11368_v50, 3  ;;  %v5789_v19 = vsel %vm5781_vm11, %v5768_v43, %v5771_v63  ;;  %v5731_v21 = vsub.s32 4, %v5707_v12 }
 0x373   :  { %v5786_v28 = vsel %vm5784_vm12, %v5774_v53, 2102212464  ;;  %v5790_v10 = vsel %vm5784_vm12, %v5777_v40, 920167782  ;;  %v7757_v11 = vmin.u32 %v5711_v56, %v11397_v41  ;;  %vm5782_vm15 = vcmp.lt.s32.totalorder %v11368_v50, 2 }
 0x374   :  { %v5791_v4 = vsel %vm5783_vm13, %v5774_v53, %v5790_v10  ;;  %v5793_v39 = vsel %vm5781_vm11, %v5771_v63, %v5774_v53  ;;  %v5794_v0 = vsel %vm5784_vm12, %v5780_v2, 1326507024  ;;  %v11419_v42 = vadd.f32 %v9446_v45, %v11400_v52 }
 0x375   :  { %v5792_v60 = vsel %vm5782_vm15, %v5789_v19, %v5791_v4  ;;  %v5531_v58 = vand.u32 3, %v5530_v30  ;;  %v5713_v31 = vclz %v7757_v11  ;;  %v5785_v61 = vsel %vm5781_vm11, %v5765_v44, %v5768_v43 }
 0x376   :  { %v5787_v1 = vsel %vm5783_vm13, %v5771_v63, %v5786_v28  ;;  %vm5647_vm0 = vcmp.lt.s32.totalorder %v11229_v3, 0  ;;  %v5795_v24 = vsel %vm5783_vm13, %v5777_v40, %v5794_v0  ;;  %vm11434_vm1 = vcmp.le.f32.partialorder %v5645_v57, 0.7853982 }
 0x377   :  { %v11428_v14 = vmul.u32.u64.low %v5797_v46, %v5792_v60  ;;  %v11429_v47 = vmul.u32.u64.high %v5797_v46, %v5792_v60, %v11428_v14  ;;  %v7758_v22 = vadd.s32 4294967294, %v5713_v31  ;;  %v5732_v51 = vsel %vm5647_vm0, %v5731_v21, %v5707_v12 }
 0x378   :  { %v5796_v43 = vsel %vm5782_vm15, %v5793_v39, %v5795_v24  ;;  %v5788_v18 = vsel %vm5782_vm15, %v5785_v61, %v5787_v1  ;;  %v5960_v33 = vand.u32 2139095040, %v11419_v42  ;;  %vm5529_vm2 = vweird.f32 %v11084_v35 }
 0x379   :  { %v11444_v32 = vmul.u32.u64.low %v5797_v46, %v5796_v43  ;;  %v11445_v17 = vmul.u32.u64.high %v5797_v46, %v5796_v43, %v11444_v32  ;;  %vm5532_vm3 = vcmp.lt.s32.totalorder %v5531_v58, 2  ;;  %vm5533_vm4 = vcmp.eq.s32.totalorder %v5531_v58, 0 }
 0x37a   :  { %vm7759_vm5 = vcmp.lt.s32.totalorder %v7758_v22, 0  ;;  %v11450_v57 = vadd.f32 %v1312_v9, %v11352_v15  ;;  %v5701_v12 = vadd.s32 %v11340_v59, %v11337_v26  ;;  %v5807_v50 = vadd.s32 1, %v11429_v47 }
 0x37b   :  { %v5716_v63 = vsel %vm7759_vm5, 0, %v7758_v22  ;;  %v5961_v48 = vshrl.u32 %v5960_v33, 23  ;;  %v5734_v53 = vsel %vm11434_vm1, 0, %v5732_v51  ;;  %v5804_v29 = vmul.u32 %v5797_v46, %v5788_v18 }
 0x37c   :  { %v5717_v25 = vsub.s32 32, %v5716_v63  ;;  %v5721_v20 = vsub.s32 4294967266, %v5716_v63  ;;  %v8399_v49 = vpop.eup %8398  ;;  %v5718_v30 = vshll.u32 %v11397_v41, %v5716_v63  ;;  %vm5806_vm7 = vc.u32 %v11445_v17, %v11428_v14 }
 0x37d   :  { %v5957_v15 = vand.u32 2147483647, %v11419_v42  ;;  %v7768_v40 = vadd.s32 4294967169, %v5961_v48  ;;  %v8401_v26 = vpop.eup %8400  ;;  %v5537_v59 = vxor.u32 2147483648, %v8399_v49  ;;  %v5808_v44 = vsel %vm5806_vm7, %v5807_v50, %v11429_v47 }
 0x37e   :  { %v5719_v2 = vshrl.u32 %v5701_v12, %v5717_v25  ;;  %v5722_v56 = vadd.s32 127, %v5721_v20  ;;  %v5534_v28 = vxor.u32 2147483648, %v8401_v26  ;;  %vm5536_vm8 = vcmp.eq.s32.totalorder %v5531_v58, 2 }
 0x37f   :  { %v5809_v19 = vadd.s32 %v5808_v44, %v5804_v29  ;;  %v5967_v10 = vadd.s32 1, %v7768_v40  ;;  %v5538_v46 = vsel %vm5536_vm8, %v5537_v59, %v8401_v26  ;;  %v11464_v41 = vadd.f32 %v9453_v54, %v11450_v57 }
 0x380   :  { %v5720_v11 = vor.u32 %v5719_v2, %v5718_v30  ;;  %v5723_v21 = vshll.u32 %v5722_v56, 23  ;;  %v5535_v4 = vsel %vm5533_vm4, %v8399_v49, %v5534_v28  ;;  %v5738_v60 = vadd.s32 3, %v5734_v53 }
 0x381   :  { %v5810_v39 = vadd.s32 536870912, %v5809_v19  ;;  %vm5968_vm9 = vcmp.gt.s32.totalorder %v5967_v10, 0  ;;  %v5539_v0 = vsel %vm5532_vm3, %v5535_v4, %v5538_v46  ;;  %v5964_v61 = vand.u32 8388607, %v5957_v15 }
 0x382   :  { %v5724_v31 = vor.u32 4788187, %v5723_v21  ;;  %v5969_v1 = vsel %vm5968_vm9, %v5967_v10, 0  ;;  %v5540_v24 = vsel %vm5529_vm2, nan, %v5539_v0  ;;  %v5727_v43 = vcvt.s32.f32 %v5720_v11 }
 0x383   :  { %v11472_v47 = vshrl.u32 %v5810_v39, 30  ;;  %v5971_v9 = vand.u32 31, %v5969_v1  ;;  %v7563_v22 = vsel %vm7533_vm6, %v11070_v16, %v5540_v24  ;;  %v11481_v33 = vand.u32 3, %v5738_v60 }
 0x384   :  { %v5725_v51 = vand.u32 2147483647, %v5724_v31  ;;  %7612 = vst [vmem:[%s14171_s4 + $0xe0] sm:$0xff] %v7563_v22  ;;  %v5965_v35 = vor.u32 8388608, %v5964_v61  ;;  %v6061_v12 = vand.u32 2147483647, %v11464_v41  ;;  %v5805_v63 = vadd.s32 %v11428_v14, %v11445_v17  ;;  %v1134_v61 = vpop.f32.mrf.mxu0 }
 0x385   :  { %v5812_v58 = vshll.u32 %v11472_v47, 30  ;;  %v5972_v18 = vsub.s32 32, %v5971_v9  ;;  %v6064_v48 = vand.u32 2139095040, %v11464_v41  ;;  %v5974_v20 = vshll.u32 %v14328_v13, %v5971_v9 }
 0x386   :  { %v5728_v32 = vmul.f32 %v5727_v43, %v5725_v51  ;;  %v5977_v30 = vshll.u32 %v14329_v38, %v5971_v9  ;;  %v5980_v40 = vshll.u32 %v14330_v27, %v5971_v9  ;;  %v5970_v26 = vshrl.u32 %v5969_v1, 5 }
 0x387   :  { %v11486_v50 = vsub.s32 %v5809_v19, %v5812_v58  ;;  %v5975_v16 = vshrl.u32 %v14329_v38, %v5972_v18  ;;  %v5978_v53 = vshrl.u32 %v14330_v27, %v5972_v18  ;;  %v5981_v29 = vshrl.u32 %v14331_v34, %v5972_v18 }
 0x388   :  { %v5729_v25 = vxor.u32 2147483648, %v5728_v32  ;;  %v5984_v14 = vshrl.u32 %v14332_v8, %v5972_v18  ;;  %v5983_v2 = vshll.u32 %v14331_v34, %v5971_v9  ;;  %v5986_v46 = vshll.u32 %v14332_v8, %v5971_v9 }
 0x389   :  { %v5815_v49 = vsub.s32 0, %v11486_v50  ;;  %v5976_v59 = vor.u32 %v5975_v16, %v5974_v20  ;;  %v5979_v28 = vor.u32 %v5978_v53, %v5977_v30  ;;  %v5982_v19 = vor.u32 %v5981_v29, %v5980_v40  ;;  %v1136_v29 = vpop.f32.mrf.mxu0 }
 0x38a   :  { %v5730_v17 = vsel %vm5647_vm0, %v5729_v25, %v5728_v32  ;;  %v5985_v10 = vor.u32 %v5984_v14, %v5983_v2  ;;  %v5987_v11 = vshrl.u32 %v14333_v7, %v5972_v18  ;;  %v11506_v4 = vshll.u32 %v5965_v35, 8 }
 0x38b   :  { %v5733_v56 = vsel %vm11434_vm1, %v11229_v3, %v5730_v17  ;;  %v7761_v44 = vmin.u32 %v5815_v49, %v11486_v50  ;;  %v6065_v60 = vshrl.u32 %v6064_v48, 23  ;;  %v5835_v39 = vsub.s32 4, %v11472_v47 }
 0x38c   :  { %8402 = vcosq.f32 %v5733_v56  ;;  %v5973_v55 = vshrl.u32 %v14328_v13, %v5972_v18  ;;  %v5988_v0 = vor.u32 %v5987_v11, %v5986_v46  ;;  %vm5989_vm10 = vcmp.lt.s32.totalorder %v5970_v26, 1 }
 0x38d   :  { %8404 = vsinq.f32 %v5733_v56  ;;  %v5817_v21 = vclz %v7761_v44  ;;  %vm5991_vm11 = vcmp.lt.s32.totalorder %v5970_v26, 3  ;;  %vm5992_vm12 = vcmp.lt.s32.totalorder %v5970_v26, 4  ;;  %v14393_v44 = vld [vmem:[#allocation24_spill] sm:$0xff] }
 0x38e   :  { %v5997_v1 = vsel %vm5989_vm10, %v5976_v59, %v5979_v28  ;;  %vm5751_vm13 = vcmp.lt.s32.totalorder %v11274_v23, 0  ;;  %v5994_v24 = vsel %vm5992_vm12, %v5982_v19, 2102212464  ;;  %v5998_v9 = vsel %vm5992_vm12, %v5985_v10, 920167782 }
 0x38f   :  { %v7762_v31 = vadd.s32 4294967294, %v5817_v21  ;;  %v6001_v22 = vsel %vm5989_vm10, %v5979_v28, %v5982_v19  ;;  %v6002_v51 = vsel %vm5992_vm12, %v5988_v0, 1326507024  ;;  %vm5990_vm0 = vcmp.lt.s32.totalorder %v5970_v26, 2 }
 0x390   :  { %v5999_v43 = vsel %vm5991_vm11, %v5982_v19, %v5998_v9  ;;  %v6003_v58 = vsel %vm5991_vm11, %v5985_v10, %v6002_v51  ;;  %v5993_v32 = vsel %vm5989_vm10, %v5973_v55, %v5976_v59  ;;  %vm11520_vm1 = vcmp.le.f32.partialorder %v5749_v6, 0.7853982  ;;  %v14394_v10 = vld [vmem:[#allocation25_spill] sm:$0xff] }
 0x391   :  { %vm7763_vm15 = vcmp.lt.s32.totalorder %v7762_v31, 0  ;;  %v6000_v35 = vsel %vm5990_vm0, %v5997_v1, %v5999_v43  ;;  %v6004_v16 = vsel %vm5990_vm0, %v6001_v22, %v6003_v58  ;;  %v5995_v53 = vsel %vm5991_vm11, %v5979_v28, %v5994_v24 }
 0x392   :  { %v5820_v18 = vsel %vm7763_vm15, 0, %v7762_v31  ;;  %v7772_v49 = vadd.s32 4294967169, %v6065_v60  ;;  %v11526_v30 = vmul.u32.u64.low %v11506_v4, %v6004_v16  ;;  %v11527_v40 = vmul.u32.u64.high %v11506_v4, %v6004_v16, %v11526_v30 }
 0x393   :  { %v5821_v25 = vsub.s32 32, %v5820_v18  ;;  %v5825_v20 = vsub.s32 4294967266, %v5820_v18  ;;  %v11530_v14 = vmul.u32.u64.low %v11506_v4, %v6000_v35  ;;  %v11531_v17 = vmul.u32.u64.high %v11506_v4, %v6000_v35, %v11530_v14 }
 0x394   :  { %v5822_v6 = vshll.u32 %v11486_v50, %v5820_v18  ;;  %v6071_v56 = vadd.s32 1, %v7772_v49  ;;  %vm5737_vm2 = vweird.f32 %v11229_v3  ;;  %vm5740_vm3 = vcmp.lt.s32.totalorder %v11481_v33, 2 }
 0x395   :  { %v5823_v59 = vshrl.u32 %v5805_v63, %v5821_v25  ;;  %v5826_v2 = vadd.s32 127, %v5825_v20  ;;  %v11538_v28 = vadd.f32 %v1134_v61, %v14393_v44  ;;  %v5996_v19 = vsel %vm5990_vm0, %v5993_v32, %v5995_v53 }
 0x396   :  { %v11542_v46 = vadd.f32 %v1136_v29, %v14394_v10  ;;  %vm5741_vm4 = vcmp.eq.s32.totalorder %v11481_v33, 0  ;;  %vm6072_vm5 = vcmp.gt.s32.totalorder %v6071_v56, 0  ;;  %vm6014_vm7 = vc.u32 %v11527_v40, %v11530_v14 }
 0x397   :  { %v5824_v11 = vor.u32 %v5823_v59, %v5822_v6  ;;  %v5827_v21 = vshll.u32 %v5826_v2, 23  ;;  %v6015_v63 = vadd.s32 1, %v11531_v17  ;;  %v6068_v50 = vand.u32 8388607, %v6061_v12 }
 0x398   :  { %v6073_v60 = vsel %vm6072_vm5, %v6071_v56, 0  ;;  %v5836_v0 = vsel %vm5751_vm13, %v5835_v39, %v11472_v47  ;;  %v6012_v31 = vmul.u32 %v11506_v4, %v5996_v19  ;;  %vm5744_vm8 = vcmp.eq.s32.totalorder %v11481_v33, 2 }
 0x399   :  { %v8403_v55 = vpop.eup %8402  ;;  %v5828_v26 = vor.u32 4788187, %v5827_v21  ;;  %v6075_v61 = vand.u32 31, %v6073_v60  ;;  %v5831_v9 = vcvt.s32.f32 %v5824_v11  ;;  %v6016_v22 = vsel %vm6014_vm7, %v6015_v63, %v11531_v17  ;;  %v1317_v63 = vpop.f32.mrf.mxu1 }
 0x39a   :  { %v8405_v1 = vpop.eup %8404  ;;  %v5745_v24 = vxor.u32 2147483648, %v8403_v55  ;;  %v6017_v58 = vadd.s32 %v6016_v22, %v6012_v31  ;;  %v5838_v35 = vsel %vm11520_vm1, 0, %v5836_v0  ;;  %v6069_v16 = vor.u32 8388608, %v6068_v50 }
 0x39b   :  { %v5742_v51 = vxor.u32 2147483648, %v8405_v1  ;;  %v5829_v43 = vand.u32 2147483647, %v5828_v26  ;;  %v6076_v18 = vsub.s32 32, %v6075_v61  ;;  %v11558_v47 = vshrl.u32 %v6073_v60, 5 }
 0x39c   :  { %v5746_v32 = vsel %vm5744_vm8, %v5745_v24, %v8405_v1  ;;  %v6018_v25 = vadd.s32 536870912, %v6017_v58  ;;  %v6078_v20 = vshll.u32 %v14328_v13, %v6075_v61  ;;  %v6081_v2 = vshll.u32 %v14329_v38, %v6075_v61 }
 0x39d   :  { %v5743_v4 = vsel %vm5741_vm4, %v8403_v55, %v5742_v51  ;;  %v5832_v39 = vmul.f32 %v5831_v9, %v5829_v43  ;;  %v6079_v29 = vshrl.u32 %v14329_v38, %v6076_v18  ;;  %v6082_v49 = vshrl.u32 %v14330_v27, %v6076_v18 }
 0x39e   :  { %v5747_v53 = vsel %vm5740_vm3, %v5743_v4, %v5746_v32  ;;  %v6085_v30 = vshrl.u32 %v14331_v34, %v6076_v18  ;;  %v6019_v59 = vshrl.u32 %v6018_v25, 30  ;;  %v6084_v33 = vshll.u32 %v14330_v27, %v6075_v61 }
 0x39f   :  { %v5748_v17 = vsel %vm5737_vm2, nan, %v5747_v53  ;;  %v5833_v6 = vxor.u32 2147483648, %v5832_v39  ;;  %v6080_v44 = vor.u32 %v6079_v29, %v6078_v20  ;;  %v6087_v19 = vshll.u32 %v14331_v34, %v6075_v61 }
 0x3a0   :  { %v7565_v56 = vsel %vm7532_vm14, %v11210_v37, %v5748_v17  ;;  %v6020_v10 = vshll.u32 %v6019_v59, 30  ;;  %v6083_v11 = vor.u32 %v6082_v49, %v6081_v2  ;;  %v6088_v21 = vshrl.u32 %v14332_v8, %v6076_v18  ;;  %v1319_v17 = vpop.f32.mrf.mxu1 }
 0x3a1   :  { %7614 = vst [vmem:[%s14171_s4 + $0xf0] sm:$0xff] %v7565_v56  ;;  %v5834_v3 = vsel %vm5751_vm13, %v5833_v6, %v5832_v39  ;;  %v6086_v50 = vor.u32 %v6085_v30, %v6084_v33  ;;  %v6090_v60 = vshll.u32 %v14332_v8, %v6075_v61  ;;  %v6091_v55 = vshrl.u32 %v14333_v7, %v6076_v18 }
 0x3a2   :  { %v5837_v37 = vsel %vm11520_vm1, %v11274_v23, %v5834_v3  ;;  %v5842_v26 = vadd.s32 3, %v5838_v35  ;;  %v11587_v0 = vsub.s32 %v6017_v58, %v6020_v10  ;;  %v6089_v31 = vor.u32 %v6088_v21, %v6087_v19 }
 0x3a3   :  { %8406 = vcosq.f32 %v5837_v37  ;;  %v6092_v1 = vor.u32 %v6091_v55, %v6090_v60  ;;  %v6109_v24 = vshll.u32 %v6069_v16, 8  ;;  %v11590_v9 = vadd.f32 %v1317_v63, %v11538_v28 }
 0x3a4   :  { %8408 = vsinq.f32 %v5837_v37  ;;  %v6023_v22 = vsub.s32 0, %v11587_v0  ;;  %v6077_v48 = vshrl.u32 %v14328_v13, %v6076_v18  ;;  %vm6093_vm9 = vcmp.lt.s32.totalorder %v11558_v47, 1 }
 0x3a5   :  { %vm6096_vm10 = vcmp.lt.s32.totalorder %v11558_v47, 4  ;;  %vm6095_vm11 = vcmp.lt.s32.totalorder %v11558_v47, 3  ;;  %v6101_v51 = vsel %vm6093_vm9, %v6080_v44, %v6083_v11  ;;  %v6043_v32 = vsub.s32 4, %v6019_v59 }
 0x3a6   :  { %v6098_v61 = vsel %vm6096_vm10, %v6086_v50, 2102212464  ;;  %v6102_v43 = vsel %vm6096_vm10, %v6089_v31, 920167782  ;;  %v7769_v58 = vmin.u32 %v6023_v22, %v11587_v0  ;;  %vm6094_vm12 = vcmp.lt.s32.totalorder %v11558_v47, 2 }
 0x3a7   :  { %v6103_v28 = vsel %vm6095_vm11, %v6086_v50, %v6102_v43  ;;  %v6105_v35 = vsel %vm6093_vm9, %v6083_v11, %v6086_v50  ;;  %v6106_v16 = vsel %vm6096_vm10, %v6092_v1, 1326507024  ;;  %v11609_v4 = vadd.f32 %v9446_v45, %v11590_v9 }
 0x3a8   :  { %v6104_v18 = vsel %vm6094_vm12, %v6101_v51, %v6103_v28  ;;  %v5843_v39 = vand.u32 3, %v5842_v26  ;;  %v6025_v25 = vclz %v7769_v58  ;;  %v6097_v20 = vsel %vm6093_vm9, %v6077_v48, %v6080_v44 }
 0x3a9   :  { %v6099_v53 = vsel %vm6095_vm11, %v6083_v11, %v6098_v61  ;;  %vm5959_vm13 = vcmp.lt.s32.totalorder %v11419_v42, 0  ;;  %v6107_v29 = vsel %vm6095_vm11, %v6089_v31, %v6106_v16  ;;  %vm11624_vm15 = vcmp.le.f32.partialorder %v5957_v15, 0.7853982 }
 0x3aa   :  { %v11618_v49 = vmul.u32.u64.low %v6109_v24, %v6104_v18  ;;  %v11619_v30 = vmul.u32.u64.high %v6109_v24, %v6104_v18, %v11618_v49  ;;  %v7770_v2 = vadd.s32 4294967294, %v6025_v25  ;;  %v6044_v56 = vsel %vm5959_vm13, %v6043_v32, %v6019_v59 }
 0x3ab   :  { %v6108_v44 = vsel %vm6094_vm12, %v6105_v35, %v6107_v29  ;;  %v6100_v33 = vsel %vm6094_vm12, %v6097_v20, %v6099_v53  ;;  %v6272_v10 = vand.u32 2139095040, %v11609_v4  ;;  %vm5841_vm0 = vweird.f32 %v11274_v23 }
 0x3ac   :  { %v11634_v19 = vmul.u32.u64.low %v6109_v24, %v6108_v44  ;;  %v11635_v3 = vmul.u32.u64.high %v6109_v24, %v6108_v44, %v11634_v19  ;;  %vm5844_vm1 = vcmp.lt.s32.totalorder %v5843_v39, 2  ;;  %vm5845_vm2 = vcmp.eq.s32.totalorder %v5843_v39, 0 }
 0x3ad   :  { %vm7771_vm3 = vcmp.lt.s32.totalorder %v7770_v2, 0  ;;  %v11640_v15 = vadd.f32 %v1319_v17, %v11542_v46  ;;  %v6013_v59 = vadd.s32 %v11530_v14, %v11527_v40  ;;  %v6119_v47 = vadd.s32 1, %v11619_v30 }
 0x3ae   :  { %v6028_v11 = vsel %vm7771_vm3, 0, %v7770_v2  ;;  %v6273_v21 = vshrl.u32 %v6272_v10, 23  ;;  %v6046_v50 = vsel %vm11624_vm15, 0, %v6044_v56  ;;  %v6116_v60 = vmul.u32 %v6109_v24, %v6100_v33 }
 0x3af   :  { %v6029_v63 = vsub.s32 32, %v6028_v11  ;;  %v6033_v37 = vsub.s32 4294967266, %v6028_v11  ;;  %v6030_v26 = vshll.u32 %v11587_v0, %v6028_v11  ;;  %vm6118_vm4 = vc.u32 %v11635_v3, %v11618_v49 }
 0x3b0   :  { %v8407_v55 = vpop.eup %8406  ;;  %v6269_v46 = vand.u32 2147483647, %v11609_v4  ;;  %v7780_v31 = vadd.s32 4294967169, %v6273_v21  ;;  %v6120_v48 = vsel %vm6118_vm4, %v6119_v47, %v11619_v30  ;;  %vm5848_vm5 = vcmp.eq.s32.totalorder %v5843_v39, 2 }
 0x3b1   :  { %v8409_v40 = vpop.eup %8408  ;;  %v5849_v14 = vxor.u32 2147483648, %v8407_v55  ;;  %v6031_v1 = vshrl.u32 %v6013_v59, %v6029_v63  ;;  %v6034_v22 = vadd.s32 127, %v6033_v37  ;;  %v6121_v51 = vadd.s32 %v6120_v48, %v6116_v60 }
 0x3b2   :  { %v5846_v61 = vxor.u32 2147483648, %v8409_v40  ;;  %v6279_v43 = vadd.s32 1, %v7780_v31  ;;  %v11654_v0 = vadd.f32 %v9453_v54, %v11640_v15  ;;  %v6050_v18 = vadd.s32 3, %v6046_v50 }
 0x3b3   :  { %v5850_v24 = vsel %vm5848_vm5, %v5849_v14, %v8409_v40  ;;  %v6032_v58 = vor.u32 %v6031_v1, %v6030_v26  ;;  %v6035_v32 = vshll.u32 %v6034_v22, 23  ;;  %v6122_v35 = vadd.s32 536870912, %v6121_v51 }
 0x3b4   :  { %v5847_v28 = vsel %vm5845_vm2, %v8407_v55, %v5846_v61  ;;  %vm6280_vm7 = vcmp.gt.s32.totalorder %v6279_v43, 0  ;;  %v6276_v20 = vand.u32 8388607, %v6269_v46  ;;  %v11671_v10 = vand.u32 3, %v6050_v18 }
 0x3b5   :  { %v5851_v16 = vsel %vm5844_vm1, %v5847_v28, %v5850_v24  ;;  %v6036_v25 = vor.u32 4788187, %v6035_v32  ;;  %v6281_v53 = vsel %vm6280_vm7, %v6279_v43, 0  ;;  %v11662_v30 = vshrl.u32 %v6122_v35, 30 }
 0x3b6   :  { %v5852_v29 = vsel %vm5841_vm0, nan, %v5851_v16  ;;  %v6283_v17 = vand.u32 31, %v6281_v53  ;;  %v6039_v44 = vcvt.s32.f32 %v6032_v58  ;;  %v6277_v23 = vor.u32 8388608, %v6276_v20  ;;  %v1141_v20 = vpop.f32.mrf.mxu0 }
 0x3b7   :  { %v7566_v2 = vsel %vm7533_vm6, %v11260_v36, %v5852_v29  ;;  %v6037_v56 = vand.u32 2147483647, %v6036_v25  ;;  %v6124_v39 = vshll.u32 %v11662_v30, 30  ;;  %v6373_v59 = vand.u32 2147483647, %v11654_v0 }
 0x3b8   :  { %7615 = vst [vmem:[%s14171_s4 + $0xf8] sm:$0xff] %v7566_v2  ;;  %v6284_v33 = vsub.s32 32, %v6283_v17  ;;  %v6117_v11 = vadd.s32 %v11618_v49, %v11635_v3  ;;  %v6376_v21 = vand.u32 2139095040, %v11654_v0  ;;  %v6286_v37 = vshll.u32 %v14328_v13, %v6283_v17 }
 0x3b9   :  { %v6040_v19 = vmul.f32 %v6039_v44, %v6037_v56  ;;  %v11676_v47 = vsub.s32 %v6121_v51, %v6124_v39  ;;  %v6289_v26 = vshll.u32 %v14329_v38, %v6283_v17  ;;  %v6292_v31 = vshll.u32 %v14330_v27, %v6283_v17 }
 0x3ba   :  { %v6287_v36 = vshrl.u32 %v14329_v38, %v6284_v33  ;;  %v6290_v50 = vshrl.u32 %v14330_v27, %v6284_v33  ;;  %v6293_v60 = vshrl.u32 %v14331_v34, %v6284_v33  ;;  %v6296_v49 = vshrl.u32 %v14332_v8, %v6284_v33 }
 0x3bb   :  { %v6041_v63 = vxor.u32 2147483648, %v6040_v19  ;;  %v6127_v55 = vsub.s32 0, %v11676_v47  ;;  %v6282_v40 = vshrl.u32 %v6281_v53, 5  ;;  %v6295_v1 = vshll.u32 %v14331_v34, %v6283_v17 }
 0x3bc   :  { %v6288_v14 = vor.u32 %v6287_v36, %v6286_v37  ;;  %v6291_v61 = vor.u32 %v6290_v50, %v6289_v26  ;;  %v6294_v51 = vor.u32 %v6293_v60, %v6292_v31  ;;  %v6298_v24 = vshll.u32 %v14332_v8, %v6283_v17  ;;  %v1143_v60 = vpop.f32.mrf.mxu0 }
 0x3bd   :  { %v6042_v3 = vsel %vm5959_vm13, %v6041_v63, %v6040_v19  ;;  %v7773_v48 = vmin.u32 %v6127_v55, %v11676_v47  ;;  %v6297_v43 = vor.u32 %v6296_v49, %v6295_v1  ;;  %v6299_v58 = vshrl.u32 %v14333_v7, %v6284_v33 }
 0x3be   :  { %v6045_v22 = vsel %vm11624_vm15, %v11419_v42, %v6042_v3  ;;  %v11696_v28 = vshll.u32 %v6277_v23, 8  ;;  %v6377_v18 = vshrl.u32 %v6376_v21, 23  ;;  %v6147_v35 = vsub.s32 4, %v11662_v30 }
 0x3bf   :  { %8410 = vcosq.f32 %v6045_v22  ;;  %v6129_v32 = vclz %v7773_v48  ;;  %v6285_v6 = vshrl.u32 %v14328_v13, %v6284_v33  ;;  %v6300_v16 = vor.u32 %v6299_v58, %v6298_v24  ;;  %v14399_v48 = vld [vmem:[#allocation27_spill] sm:$0xff] }
 0x3c0   :  { %8412 = vsinq.f32 %v6045_v22  ;;  %vm6301_vm8 = vcmp.lt.s32.totalorder %v6282_v40, 1  ;;  %vm6303_vm9 = vcmp.lt.s32.totalorder %v6282_v40, 3  ;;  %vm6304_vm10 = vcmp.lt.s32.totalorder %v6282_v40, 4 }
 0x3c1   :  { %v7774_v25 = vadd.s32 4294967294, %v6129_v32  ;;  %v6309_v53 = vsel %vm6301_vm8, %v6288_v14, %v6291_v61  ;;  %vm6063_vm11 = vcmp.lt.s32.totalorder %v11464_v41, 0  ;;  %v6306_v29 = vsel %vm6304_vm10, %v6294_v51, 2102212464 }
 0x3c2   :  { %v6310_v17 = vsel %vm6304_vm10, %v6297_v43, 920167782  ;;  %v6313_v2 = vsel %vm6301_vm8, %v6291_v61, %v6294_v51  ;;  %v6314_v56 = vsel %vm6304_vm10, %v6300_v16, 1326507024  ;;  %vm6302_vm13 = vcmp.lt.s32.totalorder %v6282_v40, 2 }
 0x3c3   :  { %vm7775_vm12 = vcmp.lt.s32.totalorder %v7774_v25, 0  ;;  %v6311_v44 = vsel %vm6303_vm9, %v6294_v51, %v6310_v17  ;;  %v6315_v39 = vsel %vm6303_vm9, %v6297_v43, %v6314_v56  ;;  %v6305_v19 = vsel %vm6301_vm8, %v6285_v6, %v6288_v14  ;;  %v14400_v43 = vld [vmem:[#allocation28_spill] sm:$0xff] }
 0x3c4   :  { %v6132_v33 = vsel %vm7775_vm12, 0, %v7774_v25  ;;  %v6312_v23 = vsel %vm6302_vm13, %v6309_v53, %v6311_v44  ;;  %v6316_v36 = vsel %vm6302_vm13, %v6313_v2, %v6315_v39  ;;  %vm11710_vm15 = vcmp.le.f32.partialorder %v6061_v12, 0.7853982 }
 0x3c5   :  { %v6133_v63 = vsub.s32 32, %v6132_v33  ;;  %v6137_v37 = vsub.s32 4294967266, %v6132_v33  ;;  %v6307_v50 = vsel %vm6303_vm9, %v6291_v61, %v6306_v29  ;;  %v7784_v55 = vadd.s32 4294967169, %v6377_v18 }
 0x3c6   :  { %v11716_v26 = vmul.u32.u64.low %v11696_v28, %v6316_v36  ;;  %v11717_v31 = vmul.u32.u64.high %v11696_v28, %v6316_v36, %v11716_v26  ;;  %v11720_v49 = vmul.u32.u64.low %v11696_v28, %v6312_v23  ;;  %v11721_v3 = vmul.u32.u64.high %v11696_v28, %v6312_v23, %v11720_v49 }
 0x3c7   :  { %v6134_v12 = vshll.u32 %v11676_v47, %v6132_v33  ;;  %v6135_v14 = vshrl.u32 %v6117_v11, %v6133_v63  ;;  %v6138_v1 = vadd.s32 127, %v6137_v37  ;;  %v6383_v22 = vadd.s32 1, %v7784_v55 }
 0x3c8   :  { %vm6049_vm0 = vweird.f32 %v11419_v42  ;;  %vm6052_vm1 = vcmp.lt.s32.totalorder %v11671_v10, 2  ;;  %v11728_v61 = vadd.f32 %v1141_v20, %v14399_v48  ;;  %v6308_v51 = vsel %vm6302_vm13, %v6305_v19, %v6307_v50 }
 0x3c9   :  { %v11732_v24 = vadd.f32 %v1143_v60, %v14400_v43  ;;  %vm6053_vm2 = vcmp.eq.s32.totalorder %v11671_v10, 0  ;;  %v6136_v58 = vor.u32 %v6135_v14, %v6134_v12  ;;  %v6139_v32 = vshll.u32 %v6138_v1, 23 }
 0x3ca   :  { %vm6384_vm3 = vcmp.gt.s32.totalorder %v6383_v22, 0  ;;  %vm6326_vm4 = vc.u32 %v11717_v31, %v11720_v49  ;;  %v6327_v11 = vadd.s32 1, %v11721_v3  ;;  %v6380_v47 = vand.u32 8388607, %v6373_v59 }
 0x3cb   :  { %v6385_v18 = vsel %vm6384_vm3, %v6383_v22, 0  ;;  %v6140_v40 = vor.u32 4788187, %v6139_v32  ;;  %v6148_v16 = vsel %vm6063_vm11, %v6147_v35, %v11662_v30  ;;  %v6324_v25 = vmul.u32 %v11696_v28, %v6308_v51 }
 0x3cc   :  { %v8411_v6 = vpop.eup %8410  ;;  %v6387_v20 = vand.u32 31, %v6385_v18  ;;  %vm6056_vm5 = vcmp.eq.s32.totalorder %v11671_v10, 2  ;;  %v6143_v17 = vcvt.s32.f32 %v6136_v58  ;;  %v6328_v2 = vsel %vm6326_vm4, %v6327_v11, %v11721_v3  ;;  %v1324_v11 = vpop.f32.mrf.mxu1 }
 0x3cd   :  { %v8413_v53 = vpop.eup %8412  ;;  %v6057_v29 = vxor.u32 2147483648, %v8411_v6  ;;  %v6141_v44 = vand.u32 2147483647, %v6140_v40  ;;  %v6329_v39 = vadd.s32 %v6328_v2, %v6324_v25  ;;  %v6150_v23 = vsel %vm11710_vm15, 0, %v6148_v16 }
 0x3ce   :  { %v6054_v56 = vxor.u32 2147483648, %v8413_v53  ;;  %v6388_v33 = vsub.s32 32, %v6387_v20  ;;  %v6381_v36 = vor.u32 8388608, %v6380_v47  ;;  %v11748_v30 = vshrl.u32 %v6385_v18, 5 }
 0x3cf   :  { %v6058_v19 = vsel %vm6056_vm5, %v6057_v29, %v8413_v53  ;;  %v6144_v35 = vmul.f32 %v6143_v17, %v6141_v44  ;;  %v6330_v63 = vadd.s32 536870912, %v6329_v39  ;;  %v6390_v37 = vshll.u32 %v14328_v13, %v6387_v20 }
 0x3d0   :  { %v6055_v28 = vsel %vm6053_vm2, %v8411_v6, %v6054_v56  ;;  %v6391_v60 = vshrl.u32 %v14329_v38, %v6388_v33  ;;  %v6394_v55 = vshrl.u32 %v14330_v27, %v6388_v33  ;;  %v6397_v26 = vshrl.u32 %v14331_v34, %v6388_v33 }
 0x3d1   :  { %v6059_v50 = vsel %vm6052_vm1, %v6055_v28, %v6058_v19  ;;  %v6145_v12 = vxor.u32 2147483648, %v6144_v35  ;;  %v6331_v14 = vshrl.u32 %v6330_v63, 30  ;;  %v6393_v1 = vshll.u32 %v14329_v38, %v6387_v20 }
 0x3d2   :  { %v6060_v3 = vsel %vm6049_vm0, nan, %v6059_v50  ;;  %v6392_v48 = vor.u32 %v6391_v60, %v6390_v37  ;;  %v6396_v10 = vshll.u32 %v14330_v27, %v6387_v20  ;;  %v6399_v51 = vshll.u32 %v14331_v34, %v6387_v20 }
 0x3d3   :  { %v7568_v22 = vsel %vm7532_vm14, %v11400_v52, %v6060_v3  ;;  %v6146_v42 = vsel %vm6063_vm11, %v6145_v12, %v6144_v35  ;;  %v6332_v43 = vshll.u32 %v6331_v14, 30  ;;  %v6395_v58 = vor.u32 %v6394_v55, %v6393_v1  ;;  %v1326_v3 = vpop.f32.mrf.mxu1 }
 0x3d4   :  { %7617 = vst [vmem:[%s14171_s4 + $0x108] sm:$0xff] %v7568_v22  ;;  %v6400_v32 = vshrl.u32 %v14332_v8, %v6388_v33  ;;  %v6149_v52 = vsel %vm11710_vm15, %v11464_v41, %v6146_v42  ;;  %v6398_v47 = vor.u32 %v6397_v26, %v6396_v10  ;;  %v6402_v18 = vshll.u32 %v14332_v8, %v6387_v20 }
 0x3d5   :  { %v6403_v6 = vshrl.u32 %v14333_v7, %v6388_v33  ;;  %8414 = vcosq.f32 %v6149_v52  ;;  %v6154_v40 = vadd.s32 3, %v6150_v23  ;;  %v11777_v16 = vsub.s32 %v6329_v39, %v6332_v43 }
 0x3d6   :  { %v6401_v25 = vor.u32 %v6400_v32, %v6399_v51  ;;  %8416 = vsinq.f32 %v6149_v52  ;;  %v6421_v29 = vshll.u32 %v6381_v36, 8  ;;  %v11780_v17 = vadd.f32 %v1324_v11, %v11728_v61 }
 0x3d7   :  { %v6404_v53 = vor.u32 %v6403_v6, %v6402_v18  ;;  %v6335_v2 = vsub.s32 0, %v11777_v16  ;;  %v6389_v21 = vshrl.u32 %v14328_v13, %v6388_v33  ;;  %vm6405_vm7 = vcmp.lt.s32.totalorder %v11748_v30, 1 }
 0x3d8   :  { %vm6408_vm8 = vcmp.lt.s32.totalorder %v11748_v30, 4  ;;  %vm6407_vm9 = vcmp.lt.s32.totalorder %v11748_v30, 3  ;;  %v6413_v56 = vsel %vm6405_vm7, %v6392_v48, %v6395_v58  ;;  %v6355_v19 = vsub.s32 4, %v6331_v14 }
 0x3d9   :  { %v6410_v20 = vsel %vm6408_vm8, %v6398_v47, 2102212464  ;;  %v6414_v44 = vsel %vm6408_vm8, %v6401_v25, 920167782  ;;  %v7781_v39 = vmin.u32 %v6335_v2, %v11777_v16  ;;  %vm6406_vm10 = vcmp.lt.s32.totalorder %v11748_v30, 2 }
 0x3da   :  { %v6415_v61 = vsel %vm6407_vm9, %v6398_v47, %v6414_v44  ;;  %v6417_v23 = vsel %vm6405_vm7, %v6395_v58, %v6398_v47  ;;  %v6418_v36 = vsel %vm6408_vm8, %v6404_v53, 1326507024  ;;  %v11799_v28 = vadd.f32 %v9446_v45, %v11780_v17 }
 0x3db   :  { %v6416_v33 = vsel %vm6406_vm10, %v6413_v56, %v6415_v61  ;;  %v6155_v35 = vand.u32 3, %v6154_v40  ;;  %v6337_v63 = vclz %v7781_v39  ;;  %v6409_v37 = vsel %vm6405_vm7, %v6389_v21, %v6392_v48 }
 0x3dc   :  { %v6411_v50 = vsel %vm6407_vm9, %v6395_v58, %v6410_v20  ;;  %vm6271_vm11 = vcmp.lt.s32.totalorder %v11609_v4, 0  ;;  %v6419_v60 = vsel %vm6407_vm9, %v6401_v25, %v6418_v36  ;;  %vm11814_vm12 = vcmp.le.f32.partialorder %v6269_v46, 0.7853982 }
 0x3dd   :  { %v11808_v55 = vmul.u32.u64.low %v6421_v29, %v6416_v33  ;;  %v11809_v26 = vmul.u32.u64.high %v6421_v29, %v6416_v33, %v11808_v55  ;;  %v7782_v1 = vadd.s32 4294967294, %v6337_v63  ;;  %v6356_v22 = vsel %vm6271_vm11, %v6355_v19, %v6331_v14 }
 0x3de   :  { %v6420_v48 = vsel %vm6406_vm10, %v6417_v23, %v6419_v60  ;;  %v6412_v10 = vsel %vm6406_vm10, %v6409_v37, %v6411_v50  ;;  %v6584_v43 = vand.u32 2139095040, %v11799_v28  ;;  %vm6153_vm13 = vweird.f32 %v11464_v41 }
 0x3df   :  { %v11824_v51 = vmul.u32.u64.low %v6421_v29, %v6420_v48  ;;  %v11825_v42 = vmul.u32.u64.high %v6421_v29, %v6420_v48, %v11824_v51  ;;  %vm6156_vm15 = vcmp.lt.s32.totalorder %v6155_v35, 2  ;;  %vm6157_vm0 = vcmp.eq.s32.totalorder %v6155_v35, 0 }
 0x3e0   :  { %vm7783_vm1 = vcmp.lt.s32.totalorder %v7782_v1, 0  ;;  %v11830_v46 = vadd.f32 %v1326_v3, %v11732_v24  ;;  %v6325_v14 = vadd.s32 %v11720_v49, %v11717_v31  ;;  %v6431_v30 = vadd.s32 1, %v11809_v26 }
 0x3e1   :  { %v6340_v58 = vsel %vm7783_vm1, 0, %v7782_v1  ;;  %v6585_v32 = vshrl.u32 %v6584_v43, 23  ;;  %v6358_v47 = vsel %vm11814_vm12, 0, %v6356_v22  ;;  %v6428_v18 = vmul.u32 %v6421_v29, %v6412_v10 }
 0x3e2   :  { %v6341_v11 = vsub.s32 32, %v6340_v58  ;;  %v6345_v52 = vsub.s32 4294967266, %v6340_v58  ;;  %v8415_v6 = vpop.eup %8414  ;;  %v6342_v40 = vshll.u32 %v11777_v16, %v6340_v58  ;;  %vm6430_vm2 = vc.u32 %v11825_v42, %v11808_v55 }
 0x3e3   :  { %v6581_v24 = vand.u32 2147483647, %v11799_v28  ;;  %v7792_v25 = vadd.s32 4294967169, %v6585_v32  ;;  %v8417_v31 = vpop.eup %8416  ;;  %v6161_v49 = vxor.u32 2147483648, %v8415_v6  ;;  %v6432_v21 = vsel %vm6430_vm2, %v6431_v30, %v11809_v26 }
 0x3e4   :  { %v6343_v53 = vshrl.u32 %v6325_v14, %v6341_v11  ;;  %v6346_v2 = vadd.s32 127, %v6345_v52  ;;  %v6158_v20 = vxor.u32 2147483648, %v8417_v31  ;;  %vm6160_vm3 = vcmp.eq.s32.totalorder %v6155_v35, 2 }
 0x3e5   :  { %v6433_v56 = vadd.s32 %v6432_v21, %v6428_v18  ;;  %v6591_v44 = vadd.s32 1, %v7792_v25  ;;  %v6162_v29 = vsel %vm6160_vm3, %v6161_v49, %v8417_v31  ;;  %v11844_v16 = vadd.f32 %v9453_v54, %v11830_v46 }
 0x3e6   :  { %v6344_v39 = vor.u32 %v6343_v53, %v6342_v40  ;;  %v6347_v19 = vshll.u32 %v6346_v2, 23  ;;  %v6159_v61 = vsel %vm6157_vm0, %v8415_v6, %v6158_v20  ;;  %v6362_v33 = vadd.s32 3, %v6358_v47 }
 0x3e7   :  { %v6434_v23 = vadd.s32 536870912, %v6433_v56  ;;  %vm6592_vm4 = vcmp.gt.s32.totalorder %v6591_v44, 0  ;;  %v6163_v36 = vsel %vm6156_vm15, %v6159_v61, %v6162_v29  ;;  %v6588_v37 = vand.u32 8388607, %v6581_v24 }
 0x3e8   :  { %v6348_v63 = vor.u32 4788187, %v6347_v19  ;;  %v6593_v50 = vsel %vm6592_vm4, %v6591_v44, 0  ;;  %v6164_v60 = vsel %vm6153_vm13, nan, %v6163_v36  ;;  %v6351_v48 = vcvt.s32.f32 %v6344_v39 }
 0x3e9   :  { %v11852_v26 = vshrl.u32 %v6434_v23, 30  ;;  %v6595_v3 = vand.u32 31, %v6593_v50  ;;  %v7569_v1 = vsel %vm7533_vm6, %v11450_v57, %v6164_v60  ;;  %v11861_v43 = vand.u32 3, %v6362_v33 }
 0x3ea   :  { %v6349_v22 = vand.u32 2147483647, %v6348_v63  ;;  %7618 = vst [vmem:[%s14171_s4 + $0x110] sm:$0xff] %v7569_v1  ;;  %v6589_v41 = vor.u32 8388608, %v6588_v37  ;;  %v14235_v14 = vand.u32 2147483647, %v11844_v16  ;;  %v6429_v58 = vadd.s32 %v11808_v55, %v11825_v42  ;;  %v1148_v37 = vpop.f32.mrf.mxu0 }
 0x3eb   :  { %v6436_v35 = vshll.u32 %v11852_v26, 30  ;;  %v6596_v10 = vsub.s32 32, %v6595_v3  ;;  %v6688_v32 = vand.u32 2139095040, %v11844_v16  ;;  %v6598_v52 = vshll.u32 %v14328_v13, %v6595_v3 }
 0x3ec   :  { %v6352_v51 = vmul.f32 %v6351_v48, %v6349_v22  ;;  %v6601_v40 = vshll.u32 %v14329_v38, %v6595_v3  ;;  %v6604_v25 = vshll.u32 %v14330_v27, %v6595_v3  ;;  %v6594_v31 = vshrl.u32 %v6593_v50, 5 }
 0x3ed   :  { %v11866_v30 = vsub.s32 %v6433_v56, %v6436_v35  ;;  %v6599_v57 = vshrl.u32 %v14329_v38, %v6596_v10  ;;  %v6602_v47 = vshrl.u32 %v14330_v27, %v6596_v10  ;;  %v6605_v18 = vshrl.u32 %v14331_v34, %v6596_v10 }
 0x3ee   :  { %v6353_v11 = vxor.u32 2147483648, %v6352_v51  ;;  %v6608_v55 = vshrl.u32 %v14332_v8, %v6596_v10  ;;  %v6607_v53 = vshll.u32 %v14331_v34, %v6595_v3  ;;  %v6610_v29 = vshll.u32 %v14332_v8, %v6595_v3 }
 0x3ef   :  { %v6439_v6 = vsub.s32 0, %v11866_v30  ;;  %v6600_v49 = vor.u32 %v6599_v57, %v6598_v52  ;;  %v6603_v20 = vor.u32 %v6602_v47, %v6601_v40  ;;  %v6606_v56 = vor.u32 %v6605_v18, %v6604_v25 }
 0x3f0   :  { %v6354_v42 = vsel %vm6271_vm11, %v6353_v11, %v6352_v51  ;;  %v6609_v44 = vor.u32 %v6608_v55, %v6607_v53  ;;  %v6611_v39 = vshrl.u32 %v14333_v7, %v6596_v10  ;;  %v11886_v61 = vshll.u32 %v6589_v41, 8 }
 0x3f1   :  { %v6357_v2 = vsel %vm11814_vm12, %v11609_v4, %v6354_v42  ;;  %v7785_v21 = vmin.u32 %v6439_v6, %v11866_v30  ;;  %v6689_v33 = vshrl.u32 %v6688_v32, 23  ;;  %v6459_v23 = vsub.s32 4, %v11852_v26  ;;  %v11898_v32 = vpop.f32.mrf.mxu1  ;;  %v1150_v6 = vpop.f32.mrf.mxu0 }
 0x3f2   :  { %8418 = vcosq.f32 %v6357_v2  ;;  %v6597_v12 = vshrl.u32 %v14328_v13, %v6596_v10  ;;  %v6612_v36 = vor.u32 %v6611_v39, %v6610_v29  ;;  %vm6613_vm5 = vcmp.lt.s32.totalorder %v6594_v31, 1  ;;  %v14406_v29 = vld [vmem:[#allocation3_spill] sm:$0xff] }
 0x3f3   :  { %8420 = vsinq.f32 %v6357_v2  ;;  %v6441_v19 = vclz %v7785_v21  ;;  %vm6615_vm7 = vcmp.lt.s32.totalorder %v6594_v31, 3  ;;  %vm6616_vm8 = vcmp.lt.s32.totalorder %v6594_v31, 4 }
 0x3f4   :  { %v6621_v50 = vsel %vm6613_vm5, %v6600_v49, %v6603_v20  ;;  %vm6375_vm9 = vcmp.lt.s32.totalorder %v11654_v0, 0  ;;  %v6618_v60 = vsel %vm6616_vm8, %v6606_v56, 2102212464  ;;  %v6622_v3 = vsel %vm6616_vm8, %v6609_v44, 920167782 }
 0x3f5   :  { %v7786_v63 = vadd.s32 4294967294, %v6441_v19  ;;  %v6625_v1 = vsel %vm6613_vm5, %v6603_v20, %v6606_v56  ;;  %v6626_v22 = vsel %vm6616_vm8, %v6612_v36, 1326507024  ;;  %vm6614_vm11 = vcmp.lt.s32.totalorder %v6594_v31, 2  ;;  %v11926_v19 = vpop.f32.mrf.mxu1  ;;  %v11934_v36 = vpop.f32.mrf.mxu0 }
 0x3f6   :  { %v6623_v48 = vsel %vm6615_vm7, %v6606_v56, %v6622_v3  ;;  %v6627_v35 = vsel %vm6615_vm7, %v6609_v44, %v6626_v22  ;;  %v6617_v51 = vsel %vm6613_vm5, %v6597_v12, %v6600_v49  ;;  %vm11902_vm12 = vcmp.le.f32.partialorder %v6373_v59, 0.7853982 }
 0x3f7   :  { %vm7787_vm10 = vcmp.lt.s32.totalorder %v7786_v63, 0  ;;  %v6624_v41 = vsel %vm6614_vm11, %v6621_v50, %v6623_v48  ;;  %v6628_v57 = vsel %vm6614_vm11, %v6625_v1, %v6627_v35  ;;  %v6619_v18 = vsel %vm6615_vm7, %v6603_v20, %v6618_v60  ;;  %v14405_v20 = vld [vmem:[#allocation26_spill] sm:$0xff] }
 0x3f8   :  { %v6444_v10 = vsel %vm7787_vm10, 0, %v7786_v63  ;;  %v7796_v40 = vadd.s32 4294967169, %v6689_v33  ;;  %v11908_v25 = vmul.u32.u64.low %v11886_v61, %v6628_v57  ;;  %v11909_v55 = vmul.u32.u64.high %v11886_v61, %v6628_v57, %v11908_v25 }
 0x3f9   :  { %v6445_v52 = vsub.s32 32, %v6444_v10  ;;  %v6449_v47 = vsub.s32 4294967266, %v6444_v10  ;;  %v11912_v42 = vmul.u32.u64.low %v11886_v61, %v6624_v41  ;;  %v11913_v49 = vmul.u32.u64.high %v11886_v61, %v6624_v41, %v11912_v42 }
 0x3fa   :  { %v6446_v59 = vshll.u32 %v11866_v30, %v6444_v10  ;;  %v6695_v21 = vadd.s32 1, %v7796_v40  ;;  %vm6361_vm13 = vweird.f32 %v11609_v4  ;;  %vm6364_vm15 = vcmp.lt.s32.totalorder %v11861_v43, 2  ;;  %v11942_v10 = vpop.f32.mrf.mxu1 }
 0x3fb   :  { %v6447_v53 = vshrl.u32 %v6429_v58, %v6445_v52  ;;  %v6450_v2 = vadd.s32 127, %v6449_v47  ;;  %v11920_v56 = vadd.f32 %v1148_v37, %v14405_v20  ;;  %v6620_v44 = vsel %vm6614_vm11, %v6617_v51, %v6619_v18  ;;  %v11948_v18 = vpop.f32.mrf.mxu0 }
 0x3fc   :  { %v11924_v39 = vadd.f32 %v1150_v6, %v14406_v29  ;;  %vm6365_vm0 = vcmp.eq.s32.totalorder %v11861_v43, 0  ;;  %vm6696_vm1 = vcmp.gt.s32.totalorder %v6695_v21, 0  ;;  %vm6638_vm2 = vc.u32 %v11909_v55, %v11912_v42  ;;  %v11958_v20 = vpop.f32.mrf.mxu1 }
 0x3fd   :  { %v6448_v30 = vor.u32 %v6447_v53, %v6446_v59  ;;  %v6451_v58 = vshll.u32 %v6450_v2, 23  ;;  %v6639_v33 = vadd.s32 1, %v11913_v49  ;;  %v6692_v12 = vand.u32 8388607, %v14235_v14 }
 0x3fe   :  { %v6697_v31 = vsel %vm6696_vm1, %v6695_v21, 0  ;;  %v6460_v50 = vsel %vm6375_vm9, %v6459_v23, %v11852_v26  ;;  %v6636_v60 = vmul.u32 %v11886_v61, %v6620_v44  ;;  %vm6368_vm3 = vcmp.eq.s32.totalorder %v11861_v43, 2 }
 0x3ff   :  { %v8419_v63 = vpop.eup %8418  ;;  %v6452_v37 = vor.u32 4788187, %v6451_v58  ;;  %v6699_v3 = vand.u32 31, %v6697_v31  ;;  %v6455_v48 = vcvt.s32.f32 %v6448_v30  ;;  %v6640_v35 = vsel %vm6638_vm2, %v6639_v33, %v11913_v49 }
 0x400   :  { %v8421_v1 = vpop.eup %8420  ;;  %v6369_v22 = vxor.u32 2147483648, %v8419_v63  ;;  %v6641_v57 = vadd.s32 %v6640_v35, %v6636_v60  ;;  %v6462_v26 = vsel %vm11902_vm12, 0, %v6460_v50  ;;  %v6693_v23 = vor.u32 8388608, %v6692_v12  ;;  %v11981_v35 = vpop.f32.mrf.mxu1 }
 0x401   :  { %v6366_v51 = vxor.u32 2147483648, %v8421_v1  ;;  %v6453_v41 = vand.u32 2147483647, %v6452_v37  ;;  %v6700_v52 = vsub.s32 32, %v6699_v3  ;;  %v11946_v61 = vshrl.u32 %v6697_v31, 5 }
 0x402   :  { %v6370_v47 = vsel %vm6368_vm3, %v6369_v22, %v8421_v1  ;;  %v6642_v25 = vadd.s32 536870912, %v6641_v57  ;;  %v6702_v49 = vshll.u32 %v14328_v13, %v6699_v3  ;;  %v6705_v58 = vshll.u32 %v14329_v38, %v6699_v3 }
 0x403   :  { %v6367_v6 = vsel %vm6365_vm0, %v8419_v63, %v6366_v51  ;;  %v6456_v40 = vmul.f32 %v6455_v48, %v6453_v41  ;;  %v6703_v53 = vshrl.u32 %v14329_v38, %v6700_v52  ;;  %v6706_v2 = vshrl.u32 %v14330_v27, %v6700_v52  ;;  %v11968_v63 = vpop.f32.mrf.mxu0 }
 0x404   :  { %v6371_v59 = vsel %vm6364_vm15, %v6367_v6, %v6370_v47  ;;  %v6709_v21 = vshrl.u32 %v14331_v34, %v6700_v52  ;;  %v6643_v30 = vshrl.u32 %v6642_v25, 30  ;;  %v6708_v12 = vshll.u32 %v14330_v27, %v6699_v3 }
 0x405   :  { %v6372_v44 = vsel %vm6361_vm13, nan, %v6371_v59  ;;  %v6457_v29 = vxor.u32 2147483648, %v6456_v40  ;;  %v6704_v33 = vor.u32 %v6703_v53, %v6702_v49  ;;  %v6711_v31 = vshll.u32 %v14331_v34, %v6699_v3  ;;  %v11991_v25 = vpop.f32.mrf.mxu0  ;;  %v12000_v59 = vpop.f32.mrf.mxu1 }
 0x406   :  { %v7571_v43 = vsel %vm7532_vm14, %v11590_v9, %v6372_v44  ;;  %v6644_v37 = vshll.u32 %v6643_v30, 30  ;;  %v6707_v50 = vor.u32 %v6706_v2, %v6705_v58  ;;  %v6712_v60 = vshrl.u32 %v14332_v8, %v6700_v52 }
 0x407   :  { %7620 = vst [vmem:[%s14171_s4 + $0x120] sm:$0xff] %v7571_v43  ;;  %v6458_v4 = vsel %vm6375_vm9, %v6457_v29, %v6456_v40  ;;  %v6710_v1 = vor.u32 %v6709_v21, %v6708_v12  ;;  %v6714_v22 = vshll.u32 %v14332_v8, %v6699_v3  ;;  %v6715_v48 = vshrl.u32 %v14333_v7, %v6700_v52  ;;  %v12014_v29 = vpop.f32.mrf.mxu0 }
 0x408   :  { %v6461_v9 = vsel %vm11902_vm12, %v11654_v0, %v6458_v4  ;;  %v6466_v51 = vadd.s32 3, %v6462_v26  ;;  %v11983_v41 = vsub.s32 %v6641_v57, %v6644_v37  ;;  %v6713_v47 = vor.u32 %v6712_v60, %v6711_v31 }
 0x409   :  { %8422 = vcosq.f32 %v6461_v9  ;;  %v6716_v6 = vor.u32 %v6715_v48, %v6714_v22  ;;  %v11985_v40 = vshll.u32 %v6693_v23, 8  ;;  %v11989_v11 = vadd.f32 %v11898_v32, %v11920_v56 }
 0x40a   :  { %8424 = vsinq.f32 %v6461_v9  ;;  %v6647_v3 = vsub.s32 0, %v11983_v41  ;;  %v6701_v49 = vshrl.u32 %v14328_v13, %v6700_v52  ;;  %vm6717_vm4 = vcmp.lt.s32.totalorder %v11946_v61, 1  ;;  %v12028_v9 = vpop.f32.mrf.mxu1 }
 0x40b   :  { %vm6720_vm5 = vcmp.lt.s32.totalorder %v11946_v61, 4  ;;  %vm6719_vm7 = vcmp.lt.s32.totalorder %v11946_v61, 3  ;;  %v6725_v26 = vsel %vm6717_vm4, %v6704_v33, %v6707_v50  ;;  %v6667_v56 = vsub.s32 4, %v6643_v30 }
 0x40c   :  { %v6722_v57 = vsel %vm6720_vm5, %v6710_v1, 2102212464  ;;  %v6726_v23 = vsel %vm6720_vm5, %v6713_v47, 920167782  ;;  %v7793_v32 = vmin.u32 %v6647_v3, %v11983_v41  ;;  %vm6718_vm8 = vcmp.lt.s32.totalorder %v11946_v61, 2 }
 0x40d   :  { %v6727_v52 = vsel %vm6719_vm7, %v6710_v1, %v6726_v23  ;;  %v6729_v2 = vsel %vm6717_vm4, %v6707_v50, %v6710_v1  ;;  %v6730_v21 = vsel %vm6720_vm5, %v6716_v6, 1326507024  ;;  %v12012_v44 = vadd.f32 %v9446_v45, %v11989_v11 }
 0x40e   :  { %v6728_v53 = vsel %vm6718_vm8, %v6725_v26, %v6727_v52  ;;  %v6467_v58 = vand.u32 3, %v6466_v51  ;;  %v6649_v43 = vclz %v7793_v32  ;;  %v6721_v12 = vsel %vm6717_vm4, %v6701_v49, %v6704_v33  ;;  %v12057_v26 = vpop.f32.mrf.mxu1 }
 0x40f   :  { %v6723_v31 = vsel %vm6719_vm7, %v6707_v50, %v6722_v57  ;;  %vm6583_vm9 = vcmp.lt.s32.totalorder %v11799_v28, 0  ;;  %v6731_v4 = vsel %vm6719_vm7, %v6713_v47, %v6730_v21  ;;  %vm12032_vm10 = vcmp.le.f32.partialorder %v6581_v24, 0.7853982  ;;  %v12047_v24 = vpop.f32.mrf.mxu0 }
 0x410   :  { %v12024_v37 = vmul.u32.u64.low %v11985_v40, %v6728_v53  ;;  %v12025_v60 = vmul.u32.u64.high %v11985_v40, %v6728_v53, %v12024_v37  ;;  %v7794_v33 = vadd.s32 4294967294, %v6649_v43  ;;  %v6668_v50 = vsel %vm6583_vm9, %v6667_v56, %v6643_v30 }
 0x411   :  { %v6732_v22 = vsel %vm6718_vm8, %v6729_v2, %v6731_v4  ;;  %v6724_v48 = vsel %vm6718_vm8, %v6721_v12, %v6723_v31  ;;  %v6896_v6 = vand.u32 2139095040, %v12012_v44  ;;  %vm6465_vm11 = vweird.f32 %v11654_v0 }
 0x412   :  { %v12043_v51 = vmul.u32.u64.low %v11985_v40, %v6732_v22  ;;  %v12044_v47 = vmul.u32.u64.high %v11985_v40, %v6732_v22, %v12043_v51  ;;  %vm6468_vm12 = vcmp.lt.s32.totalorder %v6467_v58, 2  ;;  %vm6469_vm13 = vcmp.eq.s32.totalorder %v6467_v58, 0 }
 0x413   :  { %vm7795_vm15 = vcmp.lt.s32.totalorder %v7794_v33, 0  ;;  %v12052_v30 = vadd.f32 %v11926_v19, %v11924_v39  ;;  %v6637_v61 = vadd.s32 %v11912_v42, %v11909_v55  ;;  %v6743_v49 = vadd.s32 1, %v12025_v60  ;;  %v12066_v19 = vpop.f32.mrf.mxu0 }
 0x414   :  { %v6652_v3 = vsel %vm7795_vm15, 0, %v7794_v33  ;;  %v6897_v57 = vshrl.u32 %v6896_v6, 23  ;;  %v6670_v56 = vsel %vm12032_vm10, 0, %v6668_v50  ;;  %v6740_v52 = vmul.u32 %v11985_v40, %v6724_v48  ;;  %v12069_v50 = vpop.f32.mrf.mxu1 }
 0x415   :  { %v6653_v23 = vsub.s32 32, %v6652_v3  ;;  %v6657_v32 = vsub.s32 4294967266, %v6652_v3  ;;  %v6654_v39 = vshll.u32 %v11983_v41, %v6652_v3  ;;  %vm6742_vm0 = vc.u32 %v12044_v47, %v12024_v37 }
 0x416   :  { %v8423_v53 = vpop.eup %8422  ;;  %v14234_v55 = vand.u32 2147483647, %v12012_v44  ;;  %v7804_v42 = vadd.s32 4294967169, %v6897_v57  ;;  %v6744_v31 = vsel %vm6742_vm0, %v6743_v49, %v12025_v60  ;;  %vm6472_vm1 = vcmp.eq.s32.totalorder %v6467_v58, 2  ;;  %v12076_v57 = vpop.f32.mrf.mxu0 }
 0x417   :  { %v8425_v2 = vpop.eup %8424  ;;  %v6473_v21 = vxor.u32 2147483648, %v8423_v53  ;;  %v6655_v43 = vshrl.u32 %v6637_v61, %v6653_v23  ;;  %v6658_v12 = vadd.s32 127, %v6657_v32  ;;  %v6745_v40 = vadd.s32 %v6744_v31, %v6740_v52 }
 0x418   :  { %v6470_v4 = vxor.u32 2147483648, %v8425_v2  ;;  %v6903_v33 = vadd.s32 1, %v7804_v42  ;;  %v12073_v51 = vadd.f32 %v9453_v54, %v12052_v30  ;;  %v6674_v3 = vadd.s32 3, %v6670_v56  ;;  %v12094_v0 = vpop.f32.mrf.mxu0 }
 0x419   :  { %v6474_v41 = vsel %vm6472_vm1, %v6473_v21, %v8425_v2  ;;  %v6656_v22 = vor.u32 %v6655_v43, %v6654_v39  ;;  %v6659_v48 = vshll.u32 %v6658_v12, 23  ;;  %v6746_v61 = vadd.s32 536870912, %v6745_v40  ;;  %v12085_v2 = vpop.f32.mrf.mxu1  ;;  %14410 = vst [vmem:[#allocation8_spill] sm:$0xff] %v12094_v0 }
 0x41a   :  { %v6471_v6 = vsel %vm6469_vm13, %v8423_v53, %v6470_v4  ;;  %vm6904_vm2 = vcmp.gt.s32.totalorder %v6903_v33, 0  ;;  %v6900_v23 = vand.u32 8388607, %v14234_v55  ;;  %14409 = vst [vmem:[#allocation7_spill] sm:$0xff] %v12085_v2  ;;  %v12096_v31 = vand.u32 3, %v6674_v3 }
 0x41b   :  { %v6475_v60 = vsel %vm6468_vm12, %v6471_v6, %v6474_v41  ;;  %v6660_v49 = vor.u32 4788187, %v6659_v48  ;;  %v6905_v32 = vsel %vm6904_vm2, %v6903_v33, 0  ;;  %v12083_v39 = vshrl.u32 %v6746_v61, 30  ;;  %v12107_v6 = vpop.f32.mrf.mxu1 }
 0x41c   :  { %v6476_v52 = vsel %vm6465_vm11, nan, %v6475_v60  ;;  %v6907_v42 = vand.u32 31, %v6905_v32  ;;  %v6663_v58 = vcvt.s32.f32 %v6656_v22  ;;  %v6901_v4 = vor.u32 8388608, %v6900_v23  ;;  %14411 = vst [vmem:[#allocation10_spill] sm:$0xff] %v12107_v6 }
 0x41d   :  { %v7572_v56 = vsel %vm7533_vm6, %v11640_v15, %v6476_v52  ;;  %v6661_v53 = vand.u32 2147483647, %v6660_v49  ;;  %v6748_v21 = vshll.u32 %v12083_v39, 30  ;;  %v12101_v15 = vadd.s32 %v12024_v37, %v12044_v47  ;;  %v12116_v52 = vpop.f32.mrf.mxu0  ;;  %v12125_v0 = vpop.f32.mrf.mxu1 }
 0x41e   :  { %7621 = vst [vmem:[%s14171_s4 + $0x128] sm:$0xff] %v7572_v56  ;;  %v6908_v43 = vsub.s32 32, %v6907_v42  ;;  %v7000_v48 = vand.u32 2139095040, %v12073_v51  ;;  %v6910_v60 = vshll.u32 %v14328_v13, %v6907_v42  ;;  %v6913_v37 = vshll.u32 %v14329_v38, %v6907_v42  ;;  %14412 = vst [vmem:[#allocation11_spill] sm:$0xff] %v12116_v52 }
 0x41f   :  { %v6664_v12 = vmul.f32 %v6663_v58, %v6661_v53  ;;  %v12103_v41 = vsub.s32 %v6745_v40, %v6748_v21  ;;  %v6916_v47 = vshll.u32 %v14330_v27, %v6907_v42  ;;  %v6906_v53 = vshrl.u32 %v6905_v32, 5  ;;  %14413 = vst [vmem:[#allocation14_spill] sm:$0xff] %v12125_v0 }
 0x420   :  { %v6911_v22 = vshrl.u32 %v14329_v38, %v6908_v43  ;;  %v6914_v3 = vshrl.u32 %v14330_v27, %v6908_v43  ;;  %v6917_v49 = vshrl.u32 %v14331_v34, %v6908_v43  ;;  %v6920_v40 = vshrl.u32 %v14332_v8, %v6908_v43 }
 0x421   :  { %v6665_v61 = vxor.u32 2147483648, %v6664_v12  ;;  %v6751_v23 = vsub.s32 0, %v12103_v41  ;;  %v6919_v21 = vshll.u32 %v14331_v34, %v6907_v42  ;;  %v6922_v52 = vshll.u32 %v14332_v8, %v6907_v42 }
 0x422   :  { %v6912_v58 = vor.u32 %v6911_v22, %v6910_v60  ;;  %v6915_v14 = vor.u32 %v6914_v3, %v6913_v37  ;;  %v6918_v6 = vor.u32 %v6917_v49, %v6916_v47  ;;  %v12129_v22 = vshll.u32 %v6901_v4, 8  ;;  %v12131_v60 = vpop.f32.mrf.mxu0  ;;  %v12136_v37 = vpop.f32.mrf.mxu1 }
 0x423   :  { %v6666_v56 = vsel %vm6583_vm9, %v6665_v61, %v6664_v12  ;;  %v7797_v33 = vmin.u32 %v6751_v23, %v12103_v41  ;;  %v6921_v2 = vor.u32 %v6920_v40, %v6919_v21  ;;  %v6923_v12 = vshrl.u32 %v14333_v7, %v6908_v43  ;;  %14414 = vst [vmem:[#allocation16_spill] sm:$0xff] %v12131_v60 }
 0x424   :  { %v6669_v55 = vsel %vm12032_vm10, %v11799_v28, %v6666_v56  ;;  %v7001_v61 = vshrl.u32 %v7000_v48, 23  ;;  %v6771_v1 = vsub.s32 4, %v12083_v39  ;;  %v6909_v3 = vshrl.u32 %v14328_v13, %v6908_v43  ;;  %14415 = vst [vmem:[#allocation18_spill] sm:$0xff] %v12136_v37  ;;  %v12142_v40 = vpop.f32.mrf.mxu0  ;;  %v12148_v0 = vpop.f32.mrf.mxu1 }
 0x425   :  { %8426 = vcosq.f32 %v6669_v55  ;;  %v6753_v32 = vclz %v7797_v33  ;;  %v6924_v49 = vor.u32 %v6923_v12, %v6922_v52  ;;  %vm6925_vm3 = vcmp.lt.s32.totalorder %v6906_v53, 1 }
 0x426   :  { %8428 = vsinq.f32 %v6669_v55  ;;  %vm6927_vm4 = vcmp.lt.s32.totalorder %v6906_v53, 3  ;;  %vm6928_vm5 = vcmp.lt.s32.totalorder %v6906_v53, 4  ;;  %v6933_v42 = vsel %vm6925_vm3, %v6912_v58, %v6915_v14 }
 0x427   :  { %v7798_v23 = vadd.s32 4294967294, %v6753_v32  ;;  %vm6687_vm7 = vcmp.lt.s32.totalorder %v11844_v16, 0  ;;  %v6930_v55 = vsel %vm6928_vm5, %v6918_v6, 2102212464  ;;  %v6934_v4 = vsel %vm6928_vm5, %v6921_v2, 920167782 }
 0x428   :  { %v6937_v33 = vsel %vm6925_vm3, %v6915_v14, %v6918_v6  ;;  %v6938_v48 = vsel %vm6928_vm5, %v6924_v49, 1326507024  ;;  %vm6926_vm9 = vcmp.lt.s32.totalorder %v6906_v53, 2  ;;  %v6935_v43 = vsel %vm6927_vm4, %v6918_v6, %v6934_v4 }
 0x429   :  { %vm7799_vm8 = vcmp.lt.s32.totalorder %v7798_v23, 0  ;;  %v6939_v47 = vsel %vm6927_vm4, %v6921_v2, %v6938_v48  ;;  %v6929_v56 = vsel %vm6925_vm3, %v6909_v3, %v6912_v58  ;;  %v6936_v21 = vsel %vm6926_vm9, %v6933_v42, %v6935_v43  ;;  %v12161_v48 = vpop.f32.mrf.mxu0 }
 0x42a   :  { %v6756_v52 = vsel %vm7799_vm8, 0, %v7798_v23  ;;  %v6940_v12 = vsel %vm6926_vm9, %v6937_v33, %v6939_v47  ;;  %v6931_v60 = vsel %vm6927_vm4, %v6915_v14, %v6930_v55  ;;  %v7808_v49 = vadd.s32 4294967169, %v7001_v61  ;;  %14416 = vst [vmem:[#allocation20_spill] sm:$0xff] %v12161_v48  ;;  %v14420_v55 = vld [vmem:[#allocation5_spill] sm:$0xff]  ;;  %v12175_v47 = vpop.f32.mrf.mxu1 }
 0x42b   :  { %v6757_v32 = vsub.s32 32, %v6756_v52  ;;  %v6761_v37 = vsub.s32 4294967266, %v6756_v52  ;;  %v12151_v6 = vmul.u32.u64.low %v12129_v22, %v6940_v12  ;;  %v12152_v4 = vmul.u32.u64.high %v12129_v22, %v6940_v12, %v12151_v6  ;;  %14421 = vst [vmem:[#allocation9_spill] sm:$0xff] %v12175_v47 }
 0x42c   :  { %v12155_v2 = vmul.u32.u64.low %v12129_v22, %v6936_v21  ;;  %v12156_v23 = vmul.u32.u64.high %v12129_v22, %v6936_v21, %v12155_v2  ;;  %v6758_v58 = vshll.u32 %v12103_v41, %v6756_v52  ;;  %v7007_v33 = vadd.s32 1, %v7808_v49  ;;  %v12186_v6 = vpop.f32.mrf.mxu0  ;;  %v12190_v47 = vpop.f32.mrf.mxu1 }
 0x42d   :  { %v6759_v3 = vshrl.u32 %v12101_v15, %v6757_v32  ;;  %v6762_v42 = vadd.s32 127, %v6761_v37  ;;  %vm6673_vm10 = vweird.f32 %v11799_v28  ;;  %vm6676_vm11 = vcmp.lt.s32.totalorder %v12096_v31, 2  ;;  %14423 = vst [vmem:[#allocation12_spill] sm:$0xff] %v12186_v6  ;;  %14424 = vst [vmem:[#allocation13_spill] sm:$0xff] %v12190_v47 }
 0x42e   :  { %v14417_v14 = vand.u32 2147483647, %v11844_v16  ;;  %v1156_v43 = vadd.f32 %v11934_v36, %v14420_v55  ;;  %v6932_v41 = vsel %vm6926_vm9, %v6929_v56, %v6931_v60  ;;  %vm6677_vm13 = vcmp.eq.s32.totalorder %v12096_v31, 0 }
 0x42f   :  { %v6760_v15 = vor.u32 %v6759_v3, %v6758_v58  ;;  %v6763_v37 = vshll.u32 %v6762_v42, 23  ;;  %vm7008_vm15 = vcmp.gt.s32.totalorder %v7007_v33, 0  ;;  %vm6950_vm0 = vc.u32 %v12152_v4, %v12155_v2 }
 0x430   :  { %vm12167_vm12 = vcmp.le.f32.partialorder %v14417_v14, 0.7853982  ;;  %v6951_v52 = vadd.s32 1, %v12156_v23  ;;  %v14422_v21 = vand.u32 2147483647, %v12073_v51  ;;  %v7009_v32 = vsel %vm7008_vm15, %v7007_v33, 0 }
 0x431   :  { %v6764_v36 = vor.u32 4788187, %v6763_v37  ;;  %v6772_v53 = vsel %vm6687_vm7, %v6771_v1, %v12083_v39  ;;  %v6948_v60 = vmul.u32 %v12129_v22, %v6932_v41  ;;  %v7011_v56 = vand.u32 31, %v7009_v32 }
 0x432   :  { %v7004_v12 = vand.u32 8388607, %v14422_v21  ;;  %v8427_v49 = vpop.eup %8426  ;;  %vm6680_vm1 = vcmp.eq.s32.totalorder %v12096_v31, 2  ;;  %v6767_v42 = vcvt.s32.f32 %v6760_v15  ;;  %v6952_v14 = vsel %vm6950_vm0, %v6951_v52, %v12156_v23  ;;  %v12201_v52 = vpop.f32.mrf.mxu0 }
 0x433   :  { %v8429_v58 = vpop.eup %8428  ;;  %v6681_v3 = vxor.u32 2147483648, %v8427_v49  ;;  %v6765_v33 = vand.u32 2147483647, %v6764_v36  ;;  %v6953_v21 = vadd.s32 %v6952_v14, %v6948_v60  ;;  %v7012_v37 = vsub.s32 32, %v7011_v56  ;;  %14426 = vst [vmem:[#allocation17_spill] sm:$0xff] %v12201_v52 }
 0x434   :  { %v6678_v55 = vxor.u32 2147483648, %v8429_v58  ;;  %v6774_v39 = vsel %vm12167_vm12, 0, %v6772_v53  ;;  %v7005_v22 = vor.u32 8388608, %v7004_v12  ;;  %v12195_v1 = vadd.f32 %v11942_v10, %v1156_v43 }
 0x435   :  { %v6682_v48 = vsel %vm6680_vm1, %v6681_v3, %v8429_v58  ;;  %v6768_v15 = vmul.f32 %v6767_v42, %v6765_v33  ;;  %v6954_v6 = vadd.s32 536870912, %v6953_v21  ;;  %v12199_v23 = vshrl.u32 %v7009_v32, 5  ;;  %v12211_v32 = vpop.f32.mrf.mxu1  ;;  %v12225_v33 = vpop.f32.mrf.mxu0 }
 0x436   :  { %14425 = vst [vmem:[#allocation15_spill] sm:$0xff] %v12195_v1  ;;  %v6679_v41 = vsel %vm6677_vm13, %v8427_v49, %v6678_v55  ;;  %v7014_v60 = vshll.u32 %v14328_v13, %v7011_v56  ;;  %v7015_v53 = vshrl.u32 %v14329_v38, %v7012_v37  ;;  %v7018_v12 = vshrl.u32 %v14330_v27, %v7012_v37 }
 0x437   :  { %v6683_v36 = vsel %vm6676_vm11, %v6679_v41, %v6682_v48  ;;  %v6769_v43 = vxor.u32 2147483648, %v6768_v15  ;;  %v6955_v49 = vshrl.u32 %v6954_v6, 30  ;;  %v7021_v58 = vshrl.u32 %v14331_v34, %v7012_v37  ;;  %14427 = vst [vmem:[#allocation19_spill] sm:$0xff] %v12211_v32  ;;  %14428 = vst [vmem:[#allocation21_spill] sm:$0xff] %v12225_v33 }
 0x438   :  { %v6684_v10 = vsel %vm6673_vm10, nan, %v6683_v36  ;;  %v7017_v48 = vshll.u32 %v14329_v38, %v7011_v56  ;;  %v7020_v3 = vshll.u32 %v14330_v27, %v7011_v56  ;;  %v7023_v42 = vshll.u32 %v14331_v34, %v7011_v56 }
 0x439   :  { %v7574_v31 = vsel %vm7532_vm14, %v11780_v17, %v6684_v10  ;;  %v6770_v28 = vsel %vm6687_vm7, %v6769_v43, %v6768_v15  ;;  %v6956_v6 = vshll.u32 %v6955_v49, 30  ;;  %v7016_v14 = vor.u32 %v7015_v53, %v7014_v60  ;;  %v12234_v43 = vpop.f32.mrf.mxu1 }
 0x43a   :  { %7623 = vst [vmem:[%s14171_s4 + $0x138] sm:$0xff] %v7574_v31  ;;  %v7024_v55 = vshrl.u32 %v14332_v8, %v7012_v37  ;;  %v6773_v17 = vsel %vm12167_vm12, %v11844_v16, %v6770_v28  ;;  %v7019_v41 = vor.u32 %v7018_v12, %v7017_v48  ;;  %v7026_v36 = vshll.u32 %v14332_v8, %v7011_v56 }
 0x43b   :  { %v7027_v10 = vshrl.u32 %v14333_v7, %v7012_v37  ;;  %8430 = vcosq.f32 %v6773_v17  ;;  %v12232_v31 = vsub.s32 %v6953_v21, %v6956_v6  ;;  %v7022_v32 = vor.u32 %v7021_v58, %v7020_v3  ;;  %14429 = vst [vmem:[#allocation22_spill] sm:$0xff] %v12234_v43  ;;  %v12245_v21 = vpop.f32.mrf.mxu0 }
 0x43c   :  { %v7025_v15 = vor.u32 %v7024_v55, %v7023_v42  ;;  %8432 = vsinq.f32 %v6773_v17  ;;  %v6778_v60 = vadd.s32 3, %v6774_v39  ;;  %v12236_v33 = vshll.u32 %v7005_v22, 8  ;;  %14430 = vst [vmem:[#allocation23_spill] sm:$0xff] %v12245_v21 }
 0x43d   :  { %v7028_v53 = vor.u32 %v7027_v10, %v7026_v36  ;;  %v6959_v61 = vsub.s32 0, %v12232_v31  ;;  %vm7029_vm2 = vcmp.lt.s32.totalorder %v12199_v23, 1  ;;  %vm7032_vm3 = vcmp.lt.s32.totalorder %v12199_v23, 4  ;;  %v14432_v36 = vld [vmem:[#allocation4_spill] sm:$0xff]  ;;  %v12265_v21 = vpop.f32.mrf.mxu0 }
 0x43e   :  { %v12243_v56 = vadd.f32 %v9446_v45, %v12195_v1  ;;  %v7013_v12 = vshrl.u32 %v14328_v13, %v7012_v37  ;;  %vm7031_vm4 = vcmp.lt.s32.totalorder %v12199_v23, 3  ;;  %v7037_v39 = vsel %vm7029_vm2, %v7016_v14, %v7019_v41  ;;  %v12255_v45 = vpop.f32.mrf.mxu1  ;;  %14433 = vst [vmem:[#allocation25_spill] sm:$0xff] %v12265_v21 }
 0x43f   :  { %v7038_v22 = vsel %vm7032_vm3, %v7025_v15, 920167782  ;;  %v7805_v58 = vmin.u32 %v6959_v61, %v12232_v31  ;;  %vm7030_vm5 = vcmp.lt.s32.totalorder %v12199_v23, 2  ;;  %v7034_v48 = vsel %vm7032_vm3, %v7022_v32, 2102212464  ;;  %14431 = vst [vmem:[#allocation24_spill] sm:$0xff] %v12255_v45 }
 0x440   :  { %v7039_v3 = vsel %vm7031_vm4, %v7022_v32, %v7038_v22  ;;  %v6979_v42 = vsub.s32 4, %v6955_v49  ;;  %v7041_v28 = vsel %vm7029_vm2, %v7019_v41, %v7022_v32  ;;  %v7042_v6 = vsel %vm7032_vm3, %v7028_v53, 1326507024  ;;  %v12285_v53 = vpop.f32.mrf.mxu1 }
 0x441   :  { %v7040_v37 = vsel %vm7030_vm5, %v7037_v39, %v7039_v3  ;;  %v6779_v55 = vand.u32 3, %v6778_v60  ;;  %v6961_v17 = vclz %v7805_v58  ;;  %v1158_v10 = vadd.f32 %v11948_v18, %v14432_v36  ;;  %14437 = vst [vmem:[#allocation27_spill] sm:$0xff] %v12285_v53 }
 0x442   :  { %v7033_v61 = vsel %vm7029_vm2, %v7013_v12, %v7016_v14  ;;  %v7035_v22 = vsel %vm7031_vm4, %v7019_v41, %v7034_v48  ;;  %v7043_v39 = vsel %vm7031_vm4, %v7025_v15, %v7042_v6  ;;  %v14434_v60 = vand.u32 2147483647, %v12012_v44 }
 0x443   :  { %v12272_v3 = vmul.u32.u64.low %v12236_v33, %v7040_v37  ;;  %v12273_v32 = vmul.u32.u64.high %v12236_v33, %v7040_v37, %v12272_v3  ;;  %vm6895_vm8 = vcmp.lt.s32.totalorder %v12012_v44, 0  ;;  %v7806_v14 = vadd.s32 4294967294, %v6961_v17 }
 0x444   :  { %vm12278_vm7 = vcmp.le.f32.partialorder %v14434_v60, 0.7853982  ;;  %v7044_v41 = vsel %vm7030_vm5, %v7041_v28, %v7043_v39  ;;  %v6980_v15 = vsel %vm6895_vm8, %v6979_v42, %v6955_v49  ;;  %v7208_v48 = vand.u32 2139095040, %v12243_v56  ;;  %v12297_v28 = vpop.f32.mrf.mxu0 }
 0x445   :  { %v12290_v12 = vmul.u32.u64.low %v12236_v33, %v7044_v41  ;;  %v12291_v58 = vmul.u32.u64.high %v12236_v33, %v7044_v41, %v12290_v12  ;;  %vm6777_vm9 = vweird.f32 %v11844_v16  ;;  %vm6780_vm10 = vcmp.lt.s32.totalorder %v6779_v55, 2 }
 0x446   :  { %vm6784_vm11 = vcmp.eq.s32.totalorder %v6779_v55, 2  ;;  %vm7807_vm12 = vcmp.lt.s32.totalorder %v7806_v14, 0  ;;  %v7036_v37 = vsel %vm7030_vm5, %v7033_v61, %v7035_v22  ;;  %v7055_v17 = vadd.s32 1, %v12273_v32  ;;  %v12307_v12 = vpop.f32.mrf.mxu1  ;;  %v12314_v53 = vpop.f32.mrf.mxu0 }
 0x447   :  { %v6964_v6 = vsel %vm7807_vm12, 0, %v7806_v14  ;;  %v7209_v49 = vshrl.u32 %v7208_v48, 23  ;;  %v12301_v42 = vadd.f32 %v11958_v20, %v1158_v10  ;;  %v6949_v36 = vadd.s32 %v12155_v2, %v12152_v4 }
 0x448   :  { %v6965_v39 = vsub.s32 32, %v6964_v6  ;;  %v6969_v60 = vsub.s32 4294967266, %v6964_v6  ;;  %v6982_v41 = vsel %vm12278_vm7, 0, %v6980_v15  ;;  %v8431_v23 = vpop.eup %8430  ;;  %v6966_v61 = vshll.u32 %v12232_v31, %v6964_v6  ;;  %v12318_v6 = vpop.f32.mrf.mxu1 }
 0x449   :  { %14438 = vst [vmem:[#allocation28_spill] sm:$0xff] %v12301_v42  ;;  %v7052_v22 = vmul.u32 %v12236_v33, %v7036_v37  ;;  %vm7054_vm13 = vc.u32 %v12291_v58, %v12272_v3  ;;  %v7816_v20 = vadd.s32 4294967169, %v7209_v49  ;;  %v8433_v10 = vpop.eup %8432  ;;  %v6785_v14 = vxor.u32 2147483648, %v8431_v23 }
 0x44a   :  { %v6967_v48 = vshrl.u32 %v6949_v36, %v6965_v39  ;;  %v6970_v4 = vadd.s32 127, %v6969_v60  ;;  %v7056_v2 = vsel %vm7054_vm13, %v7055_v17, %v12273_v32  ;;  %v6782_v15 = vxor.u32 2147483648, %v8433_v10 }
 0x44b   :  { %v7057_v21 = vadd.s32 %v7056_v2, %v7052_v22  ;;  %v14236_v45 = vand.u32 2147483647, %v12243_v56  ;;  %v7215_v43 = vadd.s32 1, %v7816_v20  ;;  %vm6781_vm15 = vcmp.eq.s32.totalorder %v6779_v55, 0  ;;  %v12325_v22 = vpop.f32.mrf.mxu0 }
 0x44c   :  { %v6786_v33 = vsel %vm6784_vm11, %v6785_v14, %v8433_v10  ;;  %v6968_v31 = vor.u32 %v6967_v48, %v6966_v61  ;;  %v6971_v37 = vshll.u32 %v6970_v4, 23  ;;  %v6783_v49 = vsel %vm6781_vm15, %v8431_v23, %v6782_v15  ;;  %v12336_v48 = vpop.f32.mrf.mxu1 }
 0x44d   :  { %v7058_v52 = vadd.s32 536870912, %v7057_v21  ;;  %vm7216_vm0 = vcmp.gt.s32.totalorder %v7215_v43, 0  ;;  %v12322_v32 = vadd.f32 %v9453_v54, %v12301_v42  ;;  %v6787_v17 = vsel %vm6780_vm10, %v6783_v49, %v6786_v33  ;;  %14439 = vst [vmem:[#allocation26_spill] sm:$0xff] %v12336_v48  ;;  %v12344_v4 = vpop.f32.mrf.mxu0 }
 0x44e   :  { %v6972_v36 = vor.u32 4788187, %v6971_v37  ;;  %v6986_v39 = vadd.s32 3, %v6982_v41  ;;  %v7217_v60 = vsel %vm7216_vm0, %v7215_v43, 0  ;;  %v6788_v61 = vsel %vm6777_vm9, nan, %v6787_v17  ;;  %14440 = vst [vmem:[#allocation3_spill] sm:$0xff] %v12344_v4 }
 0x44f   :  { %v12329_v20 = vshrl.u32 %v7058_v52, 30  ;;  %v7212_v23 = vand.u32 8388607, %v14236_v45  ;;  %v7219_v10 = vand.u32 31, %v7217_v60  ;;  %v7575_v54 = vsel %vm7533_vm6, %v11830_v46, %v6788_v61  ;;  %v12362_v45 = vpop.f32.mrf.mxu0 }
 0x450   :  { %v6973_v55 = vand.u32 2147483647, %v6972_v36  ;;  %v6975_v14 = vcvt.s32.f32 %v6968_v31  ;;  %7624 = vst [vmem:[%s14171_s4 + $0x140] sm:$0xff] %v7575_v54  ;;  %v12342_v41 = vand.u32 3, %v6986_v39  ;;  %v7312_v33 = vand.u32 2139095040, %v12322_v32  ;;  %v12353_v36 = vpop.f32.mrf.mxu1 }
 0x451   :  { %v7060_v16 = vshll.u32 %v12329_v20, 30  ;;  %v7220_v52 = vsub.s32 32, %v7219_v10  ;;  %v7213_v15 = vor.u32 8388608, %v7212_v23  ;;  %v7222_v37 = vshll.u32 %v14328_v13, %v7219_v10  ;;  %14441 = vst [vmem:[#allocation5_spill] sm:$0xff] %v12353_v36 }
 0x452   :  { %v6976_v43 = vmul.f32 %v6975_v14, %v6973_v55  ;;  %v7225_v61 = vshll.u32 %v14329_v38, %v7219_v10  ;;  %v7218_v55 = vshrl.u32 %v7217_v60, 5  ;;  %v7234_v48 = vshll.u32 %v14332_v8, %v7219_v10  ;;  %v12370_v60 = vpop.f32.mrf.mxu1 }
 0x453   :  { %v12346_v2 = vsub.s32 %v7057_v21, %v7060_v16  ;;  %v7223_v46 = vshrl.u32 %v14329_v38, %v7220_v52  ;;  %v7226_v49 = vshrl.u32 %v14330_v27, %v7220_v52  ;;  %v7229_v17 = vshrl.u32 %v14331_v34, %v7220_v52  ;;  %14442 = vst [vmem:[#allocation4_spill] sm:$0xff] %v12370_v60 }
 0x454   :  { %v6977_v31 = vxor.u32 2147483648, %v6976_v43  ;;  %v7228_v21 = vshll.u32 %v14330_v27, %v7219_v10  ;;  %v7232_v23 = vshrl.u32 %v14332_v8, %v7220_v52  ;;  %v7231_v16 = vshll.u32 %v14331_v34, %v7219_v10 }
 0x455   :  { %v7063_v39 = vsub.s32 0, %v12346_v2  ;;  %v7224_v14 = vor.u32 %v7223_v46, %v7222_v37  ;;  %v7227_v47 = vor.u32 %v7226_v49, %v7225_v61  ;;  %v7053_v46 = vadd.s32 %v12272_v3, %v12291_v58 }
 0x456   :  { %v6978_v54 = vsel %vm6895_vm8, %v6977_v31, %v6976_v43  ;;  %v7230_v36 = vor.u32 %v7229_v17, %v7228_v21  ;;  %v7233_v4 = vor.u32 %v7232_v23, %v7231_v16  ;;  %v7235_v43 = vshrl.u32 %v14333_v7, %v7220_v52  ;;  %v12377_v17 = vpop.f32.mrf.mxu0 }
 0x457   :  { %v6981_v42 = vsel %vm12278_vm7, %v12012_v44, %v6978_v54  ;;  %v7809_v1 = vmin.u32 %v7063_v39, %v12346_v2  ;;  %v12374_v37 = vshll.u32 %v7213_v15, 8  ;;  %v7221_v18 = vshrl.u32 %v14328_v13, %v7220_v52  ;;  %14443 = vst [vmem:[#allocation29_spill] sm:$0xff] %v12377_v17 }
 0x458   :  { %8434 = vcosq.f32 %v6981_v42  ;;  %v7236_v39 = vor.u32 %v7235_v43, %v7234_v48  ;;  %vm7237_vm1 = vcmp.lt.s32.totalorder %v7218_v55, 1  ;;  %v7313_v49 = vshrl.u32 %v7312_v33, 23  ;;  %v12388_v16 = vpop.f32.mrf.mxu0 }
 0x459   :  { %8436 = vsinq.f32 %v6981_v42  ;;  %v7065_v31 = vclz %v7809_v1  ;;  %vm7239_vm2 = vcmp.lt.s32.totalorder %v7218_v55, 3  ;;  %vm7240_vm3 = vcmp.lt.s32.totalorder %v7218_v55, 4  ;;  %v12381_v1 = vpop.f32.mrf.mxu1 }
 0x45a   :  { %v7245_v10 = vsel %vm7237_vm1, %v7224_v14, %v7227_v47  ;;  %v7242_v21 = vsel %vm7240_vm3, %v7230_v36, 2102212464  ;;  %v7246_v42 = vsel %vm7240_vm3, %v7233_v4, 920167782  ;;  %v7249_v23 = vsel %vm7237_vm1, %v7227_v47, %v7230_v36  ;;  %14444 = vst [vmem:[#allocation30_spill] sm:$0xff] %v12381_v1 }
 0x45b   :  { %v7810_v61 = vadd.s32 4294967294, %v7065_v31  ;;  %v7250_v3 = vsel %vm7240_vm3, %v7236_v39, 1326507024  ;;  %vm7238_vm5 = vcmp.lt.s32.totalorder %v7218_v55, 2  ;;  %v7247_v58 = vsel %vm7239_vm2, %v7230_v36, %v7246_v42 }
 0x45c   :  { %v7251_v48 = vsel %vm7239_vm2, %v7233_v4, %v7250_v3  ;;  %v7241_v15 = vsel %vm7237_vm1, %v7221_v18, %v7224_v14  ;;  %v7248_v33 = vsel %vm7238_vm5, %v7245_v10, %v7247_v58  ;;  %v7243_v39 = vsel %vm7239_vm2, %v7227_v47, %v7242_v21  ;;  %v12400_v14 = vpop.f32.mrf.mxu1 }
 0x45d   :  { %vm7811_vm4 = vcmp.lt.s32.totalorder %v7810_v61, 0  ;;  %v7252_v54 = vsel %vm7238_vm5, %v7249_v23, %v7251_v48  ;;  %v7820_v1 = vadd.s32 4294967169, %v7313_v49  ;;  %14445 = vst [vmem:[#allocation31_spill] sm:$0xff] %v12400_v14  ;;  %vm6985_vm7 = vweird.f32 %v12012_v44  ;;  %v12406_v49 = vpop.f32.mrf.mxu0 }
 0x45e   :  { %v7068_v52 = vsel %vm7811_vm4, 0, %v7810_v61  ;;  %v12392_v60 = vmul.u32.u64.low %v12374_v37, %v7252_v54  ;;  %v12393_v17 = vmul.u32.u64.high %v12374_v37, %v7252_v54, %v12392_v60  ;;  %vm6999_vm8 = vcmp.lt.s32.totalorder %v12073_v51, 0 }
 0x45f   :  { %v7069_v43 = vsub.s32 32, %v7068_v52  ;;  %v7073_v31 = vsub.s32 4294967266, %v7068_v52  ;;  %v12396_v4 = vmul.u32.u64.low %v12374_v37, %v7248_v33  ;;  %v12397_v36 = vmul.u32.u64.high %v12374_v37, %v7248_v33, %v12396_v4 }
 0x460   :  { %v7070_v18 = vshll.u32 %v12346_v2, %v7068_v52  ;;  %v7319_v42 = vadd.s32 1, %v7820_v1  ;;  %v7244_v47 = vsel %vm7238_vm5, %v7241_v15, %v7243_v39  ;;  %v7083_v3 = vsub.s32 4, %v12329_v20  ;;  %v12413_v1 = vpop.f32.mrf.mxu1 }
 0x461   :  { %v7071_v61 = vshrl.u32 %v7053_v46, %v7069_v43  ;;  %v7074_v10 = vadd.s32 127, %v7073_v31  ;;  %vm7262_vm10 = vc.u32 %v12393_v17, %v12396_v4  ;;  %v7263_v2 = vadd.s32 1, %v12397_v36  ;;  %14446 = vst [vmem:[#allocation32_spill] sm:$0xff] %v12413_v1 }
 0x462   :  { %vm7320_vm9 = vcmp.gt.s32.totalorder %v7319_v42, 0  ;;  %vm6988_vm11 = vcmp.lt.s32.totalorder %v12342_v41, 2  ;;  %v14447_v55 = vand.u32 2147483647, %v12073_v51  ;;  %v7260_v15 = vmul.u32 %v12374_v37, %v7244_v47  ;;  %v12433_v1 = vpop.f32.mrf.mxu1 }
 0x463   :  { %v7072_v60 = vor.u32 %v7071_v61, %v7070_v18  ;;  %v7075_v21 = vshll.u32 %v7074_v10, 23  ;;  %v7321_v46 = vsel %vm7320_vm9, %v7319_v42, 0  ;;  %vm6992_vm13 = vcmp.eq.s32.totalorder %v12342_v41, 2  ;;  %v12425_v18 = vpop.f32.mrf.mxu0  ;;  %14451 = vst [vmem:[#allocation33_spill] sm:$0xff] %v12433_v1 }
 0x464   :  { %vm12418_vm12 = vcmp.le.f32.partialorder %v14447_v55, 0.7853982  ;;  %v7323_v33 = vand.u32 31, %v7321_v46  ;;  %v7264_v39 = vsel %vm7262_vm10, %v7263_v2, %v12397_v36  ;;  %vm6989_vm15 = vcmp.eq.s32.totalorder %v12342_v41, 0 }
 0x465   :  { %v8435_v58 = vpop.eup %8434  ;;  %v7076_v52 = vor.u32 4788187, %v7075_v21  ;;  %v7079_v31 = vcvt.s32.f32 %v7072_v60  ;;  %v7265_v42 = vadd.s32 %v7264_v39, %v7260_v15  ;;  %v7084_v37 = vsel %vm6999_vm8, %v7083_v3, %v12329_v20  ;;  %v12442_v20 = vpop.f32.mrf.mxu0 }
 0x466   :  { %v8437_v54 = vpop.eup %8436  ;;  %v6993_v43 = vxor.u32 2147483648, %v8435_v58  ;;  %v7324_v55 = vsub.s32 32, %v7323_v33  ;;  %v14450_v47 = vand.u32 2147483647, %v12322_v32  ;;  %v12435_v14 = vshrl.u32 %v7321_v46, 5  ;;  %14452 = vst [vmem:[#allocation34_spill] sm:$0xff] %v12442_v20 }
 0x467   :  { %v6990_v61 = vxor.u32 2147483648, %v8437_v54  ;;  %v7077_v10 = vand.u32 2147483647, %v7076_v52  ;;  %v7266_v2 = vadd.s32 536870912, %v7265_v42  ;;  %v7326_v15 = vshll.u32 %v14328_v13, %v7323_v33  ;;  %v12469_v1 = vpop.f32.mrf.mxu0 }
 0x468   :  { %v6994_v23 = vsel %vm6992_vm13, %v6993_v43, %v8437_v54  ;;  %v7316_v21 = vand.u32 8388607, %v14450_v47  ;;  %v7327_v54 = vshrl.u32 %v14329_v38, %v7324_v55  ;;  %v7330_v43 = vshrl.u32 %v14330_v27, %v7324_v55 }
 0x469   :  { %v6991_v60 = vsel %vm6989_vm15, %v8435_v58, %v6990_v61  ;;  %v7080_v36 = vmul.f32 %v7079_v31, %v7077_v10  ;;  %v12446_v58 = vshrl.u32 %v7266_v2, 30  ;;  %v7333_v46 = vshrl.u32 %v14331_v34, %v7324_v55  ;;  %v12455_v10 = vpop.f32.mrf.mxu1 }
 0x46a   :  { %v6995_v52 = vsel %vm6988_vm11, %v6991_v60, %v6994_v23  ;;  %v7329_v23 = vshll.u32 %v14329_v38, %v7323_v33  ;;  %v7332_v31 = vshll.u32 %v14330_v27, %v7323_v33  ;;  %v7335_v61 = vshll.u32 %v14331_v34, %v7323_v33  ;;  %14453 = vst [vmem:[#allocation35_spill] sm:$0xff] %v12455_v10 }
 0x46b   :  { %v6996_v3 = vsel %vm6985_vm7, nan, %v6995_v52  ;;  %v7081_v39 = vxor.u32 2147483648, %v7080_v36  ;;  %v7268_v47 = vshll.u32 %v12446_v58, 30  ;;  %v7328_v60 = vor.u32 %v7327_v54, %v7326_v15  ;;  %v12473_v20 = vpop.f32.mrf.mxu1 }
 0x46c   :  { %v7577_v41 = vsel %vm7532_vm14, %v11989_v11, %v6996_v3  ;;  %v7336_v11 = vshrl.u32 %v14332_v8, %v7324_v55  ;;  %v7331_v52 = vor.u32 %v7330_v43, %v7329_v23  ;;  %v7338_v3 = vshll.u32 %v14332_v8, %v7323_v33  ;;  %14454 = vst [vmem:[#allocation36_spill] sm:$0xff] %v12473_v20 }
 0x46d   :  { %7626 = vst [vmem:[%s14171_s4 + $0x150] sm:$0xff] %v7577_v41  ;;  %v7082_v44 = vsel %vm6999_vm8, %v7081_v39, %v7080_v36  ;;  %v7339_v10 = vshrl.u32 %v14333_v7, %v7324_v55  ;;  %v12471_v41 = vsub.s32 %v7265_v42, %v7268_v47  ;;  %v7334_v36 = vor.u32 %v7333_v46, %v7332_v31  ;;  %v12484_v46 = vpop.f32.mrf.mxu0  ;;  %v12494_v47 = vpop.f32.mrf.mxu1 }
 0x46e   :  { %v7085_v2 = vsel %vm12418_vm12, %v12073_v51, %v7082_v44  ;;  %v7337_v39 = vor.u32 %v7336_v11, %v7335_v61  ;;  %v7317_v15 = vor.u32 8388608, %v7316_v21  ;;  %v7086_v44 = vsel %vm12418_vm12, 0, %v7084_v37  ;;  %14455 = vst [vmem:[#allocation37_spill] sm:$0xff] %v12484_v46  ;;  %14456 = vst [vmem:[#allocation38_spill] sm:$0xff] %v12494_v47 }
 0x46f   :  { %8438 = vcosq.f32 %v7085_v2  ;;  %v7340_v54 = vor.u32 %v7339_v10, %v7338_v3  ;;  %v7271_v43 = vsub.s32 0, %v12471_v41  ;;  %vm7341_vm0 = vcmp.lt.s32.totalorder %v12435_v14, 1 }
 0x470   :  { %8440 = vsinq.f32 %v7085_v2  ;;  %vm7344_vm1 = vcmp.lt.s32.totalorder %v12435_v14, 4  ;;  %v7325_v33 = vshrl.u32 %v14328_v13, %v7324_v55  ;;  %vm7343_vm2 = vcmp.lt.s32.totalorder %v12435_v14, 3 }
 0x471   :  { %v7349_v42 = vsel %vm7341_vm0, %v7328_v60, %v7331_v52  ;;  %v7350_v21 = vsel %vm7344_vm1, %v7337_v39, 920167782  ;;  %v7817_v23 = vmin.u32 %v7271_v43, %v12471_v41  ;;  %vm7342_vm3 = vcmp.lt.s32.totalorder %v12435_v14, 2 }
 0x472   :  { %v7346_v48 = vsel %vm7344_vm1, %v7334_v36, 2102212464  ;;  %v7351_v37 = vsel %vm7343_vm2, %v7334_v36, %v7350_v21  ;;  %v7353_v55 = vsel %vm7341_vm0, %v7331_v52, %v7334_v36  ;;  %v7354_v61 = vsel %vm7344_vm1, %v7340_v54, 1326507024  ;;  %v12506_v36 = vpop.f32.mrf.mxu0 }
 0x473   :  { %v7352_v31 = vsel %vm7342_vm3, %v7349_v42, %v7351_v37  ;;  %v7357_v10 = vshll.u32 %v7317_v15, 8  ;;  %v7090_v11 = vadd.s32 3, %v7086_v44  ;;  %v7273_v2 = vclz %v7817_v23  ;;  %14457 = vst [vmem:[#allocation39_spill] sm:$0xff] %v12506_v36 }
 0x474   :  { %v7345_v3 = vsel %vm7341_vm0, %v7325_v33, %v7328_v60  ;;  %v7347_v43 = vsel %vm7343_vm2, %v7331_v52, %v7346_v48  ;;  %v7355_v21 = vsel %vm7343_vm2, %v7337_v39, %v7354_v61  ;;  %v12513_v60 = vpop.f32.mrf.mxu1  ;;  %v12518_v37 = vpop.f32.mrf.mxu0  ;;  %vm7089_vm10 = vweird.f32 %v12073_v51 }
 0x475   :  { %v12502_v20 = vmul.u32.u64.low %v7357_v10, %v7352_v31  ;;  %v12503_v42 = vmul.u32.u64.high %v7357_v10, %v7352_v31, %v12502_v20  ;;  %v7818_v15 = vadd.s32 4294967294, %v7273_v2  ;;  %v7356_v54 = vsel %vm7342_vm3, %v7353_v55, %v7355_v21  ;;  %14458 = vst [vmem:[#allocation40_spill] sm:$0xff] %v12513_v60  ;;  %14459 = vst [vmem:[#allocation41_spill] sm:$0xff] %v12518_v37 }
 0x476   :  { %v12510_v44 = vmul.u32.u64.low %v7357_v10, %v7356_v54  ;;  %v12511_v23 = vmul.u32.u64.high %v7357_v10, %v7356_v54, %v12510_v44  ;;  %v7348_v52 = vsel %vm7342_vm3, %v7345_v3, %v7347_v43  ;;  %v7091_v39 = vand.u32 3, %v7090_v11  ;;  %v12525_v14 = vpop.f32.mrf.mxu1 }
 0x477   :  { %vm7819_vm4 = vcmp.lt.s32.totalorder %v7818_v15, 0  ;;  %v7367_v48 = vadd.s32 1, %v12503_v42  ;;  %v7261_v31 = vadd.s32 %v12396_v4, %v12393_v17  ;;  %v7364_v54 = vmul.u32 %v7357_v10, %v7348_v52  ;;  %14460 = vst [vmem:[#allocation42_spill] sm:$0xff] %v12525_v14  ;;  %v12528_v4 = vpop.f32.mrf.mxu0 }
 0x478   :  { %v7276_v33 = vsel %vm7819_vm4, 0, %v7818_v15  ;;  %vm7366_vm5 = vc.u32 %v12511_v23, %v12502_v20  ;;  %vm7093_vm7 = vcmp.eq.s32.totalorder %v7091_v39, 0  ;;  %vm7096_vm8 = vcmp.eq.s32.totalorder %v7091_v39, 2  ;;  %14461 = vst [vmem:[#allocation43_spill] sm:$0xff] %v12528_v4  ;;  %v12531_v37 = vpop.f32.mrf.mxu1 }
 0x479   :  { %v7277_v61 = vsub.s32 32, %v7276_v33  ;;  %v7281_v55 = vsub.s32 4294967266, %v7276_v33  ;;  %v7278_v21 = vshll.u32 %v12471_v41, %v7276_v33  ;;  %v7368_v44 = vsel %vm7366_vm5, %v7367_v48, %v12503_v42  ;;  %14462 = vst [vmem:[#allocation44_spill] sm:$0xff] %v12531_v37 }
 0x47a   :  { %v7369_v17 = vadd.s32 %v7368_v44, %v7364_v54  ;;  %v7291_v52 = vsub.s32 4, %v12446_v58  ;;  %vm7092_vm9 = vcmp.lt.s32.totalorder %v7091_v39, 2  ;;  %vm7207_vm11 = vcmp.lt.s32.totalorder %v12243_v56, 0 }
 0x47b   :  { %v7279_v43 = vshrl.u32 %v7261_v31, %v7277_v61  ;;  %v7282_v15 = vadd.s32 127, %v7281_v55  ;;  %v12535_v55 = vpop.f32.mrf.mxu0  ;;  %vm7311_vm15 = vcmp.lt.s32.totalorder %v12322_v32, 0  ;;  %vm7297_vm4 = vweird.f32 %v12243_v56 }
 0x47c   :  { %v8439_v2 = vpop.eup %8438  ;;  %v7370_v14 = vadd.s32 536870912, %v7369_v17  ;;  %14463 = vst [vmem:[#allocation45_spill] sm:$0xff] %v12535_v55 }
 0x47d   :  { %v8441_v11 = vpop.eup %8440  ;;  %v7097_v3 = vxor.u32 2147483648, %v8439_v2  ;;  %v7280_v41 = vor.u32 %v7279_v43, %v7278_v21  ;;  %v7283_v10 = vshll.u32 %v7282_v15, 23  ;;  %v8070_v43 = vpop.f32.mrf.mxu0 }
 0x47e   :  { %v7094_v60 = vxor.u32 2147483648, %v8441_v11  ;;  %v7371_v61 = vshrl.u32 %v7370_v14, 30 }
 0x47f   :  { %v7098_v47 = vsel %vm7096_vm8, %v7097_v3, %v8441_v11  ;;  %v7284_v42 = vor.u32 4788187, %v7283_v10  ;;  %v7287_v39 = vcvt.s32.f32 %v7280_v41 }
 0x480   :  { %v7095_v33 = vsel %vm7093_vm7, %v8439_v2, %v7094_v60  ;;  %v7292_v60 = vsel %vm7207_vm11, %v7291_v52, %v12446_v58  ;;  %v7372_v51 = vshll.u32 %v7371_v61, 30  ;;  %v14465_v2 = vand.u32 2147483647, %v12243_v56 }
 0x481   :  { %v7099_v31 = vsel %vm7092_vm9, %v7095_v33, %v7098_v47  ;;  %v7285_v54 = vand.u32 2147483647, %v7284_v42  ;;  %v12546_v47 = vpop.f32.mrf.mxu1  ;;  %v1654_v58 = vadd.f32 %v12000_v59, %v11991_v25  ;;  %v2202_v42 = vpop.f32.mrf.mxu0 }
 0x482   :  { %v7100_v48 = vsel %vm7089_vm10, nan, %v7099_v31  ;;  %14464 = vst [vmem:[#allocation46_spill] sm:$0xff] %v12546_v47  ;;  %vm7206_vm12 = vcmp.le.f32.partialorder %v14465_v2, 0.7853982  ;;  %v12550_v3 = vsub.s32 %v7369_v17, %v7372_v51 }
 0x483   :  { %v7578_v21 = vsel %vm7533_vm6, %v12052_v30, %v7100_v48  ;;  %v7288_v14 = vmul.f32 %v7287_v39, %v7285_v54  ;;  %v7294_v11 = vsel %vm7206_vm12, 0, %v7292_v60  ;;  %v1660_v30 = vadd.f32 %v11981_v35, %v11968_v63  ;;  %v8100_v10 = vpop.f32.mrf.mxu1 }
 0x484   :  { %7627 = vst [vmem:[%s14171_s4 + $0x158] sm:$0xff] %v7578_v21  ;;  %v7375_v44 = vsub.s32 0, %v12550_v3  ;;  %v7298_v33 = vadd.s32 3, %v7294_v11  ;;  %v1822_v17 = vadd.f32 %v12314_v53, %v1654_v58  ;;  %v14466_v54 = vand.u32 2147483647, %v12322_v32 }
 0x485   :  { %v7289_v15 = vxor.u32 2147483648, %v7288_v14  ;;  %v1829_v41 = vadd.f32 %v12297_v28, %v1660_v30  ;;  %v2366_v48 = vpop.f32.mrf.mxu1  ;;  %v7395_v60 = vsub.s32 4, %v7371_v61  ;;  %v1666_v11 = vadd.f32 %v12057_v26, %v12047_v24 }
 0x486   :  { %v7821_v63 = vmin.u32 %v7375_v44, %v12550_v3  ;;  %v2003_v25 = vadd.f32 %v12318_v6, %v1822_v17  ;;  %v12565_v21 = vand.u32 3, %v7298_v33  ;;  %vm12569_vm13 = vcmp.le.f32.partialorder %v14466_v54, 0.7853982  ;;  %v14469_v6 = vld [vmem:[#allocation2_spill] sm:$0xff]  ;;  %v14471_v44 = vld [vmem:[#allocation8_spill] sm:$0xff] }
 0x487   :  { %v7290_v52 = vsel %vm7207_vm11, %v7289_v15, %v7288_v14  ;;  %v2011_v35 = vadd.f32 %v12307_v12, %v1829_v41  ;;  %v14239_v2 = vsub.s32 2, %v14469_v6  ;;  %v1672_v14 = vadd.f32 %v12028_v9, %v12014_v29  ;;  %v14470_v15 = vld [vmem:[#allocation7_spill] sm:$0xff]  ;;  %v14472_v41 = vld [vmem:[#allocation10_spill] sm:$0xff] }
 0x488   :  { %v7293_v31 = vsel %vm7206_vm12, %v12243_v56, %v7290_v52  ;;  %v7377_v59 = vclz %v7821_v63  ;;  %v2203_v39 = vadd.f32 %v2202_v42, %v2003_v25  ;;  %v12583_v30 = vadd.f32 %v12069_v50, %v12066_v19  ;;  %v8514_v29 = vld [vmem:[%s14169_s2] sm:$0x7]  ;;  %v14473_v19 = vld [vmem:[#allocation11_spill] sm:$0xff]  ;;  %v8073_v63 = vpop.f32.mrf.mxu0 }
 0x489   :  { %8442 = vcosq.f32 %v7293_v31  ;;  %v2209_v28 = vadd.f32 %v8070_v43, %v2011_v35  ;;  %v12589_v58 = vadd.f32 %v14470_v15, %v12076_v57  ;;  %v12600_v9 = vrot.slane %v8514_v29, %v14239_v2  ;;  %v14474_v50 = vld [vmem:[#allocation14_spill] sm:$0xff] }
 0x48a   :  { %8444 = vsinq.f32 %v7293_v31  ;;  %v7822_v12 = vadd.s32 4294967294, %v7377_v59  ;;  %v12585_v43 = vadd.f32 %v2366_v48, %v2203_v39  ;;  %v7365_v24 = vadd.s32 %v12502_v20, %v12511_v23  ;;  %v14475_v20 = vld [vmem:[#allocation16_spill] sm:$0xff]  ;;  %v14476_v23 = vld [vmem:[#allocation18_spill] sm:$0xff] }
 0x48b   :  { %v12574_v51 = vadd.f32 %v8100_v10, %v2209_v28  ;;  %v12593_v10 = vadd.f32 %v14472_v41, %v14471_v44  ;;  %v12606_v57 = vadd.f32 %v14474_v50, %v14473_v19  ;;  %v1843_v52 = vadd.f32 %v12325_v22, %v1672_v14  ;;  %v14477_v25 = vld [vmem:[#allocation26_spill] sm:$0xff]  ;;  %v14480_v14 = vld [vmem:[#allocation3_spill] sm:$0xff]  ;;  %v8103_v41 = vpop.f32.mrf.mxu1  ;;  %v14481_v50 = vld [vmem:[#allocation5_spill] sm:$0xff] }
 0x48c   :  { %vm7823_vm0 = vcmp.lt.s32.totalorder %v7822_v12, 0  ;;  %vm7304_vm1 = vcmp.eq.s32.totalorder %v12565_v21, 2  ;;  %v7396_v31 = vsel %vm7311_vm15, %v7395_v60, %v7371_v61  ;;  %vm7301_vm2 = vcmp.eq.s32.totalorder %v12565_v21, 0 }
 0x48d   :  { %v7380_v26 = vsel %vm7823_vm0, 0, %v7822_v12  ;;  %v12614_v35 = vadd.f32 %v12600_v9, %v12574_v51  ;;  %v12619_v42 = vadd.f32 %v14476_v23, %v14475_v20  ;;  %v12623_v22 = vadd.f32 %v12148_v0, %v12142_v40  ;;  %v14478_v40 = vld [vmem:[#allocation20_spill] sm:$0xff]  ;;  %v14479_v12 = vld [vmem:[#allocation9_spill] sm:$0xff] }
 0x48e   :  { %v7381_v33 = vsub.s32 32, %v7380_v26  ;;  %v7385_v17 = vsub.s32 4294967266, %v7380_v26  ;;  %v2027_v59 = vadd.f32 %v14477_v25, %v1843_v52  ;;  %v12628_v61 = vadd.f32 %v12600_v9, %v12585_v43  ;;  %v14482_v25 = vld [vmem:[#allocation12_spill] sm:$0xff] }
 0x48f   :  { %vm7300_vm3 = vcmp.lt.s32.totalorder %v12565_v21, 2  ;;  %v7382_v28 = vshll.u32 %v12550_v3, %v7380_v26  ;;  %v14241_v39 = vand.u32 2147483647, %v12614_v35  ;;  %v7398_v0 = vsel %vm12569_vm13, 0, %v7396_v31  ;;  %v2214_v26 = vpop.f32.mrf.mxu0 }
 0x490   :  { %v7383_v48 = vshrl.u32 %v7365_v24, %v7381_v33  ;;  %v7386_v54 = vadd.s32 127, %v7385_v17  ;;  %v12638_v60 = vadd.f32 %v14479_v12, %v14478_v40  ;;  %v1836_v15 = vadd.f32 %v14480_v14, %v1666_v11  ;;  %v14483_v40 = vld [vmem:[#allocation13_spill] sm:$0xff] }
 0x491   :  { %v3048_v44 = vand.u32 2139095040, %v12614_v35  ;;  %v2221_v24 = vadd.f32 %v8073_v63, %v2027_v59  ;;  %v14240_v19 = vand.u32 2147483647, %v12628_v61  ;;  %v3052_v17 = vand.u32 8388607, %v14241_v39 }
 0x492   :  { %v7384_v29 = vor.u32 %v7383_v48, %v7382_v28  ;;  %v7387_v3 = vshll.u32 %v7386_v54, 23  ;;  %v2019_v52 = vadd.f32 %v14481_v50, %v1836_v15  ;;  %v2736_v31 = vand.u32 2139095040, %v12628_v61 }
 0x493   :  { %v3049_v33 = vshrl.u32 %v3048_v44, 23  ;;  %v7402_v11 = vadd.s32 3, %v7398_v0  ;;  %v12649_v12 = vadd.f32 %v14483_v40, %v14482_v25  ;;  %v12651_v28 = vadd.f32 %v8103_v41, %v2221_v24 }
 0x494   :  { %v7388_v23 = vor.u32 4788187, %v7387_v3  ;;  %v2215_v54 = vadd.f32 %v2214_v26, %v2019_v52  ;;  %v2737_v14 = vshrl.u32 %v2736_v31, 23  ;;  %v7391_v50 = vcvt.s32.f32 %v7384_v29  ;;  %v2378_v3 = vpop.f32.mrf.mxu1 }
 0x495   :  { %v7656_v48 = vadd.s32 4294967169, %v3049_v33  ;;  %v12655_v2 = vand.u32 8388607, %v14240_v19  ;;  %v3053_v25 = vor.u32 8388608, %v3052_v17  ;;  %v12661_v26 = vand.u32 3, %v7402_v11  ;;  %v14485_v11 = vld [vmem:[#allocation15_spill] sm:$0xff] }
 0x496   :  { %v8443_v20 = vpop.eup %8442  ;;  %v7389_v44 = vand.u32 2147483647, %v7388_v23  ;;  %v7644_v41 = vadd.s32 4294967169, %v2737_v14  ;;  %v12665_v29 = vadd.f32 %v12600_v9, %v12651_v28  ;;  %v12669_v23 = vadd.f32 %v2378_v3, %v2215_v54 }
 0x497   :  { %v8445_v63 = vpop.eup %8444  ;;  %v7305_v59 = vxor.u32 2147483648, %v8443_v20  ;;  %v3055_v40 = vadd.s32 1, %v7656_v48  ;;  %vm7408_vm11 = vcmp.eq.s32.totalorder %v12661_v26, 2  ;;  %vm7405_vm12 = vcmp.eq.s32.totalorder %v12661_v26, 0 }
 0x498   :  { %v7302_v15 = vxor.u32 2147483648, %v8445_v63  ;;  %v7392_v33 = vmul.f32 %v7391_v50, %v7389_v44  ;;  %v2743_v31 = vadd.s32 1, %v7644_v41  ;;  %14484 = vst [vmem:[#allocation2_spill] sm:$0xff] %v12669_v23 }
 0x499   :  { %v7306_v0 = vsel %vm7304_vm1, %v7305_v59, %v8445_v63  ;;  %vm3056_vm5 = vcmp.gt.s32.totalorder %v3055_v40, 0 }
 0x49a   :  { %v7303_v24 = vsel %vm7301_vm2, %v8443_v20, %v7302_v15  ;;  %v7393_v63 = vxor.u32 2147483648, %v7392_v33  ;;  %v3057_v59 = vsel %vm3056_vm5, %v3055_v40, 0  ;;  %v2741_v20 = vor.u32 8388608, %v12655_v2 }
 0x49b   :  { %v7307_v52 = vsel %vm7300_vm3, %v7303_v24, %v7306_v0  ;;  %v3059_v14 = vand.u32 31, %v3057_v59  ;;  %v12677_v15 = vshll.u32 %v3053_v25, 8  ;;  %vm2744_vm7 = vcmp.gt.s32.totalorder %v2743_v31, 0 }
 0x49c   :  { %v7308_v17 = vsel %vm7297_vm4, nan, %v7307_v52  ;;  %v7394_v56 = vsel %vm7311_vm15, %v7393_v63, %v7392_v33  ;;  %v3058_v21 = vshrl.u32 %v3057_v59, 5  ;;  %v3672_v2 = vand.u32 2139095040, %v12665_v29 }
 0x49d   :  { %v7580_v48 = vsel %vm7532_vm14, %v14485_v11, %v7308_v17  ;;  %v7397_v5 = vsel %vm12569_vm13, %v12322_v32, %v7394_v56  ;;  %v3060_v44 = vsub.s32 32, %v3059_v14  ;;  %v3062_v50 = vshll.u32 %v14328_v13, %v3059_v14 }
 0x49e   :  { %7629 = vst [vmem:[%s14171_s4 + $0x168] sm:$0xff] %v7580_v48  ;;  %v2745_v3 = vsel %vm2744_vm7, %v2743_v31, 0  ;;  %8446 = vcosq.f32 %v7397_v5  ;;  %v3065_v0 = vshll.u32 %v14329_v38, %v3059_v14  ;;  %v3068_v25 = vshll.u32 %v14330_v27, %v3059_v14 }
 0x49f   :  { %v3071_v40 = vshll.u32 %v14331_v34, %v3059_v14  ;;  %8448 = vsinq.f32 %v7397_v5  ;;  %v3063_v41 = vshrl.u32 %v14329_v38, %v3060_v44  ;;  %v3066_v24 = vshrl.u32 %v14330_v27, %v3060_v44 }
 0x4a0   :  { %v3074_v33 = vshll.u32 %v14332_v8, %v3059_v14  ;;  %v3061_v53 = vshrl.u32 %v14328_v13, %v3060_v44  ;;  %v3069_v52 = vshrl.u32 %v14331_v34, %v3060_v44  ;;  %v3072_v31 = vshrl.u32 %v14332_v8, %v3060_v44 }
 0x4a1   :  { %v3075_v17 = vshrl.u32 %v14333_v7, %v3060_v44  ;;  %v3064_v63 = vor.u32 %v3063_v41, %v3062_v50  ;;  %v3067_v59 = vor.u32 %v3066_v24, %v3065_v0  ;;  %vm3077_vm14 = vcmp.lt.s32.totalorder %v3058_v21, 1 }
 0x4a2   :  { %vm3078_vm8 = vcmp.lt.s32.totalorder %v3058_v21, 2  ;;  %v3070_v11 = vor.u32 %v3069_v52, %v3068_v25  ;;  %v3073_v48 = vor.u32 %v3072_v31, %v3071_v40  ;;  %vm3079_vm9 = vcmp.lt.s32.totalorder %v3058_v21, 3 }
 0x4a3   :  { %v3076_v56 = vor.u32 %v3075_v17, %v3074_v33  ;;  %vm3080_vm10 = vcmp.lt.s32.totalorder %v3058_v21, 4  ;;  %v3081_v5 = vsel %vm3077_vm14, %v3061_v53, %v3064_v63  ;;  %v3085_v19 = vsel %vm3077_vm14, %v3064_v63, %v3067_v59 }
 0x4a4   :  { %v2747_v14 = vand.u32 31, %v2745_v3  ;;  %v3082_v39 = vsel %vm3080_vm10, %v3070_v11, 2102212464  ;;  %v3086_v54 = vsel %vm3080_vm10, %v3073_v48, 920167782  ;;  %v3089_v47 = vsel %vm3077_vm14, %v3067_v59, %v3070_v11 }
 0x4a5   :  { %v3090_v37 = vsel %vm3080_vm10, %v3076_v56, 1326507024  ;;  %v3083_v55 = vsel %vm3079_vm9, %v3067_v59, %v3082_v39  ;;  %v3087_v44 = vsel %vm3079_vm9, %v3070_v11, %v3086_v54  ;;  %v12704_v41 = vshll.u32 %v2741_v20, 8 }
 0x4a6   :  { %v3091_v50 = vsel %vm3079_vm9, %v3073_v48, %v3090_v37  ;;  %v2748_v0 = vsub.s32 32, %v2747_v14  ;;  %v3088_v25 = vsel %vm3078_vm8, %v3085_v19, %v3087_v44  ;;  %v3673_v24 = vshrl.u32 %v3672_v2, 23 }
 0x4a7   :  { %v3092_v40 = vsel %vm3078_vm8, %v3089_v47, %v3091_v50  ;;  %vm7404_vm13 = vcmp.lt.s32.totalorder %v12661_v26, 2  ;;  %v12712_v39 = vmul.u32.u64.low %v12677_v15, %v3088_v25  ;;  %v12713_v54 = vmul.u32.u64.high %v12677_v15, %v3088_v25, %v12712_v39 }
 0x4a8   :  { %v12708_v33 = vmul.u32.u64.low %v12677_v15, %v3092_v40  ;;  %v12709_v53 = vmul.u32.u64.high %v12677_v15, %v3092_v40, %v12708_v33  ;;  %vm7401_vm15 = vweird.f32 %v12322_v32  ;;  %v3084_v37 = vsel %vm3078_vm8, %v3081_v5, %v3083_v55 }
 0x4a9   :  { %v2746_v19 = vshrl.u32 %v2745_v3, 5  ;;  %v2750_v47 = vshll.u32 %v14328_v13, %v2747_v14  ;;  %v2751_v20 = vshrl.u32 %v14329_v38, %v2748_v0  ;;  %v2753_v2 = vshll.u32 %v14329_v38, %v2747_v14 }
 0x4aa   :  { %v2754_v52 = vshrl.u32 %v14330_v27, %v2748_v0  ;;  %v2756_v31 = vshll.u32 %v14330_v27, %v2747_v14  ;;  %v2757_v17 = vshrl.u32 %v14331_v34, %v2748_v0  ;;  %v2759_v59 = vshll.u32 %v14331_v34, %v2747_v14 }
 0x4ab   :  { %v2752_v63 = vor.u32 %v2751_v20, %v2750_v47  ;;  %v2760_v11 = vshrl.u32 %v14332_v8, %v2748_v0  ;;  %v2763_v55 = vshrl.u32 %v14333_v7, %v2748_v0  ;;  %v8447_v21 = vpop.eup %8446  ;;  %vm3102_vm0 = vc.u32 %v12709_v53, %v12712_v39 }
 0x4ac   :  { %v3103_v3 = vadd.s32 1, %v12713_v54  ;;  %v2755_v48 = vor.u32 %v2754_v52, %v2753_v2  ;;  %v2762_v56 = vshll.u32 %v14332_v8, %v2747_v14  ;;  %v8449_v5 = vpop.eup %8448  ;;  %v7409_v44 = vxor.u32 2147483648, %v8447_v21 }
 0x4ad   :  { %v3100_v50 = vmul.u32 %v12677_v15, %v3084_v37  ;;  %v2758_v25 = vor.u32 %v2757_v17, %v2756_v31  ;;  %v2761_v40 = vor.u32 %v2760_v11, %v2759_v59  ;;  %v7406_v33 = vxor.u32 2147483648, %v8449_v5  ;;  %v14486_v11 = vld [vmem:[#allocation28_spill] sm:$0xff] }
 0x4ae   :  { %v3104_v47 = vsel %vm3102_vm0, %v3103_v3, %v12713_v54  ;;  %v2749_v20 = vshrl.u32 %v14328_v13, %v2748_v0  ;;  %v2764_v4 = vor.u32 %v2763_v55, %v2762_v56  ;;  %v7410_v36 = vsel %vm7408_vm11, %v7409_v44, %v8449_v5  ;;  %v14487_v5 = vld [vmem:[#allocation17_spill] sm:$0xff]  ;;  %v14488_v44 = vld [vmem:[#allocation19_spill] sm:$0xff] }
 0x4af   :  { %v3105_v46 = vadd.s32 %v3104_v47, %v3100_v50  ;;  %vm2765_vm1 = vcmp.lt.s32.totalorder %v2746_v19, 1  ;;  %vm2766_vm2 = vcmp.lt.s32.totalorder %v2746_v19, 2  ;;  %v7407_v14 = vsel %vm7405_vm12, %v8447_v21, %v7406_v33  ;;  %v14490_v33 = vld [vmem:[#allocation21_spill] sm:$0xff]  ;;  %v14491_v47 = vld [vmem:[#allocation22_spill] sm:$0xff] }
 0x4b0   :  { %vm2767_vm3 = vcmp.lt.s32.totalorder %v2746_v19, 3  ;;  %vm2768_vm4 = vcmp.lt.s32.totalorder %v2746_v19, 4  ;;  %v2773_v15 = vsel %vm2765_vm1, %v2752_v63, %v2755_v48  ;;  %v7411_v37 = vsel %vm7404_vm13, %v7407_v14, %v7410_v36  ;;  %v14493_v14 = vld [vmem:[#allocation23_spill] sm:$0xff]  ;;  %v14500_v19 = vld [vmem:[#allocation29_spill] sm:$0xff] }
 0x4b1   :  { %v3106_v2 = vadd.s32 536870912, %v3105_v46  ;;  %v2770_v54 = vsel %vm2768_vm4, %v2758_v25, 2102212464  ;;  %v2774_v52 = vsel %vm2768_vm4, %v2761_v40, 920167782  ;;  %v7412_v0 = vsel %vm7401_vm15, nan, %v7411_v37 }
 0x4b2   :  { %v2769_v31 = vsel %vm2765_vm1, %v2749_v20, %v2752_v63  ;;  %v2775_v17 = vsel %vm2767_vm3, %v2758_v25, %v2774_v52  ;;  %v2777_v59 = vsel %vm2765_vm1, %v2755_v48, %v2758_v25  ;;  %v7581_v55 = vsel %vm7533_vm6, %v14486_v11, %v7412_v0 }
 0x4b3   :  { %v3107_v21 = vshrl.u32 %v3106_v2, 30  ;;  %v2776_v3 = vsel %vm2766_vm2, %v2773_v15, %v2775_v17  ;;  %v2778_v56 = vsel %vm2768_vm4, %v2764_v4, 1326507024  ;;  %7630 = vst [vmem:[%s14171_s4 + $0x170] sm:$0xff] %v7581_v55  ;;  %v2771_v36 = vsel %vm2767_vm3, %v2755_v48, %v2770_v54  ;;  %v14494_v48 = vld [vmem:[#allocation24_spill] sm:$0xff] }
 0x4b4   :  { %v2779_v32 = vsel %vm2767_vm3, %v2761_v40, %v2778_v56  ;;  %v12753_v26 = vmul.u32.u64.low %v12704_v41, %v2776_v3  ;;  %v12754_v63 = vmul.u32.u64.high %v12704_v41, %v2776_v3, %v12753_v26  ;;  %v12758_v62 = vadd.f32 %v14488_v44, %v14487_v5  ;;  %v14497_v3 = vld [vmem:[#allocation25_spill] sm:$0xff]  ;;  %v14498_v56 = vld [vmem:[#allocation27_spill] sm:$0xff]  ;;  %v8076_v5 = vpop.f32.mrf.mxu0 }
 0x4b5   :  { %v3108_v50 = vshll.u32 %v3107_v21, 30  ;;  %v2780_v25 = vsel %vm2766_vm2, %v2777_v59, %v2779_v32  ;;  %v7680_v4 = vadd.s32 4294967169, %v3673_v24  ;;  %v12763_v20 = vadd.f32 %v14491_v47, %v14490_v33  ;;  %v14501_v32 = vld [vmem:[#allocation4_spill] sm:$0xff] }
 0x4b6   :  { %14489 = vst [vmem:[#allocation7_spill] sm:$0xff] %v12758_v62  ;;  %v12767_v15 = vadd.f32 %v14494_v48, %v14493_v14  ;;  %v12770_v40 = vmul.u32.u64.low %v12704_v41, %v2780_v25  ;;  %v12771_v37 = vmul.u32.u64.high %v12704_v41, %v2780_v25, %v12770_v40  ;;  %v2772_v54 = vsel %vm2766_vm2, %v2769_v31, %v2771_v36 }
 0x4b7   :  { %14492 = vst [vmem:[#allocation8_spill] sm:$0xff] %v12763_v20  ;;  %v12773_v2 = vsub.s32 %v3105_v46, %v3108_v50  ;;  %v14496_v52 = vand.u32 2147483647, %v12665_v29  ;;  %v3679_v24 = vadd.s32 1, %v7680_v4  ;;  %v1857_v17 = vadd.f32 %v12362_v45, %v12583_v30 }
 0x4b8   :  { %14495 = vst [vmem:[#allocation10_spill] sm:$0xff] %v12767_v15  ;;  %v3131_v59 = vsub.s32 4, %v3107_v21  ;;  %v2791_v11 = vadd.s32 1, %v12754_v63  ;;  %v12783_v55 = vadd.f32 %v12600_v9, %v12669_v23  ;;  %v12787_v46 = vadd.f32 %v14498_v56, %v14497_v3 }
 0x4b9   :  { %v3676_v0 = vand.u32 8388607, %v14496_v52  ;;  %v12791_v31 = vadd.f32 %v14500_v19, %v12589_v58  ;;  %v3111_v36 = vsub.s32 0, %v12773_v2  ;;  %vm3680_vm6 = vcmp.gt.s32.totalorder %v3679_v24, 0 }
 0x4ba   :  { %14499 = vst [vmem:[#allocation11_spill] sm:$0xff] %v12787_v46  ;;  %v2043_v45 = vadd.f32 %v14501_v32, %v1857_v17  ;;  %v2788_v30 = vmul.u32 %v12704_v41, %v2772_v54  ;;  %vm2790_vm5 = vc.u32 %v12771_v37, %v12753_v26  ;;  %v3681_v44 = vsel %vm3680_vm6, %v3679_v24, 0 }
 0x4bb   :  { %vm3047_vm7 = vcmp.lt.s32.totalorder %v12614_v35, 0  ;;  %v7657_v50 = vmin.u32 %v3111_v36, %v12773_v2  ;;  %v2792_v25 = vsel %vm2790_vm5, %v2791_v11, %v12754_v63  ;;  %v3677_v4 = vor.u32 8388608, %v3676_v0 }
 0x4bc   :  { %v12802_v58 = vsel %vm3047_vm7, %v3131_v59, %v3107_v21  ;;  %v2793_v33 = vadd.s32 %v2792_v25, %v2788_v30  ;;  %v3683_v47 = vand.u32 31, %v3681_v44  ;;  %v3360_v14 = vand.u32 2139095040, %v12783_v55 }
 0x4bd   :  { %v12807_v41 = vadd.f32 %v12388_v16, %v12593_v10  ;;  %v12811_v48 = vadd.f32 %v12406_v49, %v12606_v57  ;;  %v3113_v40 = vclz %v7657_v50  ;;  %v12813_v54 = vadd.f32 %v8076_v5, %v2043_v45 }
 0x4be   :  { %v14502_v63 = vand.u32 2147483647, %v12614_v35  ;;  %v3101_v52 = vadd.s32 %v12712_v39, %v12709_v53  ;;  %v2794_v0 = vadd.s32 536870912, %v2793_v33  ;;  %v3684_v24 = vsub.s32 32, %v3683_v47 }
 0x4bf   :  { %v7658_v16 = vadd.s32 4294967294, %v3113_v40  ;;  %vm2735_vm8 = vcmp.lt.s32.totalorder %v12628_v61, 0  ;;  %v12827_v10 = vshll.u32 %v3677_v4, 8  ;;  %v12831_v17 = vadd.s32 %v12753_v26, %v12771_v37 }
 0x4c0   :  { %vm12817_vm14 = vcmp.le.f32.partialorder %v14502_v63, 0.7853982  ;;  %v2795_v59 = vshrl.u32 %v2794_v0, 30  ;;  %v12833_v11 = vshrl.u32 %v3681_v44, 5  ;;  %v3361_v53 = vshrl.u32 %v3360_v14, 23 }
 0x4c1   :  { %vm7659_vm9 = vcmp.lt.s32.totalorder %v7658_v16, 0  ;;  %v3686_v39 = vshll.u32 %v14328_v13, %v3683_v47  ;;  %v3687_v3 = vshrl.u32 %v14329_v38, %v3684_v24  ;;  %v3689_v56 = vshll.u32 %v14329_v38, %v3683_v47 }
 0x4c2   :  { %v3116_v19 = vsel %vm7659_vm9, 0, %v7658_v16  ;;  %v2796_v36 = vshll.u32 %v2795_v59, 30  ;;  %v3690_v32 = vshrl.u32 %v14330_v27, %v3684_v24  ;;  %v3693_v45 = vshrl.u32 %v14331_v34, %v3684_v24 }
 0x4c3   :  { %v3117_v30 = vsub.s32 32, %v3116_v19  ;;  %v3121_v26 = vsub.s32 4294967266, %v3116_v19  ;;  %v3692_v37 = vshll.u32 %v14330_v27, %v3683_v47  ;;  %v3696_v5 = vshrl.u32 %v14332_v8, %v3684_v24 }
 0x4c4   :  { %v12842_v44 = vsub.s32 %v2793_v33, %v2796_v36  ;;  %v2819_v50 = vsub.s32 4, %v2795_v59  ;;  %v3695_v25 = vshll.u32 %v14331_v34, %v3683_v47  ;;  %v3699_v4 = vshrl.u32 %v14333_v7, %v3684_v24 }
 0x4c5   :  { %v3118_v14 = vshll.u32 %v12773_v2, %v3116_v19  ;;  %v3119_v40 = vshrl.u32 %v3101_v52, %v3117_v30  ;;  %v3122_v63 = vadd.s32 127, %v3121_v26  ;;  %v3698_v0 = vshll.u32 %v14332_v8, %v3683_v47 }
 0x4c6   :  { %v2799_v16 = vsub.s32 0, %v12842_v44  ;;  %v3688_v57 = vor.u32 %v3687_v3, %v3686_v39  ;;  %v3691_v49 = vor.u32 %v3690_v32, %v3689_v56  ;;  %v3694_v46 = vor.u32 %v3693_v45, %v3692_v37 }
 0x4c7   :  { %v3120_v15 = vor.u32 %v3119_v40, %v3118_v14  ;;  %v3123_v20 = vshll.u32 %v3122_v63, 23  ;;  %v3697_v33 = vor.u32 %v3696_v5, %v3695_v25  ;;  %v7668_v36 = vadd.s32 4294967169, %v3361_v53 }
 0x4c8   :  { %v14505_v62 = vand.u32 2147483647, %v12628_v61  ;;  %v7645_v2 = vmin.u32 %v2799_v16, %v12842_v44  ;;  %v2820_v47 = vsel %vm2735_vm8, %v2819_v50, %v2795_v59  ;;  %v3685_v52 = vshrl.u32 %v14328_v13, %v3684_v24 }
 0x4c9   :  { %v3700_v39 = vor.u32 %v3699_v4, %v3698_v0  ;;  %v3124_v3 = vor.u32 4788187, %v3123_v20  ;;  %vm3701_vm11 = vcmp.lt.s32.totalorder %v12833_v11, 1  ;;  %vm3702_vm12 = vcmp.lt.s32.totalorder %v12833_v11, 2 }
 0x4ca   :  { %vm12851_vm10 = vcmp.le.f32.partialorder %v14505_v62, 0.7853982  ;;  %vm3704_vm13 = vcmp.lt.s32.totalorder %v12833_v11, 4  ;;  %v2801_v53 = vclz %v7645_v2  ;;  %vm3703_vm15 = vcmp.lt.s32.totalorder %v12833_v11, 3 }
 0x4cb   :  { %v3706_v62 = vsel %vm3704_vm13, %v3694_v46, 2102212464  ;;  %v3709_v56 = vsel %vm3701_vm11, %v3688_v57, %v3691_v49  ;;  %v3125_v19 = vand.u32 2147483647, %v3124_v3  ;;  %v3127_v32 = vcvt.s32.f32 %v3120_v15 }
 0x4cc   :  { %v3710_v45 = vsel %vm3704_vm13, %v3697_v33, 920167782  ;;  %v3713_v30 = vsel %vm3701_vm11, %v3691_v49, %v3694_v46  ;;  %v7646_v59 = vadd.s32 4294967294, %v2801_v53  ;;  %v3705_v26 = vsel %vm3701_vm11, %v3685_v52, %v3688_v57 }
 0x4cd   :  { %v3711_v24 = vsel %vm3703_vm15, %v3694_v46, %v3710_v45  ;;  %v3714_v37 = vsel %vm3704_vm13, %v3700_v39, 1326507024  ;;  %v3128_v20 = vmul.f32 %v3127_v32, %v3125_v19  ;;  %v3707_v5 = vsel %vm3703_vm15, %v3691_v49, %v3706_v62 }
 0x4ce   :  { %v3712_v50 = vsel %vm3702_vm12, %v3709_v56, %v3711_v24  ;;  %v3715_v25 = vsel %vm3703_vm15, %v3697_v33, %v3714_v37  ;;  %vm7647_vm0 = vcmp.lt.s32.totalorder %v7646_v59, 0  ;;  %v3708_v16 = vsel %vm3702_vm12, %v3705_v26, %v3707_v5  ;;  %v14510_v5 = vld [vmem:[#allocation30_spill] sm:$0xff] }
 0x4cf   :  { %v3716_v4 = vsel %vm3702_vm12, %v3713_v30, %v3715_v25  ;;  %v12868_v14 = vmul.u32.u64.low %v12827_v10, %v3712_v50  ;;  %v12869_v40 = vmul.u32.u64.high %v12827_v10, %v3712_v50, %v12868_v14  ;;  %v3129_v15 = vxor.u32 2147483648, %v3128_v20 }
 0x4d0   :  { %v2804_v63 = vsel %vm7647_vm0, 0, %v7646_v59  ;;  %v12873_v46 = vmul.u32.u64.low %v12827_v10, %v3716_v4  ;;  %v12874_v57 = vmul.u32.u64.high %v12827_v10, %v3716_v4, %v12873_v46  ;;  %v3367_v33 = vadd.s32 1, %v7668_v36  ;;  %v14511_v4 = vld [vmem:[#allocation31_spill] sm:$0xff] }
 0x4d1   :  { %v2805_v49 = vsub.s32 32, %v2804_v63  ;;  %v2809_v0 = vsub.s32 4294967266, %v2804_v63  ;;  %v3130_v2 = vsel %vm3047_vm7, %v3129_v15, %v3128_v20  ;;  %v14508_v52 = vsel %vm12817_vm14, 0, %v12802_v58  ;;  %v8106_v58 = vpop.f32.mrf.mxu1  ;;  %v14513_v46 = vld [vmem:[#allocation6_spill] sm:$0xff] }
 0x4d2   :  { %v3138_v39 = vadd.s32 3, %v14508_v52  ;;  %v2806_v3 = vshll.u32 %v12842_v44, %v2804_v63  ;;  %v2822_v53 = vsel %vm12851_vm10, 0, %v2820_v47  ;;  %v3133_v62 = vsel %vm12817_vm14, %v12614_v35, %v3130_v2 }
 0x4d3   :  { %v2807_v11 = vshrl.u32 %v12831_v17, %v2805_v49  ;;  %v2810_v36 = vadd.s32 127, %v2809_v0  ;;  %v3727_v56 = vadd.s32 1, %v12869_v40  ;;  %8450 = vcosq.f32 %v3133_v62 }
 0x4d4   :  { %v3724_v19 = vmul.u32 %v12827_v10, %v3708_v16  ;;  %vm3726_vm1 = vc.u32 %v12874_v57, %v12868_v14  ;;  %vm3368_vm2 = vcmp.gt.s32.totalorder %v3367_v33, 0  ;;  %8452 = vsinq.f32 %v3133_v62  ;;  %v2226_v10 = vpop.f32.mrf.mxu0 }
 0x4d5   :  { %v2808_v44 = vor.u32 %v2807_v11, %v2806_v3  ;;  %v2811_v47 = vshll.u32 %v2810_v36, 23  ;;  %v3728_v32 = vsel %vm3726_vm1, %v3727_v56, %v12869_v40  ;;  %v2826_v21 = vadd.s32 3, %v2822_v53 }
 0x4d6   :  { %v3729_v45 = vadd.s32 %v3728_v32, %v3724_v19  ;;  %v14509_v17 = vand.u32 2147483647, %v12783_v55  ;;  %v3369_v59 = vsel %vm3368_vm2, %v3367_v33, 0  ;;  %v12898_v26 = vand.u32 3, %v3138_v39 }
 0x4d7   :  { %v2812_v24 = vor.u32 4788187, %v2811_v47  ;;  %v3371_v37 = vand.u32 31, %v3369_v59  ;;  %v12901_v20 = vadd.f32 %v8106_v58, %v12813_v54  ;;  %v2035_v50 = vadd.f32 %v14510_v5, %v12791_v31 }
 0x4d8   :  { %v3364_v30 = vand.u32 8388607, %v14509_v17  ;;  %v12907_v25 = vadd.f32 %v12425_v18, %v12619_v42  ;;  %v12911_v40 = vadd.f32 %v14511_v4, %v12807_v41  ;;  %v3730_v15 = vadd.s32 536870912, %v3729_v45 }
 0x4d9   :  { %v14512_v63 = vsub.s32 2, %v14469_v6  ;;  %v2813_v0 = vand.u32 2147483647, %v2812_v24  ;;  %v2815_v54 = vcvt.s32.f32 %v2808_v44  ;;  %v3372_v16 = vsub.s32 32, %v3371_v37 }
 0x4da   :  { %v12918_v33 = vand.u32 3, %v2826_v21  ;;  %v12920_v31 = vshrl.u32 %v3730_v15, 30  ;;  %v12922_v2 = vadd.f32 %v2226_v10, %v2035_v50  ;;  %v3365_v18 = vor.u32 8388608, %v3364_v30 }
 0x4db   :  { %v12916_v49 = vrot.slane %v14513_v46, %v14512_v63  ;;  %vm3144_vm3 = vcmp.eq.s32.totalorder %v12898_v26, 2  ;;  %v2816_v42 = vmul.f32 %v2815_v54, %v2813_v0  ;;  %v3375_v41 = vshrl.u32 %v14329_v38, %v3372_v16 }
 0x4dc   :  { %v3378_v6 = vshrl.u32 %v14330_v27, %v3372_v16  ;;  %v12929_v52 = vadd.f32 %v12600_v9, %v12901_v20  ;;  %vm3141_vm4 = vcmp.eq.s32.totalorder %v12898_v26, 0  ;;  %v3732_v39 = vshll.u32 %v12920_v31, 30 }
 0x4dd   :  { %v3374_v3 = vshll.u32 %v14328_v13, %v3371_v37  ;;  %v3381_v53 = vshrl.u32 %v14331_v34, %v3372_v16  ;;  %v3384_v62 = vshrl.u32 %v14332_v8, %v3372_v16  ;;  %vm3140_vm6 = vcmp.lt.s32.totalorder %v12898_v26, 2 }
 0x4de   :  { %vm7534_vm5 = vcmp.eq.s32.totalorder %v12916_v49, 1  ;;  %v2817_v11 = vxor.u32 2147483648, %v2816_v42  ;;  %v3370_v36 = vshrl.u32 %v3369_v59, 5  ;;  %v3377_v56 = vshll.u32 %v14329_v38, %v3371_v37 }
 0x4df   :  { %v3383_v19 = vshll.u32 %v14331_v34, %v3371_v37  ;;  %vm3137_vm7 = vweird.f32 %v12614_v35  ;;  %vm7585_vm14 = vcmask 457728   ;;  %v12941_v58 = vsub.s32 %v3729_v45, %v3732_v39 }
 0x4e0   :  { %v3376_v44 = vor.u32 %v3375_v41, %v3374_v3  ;;  %v3380_v47 = vshll.u32 %v14330_v27, %v3371_v37  ;;  %v12944_v32 = vshll.u32 %v3365_v18, 8  ;;  %v2818_v21 = vsel %vm2735_vm8, %v2817_v11, %v2816_v42  ;;  %v8451_v50 = vpop.eup %8450 }
 0x4e1   :  { %v3379_v17 = vor.u32 %v3378_v6, %v3377_v56  ;;  %v3385_v30 = vor.u32 %v3384_v62, %v3383_v19  ;;  %v3387_v59 = vshrl.u32 %v14333_v7, %v3372_v16  ;;  %v2821_v24 = vsel %vm12851_vm10, %v12628_v61, %v2818_v21  ;;  %v8453_v63 = vpop.eup %8452 }
 0x4e2   :  { %v3735_v10 = vsub.s32 0, %v12941_v58  ;;  %v3382_v45 = vor.u32 %v3381_v53, %v3380_v47  ;;  %v4296_v5 = vand.u32 2139095040, %v12929_v52  ;;  %8454 = vcosq.f32 %v2821_v24 }
 0x4e3   :  { %v3373_v4 = vshrl.u32 %v14328_v13, %v3372_v16  ;;  %v3386_v15 = vshll.u32 %v14332_v8, %v3371_v37  ;;  %vm3389_vm8 = vcmp.lt.s32.totalorder %v3370_v36, 1  ;;  %v3145_v46 = vxor.u32 2147483648, %v8451_v50 }
 0x4e4   :  { %8456 = vsinq.f32 %v2821_v24  ;;  %v7681_v0 = vmin.u32 %v3735_v10, %v12941_v58  ;;  %vm3392_vm9 = vcmp.lt.s32.totalorder %v3370_v36, 4  ;;  %v3142_v23 = vxor.u32 2147483648, %v8453_v63 }
 0x4e5   :  { %v3388_v54 = vor.u32 %v3387_v59, %v3386_v15  ;;  %v3397_v18 = vsel %vm3389_vm8, %v3376_v44, %v3379_v17  ;;  %v3398_v42 = vsel %vm3392_vm9, %v3385_v30, 920167782  ;;  %v3146_v41 = vsel %vm3144_vm3, %v3145_v46, %v8453_v63 }
 0x4e6   :  { %v3737_v6 = vclz %v7681_v0  ;;  %vm3391_vm10 = vcmp.lt.s32.totalorder %v3370_v36, 3  ;;  %v3394_v37 = vsel %vm3392_vm9, %v3382_v45, 2102212464  ;;  %v3143_v16 = vsel %vm3141_vm4, %v8451_v50, %v3142_v23 }
 0x4e7   :  { %v3725_v39 = vadd.s32 %v12868_v14, %v12874_v57  ;;  %vm3390_vm11 = vcmp.lt.s32.totalorder %v3370_v36, 2  ;;  %v3399_v3 = vsel %vm3391_vm10, %v3382_v45, %v3398_v42  ;;  %v3147_v53 = vsel %vm3140_vm6, %v3143_v16, %v3146_v41 }
 0x4e8   :  { %v7682_v62 = vadd.s32 4294967294, %v3737_v6  ;;  %v3393_v11 = vsel %vm3389_vm8, %v3373_v4, %v3376_v44  ;;  %v3400_v56 = vsel %vm3390_vm11, %v3397_v18, %v3399_v3  ;;  %v3148_v19 = vsel %vm3137_vm7, nan, %v3147_v53 }
 0x4e9   :  { %v3395_v47 = vsel %vm3391_vm10, %v3379_v17, %v3394_v37  ;;  %v3401_v21 = vsel %vm3389_vm8, %v3379_v17, %v3382_v45  ;;  %v3402_v14 = vsel %vm3392_vm9, %v3388_v54, 1326507024  ;;  %v7540_v57 = vsel %vm7534_vm5, %v12574_v51, %v3148_v19 }
 0x4ea   :  { %v14514_v26 = vand.u32 2147483647, %v12665_v29  ;;  %vm7683_vm13 = vcmp.lt.s32.totalorder %v7682_v62, 0  ;;  %v3403_v35 = vsel %vm3391_vm10, %v3385_v30, %v3402_v14  ;;  %v4297_v44 = vshrl.u32 %v4296_v5, 23  ;;  %7589 = vst.msk [vmem:[%s14171_s4 + $0x28] sm:$0xff] %vm7585_vm14, %v7540_v57 }
 0x4eb   :  { %v3740_v17 = vsel %vm7683_vm13, 0, %v7682_v62  ;;  %v3404_v24 = vsel %vm3390_vm11, %v3401_v21, %v3403_v35  ;;  %v12992_v51 = vmul.u32.u64.low %v12944_v32, %v3400_v56  ;;  %v12993_v10 = vmul.u32.u64.high %v12944_v32, %v3400_v56, %v12992_v51  ;;  %v8079_v21 = vpop.f32.mrf.mxu0 }
 0x4ec   :  { %vm12981_vm12 = vcmp.le.f32.partialorder %v14514_v26, 0.7853982  ;;  %v3741_v45 = vsub.s32 32, %v3740_v17  ;;  %v3745_v50 = vsub.s32 4294967266, %v3740_v17  ;;  %v3755_v4 = vsub.s32 4, %v12920_v31 }
 0x4ed   :  { %v7704_v15 = vadd.s32 4294967169, %v4297_v44  ;;  %v3396_v30 = vsel %vm3390_vm11, %v3393_v11, %v3395_v47  ;;  %v12999_v5 = vmul.u32.u64.low %v12944_v32, %v3404_v24  ;;  %v13000_v63 = vmul.u32.u64.high %v12944_v32, %v3404_v24, %v12999_v5 }
 0x4ee   :  { %v4293_v46 = vand.u32 2147483647, %v12929_v52  ;;  %v3742_v0 = vshll.u32 %v12941_v58, %v3740_v17  ;;  %v3743_v23 = vshrl.u32 %v3725_v39, %v3741_v45  ;;  %v3746_v54 = vadd.s32 127, %v3745_v50 }
 0x4ef   :  { %v4303_v18 = vadd.s32 1, %v7704_v15  ;;  %vm2829_vm15 = vcmp.eq.s32.totalorder %v12918_v33, 0  ;;  %vm2832_vm0 = vcmp.eq.s32.totalorder %v12918_v33, 2  ;;  %vm3671_vm1 = vcmp.lt.s32.totalorder %v12665_v29, 0  ;;  %v8455_v42 = vpop.eup %8454 }
 0x4f0   :  { %v3415_v36 = vadd.s32 1, %v12993_v10  ;;  %v3744_v41 = vor.u32 %v3743_v23, %v3742_v0  ;;  %v3747_v6 = vshll.u32 %v3746_v54, 23  ;;  %v3756_v37 = vsel %vm3671_vm1, %v3755_v4, %v12920_v31 }
 0x4f1   :  { %vm4304_vm2 = vcmp.gt.s32.totalorder %v4303_v18, 0  ;;  %v8457_v58 = vpop.eup %8456  ;;  %v2833_v16 = vxor.u32 2147483648, %v8455_v42  ;;  %v3412_v39 = vmul.u32 %v12944_v32, %v3396_v30  ;;  %vm3414_vm3 = vc.u32 %v13000_v63, %v12992_v51 }
 0x4f2   :  { %v4305_v3 = vsel %vm4304_vm2, %v4303_v18, 0  ;;  %v2830_v53 = vxor.u32 2147483648, %v8457_v58  ;;  %v3748_v62 = vor.u32 4788187, %v3747_v6  ;;  %v3416_v11 = vsel %vm3414_vm3, %v3415_v36, %v12993_v10 }
 0x4f3   :  { %v4300_v56 = vand.u32 8388607, %v4293_v46  ;;  %v2834_v19 = vsel %vm2832_vm0, %v2833_v16, %v8457_v58  ;;  %v3758_v31 = vsel %vm12981_vm12, 0, %v3756_v37  ;;  %v3417_v47 = vadd.s32 %v3416_v11, %v3412_v39  ;;  %v2390_v37 = vpop.f32.mrf.mxu1 }
 0x4f4   :  { %v4307_v32 = vand.u32 31, %v4305_v3  ;;  %vm2828_vm4 = vcmp.lt.s32.totalorder %v12918_v33, 2  ;;  %v2831_v14 = vsel %vm2829_vm15, %v8455_v42, %v2830_v53  ;;  %v3749_v57 = vand.u32 2147483647, %v3748_v62 }
 0x4f5   :  { %v3751_v26 = vcvt.s32.f32 %v3744_v41  ;;  %vm2825_vm6 = vweird.f32 %v12628_v61  ;;  %v2835_v35 = vsel %vm2828_vm4, %v2831_v14, %v2834_v19  ;;  %v3418_v44 = vadd.s32 536870912, %v3417_v47 }
 0x4f6   :  { %v4308_v17 = vsub.s32 32, %v4307_v32  ;;  %v2836_v24 = vsel %vm2825_vm6, nan, %v2835_v35  ;;  %v3762_v45 = vadd.s32 3, %v3758_v31  ;;  %v13026_v50 = vadd.f32 %v8079_v21, %v12911_v40 }
 0x4f7   :  { %v3752_v10 = vmul.f32 %v3751_v26, %v3749_v57  ;;  %v7537_v4 = vsel %vm7534_vm5, %v12585_v43, %v2836_v24  ;;  %v3419_v15 = vshrl.u32 %v3418_v44, 30  ;;  %v4301_v33 = vor.u32 8388608, %v4300_v56 }
 0x4f8   :  { %v4311_v30 = vshrl.u32 %v14329_v38, %v4308_v17  ;;  %7586 = vst.msk [vmem:[%s14171_s4 + $0x10] sm:$0xff] %vm7585_vm14, %v7537_v4  ;;  %v4310_v5 = vshll.u32 %v14328_v13, %v4307_v32  ;;  %v4314_v0 = vshrl.u32 %v14330_v27, %v4308_v17  ;;  %v4317_v40 = vshrl.u32 %v14331_v34, %v4308_v17 }
 0x4f9   :  { %v3753_v61 = vxor.u32 2147483648, %v3752_v10  ;;  %v3420_v23 = vshll.u32 %v3419_v15, 30  ;;  %v4313_v54 = vshll.u32 %v14329_v38, %v4307_v32  ;;  %v4316_v43 = vshll.u32 %v14330_v27, %v4307_v32 }
 0x4fa   :  { %v4320_v18 = vshrl.u32 %v14332_v8, %v4308_v17  ;;  %vm3359_vm7 = vcmp.lt.s32.totalorder %v12783_v55, 0  ;;  %v4306_v42 = vshrl.u32 %v4305_v3, 5  ;;  %v4312_v41 = vor.u32 %v4311_v30, %v4310_v5 }
 0x4fb   :  { %v3754_v36 = vsel %vm3671_vm1, %v3753_v61, %v3752_v10  ;;  %v4319_v6 = vshll.u32 %v14331_v34, %v4307_v32  ;;  %v13049_v16 = vsub.s32 %v3417_v47, %v3420_v23  ;;  %v4315_v39 = vor.u32 %v4314_v0, %v4313_v54 }
 0x4fc   :  { %v3757_v58 = vsel %vm12981_vm12, %v12665_v29, %v3754_v36  ;;  %v4318_v53 = vor.u32 %v4317_v40, %v4316_v43  ;;  %v4322_v11 = vshll.u32 %v14332_v8, %v4307_v32  ;;  %v4323_v56 = vshrl.u32 %v14333_v7, %v4308_v17  ;;  %v8109_v40 = vpop.f32.mrf.mxu1 }
 0x4fd   :  { %8458 = vcosq.f32 %v3757_v58  ;;  %v4321_v62 = vor.u32 %v4320_v18, %v4319_v6  ;;  %v13053_v3 = vand.u32 3, %v3762_v45  ;;  %v3423_v19 = vsub.s32 0, %v13049_v16 }
 0x4fe   :  { %8460 = vsinq.f32 %v3757_v58  ;;  %v13057_v31 = vadd.f32 %v2390_v37, %v12922_v2  ;;  %v4309_v59 = vshrl.u32 %v14328_v13, %v4308_v17  ;;  %v4324_v47 = vor.u32 %v4323_v56, %v4322_v11 }
 0x4ff   :  { %vm4328_vm8 = vcmp.lt.s32.totalorder %v4306_v42, 4  ;;  %v4341_v21 = vshll.u32 %v4301_v33, 8  ;;  %v7669_v14 = vmin.u32 %v3423_v19, %v13049_v16  ;;  %v3443_v57 = vsub.s32 4, %v3419_v15 }
 0x500   :  { %vm4325_vm9 = vcmp.lt.s32.totalorder %v4306_v42, 1  ;;  %v4330_v32 = vsel %vm4328_vm8, %v4318_v53, 2102212464  ;;  %v4334_v35 = vsel %vm4328_vm8, %v4321_v62, 920167782  ;;  %vm4326_vm10 = vcmp.lt.s32.totalorder %v4306_v42, 2 }
 0x501   :  { %v4333_v26 = vsel %vm4325_vm9, %v4312_v41, %v4315_v39  ;;  %v4337_v44 = vsel %vm4325_vm9, %v4315_v39, %v4318_v53  ;;  %v4338_v24 = vsel %vm4328_vm8, %v4324_v47, 1326507024  ;;  %v3425_v10 = vclz %v7669_v14 }
 0x502   :  { %vm4327_vm11 = vcmp.lt.s32.totalorder %v4306_v42, 3  ;;  %v13063_v2 = vadd.f32 %v12600_v9, %v13057_v31  ;;  %v4329_v17 = vsel %vm4325_vm9, %v4309_v59, %v4312_v41  ;;  %v3444_v61 = vsel %vm3359_vm7, %v3443_v57, %v3419_v15 }
 0x503   :  { %v4331_v45 = vsel %vm4327_vm11, %v4315_v39, %v4330_v32  ;;  %v4335_v4 = vsel %vm4327_vm11, %v4318_v53, %v4334_v35  ;;  %v4339_v33 = vsel %vm4327_vm11, %v4321_v62, %v4338_v24  ;;  %v7670_v30 = vadd.s32 4294967294, %v3425_v10 }
 0x504   :  { %v4336_v5 = vsel %vm4326_vm10, %v4333_v26, %v4335_v4  ;;  %v4340_v0 = vsel %vm4326_vm10, %v4337_v44, %v4339_v33  ;;  %v14517_v36 = vand.u32 2147483647, %v12783_v55  ;;  %v4332_v15 = vsel %vm4326_vm10, %v4329_v17, %v4331_v45 }
 0x505   :  { %v13069_v23 = vmul.u32.u64.low %v4341_v21, %v4340_v0  ;;  %v13070_v54 = vmul.u32.u64.high %v4341_v21, %v4340_v0, %v13069_v23  ;;  %v13072_v43 = vmul.u32.u64.low %v4341_v21, %v4336_v5  ;;  %v13073_v18 = vmul.u32.u64.high %v4341_v21, %v4336_v5, %v13072_v43 }
 0x506   :  { %vm13078_vm12 = vcmp.le.f32.partialorder %v14517_v36, 0.7853982  ;;  %vm7671_vm13 = vcmp.lt.s32.totalorder %v7670_v30, 0  ;;  %v3984_v6 = vand.u32 2139095040, %v13063_v2  ;;  %vm3761_vm15 = vweird.f32 %v12665_v29 }
 0x507   :  { %vm3764_vm0 = vcmp.lt.s32.totalorder %v13053_v3, 2  ;;  %v3413_v37 = vadd.s32 %v12992_v51, %v13000_v63  ;;  %v3428_v58 = vsel %vm7671_vm13, 0, %v7670_v30  ;;  %v13089_v39 = vadd.f32 %v8109_v40, %v13026_v50 }
 0x508   :  { %v3429_v53 = vsub.s32 32, %v3428_v58  ;;  %v3433_v62 = vsub.s32 4294967266, %v3428_v58  ;;  %v3446_v11 = vsel %vm13078_vm12, 0, %v3444_v61  ;;  %v3985_v42 = vshrl.u32 %v3984_v6, 23  ;;  %v14520_v6 = vld [vmem:[#allocation34_spill] sm:$0xff] }
 0x509   :  { %v4348_v56 = vmul.u32 %v4341_v21, %v4332_v15  ;;  %vm4350_vm1 = vc.u32 %v13070_v54, %v13072_v43  ;;  %v4351_v19 = vadd.s32 1, %v13073_v18  ;;  %v3981_v59 = vand.u32 2147483647, %v13063_v2 }
 0x50a   :  { %v8459_v47 = vpop.eup %8458  ;;  %v3430_v51 = vshll.u32 %v13049_v16, %v3428_v58  ;;  %v3431_v63 = vshrl.u32 %v3413_v37, %v3429_v53  ;;  %v3434_v50 = vadd.s32 127, %v3433_v62  ;;  %v7692_v14 = vadd.s32 4294967169, %v3985_v42  ;;  %v14521_v58 = vld [vmem:[#allocation32_spill] sm:$0xff] }
 0x50b   :  { %v8461_v57 = vpop.eup %8460  ;;  %vm3768_vm2 = vcmp.eq.s32.totalorder %v13053_v3, 2  ;;  %v3769_v32 = vxor.u32 2147483648, %v8459_v47  ;;  %v4352_v26 = vsel %vm4350_vm1, %v4351_v19, %v13073_v18  ;;  %v13102_v21 = vadd.f32 %v12600_v9, %v13089_v39 }
 0x50c   :  { %v3766_v35 = vxor.u32 2147483648, %v8461_v57  ;;  %v3432_v44 = vor.u32 %v3431_v63, %v3430_v51  ;;  %v3435_v24 = vshll.u32 %v3434_v50, 23  ;;  %v4353_v10 = vadd.s32 %v4352_v26, %v4348_v56  ;;  %v14523_v56 = vld [vmem:[#allocation37_spill] sm:$0xff] }
 0x50d   :  { %vm3765_vm3 = vcmp.eq.s32.totalorder %v13053_v3, 0  ;;  %v3770_v16 = vsel %vm3768_vm2, %v3769_v32, %v8461_v57  ;;  %v3450_v17 = vadd.s32 3, %v3446_v11  ;;  %v3991_v45 = vadd.s32 1, %v7692_v14  ;;  %v14522_v11 = vld [vmem:[#allocation33_spill] sm:$0xff] }
 0x50e   :  { %v3767_v4 = vsel %vm3765_vm3, %v8459_v47, %v3766_v35  ;;  %v3436_v33 = vor.u32 4788187, %v3435_v24  ;;  %v4354_v30 = vadd.s32 536870912, %v4353_v10  ;;  %v3988_v61 = vand.u32 8388607, %v3981_v59 }
 0x50f   :  { %v3771_v5 = vsel %vm3764_vm0, %v3767_v4, %v3770_v16  ;;  %v3439_v0 = vcvt.s32.f32 %v3432_v44  ;;  %vm3992_vm4 = vcmp.gt.s32.totalorder %v3991_v45, 0  ;;  %v4920_v40 = vand.u32 2139095040, %v13102_v21 }
 0x510   :  { %v3772_v23 = vsel %vm3761_vm15, nan, %v3771_v5  ;;  %v3437_v18 = vand.u32 2147483647, %v3436_v33  ;;  %v13112_v36 = vshrl.u32 %v4354_v30, 30  ;;  %v3993_v15 = vsel %vm3992_vm4, %v3991_v45, 0 }
 0x511   :  { %v13116_v37 = vadd.f32 %v14520_v6, %v12623_v22  ;;  %v13120_v53 = vadd.f32 %v14521_v58, %v12811_v48  ;;  %v7546_v3 = vsel %vm7534_vm5, %v12651_v28, %v3772_v23  ;;  %v3995_v62 = vand.u32 31, %v3993_v15 }
 0x512   :  { %v13127_v29 = vadd.f32 %v12469_v1, %v12638_v60  ;;  %v13131_v42 = vadd.f32 %v14522_v11, %v12907_v25  ;;  %7595 = vst.msk [vmem:[%s14171_s4 + $0x58] sm:$0xff] %vm7585_vm14, %v7546_v3  ;;  %v3440_v22 = vmul.f32 %v3439_v0, %v3437_v18  ;;  %v4356_v48 = vshll.u32 %v13112_v36, 30 }
 0x513   :  { %v13140_v28 = vadd.f32 %v14523_v56, %v12649_v12  ;;  %v13142_v19 = vand.u32 3, %v3450_v17  ;;  %v3989_v1 = vor.u32 8388608, %v3988_v61  ;;  %v3996_v60 = vsub.s32 32, %v3995_v62 }
 0x514   :  { %v3441_v47 = vxor.u32 2147483648, %v3440_v22  ;;  %v13144_v51 = vsub.s32 %v4353_v10, %v4356_v48  ;;  %v13146_v25 = vshrl.u32 %v3993_v15, 5  ;;  %v4921_v63 = vshrl.u32 %v4920_v40, 23 }
 0x515   :  { %v3998_v50 = vshll.u32 %v14328_v13, %v3995_v62  ;;  %v3999_v14 = vshrl.u32 %v14329_v38, %v3996_v60  ;;  %v4001_v57 = vshll.u32 %v14329_v38, %v3995_v62  ;;  %v4002_v32 = vshrl.u32 %v14330_v27, %v3996_v60 }
 0x516   :  { %v3442_v12 = vsel %vm3359_vm7, %v3441_v47, %v3440_v22  ;;  %v4359_v26 = vsub.s32 0, %v13144_v51  ;;  %v4004_v35 = vshll.u32 %v14330_v27, %v3995_v62  ;;  %v4005_v44 = vshrl.u32 %v14331_v34, %v3996_v60 }
 0x517   :  { %v3445_v24 = vsel %vm13078_vm12, %v12783_v55, %v3442_v12  ;;  %v4000_v10 = vor.u32 %v3999_v14, %v3998_v50  ;;  %v4007_v16 = vshll.u32 %v14331_v34, %v3995_v62  ;;  %v4008_v17 = vshrl.u32 %v14332_v8, %v3996_v60 }
 0x518   :  { %8462 = vcosq.f32 %v3445_v24  ;;  %v7705_v45 = vmin.u32 %v4359_v26, %v13144_v51  ;;  %v4003_v4 = vor.u32 %v4002_v32, %v4001_v57  ;;  %v4006_v33 = vor.u32 %v4005_v44, %v4004_v35  ;;  %v2238_v57 = vpop.f32.mrf.mxu0 }
 0x519   :  { %8464 = vsinq.f32 %v3445_v24  ;;  %v4009_v30 = vor.u32 %v4008_v17, %v4007_v16  ;;  %v4010_v61 = vshll.u32 %v14332_v8, %v3995_v62  ;;  %v4011_v5 = vshrl.u32 %v14333_v7, %v3996_v60 }
 0x51a   :  { %v4349_v41 = vadd.s32 %v13072_v43, %v13070_v54  ;;  %v4361_v0 = vclz %v7705_v45  ;;  %v13167_v40 = vshll.u32 %v3989_v1, 8  ;;  %v4917_v23 = vand.u32 2147483647, %v13102_v21 }
 0x51b   :  { %v3997_v18 = vshrl.u32 %v14328_v13, %v3996_v60  ;;  %v4012_v15 = vor.u32 %v4011_v5, %v4010_v61  ;;  %vm4013_vm6 = vcmp.lt.s32.totalorder %v13146_v25, 1  ;;  %v7728_v6 = vadd.s32 4294967169, %v4921_v63 }
 0x51c   :  { %v7706_v58 = vadd.s32 4294967294, %v4361_v0  ;;  %vm4015_vm7 = vcmp.lt.s32.totalorder %v13146_v25, 3  ;;  %vm4016_vm8 = vcmp.lt.s32.totalorder %v13146_v25, 4  ;;  %v4021_v3 = vsel %vm4013_vm6, %v4000_v10, %v4003_v4 }
 0x51d   :  { %vm4295_vm9 = vcmp.lt.s32.totalorder %v12929_v52, 0  ;;  %v4018_v54 = vsel %vm4016_vm8, %v4006_v33, 2102212464  ;;  %v4022_v43 = vsel %vm4016_vm8, %v4009_v30, 920167782  ;;  %v4025_v62 = vsel %vm4013_vm6, %v4003_v4, %v4006_v33 }
 0x51e   :  { %v4026_v11 = vsel %vm4016_vm8, %v4012_v15, 1326507024  ;;  %vm7707_vm10 = vcmp.lt.s32.totalorder %v7706_v58, 0  ;;  %vm4014_vm11 = vcmp.lt.s32.totalorder %v13146_v25, 2  ;;  %v4023_v22 = vsel %vm4015_vm7, %v4006_v33, %v4022_v43 }
 0x51f   :  { %v4027_v48 = vsel %vm4015_vm7, %v4009_v30, %v4026_v11  ;;  %v4364_v56 = vsel %vm7707_vm10, 0, %v7706_v58  ;;  %v4379_v1 = vsub.s32 4, %v13112_v36  ;;  %v4024_v60 = vsel %vm4014_vm11, %v4021_v3, %v4023_v22 }
 0x520   :  { %v4028_v47 = vsel %vm4014_vm11, %v4025_v62, %v4027_v48  ;;  %vm13191_vm12 = vcmp.le.f32.partialorder %v4293_v46, 0.7853982  ;;  %v4365_v50 = vsub.s32 32, %v4364_v56  ;;  %v4369_v14 = vsub.s32 4294967266, %v4364_v56 }
 0x521   :  { %v4017_v32 = vsel %vm4013_vm6, %v3997_v18, %v4000_v10  ;;  %v4019_v12 = vsel %vm4015_vm7, %v4003_v4, %v4018_v54  ;;  %v13200_v26 = vmul.u32.u64.low %v13167_v40, %v4028_v47  ;;  %v13201_v35 = vmul.u32.u64.high %v13167_v40, %v4028_v47, %v13200_v26 }
 0x522   :  { %v13204_v44 = vmul.u32.u64.low %v13167_v40, %v4024_v60  ;;  %v13205_v24 = vmul.u32.u64.high %v13167_v40, %v4024_v60, %v13204_v44  ;;  %vm3449_vm13 = vweird.f32 %v12783_v55  ;;  %v4366_v46 = vshll.u32 %v13144_v51, %v4364_v56 }
 0x523   :  { %v4367_v16 = vshrl.u32 %v4349_v41, %v4365_v50  ;;  %v4370_v17 = vadd.s32 127, %v4369_v14  ;;  %v4927_v45 = vadd.s32 1, %v7728_v6  ;;  %vm3452_vm15 = vcmp.lt.s32.totalorder %v13142_v19, 2  ;;  %v2402_v6 = vpop.f32.mrf.mxu1 }
 0x524   :  { %v2239_v10 = vadd.f32 %v2238_v57, %v13120_v53  ;;  %v4020_v4 = vsel %vm4014_vm11, %v4017_v32, %v4019_v12  ;;  %v4924_v33 = vand.u32 8388607, %v4917_v23  ;;  %vm3453_vm0 = vcmp.eq.s32.totalorder %v13142_v19, 0 }
 0x525   :  { %v4368_v30 = vor.u32 %v4367_v16, %v4366_v46  ;;  %v4371_v61 = vshll.u32 %v4370_v17, 23  ;;  %vm4928_vm1 = vcmp.gt.s32.totalorder %v4927_v45, 0  ;;  %v8463_v5 = vpop.eup %8462  ;;  %vm3456_vm2 = vcmp.eq.s32.totalorder %v13142_v19, 2 }
 0x526   :  { %vm4038_vm3 = vc.u32 %v13201_v35, %v13204_v44  ;;  %v4039_v51 = vadd.s32 1, %v13205_v24  ;;  %v4929_v53 = vsel %vm4928_vm1, %v4927_v45, 0  ;;  %v8465_v41 = vpop.eup %8464  ;;  %v3457_v25 = vxor.u32 2147483648, %v8463_v5 }
 0x527   :  { %v4372_v0 = vor.u32 4788187, %v4371_v61  ;;  %v4380_v18 = vsel %vm4295_vm9, %v4379_v1, %v13112_v36  ;;  %v4036_v15 = vmul.u32 %v13167_v40, %v4020_v4  ;;  %v3454_v58 = vxor.u32 2147483648, %v8465_v41 }
 0x528   :  { %v4040_v3 = vsel %vm4038_vm3, %v4039_v51, %v13205_v24  ;;  %v4925_v54 = vor.u32 8388608, %v4924_v33  ;;  %v4931_v43 = vand.u32 31, %v4929_v53  ;;  %v3458_v62 = vsel %vm3456_vm2, %v3457_v25, %v8465_v41  ;;  %v14526_v24 = vld [vmem:[#allocation2_spill] sm:$0xff] }
 0x529   :  { %v4373_v11 = vand.u32 2147483647, %v4372_v0  ;;  %v4375_v22 = vcvt.s32.f32 %v4368_v30  ;;  %v4041_v48 = vadd.s32 %v4040_v3, %v4036_v15  ;;  %v3455_v56 = vsel %vm3453_vm0, %v8463_v5, %v3454_v58  ;;  %v14527_v0 = vld [vmem:[#allocation35_spill] sm:$0xff] }
 0x52a   :  { %v4382_v60 = vsel %vm13191_vm12, 0, %v4380_v18  ;;  %v4932_v47 = vsub.s32 32, %v4931_v43  ;;  %v13230_v36 = vadd.f32 %v2402_v6, %v2239_v10  ;;  %v3459_v40 = vsel %vm3452_vm15, %v3455_v56, %v3458_v62 }
 0x52b   :  { %v4376_v1 = vmul.f32 %v4375_v22, %v4373_v11  ;;  %v4042_v50 = vadd.s32 536870912, %v4041_v48  ;;  %v4934_v14 = vshll.u32 %v14328_v13, %v4931_v43  ;;  %v3460_v57 = vsel %vm3449_vm13, nan, %v3459_v40  ;;  %v8082_v11 = vpop.f32.mrf.mxu0 }
 0x52c   :  { %v4935_v32 = vshrl.u32 %v14329_v38, %v4932_v47  ;;  %v4937_v12 = vshll.u32 %v14329_v38, %v4931_v43  ;;  %v4938_v26 = vshrl.u32 %v14330_v27, %v4932_v47  ;;  %v7543_v46 = vsel %vm7534_vm5, %v14526_v24, %v3460_v57 }
 0x52d   :  { %v4377_v16 = vxor.u32 2147483648, %v4376_v1  ;;  %v4043_v19 = vshrl.u32 %v4042_v50, 30  ;;  %v4941_v17 = vshrl.u32 %v14331_v34, %v4932_v47  ;;  %7592 = vst.msk [vmem:[%s14171_s4 + $0x40] sm:$0xff] %vm7585_vm14, %v7543_v46  ;;  %v4930_v55 = vshrl.u32 %v4929_v53, 5 }
 0x52e   :  { %v4940_v45 = vshll.u32 %v14330_v27, %v4931_v43  ;;  %v4943_v10 = vshll.u32 %v14331_v34, %v4931_v43  ;;  %v4944_v4 = vshrl.u32 %v14332_v8, %v4932_v47  ;;  %v4936_v61 = vor.u32 %v4935_v32, %v4934_v14 }
 0x52f   :  { %v4378_v33 = vsel %vm4295_vm9, %v4377_v16, %v4376_v1  ;;  %v4044_v30 = vshll.u32 %v4043_v19, 30  ;;  %v4939_v5 = vor.u32 %v4938_v26, %v4937_v12  ;;  %v4946_v25 = vshll.u32 %v14332_v8, %v4931_v43 }
 0x530   :  { %v4381_v51 = vsel %vm13191_vm12, %v12929_v52, %v4378_v33  ;;  %v4945_v41 = vor.u32 %v4944_v4, %v4943_v10  ;;  %v4947_v53 = vshrl.u32 %v14333_v7, %v4932_v47  ;;  %v13260_v18 = vadd.f32 %v14527_v0, %v13116_v37 }
 0x531   :  { %8466 = vcosq.f32 %v4381_v51  ;;  %v13262_v15 = vsub.s32 %v4041_v48, %v4044_v30  ;;  %v4942_v6 = vor.u32 %v4941_v17, %v4940_v45  ;;  %v4386_v58 = vadd.s32 3, %v4382_v60 }
 0x532   :  { %8468 = vsinq.f32 %v4381_v51  ;;  %v4948_v3 = vor.u32 %v4947_v53, %v4946_v25  ;;  %v4965_v62 = vshll.u32 %v4925_v54, 8  ;;  %vm4949_vm4 = vcmp.lt.s32.totalorder %v4930_v55, 1 }
 0x533   :  { %v4047_v63 = vsub.s32 0, %v13262_v15  ;;  %vm4952_vm6 = vcmp.lt.s32.totalorder %v4930_v55, 4  ;;  %v13267_v43 = vadd.f32 %v12600_v9, %v13230_v36  ;;  %v4933_v37 = vshrl.u32 %v14328_v13, %v4932_v47 }
 0x534   :  { %vm4951_vm7 = vcmp.lt.s32.totalorder %v4930_v55, 3  ;;  %v4957_v22 = vsel %vm4949_vm4, %v4936_v61, %v4939_v5  ;;  %v4958_v48 = vsel %vm4952_vm6, %v4945_v41, 920167782  ;;  %vm4950_vm8 = vcmp.lt.s32.totalorder %v4930_v55, 2 }
 0x535   :  { %v7693_v56 = vmin.u32 %v4047_v63, %v13262_v15  ;;  %v4954_v60 = vsel %vm4952_vm6, %v4942_v6, 2102212464  ;;  %v4959_v54 = vsel %vm4951_vm7, %v4942_v6, %v4958_v48  ;;  %v4067_v40 = vsub.s32 4, %v4043_v19 }
 0x536   :  { %v4960_v1 = vsel %vm4950_vm8, %v4957_v22, %v4959_v54  ;;  %v4961_v50 = vsel %vm4949_vm4, %v4939_v5, %v4942_v6  ;;  %v4962_v14 = vsel %vm4952_vm6, %v4948_v3, 1326507024  ;;  %v4387_v57 = vand.u32 3, %v4386_v58  ;;  %v8112_v6 = vpop.f32.mrf.mxu1 }
 0x537   :  { %v4049_v32 = vclz %v7693_v56  ;;  %v2257_v47 = vadd.f32 %v8082_v11, %v13131_v42  ;;  %v4953_v12 = vsel %vm4949_vm4, %v4933_v37, %v4936_v61  ;;  %v4955_v26 = vsel %vm4951_vm7, %v4939_v5, %v4954_v60 }
 0x538   :  { %v4963_v24 = vsel %vm4951_vm7, %v4945_v41, %v4962_v14  ;;  %v13279_v46 = vmul.u32.u64.low %v4965_v62, %v4960_v1  ;;  %v13280_v16 = vmul.u32.u64.high %v4965_v62, %v4960_v1, %v13279_v46  ;;  %vm13285_vm9 = vcmp.le.f32.partialorder %v3981_v59, 0.7853982 }
 0x539   :  { %vm3983_vm10 = vcmp.lt.s32.totalorder %v13063_v2, 0  ;;  %v7694_v45 = vadd.s32 4294967294, %v4049_v32  ;;  %v4964_v42 = vsel %vm4950_vm8, %v4961_v50, %v4963_v24  ;;  %v4608_v30 = vand.u32 2139095040, %v13267_v43 }
 0x53a   :  { %v4068_v10 = vsel %vm3983_vm10, %v4067_v40, %v4043_v19  ;;  %v13293_v4 = vmul.u32.u64.low %v4965_v62, %v4964_v42  ;;  %v13294_v33 = vmul.u32.u64.high %v4965_v62, %v4964_v42, %v13293_v4  ;;  %vm4385_vm11 = vweird.f32 %v12929_v52  ;;  %v14532_v52 = vld [vmem:[#allocation36_spill] sm:$0xff] }
 0x53b   :  { %vm4388_vm12 = vcmp.lt.s32.totalorder %v4387_v57, 2  ;;  %vm4392_vm13 = vcmp.eq.s32.totalorder %v4387_v57, 2  ;;  %vm7695_vm15 = vcmp.lt.s32.totalorder %v7694_v45, 0  ;;  %v4956_v59 = vsel %vm4950_vm8, %v4953_v12, %v4955_v26  ;;  %v14531_v4 = vld [vmem:[#allocation39_spill] sm:$0xff] }
 0x53c   :  { %v4037_v61 = vadd.s32 %v13204_v44, %v13201_v35  ;;  %v4052_v5 = vsel %vm7695_vm15, 0, %v7694_v45  ;;  %v4975_v51 = vadd.s32 1, %v13280_v16  ;;  %v4609_v41 = vshrl.u32 %v4608_v30, 23 }
 0x53d   :  { %v4053_v19 = vsub.s32 32, %v4052_v5  ;;  %v4057_v25 = vsub.s32 4294967266, %v4052_v5  ;;  %v4070_v53 = vsel %vm13285_vm9, 0, %v4068_v10  ;;  %v4605_v0 = vand.u32 2147483647, %v13267_v43  ;;  %v14530_v10 = vld [vmem:[#allocation7_spill] sm:$0xff] }
 0x53e   :  { %v8467_v58 = vpop.eup %8466  ;;  %v4054_v3 = vshll.u32 %v13262_v15, %v4052_v5  ;;  %v4972_v55 = vmul.u32 %v4965_v62, %v4956_v59  ;;  %vm4974_vm0 = vc.u32 %v13294_v33, %v13279_v46  ;;  %v7716_v35 = vadd.s32 4294967169, %v4609_v41  ;;  %v14534_v41 = vld [vmem:[#allocation41_spill] sm:$0xff] }
 0x53f   :  { %v8469_v44 = vpop.eup %8468  ;;  %v4393_v63 = vxor.u32 2147483648, %v8467_v58  ;;  %v4055_v11 = vshrl.u32 %v4037_v61, %v4053_v19  ;;  %v4058_v37 = vadd.s32 127, %v4057_v25  ;;  %v4976_v22 = vsel %vm4974_vm0, %v4975_v51, %v13280_v16  ;;  %v14533_v51 = vld [vmem:[#allocation8_spill] sm:$0xff] }
 0x540   :  { %v4390_v48 = vxor.u32 2147483648, %v8469_v44  ;;  %v4977_v56 = vadd.s32 %v4976_v22, %v4972_v55  ;;  %v4615_v60 = vadd.s32 1, %v7716_v35  ;;  %v13309_v54 = vadd.f32 %v8112_v6, %v2257_v47 }
 0x541   :  { %vm4389_vm1 = vcmp.eq.s32.totalorder %v4387_v57, 0  ;;  %v4394_v40 = vsel %vm4392_vm13, %v4393_v63, %v8469_v44  ;;  %v4056_v15 = vor.u32 %v4055_v11, %v4054_v3  ;;  %v4059_v62 = vshll.u32 %v4058_v37, 23 }
 0x542   :  { %v4391_v1 = vsel %vm4389_vm1, %v8467_v58, %v4390_v48  ;;  %v4074_v50 = vadd.s32 3, %v4070_v53  ;;  %v4978_v14 = vadd.s32 536870912, %v4977_v56  ;;  %vm4616_vm2 = vcmp.gt.s32.totalorder %v4615_v60, 0 }
 0x543   :  { %v4395_v32 = vsel %vm4388_vm12, %v4391_v1, %v4394_v40  ;;  %v4060_v12 = vor.u32 4788187, %v4059_v62  ;;  %v4612_v26 = vand.u32 8388607, %v4605_v0  ;;  %v4617_v24 = vsel %vm4616_vm2, %v4615_v60, 0 }
 0x544   :  { %v4396_v47 = vsel %vm4385_vm11, nan, %v4395_v32  ;;  %v13317_v16 = vshrl.u32 %v4978_v14, 30  ;;  %v4619_v45 = vand.u32 31, %v4617_v24  ;;  %v13321_v42 = vadd.f32 %v12600_v9, %v13309_v54 }
 0x545   :  { %v13325_v30 = vadd.f32 %v14531_v4, %v14530_v10  ;;  %v7552_v57 = vsel %vm7534_vm5, %v12901_v20, %v4396_v47  ;;  %v4061_v59 = vand.u32 2147483647, %v4060_v12  ;;  %v4063_v61 = vcvt.s32.f32 %v4056_v15  ;;  %v14535_v20 = vld [vmem:[#allocation38_spill] sm:$0xff] }
 0x546   :  { %v13332_v5 = vadd.f32 %v14532_v52, %v13127_v29  ;;  %v13336_v19 = vadd.f32 %v14534_v41, %v14533_v51  ;;  %7601 = vst.msk [vmem:[%s14171_s4 + $0x88] sm:$0xff] %vm7585_vm14, %v7552_v57  ;;  %v4980_v25 = vshll.u32 %v13317_v16, 30  ;;  %v4620_v53 = vsub.s32 32, %v4619_v45 }
 0x547   :  { %v13345_v6 = vadd.f32 %v14535_v20, %v13140_v28  ;;  %v4064_v58 = vmul.f32 %v4063_v61, %v4061_v59  ;;  %v13347_v3 = vand.u32 3, %v4074_v50  ;;  %v4613_v29 = vor.u32 8388608, %v4612_v26 }
 0x548   :  { %v4973_v55 = vadd.s32 %v13279_v46, %v13294_v33  ;;  %v13351_v35 = vsub.s32 %v4977_v56, %v4980_v25  ;;  %v4623_v44 = vshrl.u32 %v14329_v38, %v4620_v53  ;;  %v5544_v63 = vand.u32 2139095040, %v13321_v42 }
 0x549   :  { %v4065_v11 = vxor.u32 2147483648, %v4064_v58  ;;  %v4622_v37 = vshll.u32 %v14328_v13, %v4619_v45  ;;  %v4626_v22 = vshrl.u32 %v14330_v27, %v4620_v53  ;;  %v4629_v28 = vshrl.u32 %v14331_v34, %v4620_v53 }
 0x54a   :  { %v4983_v48 = vsub.s32 0, %v13351_v35  ;;  %v4625_v60 = vshll.u32 %v14329_v38, %v4619_v45  ;;  %v4628_v40 = vshll.u32 %v14330_v27, %v4619_v45  ;;  %v4632_v46 = vshrl.u32 %v14332_v8, %v4620_v53 }
 0x54b   :  { %v4066_v33 = vsel %vm3983_vm10, %v4065_v11, %v4064_v58  ;;  %v4618_v56 = vshrl.u32 %v4617_v24, 5  ;;  %v4624_v15 = vor.u32 %v4623_v44, %v4622_v37  ;;  %v4631_v62 = vshll.u32 %v14331_v34, %v4619_v45 }
 0x54c   :  { %v4069_v1 = vsel %vm13285_vm9, %v13063_v2, %v4066_v33  ;;  %v7729_v50 = vmin.u32 %v4983_v48, %v13351_v35  ;;  %v4627_v14 = vor.u32 %v4626_v22, %v4625_v60  ;;  %v4630_v32 = vor.u32 %v4629_v28, %v4628_v40  ;;  %v2250_v22 = vpop.f32.mrf.mxu0 }
 0x54d   :  { %8470 = vcosq.f32 %v4069_v1  ;;  %v4633_v12 = vor.u32 %v4632_v46, %v4631_v62  ;;  %v4634_v26 = vshll.u32 %v14332_v8, %v4619_v45  ;;  %v4635_v47 = vshrl.u32 %v14333_v7, %v4620_v53 }
 0x54e   :  { %8472 = vsinq.f32 %v4069_v1  ;;  %vm4919_vm3 = vcmp.lt.s32.totalorder %v13102_v21, 0  ;;  %v4985_v24 = vclz %v7729_v50  ;;  %v13372_v10 = vshll.u32 %v4613_v29, 8 }
 0x54f   :  { %v5545_v4 = vshrl.u32 %v5544_v63, 23  ;;  %v5003_v17 = vsub.s32 4, %v13317_v16  ;;  %v4621_v57 = vshrl.u32 %v14328_v13, %v4620_v53  ;;  %v4636_v59 = vor.u32 %v4635_v47, %v4634_v26 }
 0x550   :  { %vm4637_vm4 = vcmp.lt.s32.totalorder %v4618_v56, 1  ;;  %v7730_v61 = vadd.s32 4294967294, %v4985_v24  ;;  %vm4639_vm6 = vcmp.lt.s32.totalorder %v4618_v56, 3  ;;  %vm4640_vm7 = vcmp.lt.s32.totalorder %v4618_v56, 4 }
 0x551   :  { %v4645_v52 = vsel %vm4637_vm4, %v4624_v15, %v4627_v14  ;;  %vm13378_vm8 = vcmp.le.f32.partialorder %v4917_v23, 0.7853982  ;;  %v4642_v51 = vsel %vm4640_vm7, %v4630_v32, 2102212464  ;;  %v4646_v41 = vsel %vm4640_vm7, %v4633_v12, 920167782 }
 0x552   :  { %v4649_v25 = vsel %vm4637_vm4, %v4627_v14, %v4630_v32  ;;  %v4650_v20 = vsel %vm4640_vm7, %v4636_v59, 1326507024  ;;  %vm7731_vm9 = vcmp.lt.s32.totalorder %v7730_v61, 0  ;;  %vm4638_vm10 = vcmp.lt.s32.totalorder %v4618_v56, 2 }
 0x553   :  { %v4647_v53 = vsel %vm4639_vm6, %v4630_v32, %v4646_v41  ;;  %v4651_v58 = vsel %vm4639_vm6, %v4633_v12, %v4650_v20  ;;  %v4988_v29 = vsel %vm7731_vm9, 0, %v7730_v61  ;;  %v4641_v44 = vsel %vm4637_vm4, %v4621_v57, %v4624_v15 }
 0x554   :  { %v4648_v63 = vsel %vm4638_vm10, %v4645_v52, %v4647_v53  ;;  %v4652_v11 = vsel %vm4638_vm10, %v4649_v25, %v4651_v58  ;;  %v4989_v23 = vsub.s32 32, %v4988_v29  ;;  %v4993_v37 = vsub.s32 4294967266, %v4988_v29 }
 0x555   :  { %v4643_v28 = vsel %vm4639_vm6, %v4627_v14, %v4642_v51  ;;  %v7752_v48 = vadd.s32 4294967169, %v5545_v4  ;;  %v13388_v60 = vmul.u32.u64.low %v13372_v10, %v4652_v11  ;;  %v13389_v40 = vmul.u32.u64.high %v13372_v10, %v4652_v11, %v13388_v60 }
 0x556   :  { %v13392_v46 = vmul.u32.u64.low %v13372_v10, %v4648_v63  ;;  %v13393_v33 = vmul.u32.u64.high %v13372_v10, %v4648_v63, %v13392_v46  ;;  %v4990_v15 = vshll.u32 %v13351_v35, %v4988_v29  ;;  %v4991_v62 = vshrl.u32 %v4973_v55, %v4989_v23 }
 0x557   :  { %v4994_v1 = vadd.s32 127, %v4993_v37  ;;  %v5551_v50 = vadd.s32 1, %v7752_v48  ;;  %vm4073_vm11 = vweird.f32 %v13063_v2  ;;  %vm4076_vm12 = vcmp.lt.s32.totalorder %v13347_v3, 2 }
 0x558   :  { %v5004_v14 = vsel %vm4919_vm3, %v5003_v17, %v13317_v16  ;;  %v2251_v32 = vadd.f32 %v2250_v22, %v13260_v18  ;;  %v4644_v12 = vsel %vm4638_vm10, %v4641_v44, %v4643_v28  ;;  %vm4077_vm13 = vcmp.eq.s32.totalorder %v13347_v3, 0  ;;  %v2414_v17 = vpop.f32.mrf.mxu1 }
 0x559   :  { %v4992_v26 = vor.u32 %v4991_v62, %v4990_v15  ;;  %v4995_v47 = vshll.u32 %v4994_v1, 23  ;;  %vm5552_vm15 = vcmp.gt.s32.totalorder %v5551_v50, 0  ;;  %vm4662_vm0 = vc.u32 %v13389_v40, %v13392_v46 }
 0x55a   :  { %v4663_v55 = vadd.s32 1, %v13393_v33  ;;  %v5541_v35 = vand.u32 2147483647, %v13321_v42  ;;  %v5553_v24 = vsel %vm5552_vm15, %v5551_v50, 0  ;;  %v8471_v4 = vpop.eup %8470  ;;  %v5006_v18 = vsel %vm13378_vm8, 0, %v5004_v14 }
 0x55b   :  { %v4996_v57 = vor.u32 4788187, %v4995_v47  ;;  %v4660_v16 = vmul.u32 %v13372_v10, %v4644_v12  ;;  %v5555_v56 = vand.u32 31, %v5553_v24  ;;  %v8473_v59 = vpop.eup %8472  ;;  %vm4080_vm1 = vcmp.eq.s32.totalorder %v13347_v3, 2 }
 0x55c   :  { %v4081_v61 = vxor.u32 2147483648, %v8471_v4  ;;  %v4999_v52 = vcvt.s32.f32 %v4992_v26  ;;  %v4664_v51 = vsel %vm4662_vm0, %v4663_v55, %v13393_v33  ;;  %v4078_v41 = vxor.u32 2147483648, %v8473_v59 }
 0x55d   :  { %v4997_v25 = vand.u32 2147483647, %v4996_v57  ;;  %v4665_v20 = vadd.s32 %v4664_v51, %v4660_v16  ;;  %v5556_v53 = vsub.s32 32, %v5555_v56  ;;  %v5010_v29 = vadd.s32 3, %v5006_v18 }
 0x55e   :  { %v4082_v58 = vsel %vm4080_vm1, %v4081_v61, %v8473_v59  ;;  %v5548_v44 = vand.u32 8388607, %v5541_v35  ;;  %v13416_v63 = vadd.f32 %v2414_v17, %v2251_v32  ;;  %v4079_v10 = vsel %vm4077_vm13, %v8471_v4, %v4078_v41 }
 0x55f   :  { %v5000_v11 = vmul.f32 %v4999_v52, %v4997_v25  ;;  %v4666_v23 = vadd.s32 536870912, %v4665_v20  ;;  %v13420_v37 = vshrl.u32 %v5553_v24, 5  ;;  %v4083_v22 = vsel %vm4076_vm12, %v4079_v10, %v4082_v58 }
 0x560   :  { %v5558_v28 = vshll.u32 %v14328_v13, %v5555_v56  ;;  %v5559_v48 = vshrl.u32 %v14329_v38, %v5556_v53  ;;  %v5562_v60 = vshrl.u32 %v14330_v27, %v5556_v53  ;;  %v4084_v33 = vsel %vm4073_vm11, nan, %v4083_v22 }
 0x561   :  { %v5001_v15 = vxor.u32 2147483648, %v5000_v11  ;;  %v4667_v62 = vshrl.u32 %v4666_v23, 30  ;;  %v5565_v1 = vshrl.u32 %v14331_v34, %v5556_v53  ;;  %v7549_v50 = vsel %vm7534_vm5, %v13057_v31, %v4084_v33 }
 0x562   :  { %v5561_v3 = vshll.u32 %v14329_v38, %v5555_v56  ;;  %v5564_v14 = vshll.u32 %v14330_v27, %v5555_v56  ;;  %v5567_v32 = vshll.u32 %v14331_v34, %v5555_v56  ;;  %7598 = vst.msk [vmem:[%s14171_s4 + $0x70] sm:$0xff] %vm7585_vm14, %v7549_v50  ;;  %v5560_v26 = vor.u32 %v5559_v48, %v5558_v28 }
 0x563   :  { %v5002_v2 = vsel %vm4919_vm3, %v5001_v15, %v5000_v11  ;;  %v4668_v12 = vshll.u32 %v4667_v62, 30  ;;  %v5568_v47 = vshrl.u32 %v14332_v8, %v5556_v53  ;;  %v5570_v24 = vshll.u32 %v14332_v8, %v5555_v56  ;;  %v8085_v56 = vpop.f32.mrf.mxu0 }
 0x564   :  { %v5005_v31 = vsel %vm13378_vm8, %v13102_v21, %v5002_v2  ;;  %v5563_v55 = vor.u32 %v5562_v60, %v5561_v3  ;;  %v5571_v4 = vshrl.u32 %v14333_v7, %v5556_v53  ;;  %v5566_v18 = vor.u32 %v5565_v1, %v5564_v14 }
 0x565   :  { %8474 = vcosq.f32 %v5005_v31  ;;  %v13448_v57 = vsub.s32 %v4665_v20, %v4668_v12  ;;  %v5569_v16 = vor.u32 %v5568_v47, %v5567_v32  ;;  %v13450_v17 = vand.u32 3, %v5010_v29 }
 0x566   :  { %8476 = vsinq.f32 %v5005_v31  ;;  %v5549_v59 = vor.u32 8388608, %v5548_v44  ;;  %v5572_v61 = vor.u32 %v5571_v4, %v5570_v24  ;;  %vm5573_vm2 = vcmp.lt.s32.totalorder %v13420_v37, 1 }
 0x567   :  { %v4671_v52 = vsub.s32 0, %v13448_v57  ;;  %vm5576_vm3 = vcmp.lt.s32.totalorder %v13420_v37, 4  ;;  %v13457_v45 = vadd.f32 %v12600_v9, %v13416_v63  ;;  %v5557_v51 = vshrl.u32 %v14328_v13, %v5556_v53 }
 0x568   :  { %vm5575_vm4 = vcmp.lt.s32.totalorder %v13420_v37, 3  ;;  %v5581_v41 = vsel %vm5573_vm2, %v5560_v26, %v5563_v55  ;;  %v5582_v25 = vsel %vm5576_vm3, %v5569_v16, 920167782  ;;  %vm5574_vm6 = vcmp.lt.s32.totalorder %v13420_v37, 2 }
 0x569   :  { %v7717_v20 = vmin.u32 %v4671_v52, %v13448_v57  ;;  %v5578_v58 = vsel %vm5576_vm3, %v5566_v18, 2102212464  ;;  %v5583_v29 = vsel %vm5575_vm4, %v5566_v18, %v5582_v25  ;;  %v5585_v53 = vsel %vm5573_vm2, %v5563_v55, %v5566_v18 }
 0x56a   :  { %v5584_v44 = vsel %vm5574_vm6, %v5581_v41, %v5583_v29  ;;  %v5586_v10 = vsel %vm5576_vm3, %v5572_v61, 1326507024  ;;  %v5589_v11 = vshll.u32 %v5549_v59, 8  ;;  %v4691_v22 = vsub.s32 4, %v4667_v62  ;;  %v8115_v59 = vpop.f32.mrf.mxu1 }
 0x56b   :  { %v4673_v23 = vclz %v7717_v20  ;;  %v2269_v28 = vadd.f32 %v8085_v56, %v13332_v5  ;;  %v5577_v48 = vsel %vm5573_vm2, %v5557_v51, %v5560_v26  ;;  %v5579_v60 = vsel %vm5575_vm4, %v5563_v55, %v5578_v58 }
 0x56c   :  { %v5587_v33 = vsel %vm5575_vm4, %v5569_v16, %v5586_v10  ;;  %v13478_v15 = vmul.u32.u64.low %v5589_v11, %v5584_v44  ;;  %v13479_v1 = vmul.u32.u64.high %v5589_v11, %v5584_v44, %v13478_v15  ;;  %vm13484_vm7 = vcmp.le.f32.partialorder %v4605_v0, 0.7853982 }
 0x56d   :  { %v7718_v5 = vadd.s32 4294967294, %v4673_v23  ;;  %v5588_v3 = vsel %vm5574_vm6, %v5585_v53, %v5587_v33  ;;  %v5232_v14 = vand.u32 2139095040, %v13457_v45  ;;  %vm5012_vm8 = vcmp.lt.s32.totalorder %v13450_v17, 2 }
 0x56e   :  { %vm4607_vm9 = vcmp.lt.s32.totalorder %v13267_v43, 0  ;;  %v13493_v32 = vmul.u32.u64.low %v5589_v11, %v5588_v3  ;;  %v13494_v2 = vmul.u32.u64.high %v5589_v11, %v5588_v3, %v13493_v32  ;;  %vm5009_vm10 = vweird.f32 %v13102_v21  ;;  %v14542_v21 = vld [vmem:[#allocation40_spill] sm:$0xff] }
 0x56f   :  { %vm7719_vm11 = vcmp.lt.s32.totalorder %v7718_v5, 0  ;;  %v4692_v0 = vsel %vm4607_vm9, %v4691_v22, %v4667_v62  ;;  %v5580_v12 = vsel %vm5574_vm6, %v5577_v48, %v5579_v60  ;;  %v5233_v26 = vshrl.u32 %v5232_v14, 23  ;;  %v14540_v32 = vld [vmem:[#allocation10_spill] sm:$0xff] }
 0x570   :  { %vm5016_vm12 = vcmp.eq.s32.totalorder %v13450_v17, 2  ;;  %v4661_v47 = vadd.s32 %v13392_v46, %v13389_v40  ;;  %v4676_v31 = vsel %vm7719_vm11, 0, %v7718_v5  ;;  %v5599_v55 = vadd.s32 1, %v13479_v1  ;;  %v2262_v5 = vpop.f32.mrf.mxu0 }
 0x571   :  { %v4677_v24 = vsub.s32 32, %v4676_v31  ;;  %v4681_v4 = vsub.s32 4294967266, %v4676_v31  ;;  %v5229_v18 = vand.u32 2147483647, %v13457_v45  ;;  %v7740_v16 = vadd.s32 4294967169, %v5233_v26 }
 0x572   :  { %v8475_v61 = vpop.eup %8474  ;;  %v4678_v62 = vshll.u32 %v13448_v57, %v4676_v31  ;;  %v4694_v37 = vsel %vm13484_vm7, 0, %v4692_v0  ;;  %v5596_v52 = vmul.u32 %v5589_v11, %v5580_v12  ;;  %vm5598_vm13 = vc.u32 %v13494_v2, %v13478_v15  ;;  %v14541_v0 = vld [vmem:[#allocation43_spill] sm:$0xff] }
 0x573   :  { %v8477_v40 = vpop.eup %8476  ;;  %v5017_v46 = vxor.u32 2147483648, %v8475_v61  ;;  %v4679_v56 = vshrl.u32 %v4661_v47, %v4677_v24  ;;  %v4682_v51 = vadd.s32 127, %v4681_v4  ;;  %v5600_v41 = vsel %vm5598_vm13, %v5599_v55, %v13479_v1  ;;  %v14543_v55 = vld [vmem:[#allocation11_spill] sm:$0xff]  ;;  %v14544_v24 = vld [vmem:[#allocation45_spill] sm:$0xff] }
 0x574   :  { %v5014_v25 = vxor.u32 2147483648, %v8477_v40  ;;  %v5601_v20 = vadd.s32 %v5600_v41, %v5596_v52  ;;  %v5239_v58 = vadd.s32 1, %v7740_v16  ;;  %v13512_v29 = vadd.f32 %v8115_v59, %v2269_v28 }
 0x575   :  { %vm5013_vm15 = vcmp.eq.s32.totalorder %v13450_v17, 0  ;;  %v5018_v57 = vsel %vm5016_vm12, %v5017_v46, %v8477_v40  ;;  %v4680_v44 = vor.u32 %v4679_v56, %v4678_v62  ;;  %v4683_v53 = vshll.u32 %v4682_v51, 23 }
 0x576   :  { %v5015_v10 = vsel %vm5013_vm15, %v8475_v61, %v5014_v25  ;;  %v4698_v11 = vadd.s32 3, %v4694_v37  ;;  %v5602_v23 = vadd.s32 536870912, %v5601_v20  ;;  %vm5240_vm0 = vcmp.gt.s32.totalorder %v5239_v58, 0 }
 0x577   :  { %v5019_v22 = vsel %vm5012_vm8, %v5015_v10, %v5018_v57  ;;  %v4684_v48 = vor.u32 4788187, %v4683_v53  ;;  %v5236_v60 = vand.u32 8388607, %v5229_v18  ;;  %v5241_v28 = vsel %vm5240_vm0, %v5239_v58, 0 }
 0x578   :  { %v5020_v33 = vsel %vm5009_vm10, nan, %v5019_v22  ;;  %v13523_v1 = vshrl.u32 %v5602_v23, 30  ;;  %v5243_v3 = vand.u32 31, %v5241_v28  ;;  %v13527_v14 = vadd.f32 %v12600_v9, %v13512_v29 }
 0x579   :  { %v13531_v17 = vadd.f32 %v14541_v0, %v14540_v32  ;;  %v7558_v12 = vsel %vm7534_vm5, %v13089_v39, %v5020_v33  ;;  %v4685_v26 = vand.u32 2147483647, %v4684_v48  ;;  %v4687_v47 = vcvt.s32.f32 %v4680_v44 }
 0x57a   :  { %v13538_v31 = vadd.f32 %v14542_v21, %v13325_v30  ;;  %v13542_v4 = vadd.f32 %v14544_v24, %v14543_v55  ;;  %7607 = vst.msk [vmem:[%s14171_s4 + $0xb8] sm:$0xff] %vm7585_vm14, %v7558_v12  ;;  %v5604_v16 = vshll.u32 %v13523_v1, 30  ;;  %v5244_v59 = vsub.s32 32, %v5243_v3 }
 0x57b   :  { %v4688_v61 = vmul.f32 %v4687_v47, %v4685_v26  ;;  %v13549_v39 = vand.u32 3, %v4698_v11  ;;  %v13552_v62 = vadd.f32 %v2262_v5, %v13345_v6  ;;  %v5237_v30 = vor.u32 8388608, %v5236_v60 }
 0x57c   :  { %v5597_v37 = vadd.s32 %v13478_v15, %v13494_v2  ;;  %v13556_v52 = vsub.s32 %v5601_v20, %v5604_v16  ;;  %v5247_v40 = vshrl.u32 %v14329_v38, %v5244_v59  ;;  %v6168_v46 = vand.u32 2139095040, %v13527_v14 }
 0x57d   :  { %v4689_v56 = vxor.u32 2147483648, %v4688_v61  ;;  %v5246_v51 = vshll.u32 %v14328_v13, %v5243_v3  ;;  %v5250_v41 = vshrl.u32 %v14330_v27, %v5244_v59  ;;  %v5253_v25 = vshrl.u32 %v14331_v34, %v5244_v59 }
 0x57e   :  { %v5607_v6 = vsub.s32 0, %v13556_v52  ;;  %v5249_v58 = vshll.u32 %v14329_v38, %v5243_v3  ;;  %v5252_v57 = vshll.u32 %v14330_v27, %v5243_v3  ;;  %v5256_v15 = vshrl.u32 %v14332_v8, %v5244_v59 }
 0x57f   :  { %v4690_v2 = vsel %vm4607_vm9, %v4689_v56, %v4688_v61  ;;  %v5242_v20 = vshrl.u32 %v5241_v28, 5  ;;  %v5248_v44 = vor.u32 %v5247_v40, %v5246_v51  ;;  %v5255_v53 = vshll.u32 %v14331_v34, %v5243_v3 }
 0x580   :  { %v4693_v10 = vsel %vm13484_vm7, %v13267_v43, %v4690_v2  ;;  %v7753_v11 = vmin.u32 %v5607_v6, %v13556_v52  ;;  %v5251_v23 = vor.u32 %v5250_v41, %v5249_v58  ;;  %v5254_v22 = vor.u32 %v5253_v25, %v5252_v57 }
 0x581   :  { %8478 = vcosq.f32 %v4693_v10  ;;  %v5257_v48 = vor.u32 %v5256_v15, %v5255_v53  ;;  %v5258_v60 = vshll.u32 %v14332_v8, %v5243_v3  ;;  %v5259_v33 = vshrl.u32 %v14333_v7, %v5244_v59 }
 0x582   :  { %8480 = vsinq.f32 %v4693_v10  ;;  %vm5543_vm1 = vcmp.lt.s32.totalorder %v13321_v42, 0  ;;  %v5609_v28 = vclz %v7753_v11  ;;  %v5277_v5 = vshll.u32 %v5237_v30, 8 }
 0x583   :  { %v6169_v32 = vshrl.u32 %v6168_v46, 23  ;;  %v5627_v0 = vsub.s32 4, %v13523_v1  ;;  %v5245_v50 = vshrl.u32 %v14328_v13, %v5244_v59  ;;  %v5260_v12 = vor.u32 %v5259_v33, %v5258_v60 }
 0x584   :  { %vm5261_vm2 = vcmp.lt.s32.totalorder %v5242_v20, 1  ;;  %v7754_v26 = vadd.s32 4294967294, %v5609_v28  ;;  %vm5263_vm3 = vcmp.lt.s32.totalorder %v5242_v20, 3  ;;  %vm5264_vm4 = vcmp.lt.s32.totalorder %v5242_v20, 4 }
 0x585   :  { %v5269_v47 = vsel %vm5261_vm2, %v5248_v44, %v5251_v23  ;;  %v5266_v21 = vsel %vm5264_vm4, %v5254_v22, 2102212464  ;;  %v5270_v3 = vsel %vm5264_vm4, %v5257_v48, 920167782  ;;  %v5273_v55 = vsel %vm5261_vm2, %v5251_v23, %v5254_v22 }
 0x586   :  { %v5274_v24 = vsel %vm5264_vm4, %v5260_v12, 1326507024  ;;  %vm7755_vm6 = vcmp.lt.s32.totalorder %v7754_v26, 0  ;;  %vm5262_vm7 = vcmp.lt.s32.totalorder %v5242_v20, 2  ;;  %v5271_v16 = vsel %vm5263_vm3, %v5254_v22, %v5270_v3 }
 0x587   :  { %v5275_v61 = vsel %vm5263_vm3, %v5257_v48, %v5274_v24  ;;  %v5612_v30 = vsel %vm7755_vm6, 0, %v7754_v26  ;;  %v5265_v40 = vsel %vm5261_vm2, %v5245_v50, %v5248_v44  ;;  %v5272_v59 = vsel %vm5262_vm7, %v5269_v47, %v5271_v16 }
 0x588   :  { %v5276_v46 = vsel %vm5262_vm7, %v5273_v55, %v5275_v61  ;;  %v5613_v56 = vsub.s32 32, %v5612_v30  ;;  %v5617_v51 = vsub.s32 4294967266, %v5612_v30  ;;  %v5267_v41 = vsel %vm5263_vm3, %v5251_v23, %v5266_v21 }
 0x589   :  { %v7776_v25 = vadd.s32 4294967169, %v6169_v32  ;;  %v13584_v6 = vmul.u32.u64.low %v5277_v5, %v5276_v46  ;;  %v13585_v58 = vmul.u32.u64.high %v5277_v5, %v5276_v46, %v13584_v6  ;;  %v5614_v2 = vshll.u32 %v13556_v52, %v5612_v30 }
 0x58a   :  { %v13587_v57 = vmul.u32.u64.low %v5277_v5, %v5272_v59  ;;  %v13588_v15 = vmul.u32.u64.high %v5277_v5, %v5272_v59, %v13587_v57  ;;  %v5615_v53 = vshrl.u32 %v5597_v37, %v5613_v56  ;;  %v5618_v44 = vadd.s32 127, %v5617_v51 }
 0x58b   :  { %v6175_v10 = vadd.s32 1, %v7776_v25  ;;  %vm4697_vm8 = vweird.f32 %v13267_v43  ;;  %vm4700_vm9 = vcmp.lt.s32.totalorder %v13549_v39, 2  ;;  %vm13596_vm10 = vcmp.le.f32.partialorder %v5541_v35, 0.7853982 }
 0x58c   :  { %v5628_v23 = vsel %vm5543_vm1, %v5627_v0, %v13523_v1  ;;  %v5268_v22 = vsel %vm5262_vm7, %v5265_v40, %v5267_v41  ;;  %vm4701_vm11 = vcmp.eq.s32.totalorder %v13549_v39, 0  ;;  %v5616_v37 = vor.u32 %v5615_v53, %v5614_v2  ;;  %v2426_v0 = vpop.f32.mrf.mxu1 }
 0x58d   :  { %v5619_v52 = vshll.u32 %v5618_v44, 23  ;;  %vm6176_vm12 = vcmp.gt.s32.totalorder %v6175_v10, 0  ;;  %vm5286_vm13 = vc.u32 %v13585_v58, %v13587_v57  ;;  %v5287_v48 = vadd.s32 1, %v13588_v15 }
 0x58e   :  { %v6165_v35 = vand.u32 2147483647, %v13527_v14  ;;  %v6177_v60 = vsel %vm6176_vm12, %v6175_v10, 0  ;;  %v8479_v33 = vpop.eup %8478  ;;  %v5630_v1 = vsel %vm13596_vm10, 0, %v5628_v23  ;;  %v5284_v20 = vmul.u32 %v5277_v5, %v5268_v22 }
 0x58f   :  { %v5620_v28 = vor.u32 4788187, %v5619_v52  ;;  %v6179_v32 = vand.u32 31, %v6177_v60  ;;  %v8481_v50 = vpop.eup %8480  ;;  %vm4704_vm15 = vcmp.eq.s32.totalorder %v13549_v39, 2  ;;  %v4705_v12 = vxor.u32 2147483648, %v8479_v33 }
 0x590   :  { %v5623_v26 = vcvt.s32.f32 %v5616_v37  ;;  %v5288_v47 = vsel %vm5286_vm13, %v5287_v48, %v13588_v15  ;;  %v4702_v21 = vxor.u32 2147483648, %v8481_v50  ;;  %v5634_v61 = vadd.s32 3, %v5630_v1 }
 0x591   :  { %v5621_v3 = vand.u32 2147483647, %v5620_v28  ;;  %v5289_v55 = vadd.s32 %v5288_v47, %v5284_v20  ;;  %v6180_v24 = vsub.s32 32, %v6179_v32  ;;  %v4706_v16 = vsel %vm4704_vm15, %v4705_v12, %v8481_v50 }
 0x592   :  { %v6172_v30 = vand.u32 8388607, %v6165_v35  ;;  %v13616_v5 = vadd.f32 %v2426_v0, %v13552_v62  ;;  %v4703_v40 = vsel %vm4701_vm11, %v8479_v33, %v4702_v21  ;;  %v13620_v56 = vshrl.u32 %v6177_v60, 5 }
 0x593   :  { %v5624_v59 = vmul.f32 %v5623_v26, %v5621_v3  ;;  %v5290_v46 = vadd.s32 536870912, %v5289_v55  ;;  %v4707_v51 = vsel %vm4700_vm9, %v4703_v40, %v4706_v16  ;;  %v6182_v41 = vshll.u32 %v14328_v13, %v6179_v32 }
 0x594   :  { %v6183_v25 = vshrl.u32 %v14329_v38, %v6180_v24  ;;  %v6186_v6 = vshrl.u32 %v14330_v27, %v6180_v24  ;;  %v4708_v62 = vsel %vm4697_vm8, nan, %v4707_v51  ;;  %v6189_v53 = vshrl.u32 %v14331_v34, %v6180_v24 }
 0x595   :  { %v5625_v15 = vxor.u32 2147483648, %v5624_v59  ;;  %v5291_v2 = vshrl.u32 %v5290_v46, 30  ;;  %v7555_v44 = vsel %vm7534_vm5, %v13230_v36, %v4708_v62  ;;  %v6185_v39 = vshll.u32 %v14329_v38, %v6179_v32 }
 0x596   :  { %v6188_v10 = vshll.u32 %v14330_v27, %v6179_v32  ;;  %v6191_v23 = vshll.u32 %v14331_v34, %v6179_v32  ;;  %7604 = vst.msk [vmem:[%s14171_s4 + $0xa0] sm:$0xff] %vm7585_vm14, %v7555_v44  ;;  %v6184_v37 = vor.u32 %v6183_v25, %v6182_v41  ;;  %v6192_v52 = vshrl.u32 %v14332_v8, %v6180_v24 }
 0x597   :  { %v5626_v43 = vsel %vm5543_vm1, %v5625_v15, %v5624_v59  ;;  %v5292_v22 = vshll.u32 %v5291_v2, 30  ;;  %v6187_v48 = vor.u32 %v6186_v6, %v6185_v39  ;;  %v6194_v60 = vshll.u32 %v14332_v8, %v6179_v32  ;;  %v8088_v32 = vpop.f32.mrf.mxu0 }
 0x598   :  { %v5629_v36 = vsel %vm13596_vm10, %v13321_v42, %v5626_v43  ;;  %v6195_v33 = vshrl.u32 %v14333_v7, %v6180_v24  ;;  %v6190_v1 = vor.u32 %v6189_v53, %v6188_v10  ;;  %v6193_v20 = vor.u32 %v6192_v52, %v6191_v23 }
 0x599   :  { %8482 = vcosq.f32 %v5629_v36  ;;  %v13648_v28 = vsub.s32 %v5289_v55, %v5292_v22  ;;  %v13650_v0 = vand.u32 3, %v5634_v61  ;;  %v6173_v50 = vor.u32 8388608, %v6172_v30 }
 0x59a   :  { %8484 = vsinq.f32 %v5629_v36  ;;  %v6196_v12 = vor.u32 %v6195_v33, %v6194_v60  ;;  %vm6197_vm0 = vcmp.lt.s32.totalorder %v13620_v56, 1  ;;  %vm6200_vm1 = vcmp.lt.s32.totalorder %v13620_v56, 4 }
 0x59b   :  { %v5295_v26 = vsub.s32 0, %v13648_v28  ;;  %v13657_v11 = vadd.f32 %v12600_v9, %v13616_v5  ;;  %v6181_v47 = vshrl.u32 %v14328_v13, %v6180_v24  ;;  %vm6199_vm2 = vcmp.lt.s32.totalorder %v13620_v56, 3 }
 0x59c   :  { %v6205_v21 = vsel %vm6197_vm0, %v6184_v37, %v6187_v48  ;;  %v6206_v3 = vsel %vm6200_vm1, %v6193_v20, 920167782  ;;  %vm6198_vm3 = vcmp.lt.s32.totalorder %v13620_v56, 2  ;;  %v6202_v16 = vsel %vm6200_vm1, %v6190_v1, 2102212464 }
 0x59d   :  { %v7741_v55 = vmin.u32 %v5295_v26, %v13648_v28  ;;  %v6207_v61 = vsel %vm6199_vm2, %v6190_v1, %v6206_v3  ;;  %v6209_v24 = vsel %vm6197_vm0, %v6187_v48, %v6190_v1  ;;  %v6210_v40 = vsel %vm6200_vm1, %v6196_v12, 1326507024 }
 0x59e   :  { %v6208_v30 = vsel %vm6198_vm3, %v6205_v21, %v6207_v61  ;;  %v6213_v59 = vshll.u32 %v6173_v50, 8  ;;  %v5315_v51 = vsub.s32 4, %v5291_v2  ;;  %v2281_v41 = vadd.f32 %v8088_v32, %v13538_v31  ;;  %v8118_v50 = vpop.f32.mrf.mxu1 }
 0x59f   :  { %v5297_v46 = vclz %v7741_v55  ;;  %v6201_v25 = vsel %vm6197_vm0, %v6181_v47, %v6184_v37  ;;  %v6203_v6 = vsel %vm6199_vm2, %v6187_v48, %v6202_v16  ;;  %v6211_v62 = vsel %vm6199_vm2, %v6193_v20, %v6210_v40 }
 0x5a0   :  { %v13678_v15 = vmul.u32.u64.low %v6213_v59, %v6208_v30  ;;  %v13679_v53 = vmul.u32.u64.high %v6213_v59, %v6208_v30, %v13678_v15  ;;  %vm5231_vm4 = vcmp.lt.s32.totalorder %v13457_v45, 0  ;;  %v6212_v39 = vsel %vm6198_vm3, %v6209_v24, %v6211_v62 }
 0x5a1   :  { %v7742_v44 = vadd.s32 4294967294, %v5297_v46  ;;  %v5856_v31 = vand.u32 2139095040, %v13657_v11  ;;  %vm5636_vm6 = vcmp.lt.s32.totalorder %v13650_v0, 2  ;;  %vm13689_vm7 = vcmp.le.f32.partialorder %v5229_v18, 0.7853982 }
 0x5a2   :  { %v13693_v23 = vmul.u32.u64.low %v6213_v59, %v6212_v39  ;;  %v13694_v43 = vmul.u32.u64.high %v6213_v59, %v6212_v39, %v13693_v23  ;;  %vm5633_vm8 = vweird.f32 %v13321_v42  ;;  %v5316_v22 = vsel %vm5231_vm4, %v5315_v51, %v5291_v2  ;;  %v14550_v42 = vld [vmem:[#allocation44_spill] sm:$0xff] }
 0x5a3   :  { %vm7743_vm9 = vcmp.lt.s32.totalorder %v7742_v44, 0  ;;  %v6204_v37 = vsel %vm6198_vm3, %v6201_v25, %v6203_v6  ;;  %v5857_v52 = vshrl.u32 %v5856_v31, 23  ;;  %vm5640_vm10 = vcmp.eq.s32.totalorder %v13650_v0, 2  ;;  %v14549_v23 = vld [vmem:[#allocation42_spill] sm:$0xff] }
 0x5a4   :  { %v5285_v18 = vadd.s32 %v13587_v57, %v13585_v58  ;;  %v5300_v36 = vsel %vm7743_vm9, 0, %v7742_v44  ;;  %v6223_v48 = vadd.s32 1, %v13679_v53  ;;  %v5853_v1 = vand.u32 2147483647, %v13657_v11  ;;  %v2274_v44 = vpop.f32.mrf.mxu0 }
 0x5a5   :  { %v5301_v60 = vsub.s32 32, %v5300_v36  ;;  %v5305_v33 = vsub.s32 4294967266, %v5300_v36  ;;  %v7764_v20 = vadd.s32 4294967169, %v5857_v52  ;;  %v5302_v2 = vshll.u32 %v13648_v28, %v5300_v36  ;;  %v14551_v36 = vld [vmem:[#allocation46_spill] sm:$0xff] }
 0x5a6   :  { %v8483_v12 = vpop.eup %8482  ;;  %v5318_v56 = vsel %vm13689_vm7, 0, %v5316_v22  ;;  %v6220_v26 = vmul.u32 %v6213_v59, %v6204_v37  ;;  %vm6222_vm11 = vc.u32 %v13694_v43, %v13678_v15  ;;  %v13712_v61 = vadd.f32 %v8118_v50, %v2281_v41 }
 0x5a7   :  { %v8485_v58 = vpop.eup %8484  ;;  %v5641_v57 = vxor.u32 2147483648, %v8483_v12  ;;  %v5303_v32 = vshrl.u32 %v5285_v18, %v5301_v60  ;;  %v5306_v47 = vadd.s32 127, %v5305_v33  ;;  %v6224_v21 = vsel %vm6222_vm11, %v6223_v48, %v13679_v53 }
 0x5a8   :  { %v5638_v3 = vxor.u32 2147483648, %v8485_v58  ;;  %v6225_v55 = vadd.s32 %v6224_v21, %v6220_v26  ;;  %v5863_v16 = vadd.s32 1, %v7764_v20  ;;  %vm5637_vm12 = vcmp.eq.s32.totalorder %v13650_v0, 0 }
 0x5a9   :  { %v5642_v28 = vsel %vm5640_vm10, %v5641_v57, %v8485_v58  ;;  %v5304_v30 = vor.u32 %v5303_v32, %v5302_v2  ;;  %v5307_v24 = vshll.u32 %v5306_v47, 23  ;;  %v5322_v59 = vadd.s32 3, %v5318_v56 }
 0x5aa   :  { %v5639_v40 = vsel %vm5637_vm12, %v8483_v12, %v5638_v3  ;;  %v6226_v46 = vadd.s32 536870912, %v6225_v55  ;;  %vm5864_vm13 = vcmp.gt.s32.totalorder %v5863_v16, 0  ;;  %v5860_v6 = vand.u32 8388607, %v5853_v1 }
 0x5ab   :  { %v5643_v51 = vsel %vm5636_vm6, %v5639_v40, %v5642_v28  ;;  %v5308_v25 = vor.u32 4788187, %v5307_v24  ;;  %v5865_v41 = vsel %vm5864_vm13, %v5863_v16, 0  ;;  %v13727_v31 = vadd.f32 %v12600_v9, %v13712_v61 }
 0x5ac   :  { %v5644_v62 = vsel %vm5633_vm8, nan, %v5643_v51  ;;  %v13723_v53 = vshrl.u32 %v6226_v46, 30  ;;  %v5867_v39 = vand.u32 31, %v5865_v41  ;;  %v2099_v0 = vadd.f32 %v14549_v23, %v13336_v19 }
 0x5ad   :  { %v7564_v22 = vsel %vm7534_vm5, %v13309_v54, %v5644_v62  ;;  %v5309_v37 = vand.u32 2147483647, %v5308_v25  ;;  %v5311_v52 = vcvt.s32.f32 %v5304_v30  ;;  %v13736_v18 = vadd.f32 %v14550_v42, %v13531_v17 }
 0x5ae   :  { %v13740_v48 = vadd.f32 %v14551_v36, %v13542_v4  ;;  %7613 = vst.msk [vmem:[%s14171_s4 + $0xe8] sm:$0xff] %vm7585_vm14, %v7564_v22  ;;  %v6228_v19 = vshll.u32 %v13723_v53, 30  ;;  %v5868_v60 = vsub.s32 32, %v5867_v39  ;;  %v13747_v54 = vand.u32 3, %v5322_v59 }
 0x5af   :  { %v5312_v33 = vmul.f32 %v5311_v52, %v5309_v37  ;;  %v13749_v20 = vadd.f32 %v2274_v44, %v2099_v0  ;;  %v5861_v50 = vor.u32 8388608, %v5860_v6  ;;  %v6221_v17 = vadd.s32 %v13678_v15, %v13694_v43 }
 0x5b0   :  { %v13753_v12 = vsub.s32 %v6225_v55, %v6228_v19  ;;  %v5871_v4 = vshrl.u32 %v14329_v38, %v5868_v60  ;;  %v6792_v2 = vand.u32 2139095040, %v13727_v31  ;;  %v5870_v26 = vshll.u32 %v14328_v13, %v5867_v39 }
 0x5b1   :  { %v5313_v56 = vxor.u32 2147483648, %v5312_v33  ;;  %v5874_v58 = vshrl.u32 %v14330_v27, %v5868_v60  ;;  %v5877_v57 = vshrl.u32 %v14331_v34, %v5868_v60  ;;  %v5873_v47 = vshll.u32 %v14329_v38, %v5867_v39 }
 0x5b2   :  { %v6231_v32 = vsub.s32 0, %v13753_v12  ;;  %v5876_v21 = vshll.u32 %v14330_v27, %v5867_v39  ;;  %v5880_v15 = vshrl.u32 %v14332_v8, %v5868_v60  ;;  %v5866_v3 = vshrl.u32 %v5865_v41, 5 }
 0x5b3   :  { %v5314_v43 = vsel %vm5231_vm4, %v5313_v56, %v5312_v33  ;;  %v5872_v55 = vor.u32 %v5871_v4, %v5870_v26  ;;  %v5879_v16 = vshll.u32 %v14331_v34, %v5867_v39  ;;  %v5875_v24 = vor.u32 %v5874_v58, %v5873_v47 }
 0x5b4   :  { %v5317_v28 = vsel %vm13689_vm7, %v13457_v45, %v5314_v43  ;;  %v7777_v30 = vmin.u32 %v6231_v32, %v13753_v12  ;;  %v5878_v40 = vor.u32 %v5877_v57, %v5876_v21  ;;  %v5882_v46 = vshll.u32 %v14332_v8, %v5867_v39 }
 0x5b5   :  { %8486 = vcosq.f32 %v5317_v28  ;;  %v5881_v59 = vor.u32 %v5880_v15, %v5879_v16  ;;  %v5883_v51 = vshrl.u32 %v14333_v7, %v5868_v60  ;;  %vm6167_vm15 = vcmp.lt.s32.totalorder %v13527_v14, 0 }
 0x5b6   :  { %8488 = vsinq.f32 %v5317_v28  ;;  %v6233_v25 = vclz %v7777_v30  ;;  %v5901_v6 = vshll.u32 %v5861_v50, 8  ;;  %v6793_v41 = vshrl.u32 %v6792_v2, 23 }
 0x5b7   :  { %v6251_v62 = vsub.s32 4, %v13723_v53  ;;  %v5869_v10 = vshrl.u32 %v14328_v13, %v5868_v60  ;;  %v5884_v44 = vor.u32 %v5883_v51, %v5882_v46  ;;  %vm5885_vm0 = vcmp.lt.s32.totalorder %v5866_v3, 1 }
 0x5b8   :  { %v7778_v23 = vadd.s32 4294967294, %v6233_v25  ;;  %vm5887_vm1 = vcmp.lt.s32.totalorder %v5866_v3, 3  ;;  %vm5888_vm2 = vcmp.lt.s32.totalorder %v5866_v3, 4  ;;  %v5893_v0 = vsel %vm5885_vm0, %v5872_v55, %v5875_v24  ;;  %v2438_v25 = vpop.f32.mrf.mxu1 }
 0x5b9   :  { %v5890_v22 = vsel %vm5888_vm2, %v5878_v40, 2102212464  ;;  %v5894_v39 = vsel %vm5888_vm2, %v5881_v59, 920167782  ;;  %v5897_v37 = vsel %vm5885_vm0, %v5875_v24, %v5878_v40  ;;  %v5898_v52 = vsel %vm5888_vm2, %v5884_v44, 1326507024 }
 0x5ba   :  { %vm7779_vm3 = vcmp.lt.s32.totalorder %v7778_v23, 0  ;;  %vm5886_vm4 = vcmp.lt.s32.totalorder %v5866_v3, 2  ;;  %v5895_v42 = vsel %vm5887_vm1, %v5878_v40, %v5894_v39  ;;  %v5899_v36 = vsel %vm5887_vm1, %v5881_v59, %v5898_v52 }
 0x5bb   :  { %v6236_v19 = vsel %vm7779_vm3, 0, %v7778_v23  ;;  %v5889_v33 = vsel %vm5885_vm0, %v5869_v10, %v5872_v55  ;;  %v5896_v60 = vsel %vm5886_vm4, %v5893_v0, %v5895_v42  ;;  %v5900_v50 = vsel %vm5886_vm4, %v5897_v37, %v5899_v36 }
 0x5bc   :  { %v6237_v4 = vsub.s32 32, %v6236_v19  ;;  %v6241_v2 = vsub.s32 4294967266, %v6236_v19  ;;  %v5891_v56 = vsel %vm5887_vm1, %v5875_v24, %v5890_v22  ;;  %v7800_v26 = vadd.s32 4294967169, %v6793_v41 }
 0x5bd   :  { %v13781_v58 = vmul.u32.u64.low %v5901_v6, %v5900_v50  ;;  %v13782_v57 = vmul.u32.u64.high %v5901_v6, %v5900_v50, %v13781_v58  ;;  %v13784_v32 = vmul.u32.u64.low %v5901_v6, %v5896_v60  ;;  %v13785_v47 = vmul.u32.u64.high %v5901_v6, %v5896_v60, %v13784_v32 }
 0x5be   :  { %v6238_v21 = vshll.u32 %v13753_v12, %v6236_v19  ;;  %v6239_v15 = vshrl.u32 %v6221_v17, %v6237_v4  ;;  %v6242_v43 = vadd.s32 127, %v6241_v2  ;;  %v6799_v55 = vadd.s32 1, %v7800_v26 }
 0x5bf   :  { %vm5321_vm6 = vweird.f32 %v13457_v45  ;;  %vm5324_vm7 = vcmp.lt.s32.totalorder %v13747_v54, 2  ;;  %vm13793_vm8 = vcmp.le.f32.partialorder %v6165_v35, 0.7853982  ;;  %v6252_v28 = vsel %vm6167_vm15, %v6251_v62, %v13723_v53 }
 0x5c0   :  { %v5892_v30 = vsel %vm5886_vm4, %v5889_v33, %v5891_v56  ;;  %vm5325_vm9 = vcmp.eq.s32.totalorder %v13747_v54, 0  ;;  %v6240_v17 = vor.u32 %v6239_v15, %v6238_v21  ;;  %v6243_v12 = vshll.u32 %v6242_v43, 23 }
 0x5c1   :  { %vm6800_vm10 = vcmp.gt.s32.totalorder %v6799_v55, 0  ;;  %vm5910_vm11 = vc.u32 %v13782_v57, %v13784_v32  ;;  %v5911_v24 = vadd.s32 1, %v13785_v47  ;;  %v6789_v35 = vand.u32 2147483647, %v13727_v31 }
 0x5c2   :  { %v6801_v40 = vsel %vm6800_vm10, %v6799_v55, 0  ;;  %v8487_v59 = vpop.eup %8486  ;;  %v6244_v46 = vor.u32 4788187, %v6243_v12  ;;  %v6254_v53 = vsel %vm13793_vm8, 0, %v6252_v28  ;;  %v5908_v3 = vmul.u32 %v5901_v6, %v5892_v30 }
 0x5c3   :  { %v6803_v51 = vand.u32 31, %v6801_v40  ;;  %v8489_v41 = vpop.eup %8488  ;;  %vm5328_vm12 = vcmp.eq.s32.totalorder %v13747_v54, 2  ;;  %v5329_v62 = vxor.u32 2147483648, %v8487_v59  ;;  %v6247_v10 = vcvt.s32.f32 %v6240_v17 }
 0x5c4   :  { %v5912_v44 = vsel %vm5910_vm11, %v5911_v24, %v13785_v47  ;;  %v5326_v23 = vxor.u32 2147483648, %v8489_v41  ;;  %v6245_v0 = vand.u32 2147483647, %v6244_v46  ;;  %v6258_v52 = vadd.s32 3, %v6254_v53 }
 0x5c5   :  { %v5913_v22 = vadd.s32 %v5912_v44, %v5908_v3  ;;  %v6804_v39 = vsub.s32 32, %v6803_v51  ;;  %v5330_v37 = vsel %vm5328_vm12, %v5329_v62, %v8489_v41  ;;  %v6796_v42 = vand.u32 8388607, %v6789_v35 }
 0x5c6   :  { %v13813_v6 = vadd.f32 %v2438_v25, %v13749_v20  ;;  %v5327_v36 = vsel %vm5325_vm9, %v8487_v59, %v5326_v23  ;;  %v6248_v19 = vmul.f32 %v6247_v10, %v6245_v0  ;;  %v13817_v60 = vshrl.u32 %v6801_v40, 5 }
 0x5c7   :  { %v5914_v33 = vadd.s32 536870912, %v5913_v22  ;;  %v5331_v50 = vsel %vm5324_vm7, %v5327_v36, %v5330_v37  ;;  %v6806_v4 = vshll.u32 %v14328_v13, %v6803_v51  ;;  %v6807_v2 = vshrl.u32 %v14329_v38, %v6804_v39 }
 0x5c8   :  { %v6810_v56 = vshrl.u32 %v14330_v27, %v6804_v39  ;;  %v5332_v20 = vsel %vm5321_vm6, nan, %v5331_v50  ;;  %v6249_v26 = vxor.u32 2147483648, %v6248_v19  ;;  %v6813_v47 = vshrl.u32 %v14331_v34, %v6804_v39 }
 0x5c9   :  { %v5915_v58 = vshrl.u32 %v5914_v33, 30  ;;  %v7561_v21 = vsel %vm7534_vm5, %v13416_v63, %v5332_v20  ;;  %v6809_v54 = vshll.u32 %v14329_v38, %v6803_v51  ;;  %v6812_v15 = vshll.u32 %v14330_v27, %v6803_v51 }
 0x5ca   :  { %v6815_v43 = vshll.u32 %v14331_v34, %v6803_v51  ;;  %7610 = vst.msk [vmem:[%s14171_s4 + $0xd0] sm:$0xff] %vm7585_vm14, %v7561_v21  ;;  %v6250_v45 = vsel %vm6167_vm15, %v6249_v26, %v6248_v19  ;;  %v6808_v28 = vor.u32 %v6807_v2, %v6806_v4  ;;  %v6816_v30 = vshrl.u32 %v14332_v8, %v6804_v39 }
 0x5cb   :  { %v5916_v55 = vshll.u32 %v5915_v58, 30  ;;  %v6253_v63 = vsel %vm13793_vm8, %v13527_v14, %v6250_v45  ;;  %v6811_v17 = vor.u32 %v6810_v56, %v6809_v54  ;;  %v6818_v12 = vshll.u32 %v14332_v8, %v6803_v51  ;;  %v8091_v51 = vpop.f32.mrf.mxu0 }
 0x5cc   :  { %v6819_v24 = vshrl.u32 %v14333_v7, %v6804_v39  ;;  %8490 = vcosq.f32 %v6253_v63  ;;  %v6814_v59 = vor.u32 %v6813_v47, %v6812_v15  ;;  %v6817_v46 = vor.u32 %v6816_v30, %v6815_v43 }
 0x5cd   :  { %v13845_v40 = vsub.s32 %v5913_v22, %v5916_v55  ;;  %8492 = vsinq.f32 %v6253_v63  ;;  %v13847_v53 = vand.u32 3, %v6258_v52  ;;  %v6797_v3 = vor.u32 8388608, %v6796_v42 }
 0x5ce   :  { %v6820_v25 = vor.u32 %v6819_v24, %v6818_v12  ;;  %vm6821_vm13 = vcmp.lt.s32.totalorder %v13817_v60, 1  ;;  %vm6824_vm15 = vcmp.lt.s32.totalorder %v13817_v60, 4  ;;  %v13854_v16 = vadd.f32 %v12600_v9, %v13813_v6 }
 0x5cf   :  { %v5919_v41 = vsub.s32 0, %v13845_v40  ;;  %v6805_v62 = vshrl.u32 %v14328_v13, %v6804_v39  ;;  %vm6823_vm0 = vcmp.lt.s32.totalorder %v13817_v60, 3  ;;  %v6829_v10 = vsel %vm6821_vm13, %v6808_v28, %v6811_v17 }
 0x5d0   :  { %v6830_v44 = vsel %vm6824_vm15, %v6817_v46, 920167782  ;;  %vm6822_vm1 = vcmp.lt.s32.totalorder %v13817_v60, 2  ;;  %v6826_v0 = vsel %vm6824_vm15, %v6814_v59, 2102212464  ;;  %v6833_v39 = vsel %vm6821_vm13, %v6811_v17, %v6814_v59 }
 0x5d1   :  { %v7765_v23 = vmin.u32 %v5919_v41, %v13845_v40  ;;  %v6831_v22 = vsel %vm6823_vm0, %v6814_v59, %v6830_v44  ;;  %v6834_v52 = vsel %vm6824_vm15, %v6820_v25, 1326507024  ;;  %v6837_v42 = vshll.u32 %v6797_v3, 8  ;;  %v8121_v59 = vpop.f32.mrf.mxu1 }
 0x5d2   :  { %v6832_v37 = vsel %vm6822_vm1, %v6829_v10, %v6831_v22  ;;  %v5939_v19 = vsub.s32 4, %v5915_v58  ;;  %v2293_v33 = vadd.f32 %v8091_v51, %v13736_v18  ;;  %v6825_v50 = vsel %vm6821_vm13, %v6805_v62, %v6808_v28 }
 0x5d3   :  { %v5921_v36 = vclz %v7765_v23  ;;  %v6827_v4 = vsel %vm6823_vm0, %v6811_v17, %v6826_v0  ;;  %v6835_v2 = vsel %vm6823_vm0, %v6817_v46, %v6834_v52  ;;  %vm5855_vm2 = vcmp.lt.s32.totalorder %v13657_v11, 0 }
 0x5d4   :  { %v13875_v56 = vmul.u32.u64.low %v6837_v42, %v6832_v37  ;;  %v13876_v20 = vmul.u32.u64.high %v6837_v42, %v6832_v37, %v13875_v56  ;;  %v6836_v47 = vsel %vm6822_vm1, %v6833_v39, %v6835_v2  ;;  %v6480_v18 = vand.u32 2139095040, %v13854_v16 }
 0x5d5   :  { %v7766_v26 = vadd.s32 4294967294, %v5921_v36  ;;  %vm6260_vm3 = vcmp.lt.s32.totalorder %v13847_v53, 2  ;;  %vm13886_vm4 = vcmp.le.f32.partialorder %v5853_v1, 0.7853982  ;;  %vm6257_vm6 = vweird.f32 %v13527_v14 }
 0x5d6   :  { %v13890_v54 = vmul.u32.u64.low %v6837_v42, %v6836_v47  ;;  %v13891_v15 = vmul.u32.u64.high %v6837_v42, %v6836_v47, %v13890_v54  ;;  %v5940_v43 = vsel %vm5855_vm2, %v5939_v19, %v5915_v58  ;;  %v6828_v45 = vsel %vm6822_vm1, %v6825_v50, %v6827_v4  ;;  %v2450_v47 = vpop.f32.mrf.mxu1 }
 0x5d7   :  { %vm7767_vm7 = vcmp.lt.s32.totalorder %v7766_v26, 0  ;;  %v6481_v55 = vshrl.u32 %v6480_v18, 23  ;;  %vm6264_vm8 = vcmp.eq.s32.totalorder %v13847_v53, 2  ;;  %v5909_v1 = vadd.s32 %v13784_v32, %v13782_v57 }
 0x5d8   :  { %v5924_v28 = vsel %vm7767_vm7, 0, %v7766_v26  ;;  %v6847_v30 = vadd.s32 1, %v13876_v20  ;;  %v6477_v12 = vand.u32 2147483647, %v13854_v16  ;;  %v5942_v60 = vsel %vm13886_vm4, 0, %v5940_v43 }
 0x5d9   :  { %v5925_v63 = vsub.s32 32, %v5924_v28  ;;  %v5929_v17 = vsub.s32 4294967266, %v5924_v28  ;;  %v7788_v24 = vadd.s32 4294967169, %v6481_v55  ;;  %v8491_v46 = vpop.eup %8490  ;;  %v5926_v58 = vshll.u32 %v13845_v40, %v5924_v28 }
 0x5da   :  { %v6844_v3 = vmul.u32 %v6837_v42, %v6828_v45  ;;  %vm6846_vm9 = vc.u32 %v13891_v15, %v13875_v56  ;;  %v8493_v57 = vpop.eup %8492  ;;  %v6265_v32 = vxor.u32 2147483648, %v8491_v46  ;;  %v13909_v23 = vadd.f32 %v8121_v59, %v2293_v33  ;;  %v2286_v42 = vpop.f32.mrf.mxu0 }
 0x5db   :  { %v5927_v25 = vshrl.u32 %v5909_v1, %v5925_v63  ;;  %v5930_v41 = vadd.s32 127, %v5929_v17  ;;  %v6848_v51 = vsel %vm6846_vm9, %v6847_v30, %v13876_v20  ;;  %v6262_v62 = vxor.u32 2147483648, %v8493_v57 }
 0x5dc   :  { %v6849_v10 = vadd.s32 %v6848_v51, %v6844_v3  ;;  %v6487_v44 = vadd.s32 1, %v7788_v24  ;;  %vm6261_vm10 = vcmp.eq.s32.totalorder %v13847_v53, 0  ;;  %v6266_v40 = vsel %vm6264_vm8, %v6265_v32, %v8493_v57 }
 0x5dd   :  { %v5928_v0 = vor.u32 %v5927_v25, %v5926_v58  ;;  %v5931_v22 = vshll.u32 %v5930_v41, 23  ;;  %v6263_v37 = vsel %vm6261_vm10, %v8491_v46, %v6262_v62  ;;  %v5946_v39 = vadd.s32 3, %v5942_v60 }
 0x5de   :  { %v6850_v52 = vadd.s32 536870912, %v6849_v10  ;;  %vm6488_vm11 = vcmp.gt.s32.totalorder %v6487_v44, 0  ;;  %v6267_v36 = vsel %vm6260_vm3, %v6263_v37, %v6266_v40  ;;  %v6484_v33 = vand.u32 8388607, %v6477_v12 }
 0x5df   :  { %v5932_v19 = vor.u32 4788187, %v5931_v22  ;;  %v6489_v50 = vsel %vm6488_vm11, %v6487_v44, 0  ;;  %v6268_v4 = vsel %vm6257_vm6, nan, %v6267_v36  ;;  %v13924_v26 = vadd.f32 %v12600_v9, %v13909_v23 }
 0x5e0   :  { %v13920_v2 = vshrl.u32 %v6850_v52, 30  ;;  %v6491_v20 = vand.u32 31, %v6489_v50  ;;  %v7570_v53 = vsel %vm7534_vm5, %v13512_v29, %v6268_v4  ;;  %v5935_v54 = vcvt.s32.f32 %v5928_v0 }
 0x5e1   :  { %v5933_v18 = vand.u32 2147483647, %v5932_v19  ;;  %v2287_v43 = vadd.f32 %v2286_v42, %v13740_v48  ;;  %7619 = vst.msk [vmem:[%s14171_s4 + $0x118] sm:$0xff] %vm7585_vm14, %v7570_v53  ;;  %v13935_v1 = vand.u32 3, %v5946_v39  ;;  %v6485_v28 = vor.u32 8388608, %v6484_v33 }
 0x5e2   :  { %v6852_v14 = vshll.u32 %v13920_v2, 30  ;;  %v6492_v45 = vsub.s32 32, %v6491_v20  ;;  %v6845_v29 = vadd.s32 %v13875_v56, %v13891_v15  ;;  %v7416_v17 = vand.u32 2139095040, %v13924_v26 }
 0x5e3   :  { %v5936_v55 = vmul.f32 %v5935_v54, %v5933_v18  ;;  %v13937_v30 = vadd.f32 %v2450_v47, %v2287_v43  ;;  %v6494_v59 = vshll.u32 %v14328_v13, %v6491_v20  ;;  %v6497_v3 = vshll.u32 %v14329_v38, %v6491_v20 }
 0x5e4   :  { %v13941_v63 = vsub.s32 %v6849_v10, %v6852_v14  ;;  %v6495_v48 = vshrl.u32 %v14329_v38, %v6492_v45  ;;  %v6498_v46 = vshrl.u32 %v14330_v27, %v6492_v45  ;;  %v6501_v58 = vshrl.u32 %v14331_v34, %v6492_v45 }
 0x5e5   :  { %v5937_v24 = vxor.u32 2147483648, %v5936_v55  ;;  %v6500_v57 = vshll.u32 %v14330_v27, %v6491_v20  ;;  %v6504_v56 = vshrl.u32 %v14332_v8, %v6492_v45  ;;  %v6490_v32 = vshrl.u32 %v6489_v50, 5 }
 0x5e6   :  { %v6855_v60 = vsub.s32 0, %v13941_v63  ;;  %v6496_v25 = vor.u32 %v6495_v48, %v6494_v59  ;;  %v6503_v41 = vshll.u32 %v14331_v34, %v6491_v20  ;;  %v6499_v10 = vor.u32 %v6498_v46, %v6497_v3 }
 0x5e7   :  { %v5938_v15 = vsel %vm5855_vm2, %v5937_v24, %v5936_v55  ;;  %v6502_v44 = vor.u32 %v6501_v58, %v6500_v57  ;;  %v6506_v0 = vshll.u32 %v14332_v8, %v6491_v20  ;;  %v6507_v22 = vshrl.u32 %v14333_v7, %v6492_v45 }
 0x5e8   :  { %v5941_v51 = vsel %vm13886_vm4, %v13657_v11, %v5938_v15  ;;  %v7801_v62 = vmin.u32 %v6855_v60, %v13941_v63  ;;  %v6505_v40 = vor.u32 %v6504_v56, %v6503_v41  ;;  %v6525_v39 = vshll.u32 %v6485_v28, 8 }
 0x5e9   :  { %8494 = vcosq.f32 %v5941_v51  ;;  %v7417_v52 = vshrl.u32 %v7416_v17, 23  ;;  %v6875_v42 = vsub.s32 4, %v13920_v2  ;;  %v6493_v36 = vshrl.u32 %v14328_v13, %v6492_v45 }
 0x5ea   :  { %8496 = vsinq.f32 %v5941_v51  ;;  %v6857_v37 = vclz %v7801_v62  ;;  %v6508_v21 = vor.u32 %v6507_v22, %v6506_v0  ;;  %vm6509_vm12 = vcmp.lt.s32.totalorder %v6490_v32, 1 }
 0x5eb   :  { %vm6511_vm13 = vcmp.lt.s32.totalorder %v6490_v32, 3  ;;  %vm6512_vm15 = vcmp.lt.s32.totalorder %v6490_v32, 4  ;;  %v6517_v33 = vsel %vm6509_vm12, %v6496_v25, %v6499_v10  ;;  %v6521_v47 = vsel %vm6509_vm12, %v6499_v10, %v6502_v44 }
 0x5ec   :  { %v7802_v19 = vadd.s32 4294967294, %v6857_v37  ;;  %v6514_v50 = vsel %vm6512_vm15, %v6502_v44, 2102212464  ;;  %v6518_v4 = vsel %vm6512_vm15, %v6505_v40, 920167782  ;;  %vm6510_vm1 = vcmp.lt.s32.totalorder %v6490_v32, 2 }
 0x5ed   :  { %v6522_v20 = vsel %vm6512_vm15, %v6508_v21, 1326507024  ;;  %v6519_v53 = vsel %vm6511_vm13, %v6502_v44, %v6518_v4  ;;  %v6513_v43 = vsel %vm6509_vm12, %v6493_v36, %v6496_v25  ;;  %vm13969_vm2 = vcmp.le.f32.partialorder %v6789_v35, 0.7853982 }
 0x5ee   :  { %vm7803_vm0 = vcmp.lt.s32.totalorder %v7802_v19, 0  ;;  %v6523_v18 = vsel %vm6511_vm13, %v6505_v40, %v6522_v20  ;;  %v6520_v14 = vsel %vm6510_vm1, %v6517_v33, %v6519_v53  ;;  %v6515_v17 = vsel %vm6511_vm13, %v6499_v10, %v6514_v50 }
 0x5ef   :  { %v6860_v54 = vsel %vm7803_vm0, 0, %v7802_v19  ;;  %v6524_v45 = vsel %vm6510_vm1, %v6521_v47, %v6523_v18  ;;  %v7824_v24 = vadd.s32 4294967169, %v7417_v52  ;;  %vm5945_vm3 = vweird.f32 %v13657_v11 }
 0x5f0   :  { %v6861_v28 = vsub.s32 32, %v6860_v54  ;;  %v6865_v48 = vsub.s32 4294967266, %v6860_v54  ;;  %v13974_v59 = vmul.u32.u64.low %v6525_v39, %v6524_v45  ;;  %v13975_v46 = vmul.u32.u64.high %v6525_v39, %v6524_v45, %v13974_v59 }
 0x5f1   :  { %v13977_v58 = vmul.u32.u64.low %v6525_v39, %v6520_v14  ;;  %v13978_v60 = vmul.u32.u64.high %v6525_v39, %v6520_v14, %v13977_v58  ;;  %v6862_v3 = vshll.u32 %v13941_v63, %v6860_v54  ;;  %v7423_v35 = vadd.s32 1, %v7824_v24 }
 0x5f2   :  { %v6863_v57 = vshrl.u32 %v6845_v29, %v6861_v28  ;;  %v6866_v56 = vadd.s32 127, %v6865_v48  ;;  %vm5948_vm4 = vcmp.lt.s32.totalorder %v13935_v1, 2  ;;  %vm5949_vm6 = vcmp.eq.s32.totalorder %v13935_v1, 0 }
 0x5f3   :  { %vm6791_vm7 = vcmp.lt.s32.totalorder %v13727_v31, 0  ;;  %v6516_v15 = vsel %vm6510_vm1, %v6513_v43, %v6515_v17  ;;  %vm7424_vm8 = vcmp.gt.s32.totalorder %v7423_v35, 0  ;;  %v13989_v51 = vadd.f32 %v12600_v9, %v13937_v30 }
 0x5f4   :  { %v6864_v25 = vor.u32 %v6863_v57, %v6862_v3  ;;  %v6867_v41 = vshll.u32 %v6866_v56, 23  ;;  %vm6534_vm9 = vc.u32 %v13975_v46, %v13977_v58  ;;  %v6535_v29 = vadd.s32 1, %v13978_v60 }
 0x5f5   :  { %v7413_v63 = vand.u32 2147483647, %v13924_v26  ;;  %v7425_v62 = vsel %vm7424_vm8, %v7423_v35, 0  ;;  %v6876_v32 = vsel %vm6791_vm7, %v6875_v42, %v13920_v2  ;;  %v6532_v40 = vmul.u32 %v6525_v39, %v6516_v15 }
 0x5f6   :  { %v8495_v10 = vpop.eup %8494  ;;  %v6868_v44 = vor.u32 4788187, %v6867_v41  ;;  %v7427_v0 = vand.u32 31, %v7425_v62  ;;  %vm5952_vm10 = vcmp.eq.s32.totalorder %v13935_v1, 2  ;;  %v6871_v37 = vcvt.s32.f32 %v6864_v25 }
 0x5f7   :  { %v8497_v22 = vpop.eup %8496  ;;  %v5953_v9 = vxor.u32 2147483648, %v8495_v10  ;;  %v6536_v52 = vsel %vm6534_vm9, %v6535_v29, %v13978_v60  ;;  %v6878_v4 = vsel %vm13969_vm2, 0, %v6876_v32  ;;  %v7420_v2 = vand.u32 8388607, %v7413_v63 }
 0x5f8   :  { %v5950_v36 = vxor.u32 2147483648, %v8497_v22  ;;  %v6869_v21 = vand.u32 2147483647, %v6868_v44  ;;  %v6537_v19 = vadd.s32 %v6536_v52, %v6532_v40  ;;  %v7428_v33 = vsub.s32 32, %v7427_v0 }
 0x5f9   :  { %v5954_v50 = vsel %vm5952_vm10, %v5953_v9, %v8497_v22  ;;  %v7104_v39 = vand.u32 2139095040, %v13989_v51  ;;  %v7426_v53 = vshrl.u32 %v7425_v62, 5  ;;  %v7430_v54 = vshll.u32 %v14328_v13, %v7427_v0 }
 0x5fa   :  { %v5951_v42 = vsel %vm5949_vm6, %v8495_v10, %v5950_v36  ;;  %v6872_v47 = vmul.f32 %v6871_v37, %v6869_v21  ;;  %v6538_v20 = vadd.s32 536870912, %v6537_v19  ;;  %v7431_v43 = vshrl.u32 %v14329_v38, %v7428_v33 }
 0x5fb   :  { %v5955_v18 = vsel %vm5948_vm4, %v5951_v42, %v5954_v50  ;;  %v7434_v14 = vshrl.u32 %v14330_v27, %v7428_v33  ;;  %v7437_v17 = vshrl.u32 %v14331_v34, %v7428_v33  ;;  %v7433_v1 = vshll.u32 %v14329_v38, %v7427_v0 }
 0x5fc   :  { %v5956_v45 = vsel %vm5945_vm3, nan, %v5955_v18  ;;  %v6873_v28 = vxor.u32 2147483648, %v6872_v47  ;;  %v14014_v48 = vshrl.u32 %v6538_v20, 30  ;;  %v7436_v59 = vshll.u32 %v14330_v27, %v7427_v0 }
 0x5fd   :  { %v7567_v24 = vsel %vm7534_vm5, %v13616_v5, %v5956_v45  ;;  %v7439_v60 = vshll.u32 %v14331_v34, %v7427_v0  ;;  %v7432_v57 = vor.u32 %v7431_v43, %v7430_v54  ;;  %v7440_v56 = vshrl.u32 %v14332_v8, %v7428_v33 }
 0x5fe   :  { %7616 = vst.msk [vmem:[%s14171_s4 + $0x100] sm:$0xff] %vm7585_vm14, %v7567_v24  ;;  %v6874_v11 = vsel %vm6791_vm7, %v6873_v28, %v6872_v47  ;;  %v6540_v3 = vshll.u32 %v14014_v48, 30  ;;  %v7435_v35 = vor.u32 %v7434_v14, %v7433_v1  ;;  %v7442_v15 = vshll.u32 %v14332_v8, %v7427_v0 }
 0x5ff   :  { %v6877_v5 = vsel %vm13969_vm2, %v13727_v31, %v6874_v11  ;;  %v7443_v25 = vshrl.u32 %v14333_v7, %v7428_v33  ;;  %v7438_v29 = vor.u32 %v7437_v17, %v7436_v59  ;;  %v7441_v62 = vor.u32 %v7440_v56, %v7439_v60 }
 0x600   :  { %8498 = vcosq.f32 %v6877_v5  ;;  %v14036_v41 = vsub.s32 %v6537_v19, %v6540_v3  ;;  %v6882_v10 = vadd.s32 3, %v6878_v4  ;;  %v7421_v44 = vor.u32 8388608, %v7420_v2 }
 0x601   :  { %8500 = vsinq.f32 %v6877_v5  ;;  %v7444_v32 = vor.u32 %v7443_v25, %v7442_v15  ;;  %vm7445_vm11 = vcmp.lt.s32.totalorder %v7426_v53, 1  ;;  %vm7448_vm12 = vcmp.lt.s32.totalorder %v7426_v53, 4 }
 0x602   :  { %v6543_v40 = vsub.s32 0, %v14036_v41  ;;  %v7105_v55 = vshrl.u32 %v7104_v39, 23  ;;  %v7429_v22 = vshrl.u32 %v14328_v13, %v7428_v33  ;;  %vm7447_vm13 = vcmp.lt.s32.totalorder %v7426_v53, 3 }
 0x603   :  { %v7453_v0 = vsel %vm7445_vm11, %v7432_v57, %v7435_v35  ;;  %v7454_v9 = vsel %vm7448_vm12, %v7441_v62, 920167782  ;;  %vm7446_vm15 = vcmp.lt.s32.totalorder %v7426_v53, 2  ;;  %v7450_v52 = vsel %vm7448_vm12, %v7438_v29, 2102212464 }
 0x604   :  { %v7789_v37 = vmin.u32 %v6543_v40, %v14036_v41  ;;  %v7455_v36 = vsel %vm7447_vm13, %v7438_v29, %v7454_v9  ;;  %v7457_v19 = vsel %vm7445_vm11, %v7435_v35, %v7438_v29  ;;  %v7458_v50 = vsel %vm7448_vm12, %v7444_v32, 1326507024 }
 0x605   :  { %v7456_v21 = vsel %vm7446_vm15, %v7453_v0, %v7455_v36  ;;  %v7461_v4 = vshll.u32 %v7421_v44, 8  ;;  %v6883_v2 = vand.u32 3, %v6882_v10  ;;  %v7449_v39 = vsel %vm7445_vm11, %v7429_v22, %v7432_v57 }
 0x606   :  { %v6545_v42 = vclz %v7789_v37  ;;  %v7451_v33 = vsel %vm7447_vm13, %v7435_v35, %v7450_v52  ;;  %v7459_v47 = vsel %vm7447_vm13, %v7441_v62, %v7458_v50  ;;  %v7812_v14 = vadd.s32 4294967169, %v7105_v55 }
 0x607   :  { %v14045_v20 = vmul.u32.u64.low %v7461_v4, %v7456_v21  ;;  %v14046_v18 = vmul.u32.u64.high %v7461_v4, %v7456_v21, %v14045_v20  ;;  %v7460_v43 = vsel %vm7446_vm15, %v7457_v19, %v7459_v47  ;;  %v7452_v17 = vsel %vm7446_vm15, %v7449_v39, %v7451_v33 }
 0x608   :  { %v7790_v54 = vadd.s32 4294967294, %v6545_v42  ;;  %v14050_v45 = vmul.u32.u64.low %v7461_v4, %v7460_v43  ;;  %v14051_v28 = vmul.u32.u64.high %v7461_v4, %v7460_v43, %v14050_v45  ;;  %v7111_v24 = vadd.s32 1, %v7812_v14 }
 0x609   :  { %vm6881_vm1 = vweird.f32 %v13727_v31  ;;  %vm6888_vm2 = vcmp.eq.s32.totalorder %v6883_v2, 2  ;;  %v7471_v59 = vadd.s32 1, %v14046_v18  ;;  %v6533_v60 = vadd.s32 %v13977_v58, %v13975_v46 }
 0x60a   :  { %vm7791_vm0 = vcmp.lt.s32.totalorder %v7790_v54, 0  ;;  %vm7112_vm3 = vcmp.gt.s32.totalorder %v7111_v24, 0  ;;  %v7468_v5 = vmul.u32 %v7461_v4, %v7452_v17  ;;  %vm7470_vm4 = vc.u32 %v14051_v28, %v14045_v20 }
 0x60b   :  { %v6548_v1 = vsel %vm7791_vm0, 0, %v7790_v54  ;;  %v7113_v53 = vsel %vm7112_vm3, %v7111_v24, 0  ;;  %v7472_v62 = vsel %vm7470_vm4, %v7471_v59, %v14046_v18  ;;  %v7101_v46 = vand.u32 2147483647, %v13989_v51 }
 0x60c   :  { %v6549_v11 = vsub.s32 32, %v6548_v1  ;;  %v6553_v3 = vsub.s32 4294967266, %v6548_v1  ;;  %v6550_v56 = vshll.u32 %v14036_v41, %v6548_v1  ;;  %v7473_v44 = vadd.s32 %v7472_v62, %v7468_v5 }
 0x60d   :  { %v8499_v57 = vpop.eup %8498  ;;  %v7115_v58 = vand.u32 31, %v7113_v53  ;;  %vm6885_vm6 = vcmp.eq.s32.totalorder %v6883_v2, 0  ;;  %vm6884_vm7 = vcmp.lt.s32.totalorder %v6883_v2, 2  ;;  %vm6479_vm8 = vcmp.lt.s32.totalorder %v13854_v16, 0 }
 0x60e   :  { %v8501_v35 = vpop.eup %8500  ;;  %v6889_v15 = vxor.u32 2147483648, %v8499_v57  ;;  %v6551_v25 = vshrl.u32 %v6533_v60, %v6549_v11  ;;  %v6554_v29 = vadd.s32 127, %v6553_v3  ;;  %v7474_v22 = vadd.s32 536870912, %v7473_v44 }
 0x60f   :  { %v6886_v10 = vxor.u32 2147483648, %v8501_v35  ;;  %v7116_v0 = vsub.s32 32, %v7115_v58  ;;  %v6563_v52 = vsub.s32 4, %v14014_v48  ;;  %v7108_v19 = vand.u32 8388607, %v7101_v46 }
 0x610   :  { %v6890_v32 = vsel %vm6888_vm2, %v6889_v15, %v8501_v35  ;;  %v6552_v41 = vor.u32 %v6551_v25, %v6550_v56  ;;  %v6555_v40 = vshll.u32 %v6554_v29, 23  ;;  %v14068_v21 = vshrl.u32 %v7474_v22, 30 }
 0x611   :  { %v6887_v55 = vsel %vm6885_vm6, %v8499_v57, %v6886_v10  ;;  %v7119_v50 = vshrl.u32 %v14329_v38, %v7116_v0  ;;  %v7122_v39 = vshrl.u32 %v14330_v27, %v7116_v0  ;;  %v7114_v33 = vshrl.u32 %v7113_v53, 5 }
 0x612   :  { %v6891_v9 = vsel %vm6884_vm7, %v6887_v55, %v6890_v32  ;;  %v6556_v37 = vor.u32 4788187, %v6555_v40  ;;  %v6559_v42 = vcvt.s32.f32 %v6552_v41  ;;  %v7476_v31 = vshll.u32 %v14068_v21, 30 }
 0x613   :  { %v6892_v36 = vsel %vm6881_vm1, nan, %v6891_v9  ;;  %v7118_v47 = vshll.u32 %v14328_v13, %v7115_v58  ;;  %v7125_v18 = vshrl.u32 %v14331_v34, %v7116_v0  ;;  %v7121_v43 = vshll.u32 %v14329_v38, %v7115_v58 }
 0x614   :  { %v7576_v4 = vsel %vm7534_vm5, %v13712_v61, %v6892_v36  ;;  %v6557_v2 = vand.u32 2147483647, %v6556_v37  ;;  %v7127_v61 = vshll.u32 %v14331_v34, %v7115_v58  ;;  %v7128_v14 = vshrl.u32 %v14332_v8, %v7116_v0 }
 0x615   :  { %7625 = vst.msk [vmem:[%s14171_s4 + $0x148] sm:$0xff] %vm7585_vm14, %v7576_v4  ;;  %v6564_v45 = vsel %vm6479_vm8, %v6563_v52, %v14014_v48  ;;  %v7477_v17 = vsub.s32 %v7473_v44, %v7476_v31  ;;  %v7120_v24 = vor.u32 %v7119_v50, %v7118_v47  ;;  %v7124_v1 = vshll.u32 %v14330_v27, %v7115_v58 }
 0x616   :  { %v6560_v54 = vmul.f32 %v6559_v42, %v6557_v2  ;;  %v7123_v60 = vor.u32 %v7122_v39, %v7121_v43  ;;  %v7129_v11 = vor.u32 %v7128_v14, %v7127_v61  ;;  %v7131_v3 = vshrl.u32 %v14333_v7, %v7116_v0 }
 0x617   :  { %vm14094_vm9 = vcmp.le.f32.partialorder %v6477_v12, 0.7853982  ;;  %v7479_v34 = vsub.s32 0, %v7477_v17  ;;  %v7126_v57 = vor.u32 %v7125_v18, %v7124_v1  ;;  %v7130_v56 = vshll.u32 %v14332_v8, %v7115_v58 }
 0x618   :  { %v6561_v59 = vxor.u32 2147483648, %v6560_v54  ;;  %v6566_v27 = vsel %vm14094_vm9, 0, %v6564_v45  ;;  %v7109_v5 = vor.u32 8388608, %v7108_v19  ;;  %vm7133_vm10 = vcmp.lt.s32.totalorder %v7114_v33, 1 }
 0x619   :  { %v7825_v12 = vmin.u32 %v7479_v34, %v7477_v17  ;;  %v7132_v53 = vor.u32 %v7131_v3, %v7130_v56  ;;  %vm7136_vm11 = vcmp.lt.s32.totalorder %v7114_v33, 4  ;;  %v7117_v35 = vshrl.u32 %v14328_v13, %v7116_v0 }
 0x61a   :  { %v6562_v48 = vsel %vm6479_vm8, %v6561_v59, %v6560_v54  ;;  %v7141_v8 = vsel %vm7133_vm10, %v7120_v24, %v7123_v60  ;;  %v7142_v15 = vsel %vm7136_vm11, %v7129_v11, 920167782  ;;  %vm7135_vm12 = vcmp.lt.s32.totalorder %v7114_v33, 3 }
 0x61b   :  { %v6565_v7 = vsel %vm14094_vm9, %v13854_v16, %v6562_v48  ;;  %v7481_v25 = vclz %v7825_v12  ;;  %v7138_v29 = vsel %vm7136_vm11, %v7126_v57, 2102212464  ;;  %vm7134_vm13 = vcmp.lt.s32.totalorder %v7114_v33, 2 }
 0x61c   :  { %8502 = vcosq.f32 %v6565_v7  ;;  %v7143_v62 = vsel %vm7135_vm12, %v7126_v57, %v7142_v15  ;;  %v7145_v10 = vsel %vm7133_vm10, %v7123_v60, %v7126_v57  ;;  %v7149_v44 = vshll.u32 %v7109_v5, 8 }
 0x61d   :  { %8504 = vsinq.f32 %v6565_v7  ;;  %v7826_v58 = vadd.s32 4294967294, %v7481_v25  ;;  %v7137_v32 = vsel %vm7133_vm10, %v7117_v35, %v7120_v24  ;;  %v7144_v41 = vsel %vm7134_vm13, %v7141_v8, %v7143_v62 }
 0x61e   :  { %v7146_v13 = vsel %vm7136_vm11, %v7132_v53, 1326507024  ;;  %v7139_v40 = vsel %vm7135_vm12, %v7123_v60, %v7138_v29  ;;  %v14114_v22 = vmul.u32.u64.low %v7149_v44, %v7144_v41  ;;  %v14115_v0 = vmul.u32.u64.high %v7149_v44, %v7144_v41, %v14114_v22 }
 0x61f   :  { %v7147_v55 = vsel %vm7135_vm12, %v7129_v11, %v7146_v13  ;;  %vm7827_vm15 = vcmp.lt.s32.totalorder %v7826_v58, 0  ;;  %v6570_v37 = vadd.s32 3, %v6566_v27  ;;  %v7469_v50 = vadd.s32 %v14045_v20, %v14051_v28 }
 0x620   :  { %v7148_v9 = vsel %vm7134_vm13, %v7145_v10, %v7147_v55  ;;  %v7484_v52 = vsel %vm7827_vm15, 0, %v7826_v58  ;;  %v7140_v42 = vsel %vm7134_vm13, %v7137_v32, %v7139_v40  ;;  %v7159_v39 = vadd.s32 1, %v14115_v0 }
 0x621   :  { %v14118_v36 = vmul.u32.u64.low %v7149_v44, %v7148_v9  ;;  %v14119_v19 = vmul.u32.u64.high %v7149_v44, %v7148_v9, %v14118_v36  ;;  %v7485_v4 = vsub.s32 32, %v7484_v52  ;;  %v7489_v2 = vsub.s32 4294967266, %v7484_v52 }
 0x622   :  { %v7486_v31 = vshll.u32 %v7477_v17, %v7484_v52  ;;  %v7156_v54 = vmul.u32 %v7149_v44, %v7140_v42  ;;  %v6571_v43 = vand.u32 3, %v6570_v37  ;;  %vm6569_vm4 = vweird.f32 %v13854_v16 }
 0x623   :  { %v7487_v47 = vshrl.u32 %v7469_v50, %v7485_v4  ;;  %v7490_v18 = vadd.s32 127, %v7489_v2  ;;  %vm7158_vm0 = vc.u32 %v14119_v19, %v14114_v22  ;;  %vm7415_vm6 = vcmp.lt.s32.totalorder %v13924_v26, 0 }
 0x624   :  { %v7160_v45 = vsel %vm7158_vm0, %v7159_v39, %v14115_v0  ;;  %vm6576_vm1 = vcmp.eq.s32.totalorder %v6571_v43, 2  ;;  %vm6573_vm2 = vcmp.eq.s32.totalorder %v6571_v43, 0  ;;  %vm6572_vm3 = vcmp.lt.s32.totalorder %v6571_v43, 2 }
 0x625   :  { %v7488_v61 = vor.u32 %v7487_v47, %v7486_v31  ;;  %v7491_v14 = vshll.u32 %v7490_v18, 23  ;;  %v7161_v24 = vadd.s32 %v7160_v45, %v7156_v54  ;;  %v7499_v12 = vsub.s32 4, %v14068_v21 }
 0x626   :  { %vm7414_vm7 = vcmp.le.f32.partialorder %v7413_v63, 0.7853982  ;;  %v7157_v58 = vadd.s32 %v14114_v22, %v14119_v19  ;;  %vm7505_vm12 = vweird.f32 %v13924_v26  ;;  %vm7103_vm13 = vcmp.lt.s32.totalorder %v13989_v51, 0 }
 0x627   :  { %v7492_v20 = vor.u32 4788187, %v7491_v14  ;;  %v7162_v33 = vadd.s32 536870912, %v7161_v24  ;;  %v7495_v17 = vcvt.s32.f32 %v7488_v61  ;;  %vm7102_vm15 = vcmp.le.f32.partialorder %v7101_v46, 0.7853982 }
 0x629   :  { %v8503_v1 = vpop.eup %8502  ;;  %v7493_v11 = vand.u32 2147483647, %v7492_v20  ;;  %v14127_v38 = vshrl.u32 %v7162_v33, 30 }
 0x62a   :  { %v8505_v28 = vpop.eup %8504  ;;  %v6577_v59 = vxor.u32 2147483648, %v8503_v1 }
 0x62b   :  { %v6574_v60 = vxor.u32 2147483648, %v8505_v28  ;;  %v7496_v57 = vmul.f32 %v7495_v17, %v7493_v11  ;;  %v7164_v48 = vshll.u32 %v14127_v38, 30  ;;  %v7187_v54 = vsub.s32 4, %v14127_v38 }
 0x62c   :  { %v6578_v3 = vsel %vm6576_vm1, %v6577_v59, %v8505_v28 }
 0x62d   :  { %v6575_v34 = vsel %vm6573_vm2, %v8503_v1, %v6574_v60  ;;  %v7497_v5 = vxor.u32 2147483648, %v7496_v57  ;;  %v7165_v53 = vsub.s32 %v7161_v24, %v7164_v48  ;;  %v7188_v61 = vsel %vm7103_vm13, %v7187_v54, %v14127_v38 }
 0x62e   :  { %v6579_v56 = vsel %vm6572_vm3, %v6575_v34, %v6578_v3  ;;  %vm7193_vm3 = vweird.f32 %v13989_v51 }
 0x62f   :  { %v6580_v27 = vsel %vm6569_vm4, nan, %v6579_v56  ;;  %v7498_v16 = vsel %vm7415_vm6, %v7497_v5, %v7496_v57  ;;  %v7167_v8 = vsub.s32 0, %v7165_v53 }
 0x630   :  { %v7573_v7 = vsel %vm7534_vm5, %v13813_v6, %v6580_v27  ;;  %v7501_v35 = vsel %vm7414_vm7, %v13924_v26, %v7498_v16  ;;  %v7500_v6 = vsel %vm7415_vm6, %v7499_v12, %v14068_v21 }
 0x631   :  { %7622 = vst.msk [vmem:[%s14171_s4 + $0x130] sm:$0xff] %vm7585_vm14, %v7573_v7  ;;  %8506 = vcosq.f32 %v7501_v35  ;;  %v7813_v15 = vmin.u32 %v7167_v8, %v7165_v53  ;;  %v7502_v29 = vsel %vm7414_vm7, 0, %v7500_v6 }
 0x632   :  { %8508 = vsinq.f32 %v7501_v35  ;;  %v7506_v10 = vadd.s32 3, %v7502_v29 }
 0x633   :  { %v7169_v25 = vclz %v7813_v15 }
 0x634   :  { %v7507_v63 = vand.u32 3, %v7506_v10 }
 0x635   :  { %v7814_v62 = vadd.s32 4294967294, %v7169_v25 }
 0x636   :  { %vm7512_vm9 = vcmp.eq.s32.totalorder %v7507_v63, 2  ;;  %vm7509_vm10 = vcmp.eq.s32.totalorder %v7507_v63, 0  ;;  %vm7508_vm11 = vcmp.lt.s32.totalorder %v7507_v63, 2 }
 0x637   :  { %vm7815_vm8 = vcmp.lt.s32.totalorder %v7814_v62, 0 }
 0x638   :  { %v7172_v44 = vsel %vm7815_vm8, 0, %v7814_v62 }
 0x639   :  { %v7173_v32 = vsub.s32 32, %v7172_v44  ;;  %v7177_v41 = vsub.s32 4294967266, %v7172_v44  ;;  %v7174_v13 = vshll.u32 %v7165_v53, %v7172_v44 }
 0x63b   :  { %v7175_v40 = vshrl.u32 %v7157_v58, %v7173_v32  ;;  %v7178_v55 = vadd.s32 127, %v7177_v41 }
 0x63d   :  { %v7176_v9 = vor.u32 %v7175_v40, %v7174_v13  ;;  %v7179_v37 = vshll.u32 %v7178_v55, 23 }
 0x63e   :  { %v8507_v0 = vpop.eup %8506 }
 0x63f   :  { %v8509_v21 = vpop.eup %8508  ;;  %v7513_v52 = vxor.u32 2147483648, %v8507_v0  ;;  %v7180_v50 = vor.u32 4788187, %v7179_v37  ;;  %v7183_v22 = vcvt.s32.f32 %v7176_v9 }
 0x640   :  { %v7510_v36 = vxor.u32 2147483648, %v8509_v21 }
 0x641   :  { %v7514_v4 = vsel %vm7512_vm9, %v7513_v52, %v8509_v21  ;;  %v7181_v42 = vand.u32 2147483647, %v7180_v50 }
 0x642   :  { %v7511_v2 = vsel %vm7509_vm10, %v8507_v0, %v7510_v36 }
 0x643   :  { %v7515_v19 = vsel %vm7508_vm11, %v7511_v2, %v7514_v4  ;;  %v7184_v31 = vmul.f32 %v7183_v22, %v7181_v42 }
 0x644   :  { %v7516_v39 = vsel %vm7505_vm12, nan, %v7515_v19 }
 0x645   :  { %v7582_v47 = vsel %vm7534_vm5, %v13909_v23, %v7516_v39  ;;  %v7185_v18 = vxor.u32 2147483648, %v7184_v31  ;;  %v7190_v23 = vsel %vm7102_vm15, 0, %v7188_v61 }
 0x646   :  { %7631 = vst.msk [vmem:[%s14171_s4 + $0x178] sm:$0xff] %vm7585_vm14, %v7582_v47  ;;  %v7194_v14 = vadd.s32 3, %v7190_v23 }
 0x647   :  { %v7186_v26 = vsel %vm7103_vm13, %v7185_v18, %v7184_v31 }
 0x648   :  { %v7189_v43 = vsel %vm7102_vm15, %v13989_v51, %v7186_v26  ;;  %v7195_v45 = vand.u32 3, %v7194_v14 }
 0x649   :  { %8510 = vcosq.f32 %v7189_v43 }
 0x64a   :  { %8512 = vsinq.f32 %v7189_v43  ;;  %vm7200_vm0 = vcmp.eq.s32.totalorder %v7195_v45, 2  ;;  %vm7197_vm1 = vcmp.eq.s32.totalorder %v7195_v45, 0  ;;  %vm7196_vm2 = vcmp.lt.s32.totalorder %v7195_v45, 2 }
 0x656   :  { %v8511_v24 = vpop.eup %8510 }
 0x657   :  { %v8513_v1 = vpop.eup %8512  ;;  %v7201_v20 = vxor.u32 2147483648, %v8511_v24 }
 0x658   :  { %v7198_v28 = vxor.u32 2147483648, %v8513_v1 }
 0x659   :  { %v7202_v59 = vsel %vm7200_vm0, %v7201_v20, %v8513_v1 }
 0x65a   :  { %v7199_v33 = vsel %vm7197_vm1, %v8511_v24, %v7198_v28 }
 0x65b   :  { %v7203_v46 = vsel %vm7196_vm2, %v7199_v33, %v7202_v59 }
 0x65c   :  { %v7204_v60 = vsel %vm7193_vm3, nan, %v7203_v46 }
 0x65d   :  { %v7579_v11 = vsel %vm7534_vm5, %v13937_v30, %v7204_v60 }
 0x65e   :  { %7628 = vst.msk [vmem:[%s14171_s4 + $0x160] sm:$0xff] %vm7585_vm14, %v7579_v11 }

</bundles_post_ra>
